<compile_context>
chip_gen: v6e
topology: v6e:2x2x1
jax: 0.10.0
libtpu: 0.0.40
codegen_flags: <defaults>
</compile_context>

<pallas_src>
import functools

import jax
import jax.numpy as jnp
from jax.experimental import pallas as pl
from jax.experimental.pallas import tpu as pltpu

BN_EPS = 1e-5
# Per-call VMEM use with the tile caps below stays < ~15 MiB (double-buffered),
# so 48 MiB is a safe scoped limit on v5e/v6e (128 MiB) and v7x (64 MiB).
VMEM_LIMIT = 48 * 1024 * 1024


# ----------------------------------------------------------------------------
# small static helpers (trace-time only)
# ----------------------------------------------------------------------------
def _largest_divisor_leq(n, cap):
    cap = min(n, cap)
    for d in range(cap, 0, -1):
        if n % d == 0:
            return d
    return 1


def _round_up(n, m):
    return ((n + m - 1) // m) * m


def _row_tile_cap(cin):
    # Sized so (x tile + out tile + weight) * 2 (double buffering) < ~20 MiB.
    if cin >= 512:
        return 1024
    if cin >= 256:
        return 2048
    if cin >= 128:
        return 4096
    return 8192


# ----------------------------------------------------------------------------
# Pallas kernels
# ----------------------------------------------------------------------------
def _linear_kernel(z_ref, w_ref, b_ref, o_ref, sum_ref, sq_ref):
    # (B, nin) @ (nin, tile_cols) + bias ; columns are channels-last, so the
    # per-column sums reduce to per-channel BN0 statistics outside.
    y = jnp.dot(z_ref[...], w_ref[...], preferred_element_type=jnp.float32)
    y = y + b_ref[...]
    o_ref[...] = y.astype(o_ref.dtype)
    sum_ref[...] = jnp.sum(y, axis=0, keepdims=True)
    sq_ref[...] = jnp.sum(y * y, axis=0, keepdims=True)


def linear_pallas(z, w, b, *, col_tile):
    """z: (B, nin) bf16, w: (nin, nout) bf16 (channels-last cols), b: (1, nout)."""
    B, nin = z.shape
    nout = w.shape[1]
    return pl.pallas_call(
        _linear_kernel,
        grid=(nout // col_tile,),
        out_shape=(
            jax.ShapeDtypeStruct((B, nout), jnp.bfloat16),
            jax.ShapeDtypeStruct((1, nout), jnp.float32),
            jax.ShapeDtypeStruct((1, nout), jnp.float32),
        ),
        in_specs=[
            pl.BlockSpec((B, nin), lambda j: (0, 0)),
            pl.BlockSpec((nin, col_tile), lambda j: (0, j)),
            pl.BlockSpec((1, col_tile), lambda j: (0, j)),
        ],
        out_specs=(
            pl.BlockSpec((B, col_tile), lambda j: (0, j)),
            pl.BlockSpec((1, col_tile), lambda j: (0, j)),
            pl.BlockSpec((1, col_tile), lambda j: (0, j)),
        ),
        compiler_params=pltpu.CompilerParams(
            dimension_semantics=("parallel",),
            vmem_limit_bytes=VMEM_LIMIT,
        ),
    )(z, w, b)


def _deconv_stats_kernel(x_ref, scale_ref, shift_ref, w_ref, b_ref,
                         o_ref, sum_ref, sq_ref, *, n_valid, row_tile):
    # BN (hoisted bf16 scale/shift) + ReLU + tap-major deconv matmul (f32 acc)
    # + per-tile partial column statistics for the NEXT layer's BatchNorm.
    h = jnp.maximum(x_ref[...] * scale_ref[...] + shift_ref[...], 0)
    y = jnp.dot(h, w_ref[...], preferred_element_type=jnp.float32) + b_ref[...]
    o_ref[...] = y.astype(o_ref.dtype)

    if n_valid % row_tile != 0:
        # Zero the contribution of zero-padded rows (last partial tile only).
        rows = pl.program_id(0) * row_tile + jax.lax.broadcasted_iota(
            jnp.int32, y.shape, 0)
        y = jnp.where(rows < n_valid, y, 0.0)

    sum_ref[...] = jnp.sum(y, axis=0, keepdims=True)[None]
    sq_ref[...] = jnp.sum(y * y, axis=0, keepdims=True)[None]


def _deconv_tanh_kernel(x_ref, scale_ref, shift_ref, w_ref, b_ref, o_ref):
    # Last layer: BN + ReLU + weight-normed deconv + tanh, stored in bf16.
    h = jnp.maximum(x_ref[...] * scale_ref[...] + shift_ref[...], 0)
    y = jnp.dot(h, w_ref[...], preferred_element_type=jnp.float32) + b_ref[...]
    o_ref[...] = jnp.tanh(y.astype(o_ref.dtype))


def deconv_layer_pallas(x, scale, shift, w, b, *, last):
    """x: (N, Cin) bf16, scale/shift: (1, Cin) bf16, w: (Cin, C8) bf16
    (tap-major), b: (1, C8) f32."""
    N, cin = x.shape
    c8 = w.shape[1]
    tn = min(_row_tile_cap(cin), _round_up(N, 8))
    n_pad = _round_up(N, tn)
    grid = n_pad // tn
    if n_pad != N:
        x = jnp.pad(x, ((0, n_pad - N), (0, 0)))

    in_specs = [
        pl.BlockSpec((tn, cin), lambda i: (i, 0)),
        pl.BlockSpec((1, cin), lambda i: (0, 0)),
        pl.BlockSpec((1, cin), lambda i: (0, 0)),
        pl.BlockSpec((cin, c8), lambda i: (0, 0)),
        pl.BlockSpec((1, c8), lambda i: (0, 0)),
    ]
    params = pltpu.CompilerParams(
        dimension_semantics=("parallel",),
        vmem_limit_bytes=VMEM_LIMIT,
    )

    if last:
        y = pl.pallas_call(
            _deconv_tanh_kernel,
            grid=(grid,),
            out_shape=jax.ShapeDtypeStruct((n_pad, c8), jnp.bfloat16),
            in_specs=in_specs,
            out_specs=pl.BlockSpec((tn, c8), lambda i: (i, 0)),
            compiler_params=params,
        )(x, scale, shift, w, b)
        return y[:N] if n_pad != N else y

    kern = functools.partial(_deconv_stats_kernel, n_valid=N, row_tile=tn)
    y, psum, psq = pl.pallas_call(
        kern,
        grid=(grid,),
        out_shape=(
            jax.ShapeDtypeStruct((n_pad, c8), jnp.bfloat16),
            jax.ShapeDtypeStruct((grid, 1, c8), jnp.float32),
            jax.ShapeDtypeStruct((grid, 1, c8), jnp.float32),
        ),
        in_specs=in_specs,
        out_specs=(
            pl.BlockSpec((tn, c8), lambda i: (i, 0)),
            pl.BlockSpec((1, 1, c8), lambda i: (i, 0, 0)),   # per-tile partials
            pl.BlockSpec((1, 1, c8), lambda i: (i, 0, 0)),
        ),
        compiler_params=params,
    )(x, scale, shift, w, b)

    csum = jnp.sum(psum, axis=(0, 1)).reshape(1, c8)   # tiny f32 reduction
    csq = jnp.sum(psq, axis=(0, 1)).reshape(1, c8)
    if n_pad != N:
        y = y[:N]
    return y, csum, csq


# ----------------------------------------------------------------------------
# BN batch-stats -> hoisted (scale, shift)
# ----------------------------------------------------------------------------
def _bn_scale_shift(col_sum, col_sq, count, gamma, beta):
    c = gamma.shape[0]
    ch_sum = col_sum.reshape(-1, c).sum(axis=0)
    ch_sq = col_sq.reshape(-1, c).sum(axis=0)
    mean = ch_sum / count
    var = jnp.maximum(ch_sq / count - mean * mean, 0.0)  # guard vs cancellation
    scale = gamma * jax.lax.rsqrt(var + BN_EPS)
    shift = beta - mean * scale
    return (scale.reshape(1, c).astype(jnp.bfloat16),
            shift.reshape(1, c).astype(jnp.bfloat16))


# ----------------------------------------------------------------------------
# Forward pass
# ----------------------------------------------------------------------------
def generator_forward(z, p, *, patch_size, num_modalities):
    sh1 = patch_size // 16
    S = sh1 ** 3
    B = z.shape[0]
    nm = num_modalities

    # Linear (channels-last columns) + fused BN0 column statistics.
    col_tile = 512 * _largest_divisor_leq(S, 8)
    x, csum, csq = linear_pallas(z.astype(jnp.bfloat16), p["w_lin"], p["b_lin"],
                                 col_tile=col_tile)
    h = x.reshape(B * S, 512)          # rows = (b, d0, h0, w0); zero-cost reshape
    count = B * S
    scale, shift = _bn_scale_shift(csum, csq, count, p["bn0_gamma"], p["bn0_beta"])

    # Three intermediate BN+ReLU+deconv layers; next-layer BN stats fused in.
    chans = [512, 256, 128, 64]
    for i in range(3):
        cout = chans[i + 1]
        y, csum, csq = deconv_layer_pallas(
            h, scale, shift, p[f"deconv{i+1}_w"], p[f"deconv{i+1}_b"], last=False)
        h = y.reshape(-1, cout)        # tap-major columns -> zero-cost reshape
        count = h.shape[0]
        scale, shift = _bn_scale_shift(csum, csq, count,
                                       p[f"bn{i+1}_gamma"], p[f"bn{i+1}_beta"])

    # Last layer: BN+ReLU+WN-deconv+tanh, bf16, unpadded (N, 8*nm) output.
    y = deconv_layer_pallas(h, scale, shift, p["deconv4_w"], p["deconv4_b"],
                            last=True)

    # Single spatial untangle of all deferred 2x2x2 taps, straight into NCDHW.
    # Row bits: (b, d0,h0,w0, kd1,kh1,kw1, kd2,kh2,kw2, kd3,kh3,kw3);
    # column bits: (kd4,kh4,kw4, c).  Reads bf16, writes the final f32 tensor.
    y = y.reshape(B, sh1, sh1, sh1, 2, 2, 2, 2, 2, 2, 2, 2, 2, 2, 2, 2, nm)
    y = y.transpose(0, 16, 1, 4, 7, 10, 13, 2, 5, 8, 11, 14, 3, 6, 9, 12, 15)
    return y.reshape(B, nm, patch_size, patch_size, patch_size).astype(jnp.float32)


# ----------------------------------------------------------------------------
# Deterministic synthetic parameters (PyTorch layouts) + kernel-layout prep
# ----------------------------------------------------------------------------
def init_torch_like_params(key, noise_dim, patch_size, num_modalities):
    sh1 = patch_size // 16
    lin_out = sh1 ** 3 * 512
    keys = jax.random.split(key, 20)
    p = {}
    p["lin_w"] = 0.02 * jax.random.normal(keys[0], (lin_out, noise_dim), jnp.float32)
    p["lin_b"] = 0.01 * jax.random.normal(keys[1], (lin_out,), jnp.float32)

    cins = [512, 256, 128, 64]
    couts = [256, 128, 64, num_modalities]
    for i in range(4):
        cin, cout = cins[i], couts[i]
        p[f"bn{i}_gamma"] = 1.0 + 0.02 * jax.random.normal(
            keys[2 + 4 * i], (cin,), jnp.float32)
        p[f"bn{i}_beta"] = jnp.zeros((cin,), jnp.float32)
        p[f"deconv{i+1}_w"] = 0.02 * jax.random.normal(
            keys[3 + 4 * i], (cin, cout, 2, 2, 2), jnp.float32)
        p[f"deconv{i+1}_b"] = 0.01 * jax.random.normal(
            keys[4 + 4 * i], (cout,), jnp.float32)

    # WN_ConvTranspose3d: weight-norm gain along dim 0 (PyTorch default dim=0).
    v = p["deconv4_w"]
    norms = jnp.sqrt(jnp.sum(v.reshape(v.shape[0], -1) ** 2, axis=1) + 1e-12)
    p["deconv4_g"] = 1.1 * norms
    return p


def prepare_kernel_params(p, patch_size, num_modalities):
    sh1 = patch_size // 16
    S = sh1 ** 3
    kp = {}

    # Linear: y = z @ W.T + b ; permute output columns to channels-last
    # (column = ((d*sh1+h)*sh1+w)*512 + c) so the (B*S, 512) view is free.
    w = p["lin_w"].T                                     # (nin, 512*S), cols (c, s)
    w = w.reshape(-1, 512, S).transpose(0, 2, 1).reshape(-1, S * 512)
    kp["w_lin"] = w.astype(jnp.bfloat16)
    kp["b_lin"] = p["lin_b"].reshape(512, S).T.reshape(1, S * 512).astype(jnp.float32)

    for i in range(4):
        kp[f"bn{i}_gamma"] = p[f"bn{i}_gamma"]
        kp[f"bn{i}_beta"] = p[f"bn{i}_beta"]

    for i in range(4):
        w = p[f"deconv{i+1}_w"]                          # (Cin, Cout, 2, 2, 2)
        b = p[f"deconv{i+1}_b"]                          # (Cout,)
        cin, cout = w.shape[0], w.shape[1]
        if i == 3:  # weight norm (dim 0): w = g * v / ||v||_slice
            v = w
            norms = jnp.sqrt(jnp.sum(v.reshape(cin, -1) ** 2, axis=1) + 1e-12)
            w = v * (p["deconv4_g"] / norms)[:, None, None, None, None]
        # Tap-major columns: col = (kd*4 + kh*2 + kw) * Cout + c
        wmat = w.transpose(0, 2, 3, 4, 1).reshape(cin, 8 * cout)
        bmat = jnp.tile(b, 8).reshape(1, 8 * cout)
        kp[f"deconv{i+1}_w"] = wmat.astype(jnp.bfloat16)
        kp[f"deconv{i+1}_b"] = bmat.astype(jnp.float32)
    return kp


if __name__ == "__main__":
    B = 2
    noise_dim = 32
    patch_size = 16          # config.patch_shape[0] -> sh1 = 1
    num_modalities = 4       # config.num_modalities

    key = jax.random.PRNGKey(0)
    kz, kparam = jax.random.split(key)
    z = jax.random.normal(kz, (B, noise_dim), jnp.float32)

    torch_params = init_torch_like_params(kparam, noise_dim, patch_size, num_modalities)
    kparams = prepare_kernel_params(torch_params, patch_size, num_modalities)

    fwd = jax.jit(functools.partial(generator_forward,
                                    patch_size=patch_size,
                                    num_modalities=num_modalities))
    out = jax.block_until_ready(fwd(z, kparams))

    assert out.shape == (B, num_modalities, patch_size, patch_size, patch_size)
    assert bool(jnp.all(jnp.isfinite(out)))
    assert bool(jnp.all(jnp.abs(out) <= 1.0))  # tanh output range
    print("KERNEL_OK")
</pallas_src>

<mosaic_0001>
module attributes {stable_mosaic.version = 11 : i64} {
  func.func @_linear_kernel(%arg0: i32, %arg1: memref<2x32xbf16, #tpu.memory_space<vmem>>, %arg2: memref<32x512xbf16, #tpu.memory_space<vmem>>, %arg3: memref<1x512xf32, #tpu.memory_space<vmem>>, %arg4: memref<2x512xbf16, #tpu.memory_space<vmem>>, %arg5: memref<1x512xf32, #tpu.memory_space<vmem>>, %arg6: memref<1x512xf32, #tpu.memory_space<vmem>>) attributes {dimension_semantics = [#tpu.dimension_semantics<parallel>], iteration_bounds = array<i64: 1>, scalar_prefetch = 0 : i64, scratch_operands = 0 : i64, tpu.core_type = #tpu.core_type<tc>, window_params = [{pipeline_mode = #tpu.pipeline_mode<synchronous>, transform_indices = @transform_0, window_bounds = array<i64: 2, 32>}, {transform_indices = @transform_1, window_bounds = array<i64: 32, 512>}, {transform_indices = @transform_2, window_bounds = array<i64: 1, 512>}, {transform_indices = @transform_3, window_bounds = array<i64: 2, 512>}, {transform_indices = @transform_4, window_bounds = array<i64: 1, 512>}, {transform_indices = @transform_5, window_bounds = array<i64: 1, 512>}]} {
    %c0 = arith.constant 0 : index
    %c0_0 = arith.constant 0 : index
    %0 = vector.load %arg1[%c0, %c0_0] : memref<2x32xbf16, #tpu.memory_space<vmem>>, vector<2x32xbf16>
    %c0_1 = arith.constant 0 : index
    %c0_2 = arith.constant 0 : index
    %1 = vector.load %arg2[%c0_1, %c0_2] : memref<32x512xbf16, #tpu.memory_space<vmem>>, vector<32x512xbf16>
    %cst = arith.constant dense<0.000000e+00> : vector<2x512xf32>
    %2 = tpu.matmul %0, %1, %cst {dimension_numbers = #tpu.dot_dimension_numbers<[1], [0], [0], [1], [0, 0, 1, 1], [], []>} : vector<2x32xbf16>, vector<32x512xbf16>, vector<2x512xf32> -> vector<2x512xf32>
    %c0_3 = arith.constant 0 : index
    %c0_4 = arith.constant 0 : index
    %3 = vector.load %arg3[%c0_3, %c0_4] : memref<1x512xf32, #tpu.memory_space<vmem>>, vector<1x512xf32>
    %4 = vector.broadcast %3 : vector<1x512xf32> to vector<2x512xf32>
    %5 = arith.addf %2, %4 : vector<2x512xf32>
    %6 = arith.truncf %5 : vector<2x512xf32> to vector<2x512xbf16>
    %c0_5 = arith.constant 0 : index
    %c0_6 = arith.constant 0 : index
    %7 = vector.load %arg4[%c0_5, %c0_6] : memref<2x512xbf16, #tpu.memory_space<vmem>>, vector<2x512xbf16>
    tpu.vector_store %arg4[%c0_5, %c0_6], %6 {strides = array<i32>} : memref<2x512xbf16, #tpu.memory_space<vmem>>, vector<2x512xbf16>,
    %cst_7 = arith.constant dense<0.000000e+00> : vector<512xf32>
    %8 = vector.multi_reduction <add>, %5, %cst_7 [0] : vector<2x512xf32> to vector<512xf32>
    %9 = vector.shape_cast %8 : vector<512xf32> to vector<1x512xf32>
    %c0_8 = arith.constant 0 : index
    %c0_9 = arith.constant 0 : index
    %10 = vector.load %arg5[%c0_8, %c0_9] : memref<1x512xf32, #tpu.memory_space<vmem>>, vector<1x512xf32>
    tpu.vector_store %arg5[%c0_8, %c0_9], %9 {strides = array<i32>} : memref<1x512xf32, #tpu.memory_space<vmem>>, vector<1x512xf32>,
    %11 = arith.mulf %5, %5 : vector<2x512xf32>
    %cst_10 = arith.constant dense<0.000000e+00> : vector<512xf32>
    %12 = vector.multi_reduction <add>, %11, %cst_10 [0] : vector<2x512xf32> to vector<512xf32>
    %13 = vector.shape_cast %12 : vector<512xf32> to vector<1x512xf32>
    %c0_11 = arith.constant 0 : index
    %c0_12 = arith.constant 0 : index
    %14 = vector.load %arg6[%c0_11, %c0_12] : memref<1x512xf32, #tpu.memory_space<vmem>>, vector<1x512xf32>
    tpu.vector_store %arg6[%c0_11, %c0_12], %13 {strides = array<i32>} : memref<1x512xf32, #tpu.memory_space<vmem>>, vector<1x512xf32>,
    return
  }
  func.func @transform_0(%arg0: i32) -> (i32, i32) {
    %c0_i32 = arith.constant 0 : i32
    %c0_i32_0 = arith.constant 0 : i32
    %c0_i32_1 = arith.constant 0 : i32
    return %c0_i32, %c0_i32_0 : i32, i32
  }
  func.func @transform_1(%arg0: i32) -> (i32, i32) {
    %c0_i32 = arith.constant 0 : i32
    %c0_i32_0 = arith.constant 0 : i32
    return %c0_i32, %arg0 : i32, i32
  }
  func.func @transform_2(%arg0: i32) -> (i32, i32) {
    %c0_i32 = arith.constant 0 : i32
    %c0_i32_0 = arith.constant 0 : i32
    return %c0_i32, %arg0 : i32, i32
  }
  func.func @transform_3(%arg0: i32) -> (i32, i32) {
    %c0_i32 = arith.constant 0 : i32
    %c0_i32_0 = arith.constant 0 : i32
    return %c0_i32, %arg0 : i32, i32
  }
  func.func @transform_4(%arg0: i32) -> (i32, i32) {
    %c0_i32 = arith.constant 0 : i32
    %c0_i32_0 = arith.constant 0 : i32
    return %c0_i32, %arg0 : i32, i32
  }
  func.func @transform_5(%arg0: i32) -> (i32, i32) {
    %c0_i32 = arith.constant 0 : i32
    %c0_i32_0 = arith.constant 0 : i32
    return %c0_i32, %arg0 : i32, i32
  }
}

module attributes {stable_mosaic.version = 11 : i64} {
  func.func @_deconv_stats_kernel(%arg0: i32, %arg1: memref<8x512xbf16, #tpu.memory_space<vmem>>, %arg2: memref<1x512xbf16, #tpu.memory_space<vmem>>, %arg3: memref<1x512xbf16, #tpu.memory_space<vmem>>, %arg4: memref<512x2048xbf16, #tpu.memory_space<vmem>>, %arg5: memref<1x2048xf32, #tpu.memory_space<vmem>>, %arg6: memref<8x2048xbf16, #tpu.memory_space<vmem>>, %arg7: memref<1x1x2048xf32, #tpu.memory_space<vmem>>, %arg8: memref<1x1x2048xf32, #tpu.memory_space<vmem>>) attributes {dimension_semantics = [#tpu.dimension_semantics<parallel>], iteration_bounds = array<i64: 1>, scalar_prefetch = 0 : i64, scratch_operands = 0 : i64, tpu.core_type = #tpu.core_type<tc>, window_params = [{transform_indices = @transform_0, window_bounds = array<i64: 8, 512>}, {pipeline_mode = #tpu.pipeline_mode<synchronous>, transform_indices = @transform_1, window_bounds = array<i64: 1, 512>}, {pipeline_mode = #tpu.pipeline_mode<synchronous>, transform_indices = @transform_2, window_bounds = array<i64: 1, 512>}, {pipeline_mode = #tpu.pipeline_mode<synchronous>, transform_indices = @transform_3, window_bounds = array<i64: 512, 2048>}, {pipeline_mode = #tpu.pipeline_mode<synchronous>, transform_indices = @transform_4, window_bounds = array<i64: 1, 2048>}, {transform_indices = @transform_5, window_bounds = array<i64: 8, 2048>}, {transform_indices = @transform_6, window_bounds = array<i64: 1, 1, 2048>}, {transform_indices = @transform_7, window_bounds = array<i64: 1, 1, 2048>}]} {
    %c0 = arith.constant 0 : index
    %c0_0 = arith.constant 0 : index
    %0 = vector.load %arg1[%c0, %c0_0] : memref<8x512xbf16, #tpu.memory_space<vmem>>, vector<8x512xbf16>
    %c0_1 = arith.constant 0 : index
    %c0_2 = arith.constant 0 : index
    %1 = vector.load %arg2[%c0_1, %c0_2] : memref<1x512xbf16, #tpu.memory_space<vmem>>, vector<1x512xbf16>
    %2 = vector.broadcast %1 : vector<1x512xbf16> to vector<8x512xbf16>
    %3 = arith.mulf %0, %2 : vector<8x512xbf16>
    %c0_3 = arith.constant 0 : index
    %c0_4 = arith.constant 0 : index
    %4 = vector.load %arg3[%c0_3, %c0_4] : memref<1x512xbf16, #tpu.memory_space<vmem>>, vector<1x512xbf16>
    %5 = vector.broadcast %4 : vector<1x512xbf16> to vector<8x512xbf16>
    %6 = arith.addf %3, %5 : vector<8x512xbf16>
    %cst = arith.constant 0.000000e+00 : bf16
    %7 = vector.broadcast %cst : bf16 to vector<8x512xbf16>
    %8 = arith.maximumf %6, %7 : vector<8x512xbf16>
    %c0_5 = arith.constant 0 : index
    %c0_6 = arith.constant 0 : index
    %9 = vector.load %arg4[%c0_5, %c0_6] : memref<512x2048xbf16, #tpu.memory_space<vmem>>, vector<512x2048xbf16>
    %cst_7 = arith.constant dense<0.000000e+00> : vector<8x2048xf32>
    %10 = tpu.matmul %8, %9, %cst_7 {dimension_numbers = #tpu.dot_dimension_numbers<[1], [0], [0], [1], [0, 0, 1, 1], [], []>} : vector<8x512xbf16>, vector<512x2048xbf16>, vector<8x2048xf32> -> vector<8x2048xf32>
    %c0_8 = arith.constant 0 : index
    %c0_9 = arith.constant 0 : index
    %11 = vector.load %arg5[%c0_8, %c0_9] : memref<1x2048xf32, #tpu.memory_space<vmem>>, vector<1x2048xf32>
    %12 = vector.broadcast %11 : vector<1x2048xf32> to vector<8x2048xf32>
    %13 = arith.addf %10, %12 : vector<8x2048xf32>
    %14 = arith.truncf %13 : vector<8x2048xf32> to vector<8x2048xbf16>
    %c0_10 = arith.constant 0 : index
    %c0_11 = arith.constant 0 : index
    %15 = vector.load %arg6[%c0_10, %c0_11] : memref<8x2048xbf16, #tpu.memory_space<vmem>>, vector<8x2048xbf16>
    tpu.vector_store %arg6[%c0_10, %c0_11], %14 {strides = array<i32>} : memref<8x2048xbf16, #tpu.memory_space<vmem>>, vector<8x2048xbf16>,
    %c8_i32 = arith.constant 8 : i32
    %16 = arith.muli %arg0, %c8_i32 : i32
    %17 = tpu.iota {dimensions = array<i32: 0>} : vector<8x2048xi32>
    %18 = vector.broadcast %16 : i32 to vector<8x2048xi32>
    %19 = arith.addi %18, %17 : vector<8x2048xi32>
    %c2_i32 = arith.constant 2 : i32
    %20 = vector.broadcast %c2_i32 : i32 to vector<8x2048xi32>
    %21 = arith.cmpi slt, %19, %20 : vector<8x2048xi32>
    %cst_12 = arith.constant 0.000000e+00 : f32
    %22 = vector.broadcast %cst_12 : f32 to vector<8x2048xf32>
    %23 = arith.select %21, %13, %22 : vector<8x2048xi1>, vector<8x2048xf32>
    %cst_13 = arith.constant dense<0.000000e+00> : vector<2048xf32>
    %24 = vector.multi_reduction <add>, %23, %cst_13 [0] : vector<8x2048xf32> to vector<2048xf32>
    %25 = vector.shape_cast %24 : vector<2048xf32> to vector<1x2048xf32>
    %26 = vector.shape_cast %25 : vector<1x2048xf32> to vector<1x1x2048xf32>
    %c0_14 = arith.constant 0 : index
    %c0_15 = arith.constant 0 : index
    %c0_16 = arith.constant 0 : index
    %27 = vector.load %arg7[%c0_14, %c0_15, %c0_16] : memref<1x1x2048xf32, #tpu.memory_space<vmem>>, vector<1x1x2048xf32>
    tpu.vector_store %arg7[%c0_14, %c0_15, %c0_16], %26 {strides = array<i32>} : memref<1x1x2048xf32, #tpu.memory_space<vmem>>, vector<1x1x2048xf32>,
    %28 = arith.mulf %23, %23 : vector<8x2048xf32>
    %cst_17 = arith.constant dense<0.000000e+00> : vector<2048xf32>
    %29 = vector.multi_reduction <add>, %28, %cst_17 [0] : vector<8x2048xf32> to vector<2048xf32>
    %30 = vector.shape_cast %29 : vector<2048xf32> to vector<1x2048xf32>
    %31 = vector.shape_cast %30 : vector<1x2048xf32> to vector<1x1x2048xf32>
    %c0_18 = arith.constant 0 : index
    %c0_19 = arith.constant 0 : index
    %c0_20 = arith.constant 0 : index
    %32 = vector.load %arg8[%c0_18, %c0_19, %c0_20] : memref<1x1x2048xf32, #tpu.memory_space<vmem>>, vector<1x1x2048xf32>
    tpu.vector_store %arg8[%c0_18, %c0_19, %c0_20], %31 {strides = array<i32>} : memref<1x1x2048xf32, #tpu.memory_space<vmem>>, vector<1x1x2048xf32>,
    return
  }
  func.func @transform_0(%arg0: i32) -> (i32, i32) {
    %c0_i32 = arith.constant 0 : i32
    %c0_i32_0 = arith.constant 0 : i32
    return %arg0, %c0_i32 : i32, i32
  }
  func.func @transform_1(%arg0: i32) -> (i32, i32) {
    %c0_i32 = arith.constant 0 : i32
    %c0_i32_0 = arith.constant 0 : i32
    %c0_i32_1 = arith.constant 0 : i32
    return %c0_i32, %c0_i32_0 : i32, i32
  }
  func.func @transform_2(%arg0: i32) -> (i32, i32) {
    %c0_i32 = arith.constant 0 : i32
    %c0_i32_0 = arith.constant 0 : i32
    %c0_i32_1 = arith.constant 0 : i32
    return %c0_i32, %c0_i32_0 : i32, i32
  }
  func.func @transform_3(%arg0: i32) -> (i32, i32) {
    %c0_i32 = arith.constant 0 : i32
    %c0_i32_0 = arith.constant 0 : i32
    %c0_i32_1 = arith.constant 0 : i32
    return %c0_i32, %c0_i32_0 : i32, i32
  }
  func.func @transform_4(%arg0: i32) -> (i32, i32) {
    %c0_i32 = arith.constant 0 : i32
    %c0_i32_0 = arith.constant 0 : i32
    %c0_i32_1 = arith.constant 0 : i32
    return %c0_i32, %c0_i32_0 : i32, i32
  }
  func.func @transform_5(%arg0: i32) -> (i32, i32) {
    %c0_i32 = arith.constant 0 : i32
    %c0_i32_0 = arith.constant 0 : i32
    return %arg0, %c0_i32 : i32, i32
  }
  func.func @transform_6(%arg0: i32) -> (i32, i32, i32) {
    %c0_i32 = arith.constant 0 : i32
    %c0_i32_0 = arith.constant 0 : i32
    %c0_i32_1 = arith.constant 0 : i32
    return %arg0, %c0_i32, %c0_i32_0 : i32, i32, i32
  }
  func.func @transform_7(%arg0: i32) -> (i32, i32, i32) {
    %c0_i32 = arith.constant 0 : i32
    %c0_i32_0 = arith.constant 0 : i32
    %c0_i32_1 = arith.constant 0 : i32
    return %arg0, %c0_i32, %c0_i32_0 : i32, i32, i32
  }
}

module attributes {stable_mosaic.version = 11 : i64} {
  func.func @_deconv_stats_kernel(%arg0: i32, %arg1: memref<16x256xbf16, #tpu.memory_space<vmem>>, %arg2: memref<1x256xbf16, #tpu.memory_space<vmem>>, %arg3: memref<1x256xbf16, #tpu.memory_space<vmem>>, %arg4: memref<256x1024xbf16, #tpu.memory_space<vmem>>, %arg5: memref<1x1024xf32, #tpu.memory_space<vmem>>, %arg6: memref<16x1024xbf16, #tpu.memory_space<vmem>>, %arg7: memref<1x1x1024xf32, #tpu.memory_space<vmem>>, %arg8: memref<1x1x1024xf32, #tpu.memory_space<vmem>>) attributes {dimension_semantics = [#tpu.dimension_semantics<parallel>], iteration_bounds = array<i64: 1>, scalar_prefetch = 0 : i64, scratch_operands = 0 : i64, tpu.core_type = #tpu.core_type<tc>, window_params = [{transform_indices = @transform_0, window_bounds = array<i64: 16, 256>}, {pipeline_mode = #tpu.pipeline_mode<synchronous>, transform_indices = @transform_1, window_bounds = array<i64: 1, 256>}, {pipeline_mode = #tpu.pipeline_mode<synchronous>, transform_indices = @transform_2, window_bounds = array<i64: 1, 256>}, {pipeline_mode = #tpu.pipeline_mode<synchronous>, transform_indices = @transform_3, window_bounds = array<i64: 256, 1024>}, {pipeline_mode = #tpu.pipeline_mode<synchronous>, transform_indices = @transform_4, window_bounds = array<i64: 1, 1024>}, {transform_indices = @transform_5, window_bounds = array<i64: 16, 1024>}, {transform_indices = @transform_6, window_bounds = array<i64: 1, 1, 1024>}, {transform_indices = @transform_7, window_bounds = array<i64: 1, 1, 1024>}]} {
    %c0 = arith.constant 0 : index
    %c0_0 = arith.constant 0 : index
    %0 = vector.load %arg1[%c0, %c0_0] : memref<16x256xbf16, #tpu.memory_space<vmem>>, vector<16x256xbf16>
    %c0_1 = arith.constant 0 : index
    %c0_2 = arith.constant 0 : index
    %1 = vector.load %arg2[%c0_1, %c0_2] : memref<1x256xbf16, #tpu.memory_space<vmem>>, vector<1x256xbf16>
    %2 = vector.broadcast %1 : vector<1x256xbf16> to vector<16x256xbf16>
    %3 = arith.mulf %0, %2 : vector<16x256xbf16>
    %c0_3 = arith.constant 0 : index
    %c0_4 = arith.constant 0 : index
    %4 = vector.load %arg3[%c0_3, %c0_4] : memref<1x256xbf16, #tpu.memory_space<vmem>>, vector<1x256xbf16>
    %5 = vector.broadcast %4 : vector<1x256xbf16> to vector<16x256xbf16>
    %6 = arith.addf %3, %5 : vector<16x256xbf16>
    %cst = arith.constant 0.000000e+00 : bf16
    %7 = vector.broadcast %cst : bf16 to vector<16x256xbf16>
    %8 = arith.maximumf %6, %7 : vector<16x256xbf16>
    %c0_5 = arith.constant 0 : index
    %c0_6 = arith.constant 0 : index
    %9 = vector.load %arg4[%c0_5, %c0_6] : memref<256x1024xbf16, #tpu.memory_space<vmem>>, vector<256x1024xbf16>
    %cst_7 = arith.constant dense<0.000000e+00> : vector<16x1024xf32>
    %10 = tpu.matmul %8, %9, %cst_7 {dimension_numbers = #tpu.dot_dimension_numbers<[1], [0], [0], [1], [0, 0, 1, 1], [], []>} : vector<16x256xbf16>, vector<256x1024xbf16>, vector<16x1024xf32> -> vector<16x1024xf32>
    %c0_8 = arith.constant 0 : index
    %c0_9 = arith.constant 0 : index
    %11 = vector.load %arg5[%c0_8, %c0_9] : memref<1x1024xf32, #tpu.memory_space<vmem>>, vector<1x1024xf32>
    %12 = vector.broadcast %11 : vector<1x1024xf32> to vector<16x1024xf32>
    %13 = arith.addf %10, %12 : vector<16x1024xf32>
    %14 = arith.truncf %13 : vector<16x1024xf32> to vector<16x1024xbf16>
    %c0_10 = arith.constant 0 : index
    %c0_11 = arith.constant 0 : index
    %15 = vector.load %arg6[%c0_10, %c0_11] : memref<16x1024xbf16, #tpu.memory_space<vmem>>, vector<16x1024xbf16>
    tpu.vector_store %arg6[%c0_10, %c0_11], %14 {strides = array<i32>} : memref<16x1024xbf16, #tpu.memory_space<vmem>>, vector<16x1024xbf16>,
    %cst_12 = arith.constant dense<0.000000e+00> : vector<1024xf32>
    %16 = vector.multi_reduction <add>, %13, %cst_12 [0] : vector<16x1024xf32> to vector<1024xf32>
    %17 = vector.shape_cast %16 : vector<1024xf32> to vector<1x1024xf32>
    %18 = vector.shape_cast %17 : vector<1x1024xf32> to vector<1x1x1024xf32>
    %c0_13 = arith.constant 0 : index
    %c0_14 = arith.constant 0 : index
    %c0_15 = arith.constant 0 : index
    %19 = vector.load %arg7[%c0_13, %c0_14, %c0_15] : memref<1x1x1024xf32, #tpu.memory_space<vmem>>, vector<1x1x1024xf32>
    tpu.vector_store %arg7[%c0_13, %c0_14, %c0_15], %18 {strides = array<i32>} : memref<1x1x1024xf32, #tpu.memory_space<vmem>>, vector<1x1x1024xf32>,
    %20 = arith.mulf %13, %13 : vector<16x1024xf32>
    %cst_16 = arith.constant dense<0.000000e+00> : vector<1024xf32>
    %21 = vector.multi_reduction <add>, %20, %cst_16 [0] : vector<16x1024xf32> to vector<1024xf32>
    %22 = vector.shape_cast %21 : vector<1024xf32> to vector<1x1024xf32>
    %23 = vector.shape_cast %22 : vector<1x1024xf32> to vector<1x1x1024xf32>
    %c0_17 = arith.constant 0 : index
    %c0_18 = arith.constant 0 : index
    %c0_19 = arith.constant 0 : index
    %24 = vector.load %arg8[%c0_17, %c0_18, %c0_19] : memref<1x1x1024xf32, #tpu.memory_space<vmem>>, vector<1x1x1024xf32>
    tpu.vector_store %arg8[%c0_17, %c0_18, %c0_19], %23 {strides = array<i32>} : memref<1x1x1024xf32, #tpu.memory_space<vmem>>, vector<1x1x1024xf32>,
    return
  }
  func.func @transform_0(%arg0: i32) -> (i32, i32) {
    %c0_i32 = arith.constant 0 : i32
    %c0_i32_0 = arith.constant 0 : i32
    return %arg0, %c0_i32 : i32, i32
  }
  func.func @transform_1(%arg0: i32) -> (i32, i32) {
    %c0_i32 = arith.constant 0 : i32
    %c0_i32_0 = arith.constant 0 : i32
    %c0_i32_1 = arith.constant 0 : i32
    return %c0_i32, %c0_i32_0 : i32, i32
  }
  func.func @transform_2(%arg0: i32) -> (i32, i32) {
    %c0_i32 = arith.constant 0 : i32
    %c0_i32_0 = arith.constant 0 : i32
    %c0_i32_1 = arith.constant 0 : i32
    return %c0_i32, %c0_i32_0 : i32, i32
  }
  func.func @transform_3(%arg0: i32) -> (i32, i32) {
    %c0_i32 = arith.constant 0 : i32
    %c0_i32_0 = arith.constant 0 : i32
    %c0_i32_1 = arith.constant 0 : i32
    return %c0_i32, %c0_i32_0 : i32, i32
  }
  func.func @transform_4(%arg0: i32) -> (i32, i32) {
    %c0_i32 = arith.constant 0 : i32
    %c0_i32_0 = arith.constant 0 : i32
    %c0_i32_1 = arith.constant 0 : i32
    return %c0_i32, %c0_i32_0 : i32, i32
  }
  func.func @transform_5(%arg0: i32) -> (i32, i32) {
    %c0_i32 = arith.constant 0 : i32
    %c0_i32_0 = arith.constant 0 : i32
    return %arg0, %c0_i32 : i32, i32
  }
  func.func @transform_6(%arg0: i32) -> (i32, i32, i32) {
    %c0_i32 = arith.constant 0 : i32
    %c0_i32_0 = arith.constant 0 : i32
    %c0_i32_1 = arith.constant 0 : i32
    return %arg0, %c0_i32, %c0_i32_0 : i32, i32, i32
  }
  func.func @transform_7(%arg0: i32) -> (i32, i32, i32) {
    %c0_i32 = arith.constant 0 : i32
    %c0_i32_0 = arith.constant 0 : i32
    %c0_i32_1 = arith.constant 0 : i32
    return %arg0, %c0_i32, %c0_i32_0 : i32, i32, i32
  }
}

module attributes {stable_mosaic.version = 11 : i64} {
  func.func @_deconv_stats_kernel(%arg0: i32, %arg1: memref<128x128xbf16, #tpu.memory_space<vmem>>, %arg2: memref<1x128xbf16, #tpu.memory_space<vmem>>, %arg3: memref<1x128xbf16, #tpu.memory_space<vmem>>, %arg4: memref<128x512xbf16, #tpu.memory_space<vmem>>, %arg5: memref<1x512xf32, #tpu.memory_space<vmem>>, %arg6: memref<128x512xbf16, #tpu.memory_space<vmem>>, %arg7: memref<1x1x512xf32, #tpu.memory_space<vmem>>, %arg8: memref<1x1x512xf32, #tpu.memory_space<vmem>>) attributes {dimension_semantics = [#tpu.dimension_semantics<parallel>], iteration_bounds = array<i64: 1>, scalar_prefetch = 0 : i64, scratch_operands = 0 : i64, tpu.core_type = #tpu.core_type<tc>, window_params = [{transform_indices = @transform_0, window_bounds = array<i64: 128, 128>}, {pipeline_mode = #tpu.pipeline_mode<synchronous>, transform_indices = @transform_1, window_bounds = array<i64: 1, 128>}, {pipeline_mode = #tpu.pipeline_mode<synchronous>, transform_indices = @transform_2, window_bounds = array<i64: 1, 128>}, {pipeline_mode = #tpu.pipeline_mode<synchronous>, transform_indices = @transform_3, window_bounds = array<i64: 128, 512>}, {pipeline_mode = #tpu.pipeline_mode<synchronous>, transform_indices = @transform_4, window_bounds = array<i64: 1, 512>}, {transform_indices = @transform_5, window_bounds = array<i64: 128, 512>}, {transform_indices = @transform_6, window_bounds = array<i64: 1, 1, 512>}, {transform_indices = @transform_7, window_bounds = array<i64: 1, 1, 512>}]} {
    %c0 = arith.constant 0 : index
    %c0_0 = arith.constant 0 : index
    %0 = vector.load %arg1[%c0, %c0_0] : memref<128x128xbf16, #tpu.memory_space<vmem>>, vector<128x128xbf16>
    %c0_1 = arith.constant 0 : index
    %c0_2 = arith.constant 0 : index
    %1 = vector.load %arg2[%c0_1, %c0_2] : memref<1x128xbf16, #tpu.memory_space<vmem>>, vector<1x128xbf16>
    %2 = vector.broadcast %1 : vector<1x128xbf16> to vector<128x128xbf16>
    %3 = arith.mulf %0, %2 : vector<128x128xbf16>
    %c0_3 = arith.constant 0 : index
    %c0_4 = arith.constant 0 : index
    %4 = vector.load %arg3[%c0_3, %c0_4] : memref<1x128xbf16, #tpu.memory_space<vmem>>, vector<1x128xbf16>
    %5 = vector.broadcast %4 : vector<1x128xbf16> to vector<128x128xbf16>
    %6 = arith.addf %3, %5 : vector<128x128xbf16>
    %cst = arith.constant 0.000000e+00 : bf16
    %7 = vector.broadcast %cst : bf16 to vector<128x128xbf16>
    %8 = arith.maximumf %6, %7 : vector<128x128xbf16>
    %c0_5 = arith.constant 0 : index
    %c0_6 = arith.constant 0 : index
    %9 = vector.load %arg4[%c0_5, %c0_6] : memref<128x512xbf16, #tpu.memory_space<vmem>>, vector<128x512xbf16>
    %cst_7 = arith.constant dense<0.000000e+00> : vector<128x512xf32>
    %10 = tpu.matmul %8, %9, %cst_7 {dimension_numbers = #tpu.dot_dimension_numbers<[1], [0], [0], [1], [0, 0, 1, 1], [], []>} : vector<128x128xbf16>, vector<128x512xbf16>, vector<128x512xf32> -> vector<128x512xf32>
    %c0_8 = arith.constant 0 : index
    %c0_9 = arith.constant 0 : index
    %11 = vector.load %arg5[%c0_8, %c0_9] : memref<1x512xf32, #tpu.memory_space<vmem>>, vector<1x512xf32>
    %12 = vector.broadcast %11 : vector<1x512xf32> to vector<128x512xf32>
    %13 = arith.addf %10, %12 : vector<128x512xf32>
    %14 = arith.truncf %13 : vector<128x512xf32> to vector<128x512xbf16>
    %c0_10 = arith.constant 0 : index
    %c0_11 = arith.constant 0 : index
    %15 = vector.load %arg6[%c0_10, %c0_11] : memref<128x512xbf16, #tpu.memory_space<vmem>>, vector<128x512xbf16>
    tpu.vector_store %arg6[%c0_10, %c0_11], %14 {strides = array<i32>} : memref<128x512xbf16, #tpu.memory_space<vmem>>, vector<128x512xbf16>,
    %cst_12 = arith.constant dense<0.000000e+00> : vector<512xf32>
    %16 = vector.multi_reduction <add>, %13, %cst_12 [0] : vector<128x512xf32> to vector<512xf32>
    %17 = vector.shape_cast %16 : vector<512xf32> to vector<1x512xf32>
    %18 = vector.shape_cast %17 : vector<1x512xf32> to vector<1x1x512xf32>
    %c0_13 = arith.constant 0 : index
    %c0_14 = arith.constant 0 : index
    %c0_15 = arith.constant 0 : index
    %19 = vector.load %arg7[%c0_13, %c0_14, %c0_15] : memref<1x1x512xf32, #tpu.memory_space<vmem>>, vector<1x1x512xf32>
    tpu.vector_store %arg7[%c0_13, %c0_14, %c0_15], %18 {strides = array<i32>} : memref<1x1x512xf32, #tpu.memory_space<vmem>>, vector<1x1x512xf32>,
    %20 = arith.mulf %13, %13 : vector<128x512xf32>
    %cst_16 = arith.constant dense<0.000000e+00> : vector<512xf32>
    %21 = vector.multi_reduction <add>, %20, %cst_16 [0] : vector<128x512xf32> to vector<512xf32>
    %22 = vector.shape_cast %21 : vector<512xf32> to vector<1x512xf32>
    %23 = vector.shape_cast %22 : vector<1x512xf32> to vector<1x1x512xf32>
    %c0_17 = arith.constant 0 : index
    %c0_18 = arith.constant 0 : index
    %c0_19 = arith.constant 0 : index
    %24 = vector.load %arg8[%c0_17, %c0_18, %c0_19] : memref<1x1x512xf32, #tpu.memory_space<vmem>>, vector<1x1x512xf32>
    tpu.vector_store %arg8[%c0_17, %c0_18, %c0_19], %23 {strides = array<i32>} : memref<1x1x512xf32, #tpu.memory_space<vmem>>, vector<1x1x512xf32>,
    return
  }
  func.func @transform_0(%arg0: i32) -> (i32, i32) {
    %c0_i32 = arith.constant 0 : i32
    %c0_i32_0 = arith.constant 0 : i32
    return %arg0, %c0_i32 : i32, i32
  }
  func.func @transform_1(%arg0: i32) -> (i32, i32) {
    %c0_i32 = arith.constant 0 : i32
    %c0_i32_0 = arith.constant 0 : i32
    %c0_i32_1 = arith.constant 0 : i32
    return %c0_i32, %c0_i32_0 : i32, i32
  }
  func.func @transform_2(%arg0: i32) -> (i32, i32) {
    %c0_i32 = arith.constant 0 : i32
    %c0_i32_0 = arith.constant 0 : i32
    %c0_i32_1 = arith.constant 0 : i32
    return %c0_i32, %c0_i32_0 : i32, i32
  }
  func.func @transform_3(%arg0: i32) -> (i32, i32) {
    %c0_i32 = arith.constant 0 : i32
    %c0_i32_0 = arith.constant 0 : i32
    %c0_i32_1 = arith.constant 0 : i32
    return %c0_i32, %c0_i32_0 : i32, i32
  }
  func.func @transform_4(%arg0: i32) -> (i32, i32) {
    %c0_i32 = arith.constant 0 : i32
    %c0_i32_0 = arith.constant 0 : i32
    %c0_i32_1 = arith.constant 0 : i32
    return %c0_i32, %c0_i32_0 : i32, i32
  }
  func.func @transform_5(%arg0: i32) -> (i32, i32) {
    %c0_i32 = arith.constant 0 : i32
    %c0_i32_0 = arith.constant 0 : i32
    return %arg0, %c0_i32 : i32, i32
  }
  func.func @transform_6(%arg0: i32) -> (i32, i32, i32) {
    %c0_i32 = arith.constant 0 : i32
    %c0_i32_0 = arith.constant 0 : i32
    %c0_i32_1 = arith.constant 0 : i32
    return %arg0, %c0_i32, %c0_i32_0 : i32, i32, i32
  }
  func.func @transform_7(%arg0: i32) -> (i32, i32, i32) {
    %c0_i32 = arith.constant 0 : i32
    %c0_i32_0 = arith.constant 0 : i32
    %c0_i32_1 = arith.constant 0 : i32
    return %arg0, %c0_i32, %c0_i32_0 : i32, i32, i32
  }
}

module attributes {stable_mosaic.version = 11 : i64} {
  func.func @_deconv_tanh_kernel(%arg0: i32, %arg1: memref<1024x64xbf16, #tpu.memory_space<vmem>>, %arg2: memref<1x64xbf16, #tpu.memory_space<vmem>>, %arg3: memref<1x64xbf16, #tpu.memory_space<vmem>>, %arg4: memref<64x32xbf16, #tpu.memory_space<vmem>>, %arg5: memref<1x32xf32, #tpu.memory_space<vmem>>, %arg6: memref<1024x32xbf16, #tpu.memory_space<vmem>>) attributes {dimension_semantics = [#tpu.dimension_semantics<parallel>], iteration_bounds = array<i64: 1>, scalar_prefetch = 0 : i64, scratch_operands = 0 : i64, tpu.core_type = #tpu.core_type<tc>, window_params = [{transform_indices = @transform_0, window_bounds = array<i64: 1024, 64>}, {pipeline_mode = #tpu.pipeline_mode<synchronous>, transform_indices = @transform_1, window_bounds = array<i64: 1, 64>}, {pipeline_mode = #tpu.pipeline_mode<synchronous>, transform_indices = @transform_2, window_bounds = array<i64: 1, 64>}, {pipeline_mode = #tpu.pipeline_mode<synchronous>, transform_indices = @transform_3, window_bounds = array<i64: 64, 32>}, {pipeline_mode = #tpu.pipeline_mode<synchronous>, transform_indices = @transform_4, window_bounds = array<i64: 1, 32>}, {transform_indices = @transform_5, window_bounds = array<i64: 1024, 32>}]} {
    %c0 = arith.constant 0 : index
    %c0_0 = arith.constant 0 : index
    %0 = vector.load %arg1[%c0, %c0_0] : memref<1024x64xbf16, #tpu.memory_space<vmem>>, vector<1024x64xbf16>
    %c0_1 = arith.constant 0 : index
    %c0_2 = arith.constant 0 : index
    %1 = vector.load %arg2[%c0_1, %c0_2] : memref<1x64xbf16, #tpu.memory_space<vmem>>, vector<1x64xbf16>
    %2 = vector.broadcast %1 : vector<1x64xbf16> to vector<1024x64xbf16>
    %3 = arith.mulf %0, %2 : vector<1024x64xbf16>
    %c0_3 = arith.constant 0 : index
    %c0_4 = arith.constant 0 : index
    %4 = vector.load %arg3[%c0_3, %c0_4] : memref<1x64xbf16, #tpu.memory_space<vmem>>, vector<1x64xbf16>
    %5 = vector.broadcast %4 : vector<1x64xbf16> to vector<1024x64xbf16>
    %6 = arith.addf %3, %5 : vector<1024x64xbf16>
    %cst = arith.constant 0.000000e+00 : bf16
    %7 = vector.broadcast %cst : bf16 to vector<1024x64xbf16>
    %8 = arith.maximumf %6, %7 : vector<1024x64xbf16>
    %c0_5 = arith.constant 0 : index
    %c0_6 = arith.constant 0 : index
    %9 = vector.load %arg4[%c0_5, %c0_6] : memref<64x32xbf16, #tpu.memory_space<vmem>>, vector<64x32xbf16>
    %cst_7 = arith.constant dense<0.000000e+00> : vector<1024x32xf32>
    %10 = tpu.matmul %8, %9, %cst_7 {dimension_numbers = #tpu.dot_dimension_numbers<[1], [0], [0], [1], [0, 0, 1, 1], [], []>} : vector<1024x64xbf16>, vector<64x32xbf16>, vector<1024x32xf32> -> vector<1024x32xf32>
    %c0_8 = arith.constant 0 : index
    %c0_9 = arith.constant 0 : index
    %11 = vector.load %arg5[%c0_8, %c0_9] : memref<1x32xf32, #tpu.memory_space<vmem>>, vector<1x32xf32>
    %12 = vector.broadcast %11 : vector<1x32xf32> to vector<1024x32xf32>
    %13 = arith.addf %10, %12 : vector<1024x32xf32>
    %14 = arith.truncf %13 : vector<1024x32xf32> to vector<1024x32xbf16>
    %15 = math.tanh %14 : vector<1024x32xbf16>
    %c0_10 = arith.constant 0 : index
    %c0_11 = arith.constant 0 : index
    %16 = vector.load %arg6[%c0_10, %c0_11] : memref<1024x32xbf16, #tpu.memory_space<vmem>>, vector<1024x32xbf16>
    tpu.vector_store %arg6[%c0_10, %c0_11], %15 {strides = array<i32>} : memref<1024x32xbf16, #tpu.memory_space<vmem>>, vector<1024x32xbf16>,
    return
  }
  func.func @transform_0(%arg0: i32) -> (i32, i32) {
    %c0_i32 = arith.constant 0 : i32
    %c0_i32_0 = arith.constant 0 : i32
    return %arg0, %c0_i32 : i32, i32
  }
  func.func @transform_1(%arg0: i32) -> (i32, i32) {
    %c0_i32 = arith.constant 0 : i32
    %c0_i32_0 = arith.constant 0 : i32
    %c0_i32_1 = arith.constant 0 : i32
    return %c0_i32, %c0_i32_0 : i32, i32
  }
  func.func @transform_2(%arg0: i32) -> (i32, i32) {
    %c0_i32 = arith.constant 0 : i32
    %c0_i32_0 = arith.constant 0 : i32
    %c0_i32_1 = arith.constant 0 : i32
    return %c0_i32, %c0_i32_0 : i32, i32
  }
  func.func @transform_3(%arg0: i32) -> (i32, i32) {
    %c0_i32 = arith.constant 0 : i32
    %c0_i32_0 = arith.constant 0 : i32
    %c0_i32_1 = arith.constant 0 : i32
    return %c0_i32, %c0_i32_0 : i32, i32
  }
  func.func @transform_4(%arg0: i32) -> (i32, i32) {
    %c0_i32 = arith.constant 0 : i32
    %c0_i32_0 = arith.constant 0 : i32
    %c0_i32_1 = arith.constant 0 : i32
    return %c0_i32, %c0_i32_0 : i32, i32
  }
  func.func @transform_5(%arg0: i32) -> (i32, i32) {
    %c0_i32 = arith.constant 0 : i32
    %c0_i32_0 = arith.constant 0 : i32
    return %arg0, %c0_i32 : i32, i32
  }
}

</mosaic_0001>

<bundles_post_ra>
// kernel: generator_forward.5
= control target key start
LH: loop header
LB: loop body
LE: loop exit
PB: predicated region body
PF: predicated region fallthrough
CT: control target
= control target key end

     0   :  { %11 = vsyncpa [#allocation3], 0  ;;  %s523_s0 = inlined_call_operand.vmem [shape: bf16[2,32], index: 0, kind: input, shape index: {}]   ;;  %s524_s1 = inlined_call_operand.hbm [shape: bf16[32,512], index: 1, kind: input, shape index: {}]   ;;  %s525_s2 = inlined_call_operand.hbm [shape: f32[1,512], index: 2, kind: input, shape index: {}]   ;;  %s526_s3 = inlined_call_operand.vmem [shape: bf16[2,512], index: 3, kind: output, shape index: {0}]   ;;  %s527_s4 = inlined_call_operand.vmem [shape: f32[1,512], index: 4, kind: output, shape index: {1}]   ;;  %s528_s5 = inlined_call_operand.vmem [shape: f32[1,512], index: 5, kind: output, shape index: {2}]  }
   0x1   :  { %12 = vsyncpa [#allocation5], 0  ;;  %s449_s18 = smov [#allocation2]  }
   0x2   :  { %s20_s19 = sshll.u32 %s449_s18, 4  ;;  %s21_s19 = int_to_ptr.vmem [resolvable:$true] %s20_s19 }
   0x3   :  { %s413_s20 = scalar_lea.vmem %s21_s19, 1024  ;;  %p418_p1 = scmp.lt.s32.totalorder %s21_s19, %s21_s19 }
   0x4   :  { %p414_p0 = scmp.ne.s32.totalorder %s21_s19, %s413_s20  ;;  %p419_p2 = scmp.lt.s32.totalorder %s413_s20, %s413_s20 }
   0x6   :  { %p420_p3 = por %p419_p2, %p418_p1 }
   0x8   :  { %p421_p4 = pnand %p420_p3, %p414_p0 }
   0xa   :  { %424 = shalt.err (!%p421_p4)
}
   0xb   :  { %s450_s21 = smov 256   ;;  %s451_s22 = smov 16  }
   0xc   :  { %26 = dma.hbm_to_vmem [thread:$0]  %s524_s1, 1024, %s21_s19, [#allocation3], %s450_s21, %s450_s21, %s451_s22  }
   0xd   :  { %s452_s25 = smov [#allocation4]  }
   0xe   :  { %s33_s26 = sshll.u32 %s452_s25, 4  ;;  %s34_s26 = int_to_ptr.vmem [resolvable:$true] %s33_s26 }
   0xf   :  { %s433_s27 = scalar_lea.vmem %s34_s26, 64  ;;  %p438_p6 = scmp.lt.s32.totalorder %s34_s26, %s34_s26 }
  0x10   :  { %p434_p5 = scmp.ne.s32.totalorder %s34_s26, %s433_s27  ;;  %p439_p7 = scmp.lt.s32.totalorder %s433_s27, %s433_s27 }
  0x12   :  { %p440_p8 = por %p439_p7, %p438_p6 }
  0x14   :  { %p441_p9 = pnand %p440_p8, %p434_p5 }
  0x16   :  { %444 = shalt.err (!%p441_p9)
}
  0x17   :  { %36 = dma.hbm_to_vmem [thread:$0]  %s525_s2, 64, %s34_s26, [#allocation5]  }
  0x18   :  { %445 = dma.done.wait [#allocation3], 1024  }
  0x19   :  { %446 = vsyncadd [#allocation3], 4294966272 }
  0x1a   :  { %447 = dma.done.wait [#allocation5], 64  }
  0x1b   :  { %448 = vsyncadd [#allocation5], 4294967232  ;;  %v453_v0 = vmov 0   ;;  %v393_v1 = vld [vmem:[#allocation2 + $0x24] ss:$16 sps:$4 sm:$0xff]   ;;  %vm115_vm0 = vcmask 261120   ;;  %v55_v10 = vlaneseq }
  0x1c   :  { %151 = vmatprep.mubr.bf16.mxu0 %v453_v0  ;;  %192 = vmatprep.mubr.bf16.mxu1 %v453_v0  ;;  %v395_v2 = vld [vmem:[#allocation2 + $0x2c] ss:$16 sps:$4 sm:$0xff]   ;;  %v397_v3 = vld [vmem:[#allocation2 + $0x20] ss:$16 sps:$4 sm:$0xff]   ;;  %v398_v4 = vld [vmem:[#allocation2 + $0x28] ss:$16 sps:$4 sm:$0xff]  }
  0x1d   :  { %131 = vmatprep.subr.bf16.mxu0 %v393_v1  ;;  %172 = vmatprep.subr.bf16.mxu1 %v395_v2  ;;  %v399_v5 = vld [vmem:[#allocation2 + $0x4] ss:$16 sps:$4 sm:$0xff]   ;;  %v401_v6 = vld [vmem:[#allocation2 + $0xc] ss:$16 sps:$4 sm:$0xff]   ;;  %v403_v7 = vld [vmem:[#allocation2] ss:$16 sps:$4 sm:$0xff]  }
  0x1e   :  { %132 = vmatpush1.bf16.msra.mxu0 %v397_v3  ;;  %173 = vmatpush1.bf16.msra.mxu1 %v398_v4  ;;  %v404_v8 = vld [vmem:[#allocation2 + $0x8] ss:$16 sps:$4 sm:$0xff]   ;;  %v44_v9 = vld [vmem:[%s523_s0] sm:$0x1]  ;;  %v56_v11 = vshrl.u32 %v55_v10, 7  ;;  %vm235_vm1 = vcmask 1041408  }
  0x1f   :  { %133 = vmatprep.subr.bf16.mxu0 %v399_v5  ;;  %174 = vmatprep.subr.bf16.mxu1 %v401_v6  ;;  %v53_v14 = vld [vmem:[#allocation4] sm:$0xf]  ;;  %v454_v18 = vmov 1966171168   ;;  %vm295_vm2 = vcmp.lt.s32.totalorder %v55_v10, 512 }
  0x20   :  { %v57_v12 = vsub.s32 0, %v56_v11  ;;  %v65_v13 = vsub.s32 2, %v56_v11  ;;  %v61_v15 = vsub.s32 1, %v56_v11  ;;  %v69_v16 = vsub.s32 3, %v56_v11 }
  0x21   :  { %v212_v19 = vunpack.c.l.s4 %v454_v18 }
  0x22   :  { %134 = vmatpush1.bf16.msra.mxu0 %v403_v7  ;;  %175 = vmatpush1.bf16.msra.mxu1 %v404_v8  ;;  %v58_v17 = vrot.slane %v53_v14, %v57_v12  ;;  %v66_v20 = vrot.slane %v53_v14, %v65_v13  ;;  %v62_v23 = vrot.slane %v53_v14, %v61_v15 }
  0x23   :  { %v70_v24 = vrot.slane %v53_v14, %v69_v16  ;;  %v213_v26 = vunpack.c.0.s8 %v212_v19 }
  0x25   :  { %382 = vmatmul.mubr.msk.bf16.vlgmr.msra.gmra.mxu0 %vm115_vm0, %v44_v9  ;;  %383 = vmatmul.mubr.msk.bf16.vlgmr.msra.gmra.mxu1 %vm115_vm0, %v44_v9  ;;  %v497_v40 = vsub.s32 %v213_v26, %v56_v11 }
  0xe5   :  { %v153_v21 = vpop.f32.mrf.mxu0  ;;  %v194_v22 = vpop.f32.mrf.mxu1 }
  0xe6   :  { %v154_v25 = vadd.f32 %v153_v21, %v58_v17  ;;  %v195_v27 = vadd.f32 %v194_v22, %v66_v20 }
  0xe7   :  { %v155_v28 = vpop.f32.mrf.mxu0  ;;  %v196_v29 = vpop.f32.mrf.mxu1 }
  0xe8   :  { %v236_v30 = vsel %vm235_vm1, %v154_v25, 0.0  ;;  %v298_v31 = vmul.f32 %v154_v25, %v154_v25  ;;  %v250_v32 = vsel %vm235_vm1, %v195_v27, 0.0  ;;  %v300_v33 = vmul.f32 %v195_v27, %v195_v27 }
  0xe9   :  { %v237_v34 = vrot.slane %v236_v30, 4  ;;  %v251_v35 = vrot.slane %v250_v32, 4  ;;  %v156_v36 = vadd.f32 %v155_v28, %v62_v23  ;;  %v197_v37 = vadd.f32 %v196_v29, %v70_v24  ;;  %v157_v38 = vpop.f32.mrf.mxu0  ;;  %v198_v39 = vpop.f32.mrf.mxu1 }
  0xea   :  { %v302_v41 = vsel %vm235_vm1, %v298_v31, 0.0  ;;  %v316_v42 = vsel %vm235_vm1, %v300_v33, 0.0 }
  0xeb   :  { %v238_v43 = vadd.f32 %v237_v34, %v236_v30  ;;  %v303_v44 = vrot.slane %v302_v41, 4  ;;  %v252_v45 = vadd.f32 %v251_v35, %v250_v32  ;;  %v317_v46 = vrot.slane %v316_v42, 4  ;;  %v158_v47 = vpop.f32.mrf.mxu0  ;;  %v199_v48 = vpop.f32.mrf.mxu1 }
  0xec   :  { %v384_v49 = vpack.c.bf16 %v156_v36, %v154_v25  ;;  %v243_v50 = vsel %vm235_vm1, %v156_v36, 0.0  ;;  %v299_v51 = vmul.f32 %v156_v36, %v156_v36  ;;  %v385_v52 = vpack.c.bf16 %v197_v37, %v195_v27 }
  0xed   :  { %v239_v53 = vrot.slane %v238_v43, 2  ;;  %v304_v54 = vadd.f32 %v303_v44, %v302_v41  ;;  %v244_v56 = vrot.slane %v243_v50, 4  ;;  %v253_v61 = vrot.slane %v252_v45, 2 }
  0xee   :  { %v217_v55 = vrot.slane %v384_v49, %v497_v40  ;;  %v309_v57 = vsel %vm235_vm1, %v299_v51, 0.0  ;;  %v224_v58 = vrot.slane %v385_v52, %v497_v40  ;;  %v318_v62 = vadd.f32 %v317_v46, %v316_v42 }
  0xef   :  { %v240_v59 = vadd.f32 %v239_v53, %v238_v43  ;;  %v305_v60 = vrot.slane %v304_v54, 2  ;;  %v245_v63 = vadd.f32 %v244_v56, %v243_v50  ;;  %v310_v0 = vrot.slane %v309_v57, 4 }
  0xf0   :  { %v225_v1 = vcombine.low %v217_v55, %v224_v58  ;;  %v257_v2 = vsel %vm235_vm1, %v197_v37, 0.0  ;;  %v301_v6 = vmul.f32 %v197_v37, %v197_v37  ;;  %v254_v9 = vadd.f32 %v253_v61, %v252_v45 }
  0xf1   :  { %v246_v3 = vrot.slane %v245_v63, 2  ;;  %v311_v4 = vadd.f32 %v310_v0, %v309_v57  ;;  %v258_v5 = vrot.slane %v257_v2, 4  ;;  %v241_v7 = vrot.slane %v240_v59, 1 }
  0xf2   :  { %386 = vst.sshfl [vmem:[%s526_s3] sm:$0x55 pattern:$0x73625140] %v225_v1  ;;  %v306_v8 = vadd.f32 %v305_v60, %v304_v54  ;;  %v319_v11 = vrot.slane %v318_v62, 2  ;;  %v323_v15 = vsel %vm235_vm1, %v301_v6, 0.0  ;;  %v255_v21 = vrot.slane %v254_v9, 1 }
  0xf3   :  { %v247_v12 = vadd.f32 %v246_v3, %v245_v63  ;;  %v312_v13 = vrot.slane %v311_v4, 2  ;;  %v259_v14 = vadd.f32 %v258_v5, %v257_v2  ;;  %v324_v16 = vrot.slane %v323_v15, 4 }
  0xf4   :  { %v307_v20 = vrot.slane %v306_v8, 1  ;;  %v320_v22 = vadd.f32 %v319_v11, %v318_v62  ;;  %v242_v24 = vadd.f32 %v241_v7, %v240_v59  ;;  %v256_v35 = vadd.f32 %v255_v21, %v254_v9 }
  0xf5   :  { %v248_v17 = vrot.slane %v247_v12, 1  ;;  %v313_v18 = vadd.f32 %v312_v13, %v311_v4  ;;  %v260_v19 = vrot.slane %v259_v14, 2  ;;  %v325_v23 = vadd.f32 %v324_v16, %v323_v15 }
  0xf6   :  { %v308_v32 = vadd.f32 %v307_v20, %v306_v8  ;;  %v321_v33 = vrot.slane %v320_v22, 1 }
  0xf7   :  { %v249_v25 = vadd.f32 %v248_v17, %v247_v12  ;;  %v314_v26 = vrot.slane %v313_v18, 1  ;;  %v261_v27 = vadd.f32 %v260_v19, %v259_v14  ;;  %v326_v28 = vrot.slane %v325_v23, 2 }
  0xf8   :  { %v322_v42 = vadd.f32 %v321_v33, %v320_v22 }
  0xf9   :  { %v268_v29 = vcombine.low %v242_v24, %v249_v25  ;;  %v315_v30 = vadd.f32 %v314_v26, %v313_v18  ;;  %v262_v31 = vrot.slane %v261_v27, 1  ;;  %v327_v34 = vadd.f32 %v326_v28, %v325_v23 }
  0xfb   :  { %v263_v36 = vadd.f32 %v262_v31, %v261_v27  ;;  %v334_v37 = vcombine.low %v308_v32, %v315_v30  ;;  %v328_v38 = vrot.slane %v327_v34, 1  ;;  %v276_v39 = vrot.slane %v268_v29, %v497_v40 }
  0xfd   :  { %v269_v41 = vcombine.low %v256_v35, %v263_v36  ;;  %v329_v43 = vadd.f32 %v328_v38, %v327_v34  ;;  %v342_v45 = vrot.slane %v334_v37, %v497_v40 }
  0xff   :  { %v283_v44 = vrot.slane %v269_v41, %v497_v40  ;;  %v335_v46 = vcombine.low %v322_v42, %v329_v43 }
 0x101   :  { %v284_v47 = vcombine.low %v276_v39, %v283_v44  ;;  %v349_v48 = vrot.slane %v335_v46, %v497_v40 }
 0x103   :  { %v291_v49 = vrot.slane %v284_v47, %v497_v40  ;;  %v350_v50 = vcombine.low %v342_v45, %v349_v48 }
 0x105   :  { %297 = vst.msk [vmem:[%s527_s4] sm:$0xf] %vm295_vm2, %v291_v49  ;;  %v357_v51 = vrot.slane %v350_v50, %v497_v40 }
 0x107   :  { %359 = vst.msk [vmem:[%s528_s5] sm:$0xf] %vm295_vm2, %v357_v51 }
 0x108   :  { %372 = vsyncpa [#allocation3], 1 }
 0x109   :  { %373 = vsyncpa [#allocation5], 1 }

// kernel: generator_forward.7
= control target key start
LH: loop header
LB: loop body
LE: loop exit
PB: predicated region body
PF: predicated region fallthrough
CT: control target
= control target key end

     0   :  { %13 = vsyncpa [#allocation3], 0  ;;  %s1832_s0 = inlined_call_operand.vmem [shape: bf16[16,256], index: 0, kind: input, shape index: {}]   ;;  %s1833_s1 = inlined_call_operand.vmem [shape: bf16[1,256], index: 1, kind: input, shape index: {}]   ;;  %s1834_s2 = inlined_call_operand.vmem [shape: bf16[1,256], index: 2, kind: input, shape index: {}]   ;;  %s1835_s3 = inlined_call_operand.hbm [shape: bf16[256,1024], index: 3, kind: input, shape index: {}]   ;;  %s1836_s4 = inlined_call_operand.hbm [shape: f32[1,1024], index: 4, kind: input, shape index: {}]   ;;  %s1837_s5 = inlined_call_operand.vmem [shape: bf16[16,1024], index: 5, kind: output, shape index: {0}]   ;;  %s1838_s6 = inlined_call_operand.vmem [shape: f32[1,1,1024], index: 6, kind: output, shape index: {1}]   ;;  %s1839_s7 = inlined_call_operand.vmem [shape: f32[1,1,1024], index: 7, kind: output, shape index: {2}]  }
   0x1   :  { %14 = vsyncpa [#allocation5], 0  ;;  %s1654_s24 = smov [#allocation2]  }
   0x2   :  { %s26_s25 = sshll.u32 %s1654_s24, 4  ;;  %s27_s25 = int_to_ptr.vmem [resolvable:$true] %s26_s25 }
   0x3   :  { %s1618_s26 = scalar_lea.vmem %s27_s25, 16384  ;;  %p1623_p1 = scmp.lt.s32.totalorder %s27_s25, %s27_s25 }
   0x4   :  { %p1619_p0 = scmp.ne.s32.totalorder %s27_s25, %s1618_s26  ;;  %p1624_p2 = scmp.lt.s32.totalorder %s1618_s26, %s1618_s26 }
   0x6   :  { %p1625_p3 = por %p1624_p2, %p1623_p1 }
   0x8   :  { %p1626_p4 = pnand %p1625_p3, %p1619_p0 }
   0xa   :  { %1629 = shalt.err (!%p1626_p4)
}
   0xb   :  { %s1655_s27 = smov 512   ;;  %s1656_s28 = smov 32  }
   0xc   :  { %32 = dma.hbm_to_vmem [thread:$0]  %s1835_s3, 16384, %s27_s25, [#allocation3], %s1655_s27, %s1655_s27, %s1656_s28  }
   0xd   :  { %s1657_s8 = smov [#allocation4]  }
   0xe   :  { %s39_s9 = sshll.u32 %s1657_s8, 4  ;;  %s40_s9 = int_to_ptr.vmem [resolvable:$true] %s39_s9 }
   0xf   :  { %s1638_s10 = scalar_lea.vmem %s40_s9, 128  ;;  %p1643_p6 = scmp.lt.s32.totalorder %s40_s9, %s40_s9 }
  0x10   :  { %p1639_p5 = scmp.ne.s32.totalorder %s40_s9, %s1638_s10  ;;  %p1644_p7 = scmp.lt.s32.totalorder %s1638_s10, %s1638_s10 }
  0x12   :  { %p1645_p8 = por %p1644_p7, %p1643_p6 }
  0x14   :  { %p1646_p9 = pnand %p1645_p8, %p1639_p5 }
  0x16   :  { %1649 = shalt.err (!%p1646_p9)
}
  0x17   :  { %42 = dma.hbm_to_vmem [thread:$0]  %s1836_s4, 128, %s40_s9, [#allocation5]  }
  0x18   :  { %1650 = dma.done.wait [#allocation3], 16384  }
  0x19   :  { %1651 = vsyncadd [#allocation3], 4294950912 }
  0x1a   :  { %1652 = dma.done.wait [#allocation5], 128  }
  0x1b   :  { %1653 = vsyncadd [#allocation5], 4294967168  ;;  %v202_v0 = vld [vmem:[#allocation2 + $0x1c0] sm:$0xff]  ;;  %v203_v2 = vld [vmem:[#allocation2 + $0x1c8] sm:$0xff]  ;;  %v1658_v34 = vmov 1966171168   ;;  %v65_v36 = vlaneseq }
  0x1c   :  { %v206_v1 = vld [vmem:[#allocation2 + $0x1e0] sm:$0xff]  ;;  %v207_v4 = vld [vmem:[#allocation2 + $0x1e8] sm:$0xff]  ;;  %v63_v35 = vunpack.c.l.s4 %v1658_v34 }
  0x1d   :  { %v1517_v3 = vcombine.high %v202_v0, %v206_v1  ;;  %v1516_v5 = vcombine.low %v202_v0, %v206_v1  ;;  %v194_v6 = vld [vmem:[#allocation2 + $0x180] sm:$0xff]  ;;  %v1519_v8 = vcombine.high %v203_v2, %v207_v4  ;;  %v1518_v9 = vcombine.low %v203_v2, %v207_v4  ;;  %v195_v11 = vld [vmem:[#allocation2 + $0x188] sm:$0xff] }
  0x1e   :  { %v198_v7 = vld [vmem:[#allocation2 + $0x1a0] sm:$0xff]  ;;  %v199_v12 = vld [vmem:[#allocation2 + $0x1a8] sm:$0xff]  ;;  %v64_v45 = vunpack.c.0.s8 %v63_v35  ;;  %v1706_v46 = vshrl.u32 %v65_v36, 7 }
  0x1f   :  { %v1509_v10 = vcombine.high %v194_v6, %v198_v7  ;;  %v186_v13 = vld [vmem:[#allocation2 + $0x140] sm:$0xff]  ;;  %966 = vmatprep.subr.bf16.mxu0 %v1517_v3  ;;  %v1511_v14 = vcombine.high %v195_v11, %v199_v12  ;;  %v187_v16 = vld [vmem:[#allocation2 + $0x148] sm:$0xff]  ;;  %1009 = vmatprep.subr.bf16.mxu1 %v1519_v8  ;;  %v1508_v18 = vcombine.low %v194_v6, %v198_v7 }
  0x20   :  { %v190_v15 = vld [vmem:[#allocation2 + $0x160] sm:$0xff]  ;;  %v191_v17 = vld [vmem:[#allocation2 + $0x168] sm:$0xff]  ;;  %967 = vmatpush1.bf16.msra.mxu0 %v1516_v5  ;;  %1010 = vmatpush1.bf16.msra.mxu1 %v1518_v9  ;;  %v1510_v19 = vcombine.low %v195_v11, %v199_v12  ;;  %v1709_v55 = vsub.s32 %v64_v45, %v1706_v46  ;;  %v1712_v59 = vsub.s32 0, %v1706_v46 }
  0x21   :  { %968 = vmatprep.subr.bf16.mxu0 %v1509_v10  ;;  %v1501_v20 = vcombine.high %v186_v13, %v190_v15  ;;  %1011 = vmatprep.subr.bf16.mxu1 %v1511_v14  ;;  %v1503_v21 = vcombine.high %v187_v16, %v191_v17  ;;  %v178_v22 = vld [vmem:[#allocation2 + $0x100] sm:$0xff]  ;;  %v179_v24 = vld [vmem:[#allocation2 + $0x108] sm:$0xff]  ;;  %v1500_v26 = vcombine.low %v186_v13, %v190_v15 }
  0x22   :  { %v182_v23 = vld [vmem:[#allocation2 + $0x120] sm:$0xff]  ;;  %v183_v25 = vld [vmem:[#allocation2 + $0x128] sm:$0xff]  ;;  %v1502_v27 = vcombine.low %v187_v16, %v191_v17 }
  0x23   :  { %v1493_v28 = vcombine.high %v178_v22, %v182_v23  ;;  %v1495_v29 = vcombine.high %v179_v24, %v183_v25  ;;  %v170_v30 = vld [vmem:[#allocation2 + $0xc0] sm:$0xff]  ;;  %v171_v32 = vld [vmem:[#allocation2 + $0xc8] sm:$0xff]  ;;  %v1492_v37 = vcombine.low %v178_v22, %v182_v23  ;;  %v1494_v38 = vcombine.low %v179_v24, %v183_v25 }
  0x24   :  { %969 = vmatpush1.bf16.msra.mxu0 %v1508_v18  ;;  %1012 = vmatpush1.bf16.msra.mxu1 %v1510_v19  ;;  %v174_v31 = vld [vmem:[#allocation2 + $0xe0] sm:$0xff]  ;;  %v175_v33 = vld [vmem:[#allocation2 + $0xe8] sm:$0xff] }
  0x25   :  { %970 = vmatprep.subr.bf16.mxu0 %v1501_v20  ;;  %1013 = vmatprep.subr.bf16.mxu1 %v1503_v21  ;;  %v1485_v39 = vcombine.high %v170_v30, %v174_v31  ;;  %v1487_v40 = vcombine.high %v171_v32, %v175_v33  ;;  %v162_v41 = vld [vmem:[#allocation2 + $0x80] sm:$0xff]  ;;  %v163_v43 = vld [vmem:[#allocation2 + $0x88] sm:$0xff]  ;;  %v1484_v47 = vcombine.low %v170_v30, %v174_v31 }
  0x26   :  { %v166_v42 = vld [vmem:[#allocation2 + $0xa0] sm:$0xff]  ;;  %v167_v44 = vld [vmem:[#allocation2 + $0xa8] sm:$0xff]  ;;  %v1486_v48 = vcombine.low %v171_v32, %v175_v33 }
  0x27   :  { %v1477_v49 = vcombine.high %v162_v41, %v166_v42  ;;  %v1479_v50 = vcombine.high %v163_v43, %v167_v44  ;;  %v154_v51 = vld [vmem:[#allocation2 + $0x40] sm:$0xff]  ;;  %v155_v53 = vld [vmem:[#allocation2 + $0x48] sm:$0xff]  ;;  %v1476_v56 = vcombine.low %v162_v41, %v166_v42  ;;  %v1478_v57 = vcombine.low %v163_v43, %v167_v44 }
  0x28   :  { %971 = vmatpush1.bf16.msra.mxu0 %v1500_v26  ;;  %1014 = vmatpush1.bf16.msra.mxu1 %v1502_v27  ;;  %v158_v52 = vld [vmem:[#allocation2 + $0x60] sm:$0xff]  ;;  %v159_v54 = vld [vmem:[#allocation2 + $0x68] sm:$0xff] }
  0x29   :  { %972 = vmatprep.subr.bf16.mxu0 %v1493_v28  ;;  %1015 = vmatprep.subr.bf16.mxu1 %v1495_v29  ;;  %v1469_v58 = vcombine.high %v154_v51, %v158_v52  ;;  %v1471_v60 = vcombine.high %v155_v53, %v159_v54  ;;  %v146_v61 = vld [vmem:[#allocation2] sm:$0xff]  ;;  %v147_v0 = vld [vmem:[#allocation2 + $0x8] sm:$0xff]  ;;  %v1468_v5 = vcombine.low %v154_v51, %v158_v52 }
  0x2a   :  { %v150_v62 = vld [vmem:[#allocation2 + $0x20] sm:$0xff]  ;;  %v151_v1 = vld [vmem:[#allocation2 + $0x28] sm:$0xff]  ;;  %v1470_v6 = vcombine.low %v155_v53, %v159_v54  ;;  %v1659_v53 = vmov 0  }
  0x2b   :  { %v1454_v63 = vld.sshfl [vmem:[%s1833_s1] sm:$0x11 pattern:$0x75316420]  ;;  %v1461_v9 = vcombine.high %v146_v61, %v150_v62  ;;  %v1463_v12 = vcombine.high %v147_v0, %v151_v1  ;;  %v267_v17 = vld [vmem:[#allocation2 + $0x3c8] sm:$0xff]  ;;  %v1460_v21 = vcombine.low %v146_v61, %v150_v62  ;;  %v1462_v24 = vcombine.low %v147_v0, %v151_v1 }
  0x2c   :  { %973 = vmatpush1.bf16.msra.mxu0 %v1492_v37  ;;  %1016 = vmatpush1.bf16.msra.mxu1 %v1494_v38  ;;  %v61_v2 = vcombine.high %v1454_v63, %v1454_v63  ;;  %v68_v3 = vrot.slane %v1454_v63, %v1709_v55  ;;  %v1456_v4 = vld.sshfl [vmem:[%s1834_s2] sm:$0x11 pattern:$0x75316420]  ;;  %v271_v18 = vld [vmem:[#allocation2 + $0x3e8] sm:$0xff] }
  0x2d   :  { %974 = vmatprep.subr.bf16.mxu0 %v1485_v39  ;;  %1017 = vmatprep.subr.bf16.mxu1 %v1487_v40  ;;  %v107_v7 = vcombine.high %v1456_v4, %v1456_v4  ;;  %v114_v8 = vrot.slane %v1456_v4, %v1709_v55  ;;  %v266_v13 = vld [vmem:[#allocation2 + $0x3c0] sm:$0xff]  ;;  %v1583_v28 = vcombine.high %v267_v17, %v271_v18  ;;  %v51_v31 = vld [vmem:[%s1832_s0 + $0x8] sm:$0xff] }
  0x2e   :  { %v75_v10 = vrot.slane %v61_v2, %v1709_v55  ;;  %v77_v11 = vpack.i.b16 %v68_v3, %v68_v3  ;;  %v270_v14 = vld [vmem:[#allocation2 + $0x3e0] sm:$0xff]  ;;  %v259_v33 = vld [vmem:[#allocation2 + $0x388] sm:$0xff]  ;;  %v1582_v37 = vcombine.low %v267_v17, %v271_v18 }
  0x2f   :  { %v121_v15 = vrot.slane %v107_v7, %v1709_v55  ;;  %v123_v16 = vpack.i.b16 %v114_v8, %v114_v8  ;;  %v1581_v25 = vcombine.high %v266_v13, %v270_v14  ;;  %v258_v26 = vld [vmem:[#allocation2 + $0x380] sm:$0xff]  ;;  %v263_v34 = vld [vmem:[#allocation2 + $0x3a8] sm:$0xff]  ;;  %v1580_v36 = vcombine.low %v266_v13, %v270_v14 }
  0x30   :  { %975 = vmatpush1.bf16.msra.mxu0 %v1484_v47  ;;  %1018 = vmatpush1.bf16.msra.mxu1 %v1486_v48  ;;  %v82_v19 = vrot.slane %v77_v11, %v1712_v59  ;;  %v84_v20 = vpack.i.b16 %v75_v10, %v75_v10  ;;  %v262_v29 = vld [vmem:[#allocation2 + $0x3a0] sm:$0xff]  ;;  %v1575_v42 = vcombine.high %v259_v33, %v263_v34  ;;  %v251_v45 = vld [vmem:[#allocation2 + $0x348] sm:$0xff] }
  0x31   :  { %976 = vmatprep.subr.bf16.mxu0 %v1477_v49  ;;  %1019 = vmatprep.subr.bf16.mxu1 %v1479_v50  ;;  %v128_v22 = vrot.slane %v123_v16, %v1712_v59  ;;  %v130_v23 = vpack.i.b16 %v121_v15, %v121_v15  ;;  %v50_v30 = vld [vmem:[%s1832_s0] sm:$0xff]  ;;  %v1573_v39 = vcombine.high %v258_v26, %v262_v29  ;;  %v255_v47 = vld [vmem:[#allocation2 + $0x368] sm:$0xff] }
  0x32   :  { %v89_v27 = vrot.slane %v84_v20, %v1712_v59  ;;  %v250_v43 = vld [vmem:[#allocation2 + $0x340] sm:$0xff]  ;;  %v1572_v50 = vcombine.low %v258_v26, %v262_v29  ;;  %v1574_v51 = vcombine.low %v259_v33, %v263_v34  ;;  %v243_v61 = vld [vmem:[#allocation2 + $0x308] sm:$0xff]  ;;  %v1566_v1 = vcombine.low %v251_v45, %v255_v47 }
  0x33   :  { %v135_v32 = vrot.slane %v130_v23, %v1712_v59  ;;  %v254_v44 = vld [vmem:[#allocation2 + $0x360] sm:$0xff]  ;;  %v247_v62 = vld [vmem:[#allocation2 + $0x328] sm:$0xff] }
  0x34   :  { %977 = vmatpush1.bf16.msra.mxu0 %v1476_v56  ;;  %1020 = vmatpush1.bf16.msra.mxu1 %v1478_v57  ;;  %v1455_v35 = vcombine.low %v82_v19, %v89_v27  ;;  %v1565_v52 = vcombine.high %v250_v43, %v254_v44  ;;  %v1567_v57 = vcombine.high %v251_v45, %v255_v47  ;;  %v234_v4 = vld [vmem:[#allocation2 + $0x2c0] sm:$0xff]  ;;  %v239_v7 = vld [vmem:[#allocation2 + $0x2e8] sm:$0xff]  ;;  %v200_v45 = vld [vmem:[#allocation2 + $0x1b0] sm:$0xff] }
  0x35   :  { %978 = vmatprep.subr.bf16.mxu0 %v1469_v58  ;;  %1021 = vmatprep.subr.bf16.mxu1 %v1471_v60  ;;  %v1457_v38 = vcombine.low %v128_v22, %v135_v32  ;;  %v242_v58 = vld [vmem:[#allocation2 + $0x300] sm:$0xff]  ;;  %v1564_v0 = vcombine.low %v250_v43, %v254_v44  ;;  %v1559_v3 = vcombine.high %v243_v61, %v247_v62  ;;  %v227_v14 = vld [vmem:[#allocation2 + $0x288] sm:$0xff]  ;;  %v196_v44 = vld [vmem:[#allocation2 + $0x190] sm:$0xff] }
  0x36   :  { %v96_v40 = vmul.bf16 %v1455_v35, %v50_v30  ;;  %v97_v41 = vmul.bf16 %v1455_v35, %v51_v31  ;;  %v246_v60 = vld [vmem:[#allocation2 + $0x320] sm:$0xff]  ;;  %v231_v15 = vld [vmem:[#allocation2 + $0x2a8] sm:$0xff] }
  0x37   :  { %v1557_v2 = vcombine.high %v242_v58, %v246_v60  ;;  %v1556_v8 = vcombine.low %v242_v58, %v246_v60  ;;  %v230_v13 = vld [vmem:[#allocation2 + $0x2a0] sm:$0xff]  ;;  %v1543_v19 = vcombine.high %v227_v14, %v231_v15  ;;  %v219_v22 = vld [vmem:[#allocation2 + $0x248] sm:$0xff]  ;;  %v192_v58 = vld [vmem:[#allocation2 + $0x170] sm:$0xff] }
  0x38   :  { %979 = vmatpush1.bf16.msra.mxu0 %v1468_v5  ;;  %1022 = vmatpush1.bf16.msra.mxu1 %v1470_v6  ;;  %v142_v48 = vadd.bf16 %v1457_v38, %v96_v40  ;;  %v143_v49 = vadd.bf16 %v1457_v38, %v97_v41  ;;  %v238_v5 = vld [vmem:[#allocation2 + $0x2e0] sm:$0xff]  ;;  %v235_v6 = vld [vmem:[#allocation2 + $0x2c8] sm:$0xff]  ;;  %v205_v38 = vld [vmem:[#allocation2 + $0x1d8] sm:$0xff] }
  0x39   :  { %980 = vmatprep.subr.bf16.mxu0 %v1461_v9  ;;  %1023 = vmatprep.subr.bf16.mxu1 %v1463_v12  ;;  %v1558_v9 = vcombine.low %v243_v61, %v247_v62  ;;  %v1549_v10 = vcombine.high %v234_v4, %v238_v5  ;;  %v1551_v11 = vcombine.high %v235_v6, %v239_v7  ;;  %v226_v12 = vld [vmem:[#allocation2 + $0x280] sm:$0xff]  ;;  %v223_v23 = vld [vmem:[#allocation2 + $0x268] sm:$0xff]  ;;  %v189_v60 = vld [vmem:[#allocation2 + $0x158] sm:$0xff] }
  0x3a   :  { %v1734_v54 = vmax.bf16 %v1659_v53, %v142_v48  ;;  %v1736_v56 = vmax.bf16 %v1659_v53, %v143_v49  ;;  %v1548_v16 = vcombine.low %v234_v4, %v238_v5  ;;  %v1550_v17 = vcombine.low %v235_v6, %v239_v7  ;;  %v218_v20 = vld [vmem:[#allocation2 + $0x240] sm:$0xff]  ;;  %v211_v30 = vld [vmem:[#allocation2 + $0x208] sm:$0xff]  ;;  %v197_v48 = vld [vmem:[#allocation2 + $0x198] sm:$0xff] }
  0x3b   :  { %v1541_v18 = vcombine.high %v226_v12, %v230_v13  ;;  %v1535_v27 = vcombine.high %v219_v22, %v223_v23  ;;  %v214_v29 = vld [vmem:[#allocation2 + $0x220] sm:$0xff]  ;;  %v215_v31 = vld [vmem:[#allocation2 + $0x228] sm:$0xff]  ;;  %v1534_v33 = vcombine.low %v219_v22, %v223_v23  ;;  %v201_v49 = vld [vmem:[#allocation2 + $0x1b8] sm:$0xff] }
  0x3c   :  { %981 = vmatpush1.bf16.msra.mxu0 %v1460_v21  ;;  %1024 = vmatpush1.bf16.msra.mxu1 %v1462_v24  ;;  %v1740_v63 = vcombine.high %v1734_v54, %v1736_v56  ;;  %v222_v21 = vld [vmem:[#allocation2 + $0x260] sm:$0xff]  ;;  %v1540_v24 = vcombine.low %v226_v12, %v230_v13  ;;  %v1527_v35 = vcombine.high %v211_v30, %v215_v31  ;;  %v193_v61 = vld [vmem:[#allocation2 + $0x178] sm:$0xff] }
  0x3d   :  { %982 = vmatprep.subr.bf16.mxu0 %v1581_v25  ;;  %1025 = vmatprep.subr.bf16.mxu1 %v1583_v28  ;;  %v1542_v25 = vcombine.low %v227_v14, %v231_v15  ;;  %v1533_v26 = vcombine.high %v218_v20, %v222_v21  ;;  %v210_v28 = vld [vmem:[#allocation2 + $0x200] sm:$0xff]  ;;  %v1532_v32 = vcombine.low %v218_v20, %v222_v21  ;;  %v185_v4 = vld [vmem:[#allocation2 + $0x138] sm:$0xff] }
  0x3e   :  { %998 = vmatprep.mubr.bf16.mxu0 %v1740_v63  ;;  %1041 = vmatprep.mubr.bf16.mxu1 %v1740_v63  ;;  %v1525_v34 = vcombine.high %v210_v28, %v214_v29  ;;  %v1524_v40 = vcombine.low %v210_v28, %v214_v29  ;;  %v1526_v41 = vcombine.low %v211_v30, %v215_v31  ;;  %v177_v12 = vld [vmem:[#allocation2 + $0xf8] sm:$0xff] }
  0x3f   :  { %v1746_v47 = vcombine.low %v1734_v54, %v1736_v56  ;;  %v1515_v53 = vcombine.high %v197_v48, %v201_v49  ;;  %v1512_v54 = vcombine.low %v196_v44, %v200_v45  ;;  %v1514_v56 = vcombine.low %v197_v48, %v201_v49 }
  0x40   :  { %983 = vmatpush2.bf16.msra.mxu0 %v1580_v36  ;;  %1026 = vmatpush2.bf16.msra.mxu1 %v1582_v37  ;;  %v204_v36 = vld [vmem:[#allocation2 + $0x1d0] sm:$0xff]  ;;  %v1506_v6 = vcombine.low %v189_v60, %v193_v61 }
  0x41   :  { %984 = vmatprep.subr.bf16.mxu0 %v1573_v39  ;;  %1027 = vmatprep.subr.bf16.mxu1 %v1575_v42  ;;  %v208_v37 = vld [vmem:[#allocation2 + $0x1f0] sm:$0xff]  ;;  %v209_v39 = vld [vmem:[#allocation2 + $0x1f8] sm:$0xff] }
  0x42   :  { %v1521_v42 = vcombine.high %v204_v36, %v208_v37  ;;  %v1523_v43 = vcombine.high %v205_v38, %v209_v39 }
  0x44   :  { %985 = vmatpush2.bf16.msra.mxu0 %v1572_v50  ;;  %1028 = vmatpush2.bf16.msra.mxu1 %v1574_v51  ;;  %v1520_v50 = vcombine.low %v204_v36, %v208_v37  ;;  %v1522_v51 = vcombine.low %v205_v38, %v209_v39 }
  0x45   :  { %986 = vmatprep.subr.bf16.mxu0 %v1565_v52  ;;  %1029 = vmatprep.subr.bf16.mxu1 %v1567_v57  ;;  %v1513_v52 = vcombine.high %v196_v44, %v200_v45  ;;  %v188_v57 = vld [vmem:[#allocation2 + $0x150] sm:$0xff] }
  0x46   :  { %v1505_v62 = vcombine.high %v188_v57, %v192_v58  ;;  %v1504_v5 = vcombine.low %v188_v57, %v192_v58 }
  0x48   :  { %987 = vmatpush2.bf16.msra.mxu0 %v1564_v0  ;;  %1030 = vmatpush2.bf16.msra.mxu1 %v1566_v1  ;;  %v1507_v0 = vcombine.high %v189_v60, %v193_v61  ;;  %v180_v1 = vld [vmem:[#allocation2 + $0x110] sm:$0xff] }
  0x49   :  { %988 = vmatprep.subr.bf16.mxu0 %v1557_v2  ;;  %1031 = vmatprep.subr.bf16.mxu1 %v1559_v3  ;;  %v184_v2 = vld [vmem:[#allocation2 + $0x130] sm:$0xff]  ;;  %v181_v3 = vld [vmem:[#allocation2 + $0x118] sm:$0xff] }
  0x4a   :  { %v1497_v7 = vcombine.high %v180_v1, %v184_v2  ;;  %v1496_v13 = vcombine.low %v180_v1, %v184_v2  ;;  %v1498_v14 = vcombine.low %v181_v3, %v185_v4 }
  0x4c   :  { %989 = vmatpush2.bf16.msra.mxu0 %v1556_v8  ;;  %1032 = vmatpush2.bf16.msra.mxu1 %v1558_v9  ;;  %v1499_v8 = vcombine.high %v181_v3, %v185_v4  ;;  %v172_v9 = vld [vmem:[#allocation2 + $0xd0] sm:$0xff] }
  0x4d   :  { %990 = vmatprep.subr.bf16.mxu0 %v1549_v10  ;;  %1033 = vmatprep.subr.bf16.mxu1 %v1551_v11  ;;  %v176_v10 = vld [vmem:[#allocation2 + $0xf0] sm:$0xff]  ;;  %v173_v11 = vld [vmem:[#allocation2 + $0xd8] sm:$0xff] }
  0x4e   :  { %v1489_v15 = vcombine.high %v172_v9, %v176_v10  ;;  %v1488_v20 = vcombine.low %v172_v9, %v176_v10  ;;  %v1490_v21 = vcombine.low %v173_v11, %v177_v12 }
  0x50   :  { %991 = vmatpush2.bf16.msra.mxu0 %v1548_v16  ;;  %1034 = vmatpush2.bf16.msra.mxu1 %v1550_v17  ;;  %v164_v16 = vld [vmem:[#allocation2 + $0x90] sm:$0xff] }
  0x51   :  { %992 = vmatprep.subr.bf16.mxu0 %v1541_v18  ;;  %1035 = vmatprep.subr.bf16.mxu1 %v1543_v19  ;;  %v168_v17 = vld [vmem:[#allocation2 + $0xb0] sm:$0xff]  ;;  %v165_v18 = vld [vmem:[#allocation2 + $0x98] sm:$0xff] }
  0x52   :  { %v169_v19 = vld [vmem:[#allocation2 + $0xb8] sm:$0xff]  ;;  %v1481_v22 = vcombine.high %v164_v16, %v168_v17  ;;  %v1480_v28 = vcombine.low %v164_v16, %v168_v17 }
  0x53   :  { %v1483_v23 = vcombine.high %v165_v18, %v169_v19  ;;  %v1482_v29 = vcombine.low %v165_v18, %v169_v19 }
  0x54   :  { %993 = vmatpush2.bf16.msra.mxu0 %v1540_v24  ;;  %1036 = vmatpush2.bf16.msra.mxu1 %v1542_v25  ;;  %v156_v24 = vld [vmem:[#allocation2 + $0x50] sm:$0xff] }
  0x55   :  { %994 = vmatprep.subr.bf16.mxu0 %v1533_v26  ;;  %1037 = vmatprep.subr.bf16.mxu1 %v1535_v27  ;;  %v160_v25 = vld [vmem:[#allocation2 + $0x70] sm:$0xff]  ;;  %v157_v26 = vld [vmem:[#allocation2 + $0x58] sm:$0xff] }
  0x56   :  { %v161_v27 = vld [vmem:[#allocation2 + $0x78] sm:$0xff]  ;;  %v1473_v30 = vcombine.high %v156_v24, %v160_v25  ;;  %v1472_v36 = vcombine.low %v156_v24, %v160_v25 }
  0x57   :  { %v1475_v31 = vcombine.high %v157_v26, %v161_v27  ;;  %v1474_v37 = vcombine.low %v157_v26, %v161_v27 }
  0x58   :  { %995 = vmatpush2.bf16.msra.mxu0 %v1532_v32  ;;  %1038 = vmatpush2.bf16.msra.mxu1 %v1534_v33  ;;  %v148_v32 = vld [vmem:[#allocation2 + $0x10] sm:$0xff] }
  0x59   :  { %996 = vmatprep.subr.bf16.mxu0 %v1525_v34  ;;  %1039 = vmatprep.subr.bf16.mxu1 %v1527_v35  ;;  %v152_v33 = vld [vmem:[#allocation2 + $0x30] sm:$0xff]  ;;  %v149_v34 = vld [vmem:[#allocation2 + $0x18] sm:$0xff] }
  0x5a   :  { %v153_v35 = vld [vmem:[#allocation2 + $0x38] sm:$0xff]  ;;  %v1465_v38 = vcombine.high %v148_v32, %v152_v33  ;;  %v1464_v44 = vcombine.low %v148_v32, %v152_v33 }
  0x5b   :  { %v1467_v39 = vcombine.high %v149_v34, %v153_v35  ;;  %v1466_v45 = vcombine.low %v149_v34, %v153_v35 }
  0x5c   :  { %997 = vmatpush2.bf16.msra.mxu0 %v1524_v40  ;;  %1040 = vmatpush2.bf16.msra.mxu1 %v1526_v41  ;;  %v268_v40 = vld [vmem:[#allocation2 + $0x3d0] sm:$0xff] }
  0x5d   :  { %1052 = vmatprep.subr.bf16.mxu0 %v1521_v42  ;;  %1095 = vmatprep.subr.bf16.mxu1 %v1523_v43  ;;  %v272_v41 = vld [vmem:[#allocation2 + $0x3f0] sm:$0xff]  ;;  %v269_v42 = vld [vmem:[#allocation2 + $0x3d8] sm:$0xff] }
  0x5e   :  { %v273_v43 = vld [vmem:[#allocation2 + $0x3f8] sm:$0xff]  ;;  %v1585_v48 = vcombine.high %v268_v40, %v272_v41  ;;  %v1584_v57 = vcombine.low %v268_v40, %v272_v41 }
  0x5f   :  { %999 = vmatmul.mubr.bf16.vlgmr.msra.gmra.mxu0 %v1746_v47  ;;  %1042 = vmatmul.mubr.bf16.vlgmr.msra.gmra.mxu1 %v1746_v47  ;;  %v1587_v49 = vcombine.high %v269_v42, %v273_v43  ;;  %v1586_v58 = vcombine.low %v269_v42, %v273_v43 }
  0x60   :  { %1053 = vmatpush1.bf16.msra.mxu0 %v1520_v50  ;;  %1096 = vmatpush1.bf16.msra.mxu1 %v1522_v51  ;;  %v260_v50 = vld [vmem:[#allocation2 + $0x390] sm:$0xff] }
  0x61   :  { %1054 = vmatprep.subr.bf16.mxu0 %v1513_v52  ;;  %1097 = vmatprep.subr.bf16.mxu1 %v1515_v53  ;;  %v264_v51 = vld [vmem:[#allocation2 + $0x3b0] sm:$0xff]  ;;  %v261_v52 = vld [vmem:[#allocation2 + $0x398] sm:$0xff] }
  0x62   :  { %1084 = vmatprep.mubr.bf16.mxu0 %v1740_v63  ;;  %1127 = vmatprep.mubr.bf16.mxu1 %v1740_v63  ;;  %v1491_v63 = vcombine.high %v173_v11, %v177_v12  ;;  %v265_v53 = vld [vmem:[#allocation2 + $0x3b8] sm:$0xff]  ;;  %v1577_v60 = vcombine.high %v260_v50, %v264_v51  ;;  %v1576_v1 = vcombine.low %v260_v50, %v264_v51  ;;  %v282_v50 = vsub.s32 1, %v1706_v46 }
  0x63   :  { %v1579_v61 = vcombine.high %v261_v52, %v265_v53  ;;  %v1578_v2 = vcombine.low %v261_v52, %v265_v53  ;;  %v290_v51 = vsub.s32 3, %v1706_v46 }
  0x64   :  { %1055 = vmatpush1.bf16.msra.mxu0 %v1512_v54  ;;  %1098 = vmatpush1.bf16.msra.mxu1 %v1514_v56  ;;  %v252_v54 = vld [vmem:[#allocation2 + $0x350] sm:$0xff] }
  0x65   :  { %1056 = vmatprep.subr.bf16.mxu0 %v1505_v62  ;;  %1099 = vmatprep.subr.bf16.mxu1 %v1507_v0  ;;  %v256_v56 = vld [vmem:[#allocation2 + $0x370] sm:$0xff]  ;;  %v253_v62 = vld [vmem:[#allocation2 + $0x358] sm:$0xff] }
  0x66   :  { %v257_v0 = vld [vmem:[#allocation2 + $0x378] sm:$0xff]  ;;  %v1569_v3 = vcombine.high %v252_v54, %v256_v56  ;;  %v1568_v9 = vcombine.low %v252_v54, %v256_v56 }
  0x67   :  { %v1571_v4 = vcombine.high %v253_v62, %v257_v0  ;;  %v1570_v10 = vcombine.low %v253_v62, %v257_v0 }
  0x68   :  { %1057 = vmatpush1.bf16.msra.mxu0 %v1504_v5  ;;  %1100 = vmatpush1.bf16.msra.mxu1 %v1506_v6  ;;  %v244_v5 = vld [vmem:[#allocation2 + $0x310] sm:$0xff] }
  0x69   :  { %1058 = vmatprep.subr.bf16.mxu0 %v1497_v7  ;;  %1101 = vmatprep.subr.bf16.mxu1 %v1499_v8  ;;  %v248_v6 = vld [vmem:[#allocation2 + $0x330] sm:$0xff]  ;;  %v245_v7 = vld [vmem:[#allocation2 + $0x318] sm:$0xff] }
  0x6a   :  { %v249_v8 = vld [vmem:[#allocation2 + $0x338] sm:$0xff]  ;;  %v1561_v11 = vcombine.high %v244_v5, %v248_v6  ;;  %v1560_v16 = vcombine.low %v244_v5, %v248_v6 }
  0x6b   :  { %v1563_v12 = vcombine.high %v245_v7, %v249_v8  ;;  %v1562_v17 = vcombine.low %v245_v7, %v249_v8 }
  0x6c   :  { %1059 = vmatpush1.bf16.msra.mxu0 %v1496_v13  ;;  %1102 = vmatpush1.bf16.msra.mxu1 %v1498_v14  ;;  %v236_v13 = vld [vmem:[#allocation2 + $0x2d0] sm:$0xff] }
  0x6d   :  { %1060 = vmatprep.subr.bf16.mxu0 %v1489_v15  ;;  %1103 = vmatprep.subr.bf16.mxu1 %v1491_v63  ;;  %v240_v14 = vld [vmem:[#allocation2 + $0x2f0] sm:$0xff]  ;;  %v237_v15 = vld [vmem:[#allocation2 + $0x2d8] sm:$0xff] }
  0x6e   :  { %v241_v63 = vld [vmem:[#allocation2 + $0x2f8] sm:$0xff]  ;;  %v1553_v18 = vcombine.high %v236_v13, %v240_v14  ;;  %v1552_v24 = vcombine.low %v236_v13, %v240_v14 }
  0x6f   :  { %v1555_v19 = vcombine.high %v237_v15, %v241_v63  ;;  %v1554_v25 = vcombine.low %v237_v15, %v241_v63 }
  0x70   :  { %1061 = vmatpush1.bf16.msra.mxu0 %v1488_v20  ;;  %1104 = vmatpush1.bf16.msra.mxu1 %v1490_v21  ;;  %v228_v20 = vld [vmem:[#allocation2 + $0x290] sm:$0xff] }
  0x71   :  { %1062 = vmatprep.subr.bf16.mxu0 %v1481_v22  ;;  %1105 = vmatprep.subr.bf16.mxu1 %v1483_v23  ;;  %v232_v21 = vld [vmem:[#allocation2 + $0x2b0] sm:$0xff]  ;;  %v229_v22 = vld [vmem:[#allocation2 + $0x298] sm:$0xff] }
  0x72   :  { %v233_v23 = vld [vmem:[#allocation2 + $0x2b8] sm:$0xff]  ;;  %v1545_v26 = vcombine.high %v228_v20, %v232_v21  ;;  %v1544_v32 = vcombine.low %v228_v20, %v232_v21 }
  0x73   :  { %v1547_v27 = vcombine.high %v229_v22, %v233_v23  ;;  %v1546_v33 = vcombine.low %v229_v22, %v233_v23 }
  0x74   :  { %1063 = vmatpush1.bf16.msra.mxu0 %v1480_v28  ;;  %1106 = vmatpush1.bf16.msra.mxu1 %v1482_v29  ;;  %v220_v28 = vld [vmem:[#allocation2 + $0x250] sm:$0xff] }
  0x75   :  { %1064 = vmatprep.subr.bf16.mxu0 %v1473_v30  ;;  %1107 = vmatprep.subr.bf16.mxu1 %v1475_v31  ;;  %v224_v29 = vld [vmem:[#allocation2 + $0x270] sm:$0xff]  ;;  %v221_v30 = vld [vmem:[#allocation2 + $0x258] sm:$0xff] }
  0x76   :  { %v225_v31 = vld [vmem:[#allocation2 + $0x278] sm:$0xff]  ;;  %v1537_v34 = vcombine.high %v220_v28, %v224_v29  ;;  %v1536_v40 = vcombine.low %v220_v28, %v224_v29 }
  0x77   :  { %v1539_v35 = vcombine.high %v221_v30, %v225_v31  ;;  %v1538_v41 = vcombine.low %v221_v30, %v225_v31 }
  0x78   :  { %1065 = vmatpush1.bf16.msra.mxu0 %v1472_v36  ;;  %1108 = vmatpush1.bf16.msra.mxu1 %v1474_v37  ;;  %v212_v36 = vld [vmem:[#allocation2 + $0x210] sm:$0xff] }
  0x79   :  { %1066 = vmatprep.subr.bf16.mxu0 %v1465_v38  ;;  %1109 = vmatprep.subr.bf16.mxu1 %v1467_v39  ;;  %v216_v37 = vld [vmem:[#allocation2 + $0x230] sm:$0xff]  ;;  %v213_v38 = vld [vmem:[#allocation2 + $0x218] sm:$0xff] }
  0x7a   :  { %v217_v39 = vld [vmem:[#allocation2 + $0x238] sm:$0xff]  ;;  %v1529_v42 = vcombine.high %v212_v36, %v216_v37 }
  0x7b   :  { %v1531_v43 = vcombine.high %v213_v38, %v217_v39 }
  0x7c   :  { %1067 = vmatpush1.bf16.msra.mxu0 %v1464_v44  ;;  %1110 = vmatpush1.bf16.msra.mxu1 %v1466_v45  ;;  %v1528_v44 = vcombine.low %v212_v36, %v216_v37  ;;  %v1530_v45 = vcombine.low %v213_v38, %v217_v39 }
  0x7d   :  { %1068 = vmatprep.subr.bf16.mxu0 %v1585_v48  ;;  %1111 = vmatprep.subr.bf16.mxu1 %v1587_v49  ;;  %v1754_v48 = vld [vmem:[#allocation4] sm:$0xff]  ;;  %v286_v49 = vsub.s32 2, %v1706_v46 }
  0x7e   :  { %v279_v52 = vrot.slane %v1754_v48, %v1712_v59 }
  0x7f   :  { %v287_v53 = vrot.slane %v1754_v48, %v286_v49 }
  0x80   :  { %1069 = vmatpush2.bf16.msra.mxu0 %v1584_v57  ;;  %1112 = vmatpush2.bf16.msra.mxu1 %v1586_v58  ;;  %v283_v57 = vrot.slane %v1754_v48, %v282_v50 }
  0x81   :  { %1070 = vmatprep.subr.bf16.mxu0 %v1577_v60  ;;  %1113 = vmatprep.subr.bf16.mxu1 %v1579_v61  ;;  %v291_v60 = vrot.slane %v1754_v48, %v290_v51 }
  0x84   :  { %1071 = vmatpush2.bf16.msra.mxu0 %v1576_v1  ;;  %1114 = vmatpush2.bf16.msra.mxu1 %v1578_v2 }
  0x85   :  { %1072 = vmatprep.subr.bf16.mxu0 %v1569_v3  ;;  %1115 = vmatprep.subr.bf16.mxu1 %v1571_v4 }
  0x88   :  { %1073 = vmatpush2.bf16.msra.mxu0 %v1568_v9  ;;  %1116 = vmatpush2.bf16.msra.mxu1 %v1570_v10 }
  0x89   :  { %1074 = vmatprep.subr.bf16.mxu0 %v1561_v11  ;;  %1117 = vmatprep.subr.bf16.mxu1 %v1563_v12 }
  0x8c   :  { %1075 = vmatpush2.bf16.msra.mxu0 %v1560_v16  ;;  %1118 = vmatpush2.bf16.msra.mxu1 %v1562_v17 }
  0x8d   :  { %1076 = vmatprep.subr.bf16.mxu0 %v1553_v18  ;;  %1119 = vmatprep.subr.bf16.mxu1 %v1555_v19 }
  0x90   :  { %1077 = vmatpush2.bf16.msra.mxu0 %v1552_v24  ;;  %1120 = vmatpush2.bf16.msra.mxu1 %v1554_v25 }
  0x91   :  { %1078 = vmatprep.subr.bf16.mxu0 %v1545_v26  ;;  %1121 = vmatprep.subr.bf16.mxu1 %v1547_v27 }
  0x94   :  { %1079 = vmatpush2.bf16.msra.mxu0 %v1544_v32  ;;  %1122 = vmatpush2.bf16.msra.mxu1 %v1546_v33 }
  0x95   :  { %1080 = vmatprep.subr.bf16.mxu0 %v1537_v34  ;;  %1123 = vmatprep.subr.bf16.mxu1 %v1539_v35 }
  0x98   :  { %1081 = vmatpush2.bf16.msra.mxu0 %v1536_v40  ;;  %1124 = vmatpush2.bf16.msra.mxu1 %v1538_v41 }
  0x99   :  { %1082 = vmatprep.subr.bf16.mxu0 %v1529_v42  ;;  %1125 = vmatprep.subr.bf16.mxu1 %v1531_v43 }
  0x9c   :  { %1083 = vmatpush2.bf16.msra.mxu0 %v1528_v44  ;;  %1126 = vmatpush2.bf16.msra.mxu1 %v1530_v45 }
  0x9f   :  { %1085 = vmatmul.mubr.bf16.vlgmr.msra.gmra.mxu0 %v1746_v47  ;;  %1128 = vmatmul.mubr.bf16.vlgmr.msra.gmra.mxu1 %v1746_v47 }
 0x11f   :  { %v1000_v58 = vpop.f32.mrf.mxu0  ;;  %v1043_v47 = vpop.f32.mrf.mxu1 }
 0x120   :  { %v1001_v61 = vadd.f32 %v1000_v58, %v279_v52  ;;  %v1044_v54 = vadd.f32 %v1043_v47, %v287_v53 }
 0x121   :  { %v1002_v56 = vpop.f32.mrf.mxu0  ;;  %v1045_v0 = vpop.f32.mrf.mxu1 }
 0x122   :  { %v1003_v62 = vadd.f32 %v1002_v56, %v283_v57  ;;  %v1046_v1 = vadd.f32 %v1045_v0, %v291_v60  ;;  %v1309_v6 = vmul.f32 %v1001_v61, %v1001_v61  ;;  %v1311_v59 = vmul.f32 %v1044_v54, %v1044_v54 }
 0x123   :  { %v1004_v2 = vpop.f32.mrf.mxu0  ;;  %v1047_v5 = vpop.f32.mrf.mxu1 }
 0x124   :  { %v1596_v3 = vpack.c.bf16 %v1003_v62, %v1001_v61  ;;  %v1005_v4 = vadd.f32 %v1004_v2, %v279_v52  ;;  %v1597_v7 = vpack.c.bf16 %v1046_v1, %v1044_v54  ;;  %v1048_v8 = vadd.f32 %v1047_v5, %v287_v53 }
 0x125   :  { %v1006_v9 = vpop.f32.mrf.mxu0  ;;  %v1310_v10 = vmul.f32 %v1003_v62, %v1003_v62  ;;  %v1049_v14 = vpop.f32.mrf.mxu1  ;;  %v1312_v15 = vmul.f32 %v1046_v1, %v1046_v1 }
 0x126   :  { %1186 = vst [vmem:[%s1837_s5] sm:$0xff] %v1596_v3  ;;  %v1194_v11 = vadd.f32 %v1005_v4, %v1001_v61  ;;  %v1317_v12 = vmul.f32 %v1005_v4, %v1005_v4  ;;  %v1007_v13 = vadd.f32 %v1006_v9, %v283_v57  ;;  %1187 = vst [vmem:[%s1837_s5 + $0x8] sm:$0xff] %v1597_v7 }
 0x127   :  { %v1208_v63 = vadd.f32 %v1048_v8, %v1044_v54  ;;  %v1319_v16 = vmul.f32 %v1048_v8, %v1048_v8  ;;  %v1050_v17 = vadd.f32 %v1049_v14, %v291_v60 }
 0x128   :  { %v1195_v18 = vrot.slane %v1194_v11, 4  ;;  %v1325_v19 = vadd.f32 %v1317_v12, %v1309_v6  ;;  %v1600_v20 = vpack.c.bf16 %v1007_v13, %v1005_v4  ;;  %v1201_v21 = vadd.f32 %v1007_v13, %v1003_v62 }
 0x129   :  { %v1209_v22 = vrot.slane %v1208_v63, 4  ;;  %v1339_v23 = vadd.f32 %v1319_v16, %v1311_v59  ;;  %v1318_v24 = vmul.f32 %v1007_v13, %v1007_v13  ;;  %v1601_v25 = vpack.c.bf16 %v1050_v17, %v1048_v8 }
 0x12a   :  { %v1196_v26 = vadd.f32 %v1195_v18, %v1194_v11  ;;  %v1326_v27 = vrot.slane %v1325_v19, 4  ;;  %1190 = vst [vmem:[%s1837_s5 + $0x20] sm:$0xff] %v1600_v20  ;;  %v1202_v28 = vrot.slane %v1201_v21, 4  ;;  %v1215_v29 = vadd.f32 %v1050_v17, %v1046_v1 }
 0x12b   :  { %v1210_v30 = vadd.f32 %v1209_v22, %v1208_v63  ;;  %v1340_v31 = vrot.slane %v1339_v23, 4  ;;  %v1332_v32 = vadd.f32 %v1318_v24, %v1310_v10  ;;  %1191 = vst [vmem:[%s1837_s5 + $0x28] sm:$0xff] %v1601_v25  ;;  %v1320_v33 = vmul.f32 %v1050_v17, %v1050_v17 }
 0x12c   :  { %v1197_v34 = vrot.slane %v1196_v26, 2  ;;  %v1327_v35 = vadd.f32 %v1326_v27, %v1325_v19  ;;  %v1203_v36 = vadd.f32 %v1202_v28, %v1201_v21  ;;  %v1216_v37 = vrot.slane %v1215_v29, 4 }
 0x12d   :  { %v1211_v38 = vrot.slane %v1210_v30, 2  ;;  %v1341_v39 = vadd.f32 %v1340_v31, %v1339_v23  ;;  %v1333_v40 = vrot.slane %v1332_v32, 4  ;;  %v1346_v41 = vadd.f32 %v1320_v33, %v1312_v15 }
 0x12e   :  { %v1198_v42 = vadd.f32 %v1197_v34, %v1196_v26  ;;  %v1328_v43 = vrot.slane %v1327_v35, 2  ;;  %v1204_v44 = vrot.slane %v1203_v36, 2  ;;  %v1217_v45 = vadd.f32 %v1216_v37, %v1215_v29 }
 0x12f   :  { %v1212_v49 = vadd.f32 %v1211_v38, %v1210_v30  ;;  %v1342_v50 = vrot.slane %v1341_v39, 2  ;;  %v1334_v51 = vadd.f32 %v1333_v40, %v1332_v32  ;;  %v1347_v52 = vrot.slane %v1346_v41, 4 }
 0x130   :  { %v1199_v53 = vrot.slane %v1198_v42, 1  ;;  %v1329_v57 = vadd.f32 %v1328_v43, %v1327_v35  ;;  %v1205_v58 = vadd.f32 %v1204_v44, %v1203_v36  ;;  %v1218_v60 = vrot.slane %v1217_v45, 2 }
 0x131   :  { %v1343_v61 = vadd.f32 %v1342_v50, %v1341_v39  ;;  %v1335_v47 = vrot.slane %v1334_v51, 2  ;;  %v1348_v54 = vadd.f32 %v1347_v52, %v1346_v41  ;;  %v1213_v56 = vrot.slane %v1212_v49, 1 }
 0x132   :  { %v1206_v62 = vrot.slane %v1205_v58, 1  ;;  %v1219_v0 = vadd.f32 %v1218_v60, %v1217_v45  ;;  %v1330_v1 = vrot.slane %v1329_v57, 1  ;;  %v1200_v4 = vadd.f32 %v1199_v53, %v1198_v42 }
 0x133   :  { %v1336_v2 = vadd.f32 %v1335_v47, %v1334_v51  ;;  %v1349_v3 = vrot.slane %v1348_v54, 2  ;;  %v1344_v59 = vrot.slane %v1343_v61, 1  ;;  %v1214_v9 = vadd.f32 %v1213_v56, %v1212_v49 }
 0x134   :  { %v1207_v5 = vadd.f32 %v1206_v62, %v1205_v58  ;;  %v1220_v6 = vrot.slane %v1219_v0, 1  ;;  %v1331_v12 = vadd.f32 %v1330_v1, %v1329_v57  ;;  %v294_v25 = vsub.s32 4, %v1706_v46 }
 0x135   :  { %v1337_v7 = vrot.slane %v1336_v2, 1  ;;  %v1350_v8 = vadd.f32 %v1349_v3, %v1348_v54  ;;  %v1345_v16 = vadd.f32 %v1344_v59, %v1343_v61  ;;  %v302_v26 = vsub.s32 6, %v1706_v46 }
 0x136   :  { %v1258_v10 = vcombine.low %v1200_v4, %v1207_v5  ;;  %v1221_v11 = vadd.f32 %v1220_v6, %v1219_v0  ;;  %v298_v27 = vsub.s32 5, %v1706_v46  ;;  %v306_v28 = vsub.s32 7, %v1706_v46 }
 0x137   :  { %v1338_v13 = vadd.f32 %v1337_v7, %v1336_v2  ;;  %v1351_v14 = vrot.slane %v1350_v8, 1  ;;  %v295_v29 = vrot.slane %v1754_v48, %v294_v25  ;;  %v303_v30 = vrot.slane %v1754_v48, %v302_v26 }
 0x138   :  { %v1777_v15 = vrot.slane %v1258_v10, %v1709_v55  ;;  %v1259_v63 = vcombine.low %v1214_v9, %v1221_v11  ;;  %v299_v31 = vrot.slane %v1754_v48, %v298_v27  ;;  %v307_v33 = vrot.slane %v1754_v48, %v306_v28 }
 0x139   :  { %v1389_v17 = vcombine.low %v1331_v12, %v1338_v13  ;;  %v1352_v18 = vadd.f32 %v1351_v14, %v1350_v8 }
 0x13a   :  { %v1780_v19 = vrot.slane %v1259_v63, %v1709_v55 }
 0x13b   :  { %v1783_v20 = vrot.slane %v1389_v17, %v1709_v55  ;;  %v1390_v21 = vcombine.low %v1345_v16, %v1352_v18 }
 0x13c   :  { %v1290_v22 = vcombine.low %v1777_v15, %v1780_v19 }
 0x13d   :  { %v1788_v23 = vrot.slane %v1390_v21, %v1709_v55 }
 0x13f   :  { %v1421_v24 = vcombine.low %v1783_v20, %v1788_v23 }
 0x15f   :  { %v1086_v32 = vpop.f32.mrf.mxu0  ;;  %v1129_v34 = vpop.f32.mrf.mxu1 }
 0x160   :  { %v1087_v35 = vadd.f32 %v1086_v32, %v295_v29  ;;  %v1130_v36 = vadd.f32 %v1129_v34, %v303_v30 }
 0x161   :  { %v1088_v37 = vpop.f32.mrf.mxu0  ;;  %v1131_v39 = vpop.f32.mrf.mxu1 }
 0x162   :  { %v1089_v38 = vadd.f32 %v1088_v37, %v299_v31  ;;  %v1132_v40 = vadd.f32 %v1131_v39, %v307_v33  ;;  %v1313_v44 = vmul.f32 %v1087_v35, %v1087_v35  ;;  %v1315_v45 = vmul.f32 %v1130_v36, %v1130_v36 }
 0x163   :  { %v1090_v41 = vpop.f32.mrf.mxu0  ;;  %v1133_v46 = vpop.f32.mrf.mxu1 }
 0x164   :  { %v1598_v42 = vpack.c.bf16 %v1089_v38, %v1087_v35  ;;  %v1091_v43 = vadd.f32 %v1090_v41, %v295_v29  ;;  %v1599_v49 = vpack.c.bf16 %v1132_v40, %v1130_v36  ;;  %v1134_v50 = vadd.f32 %v1133_v46, %v303_v30 }
 0x165   :  { %v1092_v51 = vpop.f32.mrf.mxu0  ;;  %v1314_v48 = vmul.f32 %v1089_v38, %v1089_v38  ;;  %v1135_v58 = vpop.f32.mrf.mxu1  ;;  %v1316_v60 = vmul.f32 %v1132_v40, %v1132_v40 }
 0x166   :  { %1188 = vst [vmem:[%s1837_s5 + $0x10] sm:$0xff] %v1598_v42  ;;  %v1222_v52 = vadd.f32 %v1091_v43, %v1087_v35  ;;  %v1321_v53 = vmul.f32 %v1091_v43, %v1091_v43  ;;  %v1093_v57 = vadd.f32 %v1092_v51, %v299_v31  ;;  %1189 = vst [vmem:[%s1837_s5 + $0x18] sm:$0xff] %v1599_v49 }
 0x167   :  { %v1236_v61 = vadd.f32 %v1134_v50, %v1130_v36  ;;  %v1323_v47 = vmul.f32 %v1134_v50, %v1134_v50  ;;  %v1136_v54 = vadd.f32 %v1135_v58, %v307_v33 }
 0x168   :  { %v1223_v56 = vrot.slane %v1222_v52, 4  ;;  %v1353_v62 = vadd.f32 %v1321_v53, %v1313_v44  ;;  %v1602_v0 = vpack.c.bf16 %v1093_v57, %v1091_v43  ;;  %v1229_v1 = vadd.f32 %v1093_v57, %v1089_v38 }
 0x169   :  { %v1237_v2 = vrot.slane %v1236_v61, 4  ;;  %v1367_v3 = vadd.f32 %v1323_v47, %v1315_v45  ;;  %v1322_v4 = vmul.f32 %v1093_v57, %v1093_v57  ;;  %v1603_v5 = vpack.c.bf16 %v1136_v54, %v1134_v50 }
 0x16a   :  { %v1224_v6 = vadd.f32 %v1223_v56, %v1222_v52  ;;  %v1354_v59 = vrot.slane %v1353_v62, 4  ;;  %1192 = vst [vmem:[%s1837_s5 + $0x30] sm:$0xff] %v1602_v0  ;;  %v1230_v7 = vrot.slane %v1229_v1, 4  ;;  %v1243_v8 = vadd.f32 %v1136_v54, %v1132_v40 }
 0x16b   :  { %v1238_v9 = vadd.f32 %v1237_v2, %v1236_v61  ;;  %v1368_v10 = vrot.slane %v1367_v3, 4  ;;  %v1360_v11 = vadd.f32 %v1322_v4, %v1314_v48  ;;  %1193 = vst [vmem:[%s1837_s5 + $0x38] sm:$0xff] %v1603_v5  ;;  %v1324_v12 = vmul.f32 %v1136_v54, %v1136_v54 }
 0x16c   :  { %v1225_v13 = vrot.slane %v1224_v6, 2  ;;  %v1355_v14 = vadd.f32 %v1354_v59, %v1353_v62  ;;  %v1231_v63 = vadd.f32 %v1230_v7, %v1229_v1  ;;  %v1244_v16 = vrot.slane %v1243_v8, 4 }
 0x16d   :  { %v1239_v17 = vrot.slane %v1238_v9, 2  ;;  %v1369_v18 = vadd.f32 %v1368_v10, %v1367_v3  ;;  %v1361_v21 = vrot.slane %v1360_v11, 4  ;;  %v1374_v25 = vadd.f32 %v1324_v12, %v1316_v60 }
 0x16e   :  { %v1226_v26 = vadd.f32 %v1225_v13, %v1224_v6  ;;  %v1356_v27 = vrot.slane %v1355_v14, 2  ;;  %v1232_v28 = vrot.slane %v1231_v63, 2  ;;  %v1245_v29 = vadd.f32 %v1244_v16, %v1243_v8 }
 0x16f   :  { %v1240_v30 = vadd.f32 %v1239_v17, %v1238_v9  ;;  %v1370_v31 = vrot.slane %v1369_v18, 2  ;;  %v1362_v32 = vadd.f32 %v1361_v21, %v1360_v11  ;;  %v1375_v33 = vrot.slane %v1374_v25, 4 }
 0x170   :  { %v1227_v34 = vrot.slane %v1226_v26, 1  ;;  %v1357_v35 = vadd.f32 %v1356_v27, %v1355_v14  ;;  %v1233_v36 = vadd.f32 %v1232_v28, %v1231_v63  ;;  %v1246_v37 = vrot.slane %v1245_v29, 2 }
 0x171   :  { %v1371_v38 = vadd.f32 %v1370_v31, %v1369_v18  ;;  %v1363_v39 = vrot.slane %v1362_v32, 2  ;;  %v1376_v40 = vadd.f32 %v1375_v33, %v1374_v25  ;;  %v1241_v41 = vrot.slane %v1240_v30, 1 }
 0x172   :  { %v1234_v42 = vrot.slane %v1233_v36, 1  ;;  %v1247_v43 = vadd.f32 %v1246_v37, %v1245_v29  ;;  %v1358_v46 = vrot.slane %v1357_v35, 1  ;;  %v1228_v49 = vadd.f32 %v1227_v34, %v1226_v26 }
 0x173   :  { %v1364_v44 = vadd.f32 %v1363_v39, %v1362_v32  ;;  %v1377_v45 = vrot.slane %v1376_v40, 2  ;;  %v1372_v48 = vrot.slane %v1371_v38, 1  ;;  %v1242_v57 = vadd.f32 %v1241_v41, %v1240_v30 }
 0x174   :  { %v1235_v50 = vadd.f32 %v1234_v42, %v1233_v36  ;;  %v1248_v51 = vrot.slane %v1247_v43, 1  ;;  %v1359_v61 = vadd.f32 %v1358_v46, %v1357_v35  ;;  %v1298_v7 = vrot.slane %v1290_v22, %v1709_v55 }
 0x175   :  { %v1365_v52 = vrot.slane %v1364_v44, 1  ;;  %v1378_v53 = vadd.f32 %v1377_v45, %v1376_v40  ;;  %v1373_v0 = vadd.f32 %v1372_v48, %v1371_v38  ;;  %v1429_v11 = vrot.slane %v1421_v24, %v1709_v55 }
 0x176   :  { %v1260_v58 = vcombine.low %v1228_v49, %v1235_v50  ;;  %v1249_v60 = vadd.f32 %v1248_v51, %v1247_v43 }
 0x177   :  { %v1366_v47 = vadd.f32 %v1365_v52, %v1364_v44  ;;  %v1379_v54 = vrot.slane %v1378_v53, 1 }
 0x178   :  { %v1282_v56 = vrot.slane %v1260_v58, %v1709_v55  ;;  %v1261_v62 = vcombine.low %v1242_v57, %v1249_v60 }
 0x179   :  { %v1391_v1 = vcombine.low %v1359_v61, %v1366_v47  ;;  %v1380_v2 = vadd.f32 %v1379_v54, %v1378_v53 }
 0x17a   :  { %v1289_v3 = vrot.slane %v1261_v62, %v1709_v55 }
 0x17b   :  { %v1413_v4 = vrot.slane %v1391_v1, %v1709_v55  ;;  %v1392_v5 = vcombine.low %v1373_v0, %v1380_v2 }
 0x17c   :  { %v1291_v6 = vcombine.low %v1282_v56, %v1289_v3 }
 0x17d   :  { %v1420_v59 = vrot.slane %v1392_v5, %v1709_v55 }
 0x17e   :  { %v1305_v8 = vrot.slane %v1291_v6, %v1709_v55 }
 0x17f   :  { %v1422_v9 = vcombine.low %v1413_v4, %v1420_v59 }
 0x180   :  { %v1306_v10 = vcombine.low %v1298_v7, %v1305_v8 }
 0x181   :  { %v1436_v12 = vrot.slane %v1422_v9, %v1709_v55 }
 0x182   :  { %1308 = vst [vmem:[%s1838_s6] sm:$0xff] %v1306_v10 }
 0x183   :  { %v1437_v13 = vcombine.low %v1429_v11, %v1436_v12 }
 0x185   :  { %1439 = vst [vmem:[%s1839_s7] sm:$0xff] %v1437_v13 }
 0x186   :  { %1452 = vsyncpa [#allocation3], 1 }
 0x187   :  { %1453 = vsyncpa [#allocation5], 1 }

// kernel: generator_forward.8
= control target key start
LH: loop header
LB: loop body
LE: loop exit
PB: predicated region body
PF: predicated region fallthrough
CT: control target
= control target key end

     0   :  { %13 = vsyncpa [#allocation3], 0  ;;  %s1731_s0 = inlined_call_operand.vmem [shape: bf16[128,128], index: 0, kind: input, shape index: {}]   ;;  %s1732_s1 = inlined_call_operand.vmem [shape: bf16[1,128], index: 1, kind: input, shape index: {}]   ;;  %s1733_s2 = inlined_call_operand.vmem [shape: bf16[1,128], index: 2, kind: input, shape index: {}]   ;;  %s1734_s3 = inlined_call_operand.hbm [shape: bf16[128,512], index: 3, kind: input, shape index: {}]   ;;  %s1735_s4 = inlined_call_operand.hbm [shape: f32[1,512], index: 4, kind: input, shape index: {}]   ;;  %s1736_s5 = inlined_call_operand.vmem [shape: bf16[128,512], index: 5, kind: output, shape index: {0}]   ;;  %s1737_s6 = inlined_call_operand.vmem [shape: f32[1,1,512], index: 6, kind: output, shape index: {1}]   ;;  %s1738_s7 = inlined_call_operand.vmem [shape: f32[1,1,512], index: 7, kind: output, shape index: {2}]  }
   0x1   :  { %14 = vsyncpa [#allocation5], 0  ;;  %s1364_s24 = smov [#allocation2]  }
   0x2   :  { %s26_s25 = sshll.u32 %s1364_s24, 4  ;;  %s27_s25 = int_to_ptr.vmem [resolvable:$true] %s26_s25 }
   0x3   :  { %s1328_s26 = scalar_lea.vmem %s27_s25, 4096  ;;  %p1333_p1 = scmp.lt.s32.totalorder %s27_s25, %s27_s25 }
   0x4   :  { %p1329_p0 = scmp.ne.s32.totalorder %s27_s25, %s1328_s26  ;;  %p1334_p2 = scmp.lt.s32.totalorder %s1328_s26, %s1328_s26 }
   0x6   :  { %p1335_p3 = por %p1334_p2, %p1333_p1 }
   0x8   :  { %p1336_p4 = pnand %p1335_p3, %p1329_p0 }
   0xa   :  { %1339 = shalt.err (!%p1336_p4)
}
   0xb   :  { %s1365_s27 = smov 256   ;;  %s1366_s28 = smov 16  }
   0xc   :  { %32 = dma.hbm_to_vmem [thread:$0]  %s1734_s3, 4096, %s27_s25, [#allocation3], %s1365_s27, %s1365_s27, %s1366_s28  }
   0xd   :  { %s1367_s8 = smov [#allocation4]  }
   0xe   :  { %s39_s9 = sshll.u32 %s1367_s8, 4  ;;  %s40_s9 = int_to_ptr.vmem [resolvable:$true] %s39_s9 }
   0xf   :  { %s1348_s10 = scalar_lea.vmem %s40_s9, 64  ;;  %p1353_p6 = scmp.lt.s32.totalorder %s40_s9, %s40_s9 }
  0x10   :  { %p1349_p5 = scmp.ne.s32.totalorder %s40_s9, %s1348_s10  ;;  %p1354_p7 = scmp.lt.s32.totalorder %s1348_s10, %s1348_s10 }
  0x12   :  { %p1355_p8 = por %p1354_p7, %p1353_p6 }
  0x14   :  { %p1356_p9 = pnand %p1355_p8, %p1349_p5 }
  0x16   :  { %1359 = shalt.err (!%p1356_p9)
}
  0x17   :  { %42 = dma.hbm_to_vmem [thread:$0]  %s1735_s4, 64, %s40_s9, [#allocation5]  }
  0x18   :  { %1360 = dma.done.wait [#allocation3], 4096  }
  0x19   :  { %1361 = vsyncadd [#allocation3], 4294963200 }
  0x1a   :  { %1362 = dma.done.wait [#allocation5], 64  }
  0x1b   :  { %1363 = vsyncadd [#allocation5], 4294967232  ;;  %v1368_v0 = vmov 0   ;;  %v1272_v1 = vld [vmem:[#allocation2 + $0xe4] ss:$16 sps:$4 sm:$0xff]   ;;  %v70_v19 = vlaneseq }
  0x1c   :  { %432 = vmatprep.mubr.bf16.mxu0 %v1368_v0  ;;  %545 = vmatprep.mubr.bf16.mxu1 %v1368_v0  ;;  %v1274_v2 = vld [vmem:[#allocation2 + $0xec] ss:$16 sps:$4 sm:$0xff]   ;;  %v1276_v3 = vld [vmem:[#allocation2 + $0xe0] ss:$16 sps:$4 sm:$0xff]   ;;  %v1277_v4 = vld [vmem:[#allocation2 + $0xe8] ss:$16 sps:$4 sm:$0xff]  }
  0x1d   :  { %400 = vmatprep.subr.bf16.mxu0 %v1272_v1  ;;  %513 = vmatprep.subr.bf16.mxu1 %v1274_v2  ;;  %v1278_v5 = vld [vmem:[#allocation2 + $0xc4] ss:$16 sps:$4 sm:$0xff]   ;;  %v1280_v6 = vld [vmem:[#allocation2 + $0xcc] ss:$16 sps:$4 sm:$0xff]   ;;  %v1282_v7 = vld [vmem:[#allocation2 + $0xc0] ss:$16 sps:$4 sm:$0xff]  }
  0x1e   :  { %401 = vmatpush1.bf16.msra.mxu0 %v1276_v3  ;;  %514 = vmatpush1.bf16.msra.mxu1 %v1277_v4  ;;  %v1283_v8 = vld [vmem:[#allocation2 + $0xc8] ss:$16 sps:$4 sm:$0xff]   ;;  %v1284_v9 = vld [vmem:[#allocation2 + $0xa4] ss:$16 sps:$4 sm:$0xff]   ;;  %v1286_v10 = vld [vmem:[#allocation2 + $0xac] ss:$16 sps:$4 sm:$0xff]  }
  0x1f   :  { %402 = vmatprep.subr.bf16.mxu0 %v1278_v5  ;;  %515 = vmatprep.subr.bf16.mxu1 %v1280_v6  ;;  %v1288_v11 = vld [vmem:[#allocation2 + $0xa0] ss:$16 sps:$4 sm:$0xff]   ;;  %v1289_v12 = vld [vmem:[#allocation2 + $0xa8] ss:$16 sps:$4 sm:$0xff]   ;;  %v1290_v13 = vld [vmem:[#allocation2 + $0x84] ss:$16 sps:$4 sm:$0xff]  }
  0x20   :  { %v1292_v14 = vld [vmem:[#allocation2 + $0x8c] ss:$16 sps:$4 sm:$0xff]   ;;  %v1294_v15 = vld [vmem:[#allocation2 + $0x80] ss:$16 sps:$4 sm:$0xff]   ;;  %v1295_v16 = vld [vmem:[#allocation2 + $0x88] ss:$16 sps:$4 sm:$0xff]  }
  0x21   :  { %v1296_v17 = vld [vmem:[#allocation2 + $0x64] ss:$16 sps:$4 sm:$0xff]   ;;  %v1298_v18 = vld [vmem:[#allocation2 + $0x6c] ss:$16 sps:$4 sm:$0xff]   ;;  %v1300_v20 = vld [vmem:[#allocation2 + $0x60] ss:$16 sps:$4 sm:$0xff]  }
  0x22   :  { %403 = vmatpush1.bf16.msra.mxu0 %v1282_v7  ;;  %516 = vmatpush1.bf16.msra.mxu1 %v1283_v8  ;;  %v1301_v21 = vld [vmem:[#allocation2 + $0x68] ss:$16 sps:$4 sm:$0xff]   ;;  %v1302_v22 = vld [vmem:[#allocation2 + $0x44] ss:$16 sps:$4 sm:$0xff]   ;;  %v1304_v23 = vld [vmem:[#allocation2 + $0x4c] ss:$16 sps:$4 sm:$0xff]  }
  0x23   :  { %404 = vmatprep.subr.bf16.mxu0 %v1284_v9  ;;  %517 = vmatprep.subr.bf16.mxu1 %v1286_v10  ;;  %v1419_v24 = vshrl.u32 %v70_v19, 7  ;;  %v1306_v25 = vld [vmem:[#allocation2 + $0x40] ss:$16 sps:$4 sm:$0xff]   ;;  %v1307_v26 = vld [vmem:[#allocation2 + $0x48] ss:$16 sps:$4 sm:$0xff]   ;;  %vm965_vm0 = vcmp.lt.s32.totalorder %v70_v19, 512 }
  0x24   :  { %v1308_v27 = vld [vmem:[#allocation2 + $0x24] ss:$16 sps:$4 sm:$0xff]   ;;  %v1310_v28 = vld [vmem:[#allocation2 + $0x2c] ss:$16 sps:$4 sm:$0xff]   ;;  %v66_v30 = vld [vmem:[%s1732_s1] sm:$0x1] }
  0x25   :  { %v1422_v29 = vsub.s32 0, %v1419_v24  ;;  %v94_v31 = vld [vmem:[%s1733_s2] sm:$0x1]  ;;  %v68_v32 = vpack.i.b16 %v66_v30, %v66_v30  ;;  %v1313_v35 = vld [vmem:[#allocation2 + $0x28] ss:$16 sps:$4 sm:$0xff]  }
  0x26   :  { %405 = vmatpush1.bf16.msra.mxu0 %v1288_v11  ;;  %518 = vmatpush1.bf16.msra.mxu1 %v1289_v12  ;;  %v96_v33 = vpack.i.b16 %v94_v31, %v94_v31  ;;  %v1312_v34 = vld [vmem:[#allocation2 + $0x20] ss:$16 sps:$4 sm:$0xff]   ;;  %v1314_v36 = vld [vmem:[#allocation2 + $0x4] ss:$16 sps:$4 sm:$0xff]   ;;  %v1316_v37 = vld [vmem:[#allocation2 + $0xc] ss:$16 sps:$4 sm:$0xff]  }
  0x27   :  { %406 = vmatprep.subr.bf16.mxu0 %v1290_v13  ;;  %519 = vmatprep.subr.bf16.mxu1 %v1292_v14  ;;  %v73_v38 = vrot.slane %v68_v32, %v1422_v29  ;;  %v50_v40 = vld [vmem:[%s1731_s0] sm:$0xf]  ;;  %v51_v41 = vld [vmem:[%s1731_s0 + $0x4] sm:$0xf]  ;;  %v52_v42 = vld [vmem:[%s1731_s0 + $0x8] sm:$0xf] }
  0x28   :  { %v101_v39 = vrot.slane %v96_v33, %v1422_v29  ;;  %v53_v45 = vld [vmem:[%s1731_s0 + $0xc] sm:$0xf]  ;;  %v1318_v46 = vld [vmem:[#allocation2] ss:$16 sps:$4 sm:$0xff]   ;;  %v1319_v47 = vld [vmem:[#allocation2 + $0x8] ss:$16 sps:$4 sm:$0xff]  }
  0x29   :  { %v1441_v43 = vcombine.low %v73_v38, %v73_v38  ;;  %v54_v58 = vld [vmem:[%s1731_s0 + $0x10] sm:$0xf]  ;;  %v55_v59 = vld [vmem:[%s1731_s0 + $0x14] sm:$0xf]  ;;  %v56_v5 = vld [vmem:[%s1731_s0 + $0x18] sm:$0xf] }
  0x2a   :  { %407 = vmatpush1.bf16.msra.mxu0 %v1294_v15  ;;  %520 = vmatpush1.bf16.msra.mxu1 %v1295_v16  ;;  %v1443_v44 = vcombine.low %v101_v39, %v101_v39  ;;  %v57_v6 = vld [vmem:[%s1731_s0 + $0x1c] sm:$0xf]  ;;  %v58_v14 = vld [vmem:[%s1731_s0 + $0x20] sm:$0xf]  ;;  %v59_v15 = vld [vmem:[%s1731_s0 + $0x24] sm:$0xf] }
  0x2b   :  { %408 = vmatprep.subr.bf16.mxu0 %v1296_v17  ;;  %521 = vmatprep.subr.bf16.mxu1 %v1298_v18  ;;  %v78_v48 = vmul.bf16 %v1441_v43, %v50_v40  ;;  %v79_v49 = vmul.bf16 %v1441_v43, %v51_v41  ;;  %v80_v50 = vmul.bf16 %v1441_v43, %v52_v42 }
  0x2c   :  { %v81_v51 = vmul.bf16 %v1441_v43, %v53_v45  ;;  %v82_v61 = vmul.bf16 %v1441_v43, %v54_v58  ;;  %v83_v1 = vmul.bf16 %v1441_v43, %v55_v59  ;;  %v84_v7 = vmul.bf16 %v1441_v43, %v56_v5 }
  0x2d   :  { %v106_v52 = vadd.bf16 %v1443_v44, %v78_v48  ;;  %v107_v53 = vadd.bf16 %v1443_v44, %v79_v49  ;;  %v108_v56 = vadd.bf16 %v1443_v44, %v80_v50  ;;  %v85_v10 = vmul.bf16 %v1441_v43, %v57_v6 }
  0x2e   :  { %409 = vmatpush1.bf16.msra.mxu0 %v1300_v20  ;;  %522 = vmatpush1.bf16.msra.mxu1 %v1301_v21  ;;  %v109_v57 = vadd.bf16 %v1443_v44, %v81_v51  ;;  %v110_v3 = vadd.bf16 %v1443_v44, %v82_v61  ;;  %v111_v4 = vadd.bf16 %v1443_v44, %v83_v1  ;;  %v182_v58 = vsub.s32 2, %v1419_v24 }
  0x2f   :  { %410 = vmatprep.subr.bf16.mxu0 %v1302_v22  ;;  %523 = vmatprep.subr.bf16.mxu1 %v1304_v23  ;;  %v122_v54 = vmax.bf16 %v1368_v0, %v106_v52  ;;  %v123_v55 = vmax.bf16 %v1368_v0, %v107_v53  ;;  %v124_v62 = vmax.bf16 %v1368_v0, %v108_v56  ;;  %v178_v59 = vsub.s32 1, %v1419_v24 }
  0x30   :  { %v125_v63 = vmax.bf16 %v1368_v0, %v109_v57  ;;  %v126_v8 = vmax.bf16 %v1368_v0, %v110_v3  ;;  %v127_v9 = vmax.bf16 %v1368_v0, %v111_v4  ;;  %v112_v11 = vadd.bf16 %v1443_v44, %v84_v7  ;;  %v170_v57 = vld [vmem:[#allocation4] sm:$0xf] }
  0x31   :  { %v1162_v60 = vcombine.low %v122_v54, %v123_v55  ;;  %v113_v13 = vadd.bf16 %v1443_v44, %v85_v10  ;;  %v86_v18 = vmul.bf16 %v1441_v43, %v58_v14  ;;  %v87_v20 = vmul.bf16 %v1441_v43, %v59_v15 }
  0x32   :  { %411 = vmatpush1.bf16.msra.mxu0 %v1306_v25  ;;  %524 = vmatpush1.bf16.msra.mxu1 %v1307_v26  ;;  %v1163_v2 = vcombine.low %v124_v62, %v125_v63  ;;  %v1164_v12 = vcombine.low %v126_v8, %v127_v9  ;;  %v128_v16 = vmax.bf16 %v1368_v0, %v112_v11  ;;  %v60_v25 = vld [vmem:[%s1731_s0 + $0x28] sm:$0xf]  ;;  %v61_v26 = vld [vmem:[%s1731_s0 + $0x2c] sm:$0xf]  ;;  %v1369_v4 = vmov 1966171168  }
  0x33   :  { %412 = vmatprep.subr.bf16.mxu0 %v1308_v27  ;;  %525 = vmatprep.subr.bf16.mxu1 %v1310_v28  ;;  %v129_v17 = vmax.bf16 %v1368_v0, %v113_v13  ;;  %v114_v22 = vadd.bf16 %v1443_v44, %v86_v18  ;;  %v115_v23 = vadd.bf16 %v1443_v44, %v87_v20  ;;  %v1558_v5 = vunpack.c.l.s4 %v1369_v4 }
  0x34   :  { %v88_v27 = vmul.bf16 %v1441_v43, %v60_v25  ;;  %v89_v31 = vmul.bf16 %v1441_v43, %v61_v26  ;;  %v1552_v61 = vrot.slane %v170_v57, %v182_v58  ;;  %v1554_v62 = vrot.slane %v170_v57, %v178_v59 }
  0x35   :  { %v1165_v21 = vcombine.low %v128_v16, %v129_v17  ;;  %v130_v28 = vmax.bf16 %v1368_v0, %v114_v22  ;;  %v131_v30 = vmax.bf16 %v1368_v0, %v115_v23  ;;  %v942_v20 = vunpack.c.0.s8 %v1558_v5 }
  0x36   :  { %413 = vmatpush1.bf16.msra.mxu0 %v1312_v34  ;;  %526 = vmatpush1.bf16.msra.mxu1 %v1313_v35  ;;  %v116_v33 = vadd.bf16 %v1443_v44, %v88_v27  ;;  %v117_v34 = vadd.bf16 %v1443_v44, %v89_v31  ;;  %v62_v35 = vld [vmem:[%s1731_s0 + $0x30] sm:$0xf] }
  0x37   :  { %414 = vmatprep.subr.bf16.mxu0 %v1314_v36  ;;  %527 = vmatprep.subr.bf16.mxu1 %v1316_v37  ;;  %v1166_v32 = vcombine.low %v130_v28, %v131_v30  ;;  %v63_v36 = vld [vmem:[%s1731_s0 + $0x34] sm:$0xf]  ;;  %v90_v37 = vmul.bf16 %v1441_v43, %v62_v35 }
  0x38   :  { %v132_v38 = vmax.bf16 %v1368_v0, %v116_v33  ;;  %v133_v39 = vmax.bf16 %v1368_v0, %v117_v34  ;;  %v91_v40 = vmul.bf16 %v1441_v43, %v63_v36 }
  0x39   :  { %v118_v42 = vadd.bf16 %v1443_v44, %v90_v37 }
  0x3a   :  { %415 = vmatpush1.bf16.msra.mxu0 %v1318_v46  ;;  %528 = vmatpush1.bf16.msra.mxu1 %v1319_v47  ;;  %v1167_v41 = vcombine.low %v132_v38, %v133_v39  ;;  %v119_v45 = vadd.bf16 %v1443_v44, %v91_v40  ;;  %v64_v46 = vld [vmem:[%s1731_s0 + $0x38] sm:$0xf]  ;;  %v65_v47 = vld [vmem:[%s1731_s0 + $0x3c] sm:$0xf] }
  0x3b   :  { %v92_v48 = vmul.bf16 %v1441_v43, %v64_v46  ;;  %v134_v49 = vmax.bf16 %v1368_v0, %v118_v42  ;;  %v93_v51 = vmul.bf16 %v1441_v43, %v65_v47 }
  0x3c   :  { %v135_v50 = vmax.bf16 %v1368_v0, %v119_v45 }
  0x3d   :  { %433 = vmatmul.mubr.bf16.vlgmr.msra.gmra.mxu0 %v1162_v60  ;;  %546 = vmatmul.mubr.bf16.vlgmr.msra.gmra.mxu1 %v1162_v60  ;;  %v120_v53 = vadd.bf16 %v1443_v44, %v92_v48  ;;  %v121_v54 = vadd.bf16 %v1443_v44, %v93_v51  ;;  %v186_v44 = vsub.s32 3, %v1419_v24  ;;  %v1550_v60 = vrot.slane %v170_v57, %v1422_v29 }
  0x3e   :  { %442 = vmatprep.mubr.bf16.mxu0 %v1368_v0  ;;  %555 = vmatprep.mubr.bf16.mxu1 %v1368_v0  ;;  %v1168_v52 = vcombine.low %v134_v49, %v135_v50 }
  0x3f   :  { %v136_v55 = vmax.bf16 %v1368_v0, %v120_v53  ;;  %v137_v56 = vmax.bf16 %v1368_v0, %v121_v54  ;;  %v1556_v63 = vrot.slane %v170_v57, %v186_v44 }
  0x41   :  { %v1169_v43 = vcombine.low %v136_v55, %v137_v56 }
  0x45   :  { %443 = vmatmul.mubr.bf16.gmra.mxu0 %v1163_v2  ;;  %556 = vmatmul.mubr.bf16.gmra.mxu1 %v1163_v2 }
  0x46   :  { %452 = vmatprep.mubr.bf16.mxu0 %v1368_v0  ;;  %565 = vmatprep.mubr.bf16.mxu1 %v1368_v0 }
  0x4d   :  { %453 = vmatmul.mubr.bf16.gmra.mxu0 %v1164_v12  ;;  %566 = vmatmul.mubr.bf16.gmra.mxu1 %v1164_v12 }
  0x4e   :  { %462 = vmatprep.mubr.bf16.mxu0 %v1368_v0  ;;  %575 = vmatprep.mubr.bf16.mxu1 %v1368_v0 }
  0x55   :  { %463 = vmatmul.mubr.bf16.gmra.mxu0 %v1165_v21  ;;  %576 = vmatmul.mubr.bf16.gmra.mxu1 %v1165_v21 }
  0x56   :  { %472 = vmatprep.mubr.bf16.mxu0 %v1368_v0  ;;  %585 = vmatprep.mubr.bf16.mxu1 %v1368_v0 }
  0x5d   :  { %473 = vmatmul.mubr.bf16.gmra.mxu0 %v1166_v32  ;;  %586 = vmatmul.mubr.bf16.gmra.mxu1 %v1166_v32 }
  0x5e   :  { %482 = vmatprep.mubr.bf16.mxu0 %v1368_v0  ;;  %595 = vmatprep.mubr.bf16.mxu1 %v1368_v0 }
  0x65   :  { %483 = vmatmul.mubr.bf16.gmra.mxu0 %v1167_v41  ;;  %596 = vmatmul.mubr.bf16.gmra.mxu1 %v1167_v41 }
  0x66   :  { %492 = vmatprep.mubr.bf16.mxu0 %v1368_v0  ;;  %605 = vmatprep.mubr.bf16.mxu1 %v1368_v0 }
  0x6d   :  { %493 = vmatmul.mubr.bf16.gmra.mxu0 %v1168_v52  ;;  %606 = vmatmul.mubr.bf16.gmra.mxu1 %v1168_v52 }
  0x6e   :  { %502 = vmatprep.mubr.bf16.mxu0 %v1368_v0  ;;  %615 = vmatprep.mubr.bf16.mxu1 %v1368_v0 }
  0x75   :  { %503 = vmatmul.mubr.bf16.gmra.mxu0 %v1169_v43  ;;  %616 = vmatmul.mubr.bf16.gmra.mxu1 %v1169_v43 }
  0xfd   :  { %v434_v0 = vpop.f32.mrf.mxu0  ;;  %v547_v1 = vpop.f32.mrf.mxu1 }
  0xfe   :  { %v435_v6 = vadd.f32 %v434_v0, %v1550_v60  ;;  %v548_v7 = vadd.f32 %v547_v1, %v1552_v61 }
  0xff   :  { %v436_v2 = vpop.f32.mrf.mxu0  ;;  %v549_v3 = vpop.f32.mrf.mxu1 }
 0x100   :  { %v437_v29 = vadd.f32 %v436_v2, %v1554_v62  ;;  %v550_v8 = vadd.f32 %v549_v3, %v1556_v63  ;;  %v968_v21 = vmul.f32 %v435_v6, %v435_v6  ;;  %v970_v22 = vmul.f32 %v548_v7, %v548_v7 }
 0x101   :  { %v438_v9 = vpop.f32.mrf.mxu0  ;;  %v551_v10 = vpop.f32.mrf.mxu1 }
 0x102   :  { %v1234_v11 = vpack.c.bf16 %v437_v29, %v435_v6  ;;  %v1235_v12 = vpack.c.bf16 %v550_v8, %v548_v7  ;;  %v439_v13 = vadd.f32 %v438_v9, %v1550_v60  ;;  %v552_v14 = vadd.f32 %v551_v10, %v1552_v61 }
 0x103   :  { %v440_v15 = vpop.f32.mrf.mxu0  ;;  %v553_v16 = vpop.f32.mrf.mxu1  ;;  %v969_v28 = vmul.f32 %v437_v29, %v437_v29  ;;  %v971_v33 = vmul.f32 %v550_v8, %v550_v8 }
 0x104   :  { %818 = vst [vmem:[%s1736_s5] sm:$0xff] %v1234_v11  ;;  %819 = vst [vmem:[%s1736_s5 + $0x8] sm:$0xff] %v1235_v12  ;;  %v441_v17 = vadd.f32 %v440_v15, %v1554_v62  ;;  %v554_v18 = vadd.f32 %v553_v16, %v1556_v63  ;;  %v972_v23 = vmul.f32 %v439_v13, %v439_v13 }
 0x105   :  { %v974_v25 = vmul.f32 %v552_v14, %v552_v14  ;;  %v444_v26 = vpop.f32.mrf.mxu0  ;;  %v557_v27 = vpop.f32.mrf.mxu1  ;;  %v850_v34 = vadd.f32 %v439_v13, %v435_v6  ;;  %v892_v35 = vadd.f32 %v552_v14, %v548_v7 }
 0x106   :  { %v1236_v30 = vpack.c.bf16 %v441_v17, %v439_v13  ;;  %v973_v31 = vmul.f32 %v441_v17, %v441_v17  ;;  %v1237_v32 = vpack.c.bf16 %v554_v18, %v552_v14  ;;  %v975_v36 = vmul.f32 %v554_v18, %v554_v18 }
 0x107   :  { %v446_v37 = vpop.f32.mrf.mxu0  ;;  %v559_v38 = vpop.f32.mrf.mxu1  ;;  %v871_v39 = vadd.f32 %v441_v17, %v437_v29  ;;  %v445_v40 = vadd.f32 %v444_v26, %v1550_v60  ;;  %v558_v41 = vadd.f32 %v557_v27, %v1552_v61  ;;  %v1032_v45 = vadd.f32 %v972_v23, %v968_v21 }
 0x108   :  { %820 = vst [vmem:[%s1736_s5 + $0x10] sm:$0xff] %v1236_v30  ;;  %821 = vst [vmem:[%s1736_s5 + $0x18] sm:$0xff] %v1237_v32  ;;  %v447_v42 = vadd.f32 %v446_v37, %v1554_v62  ;;  %v1074_v46 = vadd.f32 %v974_v25, %v970_v22  ;;  %v913_v47 = vadd.f32 %v554_v18, %v550_v8 }
 0x109   :  { %v560_v48 = vadd.f32 %v559_v38, %v1556_v63  ;;  %v448_v49 = vpop.f32.mrf.mxu0  ;;  %v561_v50 = vpop.f32.mrf.mxu1  ;;  %v1053_v51 = vadd.f32 %v973_v31, %v969_v28  ;;  %v1095_v52 = vadd.f32 %v975_v36, %v971_v33  ;;  %v976_v53 = vmul.f32 %v445_v40, %v445_v40 }
 0x10a   :  { %v978_v54 = vmul.f32 %v558_v41, %v558_v41  ;;  %v851_v55 = vadd.f32 %v850_v34, %v445_v40  ;;  %v1238_v56 = vpack.c.bf16 %v447_v42, %v445_v40  ;;  %v977_v43 = vmul.f32 %v447_v42, %v447_v42 }
 0x10b   :  { %v1239_v57 = vpack.c.bf16 %v560_v48, %v558_v41  ;;  %v450_v58 = vpop.f32.mrf.mxu0  ;;  %v563_v59 = vpop.f32.mrf.mxu1  ;;  %v1033_v44 = vadd.f32 %v1032_v45, %v976_v53  ;;  %v893_v0 = vadd.f32 %v892_v35, %v558_v41  ;;  %v872_v1 = vadd.f32 %v871_v39, %v447_v42 }
 0x10c   :  { %v979_v2 = vmul.f32 %v560_v48, %v560_v48  ;;  %v1075_v3 = vadd.f32 %v1074_v46, %v978_v54  ;;  %822 = vst [vmem:[%s1736_s5 + $0x20] sm:$0xff] %v1238_v56  ;;  %v449_v4 = vadd.f32 %v448_v49, %v1550_v60  ;;  %v562_v6 = vadd.f32 %v561_v50, %v1552_v61 }
 0x10d   :  { %823 = vst [vmem:[%s1736_s5 + $0x28] sm:$0xff] %v1239_v57  ;;  %v451_v7 = vadd.f32 %v450_v58, %v1554_v62  ;;  %v454_v29 = vpop.f32.mrf.mxu0  ;;  %v567_v8 = vpop.f32.mrf.mxu1  ;;  %v1054_v9 = vadd.f32 %v1053_v51, %v977_v43  ;;  %v914_v10 = vadd.f32 %v913_v47, %v560_v48  ;;  %v564_v11 = vadd.f32 %v563_v59, %v1556_v63 }
 0x10e   :  { %v455_v12 = vadd.f32 %v454_v29, %v1550_v60  ;;  %v1096_v13 = vadd.f32 %v1095_v52, %v979_v2  ;;  %v980_v14 = vmul.f32 %v449_v4, %v449_v4  ;;  %v982_v15 = vmul.f32 %v562_v6, %v562_v6 }
 0x10f   :  { %v568_v16 = vadd.f32 %v567_v8, %v1552_v61  ;;  %v456_v17 = vpop.f32.mrf.mxu0  ;;  %v569_v18 = vpop.f32.mrf.mxu1  ;;  %v852_v21 = vadd.f32 %v851_v55, %v449_v4  ;;  %v1240_v22 = vpack.c.bf16 %v451_v7, %v449_v4  ;;  %v981_v23 = vmul.f32 %v451_v7, %v451_v7 }
 0x110   :  { %v1241_v25 = vpack.c.bf16 %v564_v11, %v562_v6  ;;  %v1034_v26 = vadd.f32 %v1033_v44, %v980_v14  ;;  %v894_v27 = vadd.f32 %v893_v0, %v562_v6  ;;  %v873_v28 = vadd.f32 %v872_v1, %v451_v7 }
 0x111   :  { %v983_v30 = vmul.f32 %v564_v11, %v564_v11  ;;  %v458_v31 = vpop.f32.mrf.mxu0  ;;  %v571_v32 = vpop.f32.mrf.mxu1  ;;  %v1076_v33 = vadd.f32 %v1075_v3, %v982_v15  ;;  %824 = vst [vmem:[%s1736_s5 + $0x30] sm:$0xff] %v1240_v22  ;;  %v1055_v34 = vadd.f32 %v1054_v9, %v981_v23  ;;  %v915_v35 = vadd.f32 %v914_v10, %v564_v11 }
 0x112   :  { %825 = vst [vmem:[%s1736_s5 + $0x38] sm:$0xff] %v1241_v25  ;;  %v984_v36 = vmul.f32 %v455_v12, %v455_v12  ;;  %v853_v37 = vadd.f32 %v852_v21, %v455_v12  ;;  %v986_v38 = vmul.f32 %v568_v16, %v568_v16  ;;  %v457_v39 = vadd.f32 %v456_v17, %v1554_v62 }
 0x113   :  { %v570_v40 = vadd.f32 %v569_v18, %v1556_v63  ;;  %v460_v41 = vpop.f32.mrf.mxu0  ;;  %v573_v42 = vpop.f32.mrf.mxu1  ;;  %v895_v45 = vadd.f32 %v894_v27, %v568_v16  ;;  %v459_v46 = vadd.f32 %v458_v31, %v1550_v60  ;;  %v572_v47 = vadd.f32 %v571_v32, %v1552_v61 }
 0x114   :  { %v461_v48 = vadd.f32 %v460_v41, %v1554_v62  ;;  %v1097_v49 = vadd.f32 %v1096_v13, %v983_v30  ;;  %v1035_v50 = vadd.f32 %v1034_v26, %v984_v36  ;;  %v1242_v51 = vpack.c.bf16 %v457_v39, %v455_v12 }
 0x115   :  { %v985_v52 = vmul.f32 %v457_v39, %v457_v39  ;;  %v464_v53 = vpop.f32.mrf.mxu0  ;;  %v577_v54 = vpop.f32.mrf.mxu1  ;;  %v1077_v55 = vadd.f32 %v1076_v33, %v986_v38  ;;  %v874_v56 = vadd.f32 %v873_v28, %v457_v39  ;;  %v1243_v43 = vpack.c.bf16 %v570_v40, %v568_v16 }
 0x116   :  { %v987_v57 = vmul.f32 %v570_v40, %v570_v40  ;;  %826 = vst [vmem:[%s1736_s5 + $0x40] sm:$0xff] %v1242_v51  ;;  %v916_v58 = vadd.f32 %v915_v35, %v570_v40  ;;  %v854_v59 = vadd.f32 %v853_v37, %v459_v46  ;;  %v988_v44 = vmul.f32 %v459_v46, %v459_v46 }
 0x117   :  { %v990_v0 = vmul.f32 %v572_v47, %v572_v47  ;;  %v466_v1 = vpop.f32.mrf.mxu0  ;;  %v579_v2 = vpop.f32.mrf.mxu1  ;;  %v1056_v3 = vadd.f32 %v1055_v34, %v985_v52  ;;  %827 = vst [vmem:[%s1736_s5 + $0x48] sm:$0xff] %v1243_v43  ;;  %v896_v4 = vadd.f32 %v895_v45, %v572_v47  ;;  %v1244_v6 = vpack.c.bf16 %v461_v48, %v459_v46 }
 0x118   :  { %v989_v7 = vmul.f32 %v461_v48, %v461_v48  ;;  %v1098_v29 = vadd.f32 %v1097_v49, %v987_v57  ;;  %v875_v8 = vadd.f32 %v874_v56, %v461_v48  ;;  %v574_v9 = vadd.f32 %v573_v42, %v1556_v63 }
 0x119   :  { %v465_v10 = vadd.f32 %v464_v53, %v1550_v60  ;;  %v468_v11 = vpop.f32.mrf.mxu0  ;;  %v581_v12 = vpop.f32.mrf.mxu1  ;;  %v1036_v13 = vadd.f32 %v1035_v50, %v988_v44  ;;  %828 = vst [vmem:[%s1736_s5 + $0x50] sm:$0xff] %v1244_v6  ;;  %v578_v14 = vadd.f32 %v577_v54, %v1552_v61  ;;  %v467_v15 = vadd.f32 %v466_v1, %v1554_v62 }
 0x11a   :  { %v580_v16 = vadd.f32 %v579_v2, %v1556_v63  ;;  %v1078_v17 = vadd.f32 %v1077_v55, %v990_v0  ;;  %v1057_v18 = vadd.f32 %v1056_v3, %v989_v7  ;;  %v1245_v21 = vpack.c.bf16 %v574_v9, %v572_v47 }
 0x11b   :  { %v991_v22 = vmul.f32 %v574_v9, %v574_v9  ;;  %v470_v23 = vpop.f32.mrf.mxu0  ;;  %v583_v25 = vpop.f32.mrf.mxu1  ;;  %v917_v26 = vadd.f32 %v916_v58, %v574_v9  ;;  %v992_v27 = vmul.f32 %v465_v10, %v465_v10  ;;  %v994_v28 = vmul.f32 %v578_v14, %v578_v14 }
 0x11c   :  { %v1246_v30 = vpack.c.bf16 %v467_v15, %v465_v10  ;;  %829 = vst [vmem:[%s1736_s5 + $0x58] sm:$0xff] %v1245_v21  ;;  %v855_v31 = vadd.f32 %v854_v59, %v465_v10  ;;  %v897_v32 = vadd.f32 %v896_v4, %v578_v14  ;;  %v993_v33 = vmul.f32 %v467_v15, %v467_v15 }
 0x11d   :  { %v1247_v34 = vpack.c.bf16 %v580_v16, %v578_v14  ;;  %v474_v35 = vpop.f32.mrf.mxu0  ;;  %v587_v36 = vpop.f32.mrf.mxu1  ;;  %v1099_v37 = vadd.f32 %v1098_v29, %v991_v22  ;;  %v1037_v38 = vadd.f32 %v1036_v13, %v992_v27  ;;  %v876_v39 = vadd.f32 %v875_v8, %v467_v15 }
 0x11e   :  { %830 = vst [vmem:[%s1736_s5 + $0x60] sm:$0xff] %v1246_v30  ;;  %v995_v40 = vmul.f32 %v580_v16, %v580_v16  ;;  %v1079_v41 = vadd.f32 %v1078_v17, %v994_v28  ;;  %v469_v42 = vadd.f32 %v468_v11, %v1550_v60  ;;  %v582_v45 = vadd.f32 %v581_v12, %v1552_v61 }
 0x11f   :  { %831 = vst [vmem:[%s1736_s5 + $0x68] sm:$0xff] %v1247_v34  ;;  %v471_v46 = vadd.f32 %v470_v23, %v1554_v62  ;;  %v476_v47 = vpop.f32.mrf.mxu0  ;;  %v589_v48 = vpop.f32.mrf.mxu1  ;;  %v1058_v49 = vadd.f32 %v1057_v18, %v993_v33  ;;  %v918_v50 = vadd.f32 %v917_v26, %v580_v16  ;;  %v584_v51 = vadd.f32 %v583_v25, %v1556_v63 }
 0x120   :  { %v475_v52 = vadd.f32 %v474_v35, %v1550_v60  ;;  %v1100_v53 = vadd.f32 %v1099_v37, %v995_v40  ;;  %v996_v54 = vmul.f32 %v469_v42, %v469_v42  ;;  %v998_v55 = vmul.f32 %v582_v45, %v582_v45 }
 0x121   :  { %v588_v56 = vadd.f32 %v587_v36, %v1552_v61  ;;  %v478_v43 = vpop.f32.mrf.mxu0  ;;  %v591_v57 = vpop.f32.mrf.mxu1  ;;  %v856_v58 = vadd.f32 %v855_v31, %v469_v42  ;;  %v1248_v59 = vpack.c.bf16 %v471_v46, %v469_v42  ;;  %v997_v44 = vmul.f32 %v471_v46, %v471_v46 }
 0x122   :  { %v1249_v0 = vpack.c.bf16 %v584_v51, %v582_v45  ;;  %v1038_v1 = vadd.f32 %v1037_v38, %v996_v54  ;;  %v898_v2 = vadd.f32 %v897_v32, %v582_v45  ;;  %v877_v3 = vadd.f32 %v876_v39, %v471_v46 }
 0x123   :  { %v999_v4 = vmul.f32 %v584_v51, %v584_v51  ;;  %v480_v6 = vpop.f32.mrf.mxu0  ;;  %v593_v7 = vpop.f32.mrf.mxu1  ;;  %v1080_v29 = vadd.f32 %v1079_v41, %v998_v55  ;;  %832 = vst [vmem:[%s1736_s5 + $0x70] sm:$0xff] %v1248_v59  ;;  %v1059_v8 = vadd.f32 %v1058_v49, %v997_v44  ;;  %v919_v9 = vadd.f32 %v918_v50, %v584_v51 }
 0x124   :  { %833 = vst [vmem:[%s1736_s5 + $0x78] sm:$0xff] %v1249_v0  ;;  %v1000_v10 = vmul.f32 %v475_v52, %v475_v52  ;;  %v857_v11 = vadd.f32 %v856_v58, %v475_v52  ;;  %v1002_v12 = vmul.f32 %v588_v56, %v588_v56  ;;  %v477_v13 = vadd.f32 %v476_v47, %v1554_v62 }
 0x125   :  { %v590_v14 = vadd.f32 %v589_v48, %v1556_v63  ;;  %v484_v15 = vpop.f32.mrf.mxu0  ;;  %v597_v16 = vpop.f32.mrf.mxu1  ;;  %v899_v17 = vadd.f32 %v898_v2, %v588_v56  ;;  %v479_v18 = vadd.f32 %v478_v43, %v1550_v60  ;;  %v592_v21 = vadd.f32 %v591_v57, %v1552_v61 }
 0x126   :  { %v481_v22 = vadd.f32 %v480_v6, %v1554_v62  ;;  %v1101_v23 = vadd.f32 %v1100_v53, %v999_v4  ;;  %v1039_v25 = vadd.f32 %v1038_v1, %v1000_v10  ;;  %v1250_v26 = vpack.c.bf16 %v477_v13, %v475_v52 }
 0x127   :  { %v1001_v27 = vmul.f32 %v477_v13, %v477_v13  ;;  %v486_v28 = vpop.f32.mrf.mxu0  ;;  %v599_v30 = vpop.f32.mrf.mxu1  ;;  %v1081_v31 = vadd.f32 %v1080_v29, %v1002_v12  ;;  %v878_v32 = vadd.f32 %v877_v3, %v477_v13  ;;  %v1251_v33 = vpack.c.bf16 %v590_v14, %v588_v56 }
 0x128   :  { %v1003_v34 = vmul.f32 %v590_v14, %v590_v14  ;;  %834 = vst [vmem:[%s1736_s5 + $0x80] sm:$0xff] %v1250_v26  ;;  %v920_v35 = vadd.f32 %v919_v9, %v590_v14  ;;  %v858_v36 = vadd.f32 %v857_v11, %v479_v18  ;;  %v1004_v37 = vmul.f32 %v479_v18, %v479_v18 }
 0x129   :  { %v1006_v38 = vmul.f32 %v592_v21, %v592_v21  ;;  %v488_v39 = vpop.f32.mrf.mxu0  ;;  %v601_v40 = vpop.f32.mrf.mxu1  ;;  %v1060_v41 = vadd.f32 %v1059_v8, %v1001_v27  ;;  %835 = vst [vmem:[%s1736_s5 + $0x88] sm:$0xff] %v1251_v33  ;;  %v900_v42 = vadd.f32 %v899_v17, %v592_v21  ;;  %v1252_v45 = vpack.c.bf16 %v481_v22, %v479_v18 }
 0x12a   :  { %v1005_v46 = vmul.f32 %v481_v22, %v481_v22  ;;  %v1102_v47 = vadd.f32 %v1101_v23, %v1003_v34  ;;  %v879_v48 = vadd.f32 %v878_v32, %v481_v22  ;;  %v594_v49 = vadd.f32 %v593_v7, %v1556_v63 }
 0x12b   :  { %v485_v50 = vadd.f32 %v484_v15, %v1550_v60  ;;  %v490_v51 = vpop.f32.mrf.mxu0  ;;  %v603_v52 = vpop.f32.mrf.mxu1  ;;  %v1040_v53 = vadd.f32 %v1039_v25, %v1004_v37  ;;  %836 = vst [vmem:[%s1736_s5 + $0x90] sm:$0xff] %v1252_v45  ;;  %v598_v54 = vadd.f32 %v597_v16, %v1552_v61  ;;  %v487_v55 = vadd.f32 %v486_v28, %v1554_v62 }
 0x12c   :  { %v600_v56 = vadd.f32 %v599_v30, %v1556_v63  ;;  %v1082_v43 = vadd.f32 %v1081_v31, %v1006_v38  ;;  %v1061_v57 = vadd.f32 %v1060_v41, %v1005_v46  ;;  %v1253_v58 = vpack.c.bf16 %v594_v49, %v592_v21 }
 0x12d   :  { %v1007_v59 = vmul.f32 %v594_v49, %v594_v49  ;;  %v494_v44 = vpop.f32.mrf.mxu0  ;;  %v607_v0 = vpop.f32.mrf.mxu1  ;;  %v921_v1 = vadd.f32 %v920_v35, %v594_v49  ;;  %v1008_v2 = vmul.f32 %v485_v50, %v485_v50  ;;  %v1010_v3 = vmul.f32 %v598_v54, %v598_v54 }
 0x12e   :  { %v1254_v4 = vpack.c.bf16 %v487_v55, %v485_v50  ;;  %837 = vst [vmem:[%s1736_s5 + $0x98] sm:$0xff] %v1253_v58  ;;  %v859_v6 = vadd.f32 %v858_v36, %v485_v50  ;;  %v901_v7 = vadd.f32 %v900_v42, %v598_v54  ;;  %v1009_v29 = vmul.f32 %v487_v55, %v487_v55 }
 0x12f   :  { %v1255_v8 = vpack.c.bf16 %v600_v56, %v598_v54  ;;  %v496_v9 = vpop.f32.mrf.mxu0  ;;  %v609_v10 = vpop.f32.mrf.mxu1  ;;  %v1103_v11 = vadd.f32 %v1102_v47, %v1007_v59  ;;  %v1041_v12 = vadd.f32 %v1040_v53, %v1008_v2  ;;  %v880_v13 = vadd.f32 %v879_v48, %v487_v55 }
 0x130   :  { %838 = vst [vmem:[%s1736_s5 + $0xa0] sm:$0xff] %v1254_v4  ;;  %v1011_v14 = vmul.f32 %v600_v56, %v600_v56  ;;  %v1083_v15 = vadd.f32 %v1082_v43, %v1010_v3  ;;  %v489_v16 = vadd.f32 %v488_v39, %v1550_v60  ;;  %v602_v17 = vadd.f32 %v601_v40, %v1552_v61 }
 0x131   :  { %839 = vst [vmem:[%s1736_s5 + $0xa8] sm:$0xff] %v1255_v8  ;;  %v491_v18 = vadd.f32 %v490_v51, %v1554_v62  ;;  %v498_v21 = vpop.f32.mrf.mxu0  ;;  %v611_v22 = vpop.f32.mrf.mxu1  ;;  %v1062_v23 = vadd.f32 %v1061_v57, %v1009_v29  ;;  %v922_v25 = vadd.f32 %v921_v1, %v600_v56  ;;  %v604_v26 = vadd.f32 %v603_v52, %v1556_v63 }
 0x132   :  { %v495_v27 = vadd.f32 %v494_v44, %v1550_v60  ;;  %v1104_v28 = vadd.f32 %v1103_v11, %v1011_v14  ;;  %v1012_v30 = vmul.f32 %v489_v16, %v489_v16  ;;  %v1014_v31 = vmul.f32 %v602_v17, %v602_v17 }
 0x133   :  { %v608_v32 = vadd.f32 %v607_v0, %v1552_v61  ;;  %v500_v33 = vpop.f32.mrf.mxu0  ;;  %v613_v34 = vpop.f32.mrf.mxu1  ;;  %v860_v35 = vadd.f32 %v859_v6, %v489_v16  ;;  %v1256_v36 = vpack.c.bf16 %v491_v18, %v489_v16  ;;  %v1013_v37 = vmul.f32 %v491_v18, %v491_v18 }
 0x134   :  { %v1257_v38 = vpack.c.bf16 %v604_v26, %v602_v17  ;;  %v1042_v39 = vadd.f32 %v1041_v12, %v1012_v30  ;;  %v902_v40 = vadd.f32 %v901_v7, %v602_v17  ;;  %v881_v41 = vadd.f32 %v880_v13, %v491_v18 }
 0x135   :  { %v1015_v42 = vmul.f32 %v604_v26, %v604_v26  ;;  %v504_v45 = vpop.f32.mrf.mxu0  ;;  %v617_v46 = vpop.f32.mrf.mxu1  ;;  %v1084_v47 = vadd.f32 %v1083_v15, %v1014_v31  ;;  %840 = vst [vmem:[%s1736_s5 + $0xb0] sm:$0xff] %v1256_v36  ;;  %v1063_v48 = vadd.f32 %v1062_v23, %v1013_v37  ;;  %v923_v49 = vadd.f32 %v922_v25, %v604_v26 }
 0x136   :  { %841 = vst [vmem:[%s1736_s5 + $0xb8] sm:$0xff] %v1257_v38  ;;  %v1016_v50 = vmul.f32 %v495_v27, %v495_v27  ;;  %v861_v51 = vadd.f32 %v860_v35, %v495_v27  ;;  %v1018_v52 = vmul.f32 %v608_v32, %v608_v32  ;;  %v497_v53 = vadd.f32 %v496_v9, %v1554_v62 }
 0x137   :  { %v610_v54 = vadd.f32 %v609_v10, %v1556_v63  ;;  %v903_v55 = vadd.f32 %v902_v40, %v608_v32  ;;  %v499_v56 = vadd.f32 %v498_v21, %v1550_v60  ;;  %v612_v43 = vadd.f32 %v611_v22, %v1552_v61  ;;  %v506_v58 = vpop.f32.mrf.mxu0  ;;  %v619_v2 = vpop.f32.mrf.mxu1 }
 0x138   :  { %v501_v57 = vadd.f32 %v500_v33, %v1554_v62  ;;  %v1105_v59 = vadd.f32 %v1104_v28, %v1015_v42  ;;  %v1043_v44 = vadd.f32 %v1042_v39, %v1016_v50  ;;  %v1258_v0 = vpack.c.bf16 %v497_v53, %v495_v27 }
 0x139   :  { %v1017_v1 = vmul.f32 %v497_v53, %v497_v53  ;;  %v1085_v3 = vadd.f32 %v1084_v47, %v1018_v52  ;;  %v882_v4 = vadd.f32 %v881_v41, %v497_v53  ;;  %v1259_v6 = vpack.c.bf16 %v610_v54, %v608_v32  ;;  %v508_v15 = vpop.f32.mrf.mxu0  ;;  %v621_v22 = vpop.f32.mrf.mxu1 }
 0x13a   :  { %v1019_v7 = vmul.f32 %v610_v54, %v610_v54  ;;  %842 = vst [vmem:[%s1736_s5 + $0xc0] sm:$0xff] %v1258_v0  ;;  %v924_v29 = vadd.f32 %v923_v49, %v610_v54  ;;  %v862_v8 = vadd.f32 %v861_v51, %v499_v56  ;;  %v1020_v9 = vmul.f32 %v499_v56, %v499_v56 }
 0x13b   :  { %v1022_v10 = vmul.f32 %v612_v43, %v612_v43  ;;  %v1064_v11 = vadd.f32 %v1063_v48, %v1017_v1  ;;  %843 = vst [vmem:[%s1736_s5 + $0xc8] sm:$0xff] %v1259_v6  ;;  %v904_v12 = vadd.f32 %v903_v55, %v612_v43  ;;  %v1260_v13 = vpack.c.bf16 %v501_v57, %v499_v56  ;;  %v510_v37 = vpop.f32.mrf.mxu0  ;;  %v623_v42 = vpop.f32.mrf.mxu1 }
 0x13c   :  { %v1021_v14 = vmul.f32 %v501_v57, %v501_v57  ;;  %v1106_v16 = vadd.f32 %v1105_v59, %v1019_v7  ;;  %v883_v17 = vadd.f32 %v882_v4, %v501_v57  ;;  %v614_v18 = vadd.f32 %v613_v34, %v1556_v63 }
 0x13d   :  { %v505_v21 = vadd.f32 %v504_v45, %v1550_v60  ;;  %v1044_v23 = vadd.f32 %v1043_v44, %v1020_v9  ;;  %844 = vst [vmem:[%s1736_s5 + $0xd0] sm:$0xff] %v1260_v13  ;;  %v618_v25 = vadd.f32 %v617_v46, %v1552_v61  ;;  %v507_v26 = vadd.f32 %v506_v58, %v1554_v62 }
 0x13e   :  { %v620_v27 = vadd.f32 %v619_v2, %v1556_v63  ;;  %v1086_v28 = vadd.f32 %v1085_v3, %v1022_v10  ;;  %v1065_v30 = vadd.f32 %v1064_v11, %v1021_v14  ;;  %v1261_v31 = vpack.c.bf16 %v614_v18, %v612_v43 }
 0x13f   :  { %v1023_v32 = vmul.f32 %v614_v18, %v614_v18  ;;  %v925_v33 = vadd.f32 %v924_v29, %v614_v18  ;;  %v1024_v34 = vmul.f32 %v505_v21, %v505_v21  ;;  %v1026_v35 = vmul.f32 %v618_v25, %v618_v25 }
 0x140   :  { %v1262_v36 = vpack.c.bf16 %v507_v26, %v505_v21  ;;  %845 = vst [vmem:[%s1736_s5 + $0xd8] sm:$0xff] %v1261_v31  ;;  %v863_v38 = vadd.f32 %v862_v8, %v505_v21  ;;  %v905_v39 = vadd.f32 %v904_v12, %v618_v25  ;;  %v1025_v40 = vmul.f32 %v507_v26, %v507_v26 }
 0x141   :  { %v1263_v41 = vpack.c.bf16 %v620_v27, %v618_v25  ;;  %v1107_v45 = vadd.f32 %v1106_v16, %v1023_v32  ;;  %v1045_v46 = vadd.f32 %v1044_v23, %v1024_v34  ;;  %v884_v47 = vadd.f32 %v883_v17, %v507_v26 }
 0x142   :  { %846 = vst [vmem:[%s1736_s5 + $0xe0] sm:$0xff] %v1262_v36  ;;  %v1027_v48 = vmul.f32 %v620_v27, %v620_v27  ;;  %v1087_v49 = vadd.f32 %v1086_v28, %v1026_v35  ;;  %v509_v50 = vadd.f32 %v508_v15, %v1550_v60  ;;  %v622_v51 = vadd.f32 %v621_v22, %v1552_v61 }
 0x143   :  { %847 = vst [vmem:[%s1736_s5 + $0xe8] sm:$0xff] %v1263_v41  ;;  %v511_v52 = vadd.f32 %v510_v37, %v1554_v62  ;;  %v1066_v53 = vadd.f32 %v1065_v30, %v1025_v40  ;;  %v926_v54 = vadd.f32 %v925_v33, %v620_v27  ;;  %v624_v56 = vadd.f32 %v623_v42, %v1556_v63 }
 0x144   :  { %v1108_v55 = vadd.f32 %v1107_v45, %v1027_v48  ;;  %v864_v43 = vadd.f32 %v863_v38, %v509_v50  ;;  %v1028_v57 = vmul.f32 %v509_v50, %v509_v50  ;;  %v906_v58 = vadd.f32 %v905_v39, %v622_v51 }
 0x145   :  { %v1030_v59 = vmul.f32 %v622_v51, %v622_v51  ;;  %v1264_v44 = vpack.c.bf16 %v511_v52, %v509_v50  ;;  %v885_v0 = vadd.f32 %v884_v47, %v511_v52  ;;  %v1029_v1 = vmul.f32 %v511_v52, %v511_v52 }
 0x146   :  { %v1265_v2 = vpack.c.bf16 %v624_v56, %v622_v51  ;;  %v865_v3 = vrot.slane %v864_v43, 4  ;;  %v1046_v4 = vadd.f32 %v1045_v46, %v1028_v57  ;;  %v907_v60 = vrot.slane %v906_v58, 4 }
 0x147   :  { %v1088_v6 = vadd.f32 %v1087_v49, %v1030_v59  ;;  %848 = vst [vmem:[%s1736_s5 + $0xf0] sm:$0xff] %v1264_v44  ;;  %v886_v61 = vrot.slane %v885_v0, 4  ;;  %v1067_v62 = vadd.f32 %v1066_v53, %v1029_v1  ;;  %v927_v63 = vadd.f32 %v926_v54, %v624_v56 }
 0x148   :  { %849 = vst [vmem:[%s1736_s5 + $0xf8] sm:$0xff] %v1265_v2  ;;  %v1031_v7 = vmul.f32 %v624_v56, %v624_v56  ;;  %v866_v29 = vadd.f32 %v865_v3, %v864_v43  ;;  %v1047_v8 = vrot.slane %v1046_v4, 4  ;;  %v908_v9 = vadd.f32 %v907_v60, %v906_v58 }
 0x149   :  { %v1089_v10 = vrot.slane %v1088_v6, 4  ;;  %v887_v11 = vadd.f32 %v886_v61, %v885_v0  ;;  %v1068_v12 = vrot.slane %v1067_v62, 4  ;;  %v928_v13 = vrot.slane %v927_v63, 4 }
 0x14a   :  { %v1109_v14 = vadd.f32 %v1108_v55, %v1031_v7  ;;  %v867_v15 = vrot.slane %v866_v29, 2  ;;  %v1048_v16 = vadd.f32 %v1047_v8, %v1046_v4  ;;  %v909_v17 = vrot.slane %v908_v9, 2 }
 0x14b   :  { %v1090_v18 = vadd.f32 %v1089_v10, %v1088_v6  ;;  %v888_v21 = vrot.slane %v887_v11, 2  ;;  %v1069_v22 = vadd.f32 %v1068_v12, %v1067_v62  ;;  %v929_v23 = vadd.f32 %v928_v13, %v927_v63 }
 0x14c   :  { %v1110_v25 = vrot.slane %v1109_v14, 4  ;;  %v868_v26 = vadd.f32 %v867_v15, %v866_v29  ;;  %v1049_v27 = vrot.slane %v1048_v16, 2  ;;  %v910_v28 = vadd.f32 %v909_v17, %v908_v9 }
 0x14d   :  { %v1091_v30 = vrot.slane %v1090_v18, 2  ;;  %v889_v31 = vadd.f32 %v888_v21, %v887_v11  ;;  %v1070_v32 = vrot.slane %v1069_v22, 2  ;;  %v930_v33 = vrot.slane %v929_v23, 2 }
 0x14e   :  { %v1111_v34 = vadd.f32 %v1110_v25, %v1109_v14  ;;  %v869_v35 = vrot.slane %v868_v26, 1  ;;  %v1050_v36 = vadd.f32 %v1049_v27, %v1048_v16  ;;  %v911_v37 = vrot.slane %v910_v28, 1 }
 0x14f   :  { %v1092_v38 = vadd.f32 %v1091_v30, %v1090_v18  ;;  %v890_v39 = vrot.slane %v889_v31, 1  ;;  %v1071_v40 = vadd.f32 %v1070_v32, %v1069_v22  ;;  %v931_v41 = vadd.f32 %v930_v33, %v929_v23 }
 0x150   :  { %v1112_v42 = vrot.slane %v1111_v34, 2  ;;  %v870_v45 = vadd.f32 %v869_v35, %v868_v26  ;;  %v1051_v46 = vrot.slane %v1050_v36, 1  ;;  %v945_v48 = vsub.s32 %v942_v20, %v1419_v24 }
 0x151   :  { %v1093_v47 = vrot.slane %v1092_v38, 1  ;;  %v891_v49 = vadd.f32 %v890_v39, %v889_v31  ;;  %v1072_v50 = vrot.slane %v1071_v40, 1  ;;  %v932_v51 = vrot.slane %v931_v41, 1 }
 0x152   :  { %v1113_v52 = vadd.f32 %v1112_v42, %v1111_v34  ;;  %v1052_v53 = vadd.f32 %v1051_v46, %v1050_v36  ;;  %v912_v54 = vadd.f32 %v911_v37, %v910_v28 }
 0x153   :  { %v938_v55 = vcombine.low %v870_v45, %v891_v49  ;;  %v1073_v56 = vadd.f32 %v1072_v50, %v1071_v40  ;;  %v933_v43 = vadd.f32 %v932_v51, %v931_v41  ;;  %v1094_v58 = vadd.f32 %v1093_v47, %v1092_v38 }
 0x154   :  { %v1114_v57 = vrot.slane %v1113_v52, 1 }
 0x155   :  { %v946_v59 = vrot.slane %v938_v55, %v945_v48  ;;  %v1120_v44 = vcombine.low %v1052_v53, %v1073_v56  ;;  %v939_v0 = vcombine.low %v912_v54, %v933_v43 }
 0x156   :  { %v1115_v1 = vadd.f32 %v1114_v57, %v1113_v52 }
 0x157   :  { %v1128_v2 = vrot.slane %v1120_v44, %v945_v48  ;;  %v953_v3 = vrot.slane %v939_v0, %v945_v48 }
 0x158   :  { %v1121_v4 = vcombine.low %v1094_v58, %v1115_v1 }
 0x159   :  { %v954_v5 = vcombine.low %v946_v59, %v953_v3 }
 0x15a   :  { %v1135_v24 = vrot.slane %v1121_v4, %v945_v48 }
 0x15b   :  { %v961_v20 = vrot.slane %v954_v5, %v945_v48 }
 0x15c   :  { %v1136_v60 = vcombine.low %v1128_v2, %v1135_v24 }
 0x15d   :  { %967 = vst.msk [vmem:[%s1737_s6] sm:$0xf] %vm965_vm0, %v961_v20 }
 0x15e   :  { %v1143_v6 = vrot.slane %v1136_v60, %v945_v48 }
 0x160   :  { %1145 = vst.msk [vmem:[%s1738_s7] sm:$0xf] %vm965_vm0, %v1143_v6 }
 0x161   :  { %1158 = vsyncpa [#allocation3], 1 }
 0x162   :  { %1159 = vsyncpa [#allocation5], 1 }

// kernel: generator_forward.6
= control target key start
LH: loop header
LB: loop body
LE: loop exit
PB: predicated region body
PF: predicated region fallthrough
CT: control target
= control target key end

     0   :  { %13 = vsyncpa [#allocation3], 0  ;;  %s5533_s0 = inlined_call_operand.vmem [shape: bf16[8,512], index: 0, kind: input, shape index: {}]   ;;  %s5534_s1 = inlined_call_operand.vmem [shape: bf16[1,512], index: 1, kind: input, shape index: {}]   ;;  %s5535_s2 = inlined_call_operand.vmem [shape: bf16[1,512], index: 2, kind: input, shape index: {}]   ;;  %s5536_s3 = inlined_call_operand.hbm [shape: bf16[512,2048], index: 3, kind: input, shape index: {}]   ;;  %s5537_s4 = inlined_call_operand.hbm [shape: f32[1,2048], index: 4, kind: input, shape index: {}]   ;;  %s5538_s5 = inlined_call_operand.vmem [shape: bf16[8,2048], index: 5, kind: output, shape index: {0}]   ;;  %s5539_s6 = inlined_call_operand.vmem [shape: f32[1,1,2048], index: 6, kind: output, shape index: {1}]   ;;  %s5540_s7 = inlined_call_operand.vmem [shape: f32[1,1,2048], index: 7, kind: output, shape index: {2}]  }
   0x1   :  { %14 = vsyncpa [#allocation5], 0  ;;  %s5157_s24 = smov [#allocation2]  }
   0x2   :  { %s26_s25 = sshll.u32 %s5157_s24, 4  ;;  %s27_s25 = int_to_ptr.vmem [resolvable:$true] %s26_s25 }
   0x3   :  { %s5121_s26 = scalar_lea.vmem %s27_s25, 65536  ;;  %p5126_p1 = scmp.lt.s32.totalorder %s27_s25, %s27_s25 }
   0x4   :  { %p5122_p0 = scmp.ne.s32.totalorder %s27_s25, %s5121_s26  ;;  %p5127_p2 = scmp.lt.s32.totalorder %s5121_s26, %s5121_s26 }
   0x6   :  { %p5128_p3 = por %p5127_p2, %p5126_p1 }
   0x8   :  { %p5129_p4 = pnand %p5128_p3, %p5122_p0 }
   0xa   :  { %5132 = shalt.err (!%p5129_p4)
}
   0xb   :  { %s5158_s27 = smov 1024   ;;  %s5159_s28 = smov 64  }
   0xc   :  { %32 = dma.hbm_to_vmem [thread:$0]  %s5536_s3, 65536, %s27_s25, [#allocation3], %s5158_s27, %s5158_s27, %s5159_s28  }
   0xd   :  { %s5160_s8 = smov [#allocation4]  }
   0xe   :  { %s39_s9 = sshll.u32 %s5160_s8, 4  ;;  %s40_s9 = int_to_ptr.vmem [resolvable:$true] %s39_s9 }
   0xf   :  { %s5141_s10 = scalar_lea.vmem %s40_s9, 256  ;;  %p5146_p6 = scmp.lt.s32.totalorder %s40_s9, %s40_s9 }
  0x10   :  { %p5142_p5 = scmp.ne.s32.totalorder %s40_s9, %s5141_s10  ;;  %p5147_p7 = scmp.lt.s32.totalorder %s5141_s10, %s5141_s10 }
  0x12   :  { %p5148_p8 = por %p5147_p7, %p5146_p6 }
  0x14   :  { %p5149_p9 = pnand %p5148_p8, %p5142_p5 }
  0x16   :  { %5152 = shalt.err (!%p5149_p9)
}
  0x17   :  { %42 = dma.hbm_to_vmem [thread:$0]  %s5537_s4, 256, %s40_s9, [#allocation5]  }
  0x18   :  { %5153 = dma.done.wait [#allocation3], 65536  }
  0x19   :  { %5154 = vsyncadd [#allocation3], 4294901760 }
  0x1a   :  { %5155 = dma.done.wait [#allocation5], 256  }
  0x1b   :  { %5156 = vsyncadd [#allocation5], 4294967040  ;;  %v302_v0 = vld [vmem:[#allocation2 + $0x380] sm:$0xff]  ;;  %v5161_v32 = vmov 1966171168   ;;  %v65_v34 = vlaneseq }
  0x1c   :  { %v310_v1 = vld [vmem:[#allocation2 + $0x3c0] sm:$0xff]  ;;  %v63_v33 = vunpack.c.l.s4 %v5161_v32 }
  0x1d   :  { %v558_v2 = vld [vmem:[#allocation2 + $0xb80] sm:$0xff]  ;;  %v4691_v3 = vcombine.high %v302_v0, %v310_v1  ;;  %v4690_v5 = vcombine.low %v302_v0, %v310_v1  ;;  %v5209_v44 = vshrl.u32 %v65_v34, 7 }
  0x1e   :  { %v566_v4 = vld [vmem:[#allocation2 + $0xbc0] sm:$0xff]  ;;  %v64_v43 = vunpack.c.0.s8 %v63_v33 }
  0x1f   :  { %v286_v6 = vld [vmem:[#allocation2 + $0x300] sm:$0xff]  ;;  %v4947_v8 = vcombine.high %v558_v2, %v566_v4  ;;  %v4946_v9 = vcombine.low %v558_v2, %v566_v4  ;;  %3360 = vmatprep.subr.bf16.mxu0 %v4691_v3  ;;  %v5226_v2 = vsub.s32 0, %v5209_v44  ;;  %vm4093_vm0 = vcmp.lt.s32.totalorder %v5209_v44, 2 }
  0x20   :  { %v294_v7 = vld [vmem:[#allocation2 + $0x340] sm:$0xff]  ;;  %3361 = vmatpush1.bf16.msra.mxu0 %v4690_v5  ;;  %v5212_v55 = vsub.s32 %v64_v43, %v5209_v44 }
  0x21   :  { %v4675_v10 = vcombine.high %v286_v6, %v294_v7  ;;  %v542_v11 = vld [vmem:[#allocation2 + $0xb00] sm:$0xff]  ;;  %3401 = vmatprep.subr.bf16.mxu1 %v4947_v8  ;;  %v4674_v18 = vcombine.low %v286_v6, %v294_v7 }
  0x22   :  { %v550_v12 = vld [vmem:[#allocation2 + $0xb40] sm:$0xff]  ;;  %3402 = vmatpush1.bf16.msra.mxu1 %v4946_v9 }
  0x23   :  { %v270_v13 = vld [vmem:[#allocation2 + $0x280] sm:$0xff]  ;;  %v4931_v14 = vcombine.high %v542_v11, %v550_v12  ;;  %3362 = vmatprep.subr.bf16.mxu0 %v4675_v10  ;;  %v4930_v19 = vcombine.low %v542_v11, %v550_v12 }
  0x24   :  { %v278_v15 = vld [vmem:[#allocation2 + $0x2c0] sm:$0xff]  ;;  %3363 = vmatpush1.bf16.msra.mxu0 %v4674_v18 }
  0x25   :  { %v526_v16 = vld [vmem:[#allocation2 + $0xa80] sm:$0xff]  ;;  %v4659_v20 = vcombine.high %v270_v13, %v278_v15  ;;  %3403 = vmatprep.subr.bf16.mxu1 %v4931_v14  ;;  %v4658_v26 = vcombine.low %v270_v13, %v278_v15 }
  0x26   :  { %v534_v17 = vld [vmem:[#allocation2 + $0xac0] sm:$0xff]  ;;  %3404 = vmatpush1.bf16.msra.mxu1 %v4930_v19 }
  0x27   :  { %v4915_v21 = vcombine.high %v526_v16, %v534_v17  ;;  %v254_v22 = vld [vmem:[#allocation2 + $0x200] sm:$0xff]  ;;  %3364 = vmatprep.subr.bf16.mxu0 %v4659_v20  ;;  %v4914_v27 = vcombine.low %v526_v16, %v534_v17 }
  0x28   :  { %v262_v23 = vld [vmem:[#allocation2 + $0x240] sm:$0xff]  ;;  %3365 = vmatpush1.bf16.msra.mxu0 %v4658_v26 }
  0x29   :  { %v510_v24 = vld [vmem:[#allocation2 + $0xa00] sm:$0xff]  ;;  %v4643_v28 = vcombine.high %v254_v22, %v262_v23  ;;  %3405 = vmatprep.subr.bf16.mxu1 %v4915_v21  ;;  %v4642_v37 = vcombine.low %v254_v22, %v262_v23 }
  0x2a   :  { %v518_v25 = vld [vmem:[#allocation2 + $0xa40] sm:$0xff]  ;;  %3406 = vmatpush1.bf16.msra.mxu1 %v4914_v27 }
  0x2b   :  { %v4899_v29 = vcombine.high %v510_v24, %v518_v25  ;;  %v238_v30 = vld [vmem:[#allocation2 + $0x180] sm:$0xff]  ;;  %3366 = vmatprep.subr.bf16.mxu0 %v4643_v28  ;;  %v4898_v38 = vcombine.low %v510_v24, %v518_v25 }
  0x2c   :  { %v246_v31 = vld [vmem:[#allocation2 + $0x1c0] sm:$0xff]  ;;  %3367 = vmatpush1.bf16.msra.mxu0 %v4642_v37 }
  0x2d   :  { %v494_v35 = vld [vmem:[#allocation2 + $0x980] sm:$0xff]  ;;  %v4627_v39 = vcombine.high %v238_v30, %v246_v31  ;;  %3407 = vmatprep.subr.bf16.mxu1 %v4899_v29  ;;  %v4626_v47 = vcombine.low %v238_v30, %v246_v31 }
  0x2e   :  { %v502_v36 = vld [vmem:[#allocation2 + $0x9c0] sm:$0xff]  ;;  %3408 = vmatpush1.bf16.msra.mxu1 %v4898_v38 }
  0x2f   :  { %v4883_v40 = vcombine.high %v494_v35, %v502_v36  ;;  %v222_v41 = vld [vmem:[#allocation2 + $0x100] sm:$0xff]  ;;  %3368 = vmatprep.subr.bf16.mxu0 %v4627_v39  ;;  %v4882_v48 = vcombine.low %v494_v35, %v502_v36 }
  0x30   :  { %v230_v42 = vld [vmem:[#allocation2 + $0x140] sm:$0xff]  ;;  %3369 = vmatpush1.bf16.msra.mxu0 %v4626_v47 }
  0x31   :  { %v478_v45 = vld [vmem:[#allocation2 + $0x900] sm:$0xff]  ;;  %v4611_v49 = vcombine.high %v222_v41, %v230_v42  ;;  %3409 = vmatprep.subr.bf16.mxu1 %v4883_v40  ;;  %v4610_v58 = vcombine.low %v222_v41, %v230_v42 }
  0x32   :  { %v486_v46 = vld [vmem:[#allocation2 + $0x940] sm:$0xff]  ;;  %3410 = vmatpush1.bf16.msra.mxu1 %v4882_v48  ;;  %v51_v48 = vld [vmem:[%s5533_s0 + $0x8] sm:$0xff] }
  0x33   :  { %v206_v50 = vld [vmem:[#allocation2 + $0x80] sm:$0xff]  ;;  %v4867_v51 = vcombine.high %v478_v45, %v486_v46  ;;  %v4866_v59 = vcombine.low %v478_v45, %v486_v46  ;;  %3370 = vmatprep.subr.bf16.mxu0 %v4611_v49 }
  0x34   :  { %v214_v52 = vld [vmem:[#allocation2 + $0xc0] sm:$0xff]  ;;  %3371 = vmatpush1.bf16.msra.mxu0 %v4610_v58 }
  0x35   :  { %v462_v53 = vld [vmem:[#allocation2 + $0x880] sm:$0xff]  ;;  %v4595_v62 = vcombine.high %v206_v50, %v214_v52  ;;  %v4594_v0 = vcombine.low %v206_v50, %v214_v52  ;;  %3411 = vmatprep.subr.bf16.mxu1 %v4867_v51 }
  0x36   :  { %v470_v54 = vld [vmem:[#allocation2 + $0x8c0] sm:$0xff]  ;;  %3412 = vmatpush1.bf16.msra.mxu1 %v4866_v59 }
  0x37   :  { %v5214_v56 = vld [vmem:[#allocation2] sm:$0xff]  ;;  %v4851_v63 = vcombine.high %v462_v53, %v470_v54  ;;  %v4850_v3 = vcombine.low %v462_v53, %v470_v54  ;;  %3372 = vmatprep.subr.bf16.mxu0 %v4595_v62 }
  0x38   :  { %v5216_v57 = vld [vmem:[#allocation2 + $0x40] sm:$0xff]  ;;  %3373 = vmatpush1.bf16.msra.mxu0 %v4594_v0 }
  0x39   :  { %v5218_v60 = vld [vmem:[#allocation2 + $0x800] sm:$0xff]  ;;  %v4579_v4 = vcombine.high %v5214_v56, %v5216_v57  ;;  %v4578_v9 = vcombine.low %v5214_v56, %v5216_v57  ;;  %3413 = vmatprep.subr.bf16.mxu1 %v4851_v63 }
  0x3a   :  { %v5220_v61 = vld [vmem:[#allocation2 + $0x840] sm:$0xff]  ;;  %3414 = vmatpush1.bf16.msra.mxu1 %v4850_v3 }
  0x3b   :  { %v4568_v1 = vld.sshfl [vmem:[%s5534_s1] sm:$0x33 pattern:$0x75316420]  ;;  %v4835_v8 = vcombine.high %v5218_v60, %v5220_v61  ;;  %v4834_v12 = vcombine.low %v5218_v60, %v5220_v61  ;;  %3374 = vmatprep.subr.bf16.mxu0 %v4579_v4 }
  0x3c   :  { %v61_v5 = vcombine.high %v4568_v1, %v4568_v1  ;;  %v68_v6 = vrot.slane %v4568_v1, %v5212_v55  ;;  %v4571_v7 = vld.sshfl [vmem:[%s5535_s2] sm:$0x33 pattern:$0x75316420]  ;;  %3375 = vmatpush1.bf16.msra.mxu0 %v4578_v9  ;;  %v5162_v1 = vmov 0  }
  0x3d   :  { %v129_v10 = vcombine.high %v4571_v7, %v4571_v7  ;;  %v136_v11 = vrot.slane %v4571_v7, %v5212_v55  ;;  %v430_v16 = vld [vmem:[#allocation2 + $0x780] sm:$0xff]  ;;  %3415 = vmatprep.subr.bf16.mxu1 %v4835_v8 }
  0x3e   :  { %v75_v13 = vrot.slane %v61_v5, %v5212_v55  ;;  %v79_v14 = vpack.i.b16 %v68_v6, %v68_v6  ;;  %v76_v15 = vcombine.high %v68_v6, %v68_v6  ;;  %v438_v17 = vld [vmem:[#allocation2 + $0x7c0] sm:$0xff]  ;;  %3416 = vmatpush1.bf16.msra.mxu1 %v4834_v12 }
  0x3f   :  { %v143_v18 = vrot.slane %v129_v10, %v5212_v55  ;;  %v147_v19 = vpack.i.b16 %v136_v11, %v136_v11  ;;  %v144_v20 = vcombine.high %v136_v11, %v136_v11  ;;  %v686_v25 = vld [vmem:[#allocation2 + $0xf80] sm:$0xff]  ;;  %v4819_v31 = vcombine.high %v430_v16, %v438_v17 }
  0x40   :  { %v84_v21 = vrot.slane %v79_v14, %v5226_v2  ;;  %v86_v22 = vpack.i.b16 %v75_v13, %v75_v13  ;;  %v77_v23 = vcombine.high %v75_v13, %v75_v13  ;;  %v93_v24 = vpack.i.b16 %v76_v15, %v76_v15  ;;  %v694_v26 = vld [vmem:[#allocation2 + $0xfc0] sm:$0xff] }
  0x41   :  { %v152_v27 = vrot.slane %v147_v19, %v5226_v2  ;;  %v154_v28 = vpack.i.b16 %v143_v18, %v143_v18  ;;  %v145_v29 = vcombine.high %v143_v18, %v143_v18  ;;  %v161_v30 = vpack.i.b16 %v144_v20, %v144_v20  ;;  %v50_v35 = vld [vmem:[%s5533_s0] sm:$0xff]  ;;  %3376 = vmatprep.subr.bf16.mxu0 %v4819_v31 }
  0x42   :  { %v91_v32 = vrot.slane %v86_v22, %v5226_v2  ;;  %v98_v33 = vrot.slane %v93_v24, %v5226_v2  ;;  %v100_v34 = vpack.i.b16 %v77_v23, %v77_v23  ;;  %v5075_v39 = vcombine.high %v686_v25, %v694_v26  ;;  %v414_v40 = vld [vmem:[#allocation2 + $0x700] sm:$0xff] }
  0x43   :  { %v159_v36 = vrot.slane %v154_v28, %v5226_v2  ;;  %v166_v37 = vrot.slane %v161_v30, %v5226_v2  ;;  %v168_v38 = vpack.i.b16 %v145_v29, %v145_v29  ;;  %v422_v41 = vld [vmem:[#allocation2 + $0x740] sm:$0xff]  ;;  %v4818_v50 = vcombine.low %v430_v16, %v438_v17 }
  0x44   :  { %v4569_v42 = vcombine.low %v84_v21, %v91_v32  ;;  %v105_v43 = vrot.slane %v100_v34, %v5226_v2  ;;  %v670_v45 = vld [vmem:[#allocation2 + $0xf00] sm:$0xff]  ;;  %v5074_v53 = vcombine.low %v686_v25, %v694_v26  ;;  %v4803_v54 = vcombine.high %v414_v40, %v422_v41  ;;  %3417 = vmatprep.subr.bf16.mxu1 %v5075_v39 }
  0x45   :  { %v678_v46 = vld [vmem:[#allocation2 + $0xf40] sm:$0xff]  ;;  %v4572_v47 = vcombine.low %v152_v27, %v159_v36  ;;  %v173_v49 = vrot.slane %v168_v38, %v5226_v2  ;;  %3377 = vmatpush2.bf16.msra.mxu0 %v4818_v50  ;;  %v4802_v0 = vcombine.low %v414_v40, %v422_v41 }
  0x46   :  { %v118_v51 = vmul.bf16 %v4569_v42, %v50_v35  ;;  %v4570_v52 = vcombine.low %v98_v33, %v105_v43  ;;  %v5059_v57 = vcombine.high %v670_v45, %v678_v46  ;;  %v398_v58 = vld [vmem:[#allocation2 + $0x680] sm:$0xff]  ;;  %3418 = vmatpush2.bf16.msra.mxu1 %v5074_v53  ;;  %3378 = vmatprep.subr.bf16.mxu0 %v4803_v54  ;;  %v311_v53 = vld [vmem:[#allocation2 + $0x3c8] sm:$0xff] }
  0x47   :  { %v4573_v56 = vcombine.low %v166_v37, %v173_v49  ;;  %v406_v59 = vld [vmem:[#allocation2 + $0x6c0] sm:$0xff]  ;;  %v5058_v5 = vcombine.low %v670_v45, %v678_v46  ;;  %v559_v54 = vld [vmem:[#allocation2 + $0xb88] sm:$0xff] }
  0x48   :  { %v186_v60 = vadd.bf16 %v4572_v47, %v118_v51  ;;  %v119_v61 = vmul.bf16 %v4570_v52, %v51_v48  ;;  %v654_v62 = vld [vmem:[#allocation2 + $0xe80] sm:$0xff]  ;;  %v4787_v6 = vcombine.high %v398_v58, %v406_v59  ;;  %3419 = vmatprep.subr.bf16.mxu1 %v5059_v57  ;;  %v4786_v14 = vcombine.low %v398_v58, %v406_v59  ;;  %v303_v52 = vld [vmem:[#allocation2 + $0x388] sm:$0xff] }
  0x49   :  { %v662_v63 = vld [vmem:[#allocation2 + $0xec0] sm:$0xff]  ;;  %3379 = vmatpush2.bf16.msra.mxu0 %v4802_v0  ;;  %v4693_v59 = vcombine.high %v303_v52, %v311_v53  ;;  %v543_v0 = vld [vmem:[#allocation2 + $0xb08] sm:$0xff] }
  0x4a   :  { %v5257_v3 = vmax.bf16 %v5162_v1, %v186_v60  ;;  %v187_v4 = vadd.bf16 %v4573_v56, %v119_v61  ;;  %v5043_v7 = vcombine.high %v654_v62, %v662_v63  ;;  %v382_v8 = vld [vmem:[#allocation2 + $0x600] sm:$0xff]  ;;  %3420 = vmatpush2.bf16.msra.mxu1 %v5058_v5  ;;  %3380 = vmatprep.subr.bf16.mxu0 %v4787_v6  ;;  %v567_v56 = vld [vmem:[#allocation2 + $0xbc8] sm:$0xff] }
  0x4b   :  { %v390_v9 = vld [vmem:[#allocation2 + $0x640] sm:$0xff]  ;;  %v5042_v16 = vcombine.low %v654_v62, %v662_v63  ;;  %v4949_v60 = vcombine.high %v559_v54, %v567_v56  ;;  %v287_v61 = vld [vmem:[#allocation2 + $0x308] sm:$0xff]  ;;  %v4692_v5 = vcombine.low %v303_v52, %v311_v53  ;;  %v4948_v6 = vcombine.low %v559_v54, %v567_v56 }
  0x4c   :  { %v5261_v10 = vcombine.high %v5257_v3, %v5257_v3  ;;  %v5263_v11 = vmax.bf16 %v5162_v1, %v187_v4  ;;  %v638_v12 = vld [vmem:[#allocation2 + $0xe00] sm:$0xff]  ;;  %v4771_v17 = vcombine.high %v382_v8, %v390_v9  ;;  %3421 = vmatprep.subr.bf16.mxu1 %v5043_v7  ;;  %v4770_v23 = vcombine.low %v382_v8, %v390_v9  ;;  %v295_v62 = vld [vmem:[#allocation2 + $0x348] sm:$0xff] }
  0x4d   :  { %v646_v13 = vld [vmem:[#allocation2 + $0xe40] sm:$0xff]  ;;  %3381 = vmatpush2.bf16.msra.mxu0 %v4786_v14  ;;  %v5273_v63 = vcombine.low %v5257_v3, %v5257_v3  ;;  %v551_v1 = vld [vmem:[#allocation2 + $0xb48] sm:$0xff]  ;;  %v4677_v7 = vcombine.high %v287_v61, %v295_v62  ;;  %v4676_v14 = vcombine.low %v287_v61, %v295_v62 }
  0x4e   :  { %3392 = vmatprep.mubr.bf16.mxu0 %v5261_v10  ;;  %v5268_v15 = vcombine.high %v5263_v11, %v5263_v11  ;;  %v5027_v18 = vcombine.high %v638_v12, %v646_v13  ;;  %v366_v19 = vld [vmem:[#allocation2 + $0x580] sm:$0xff]  ;;  %3422 = vmatpush2.bf16.msra.mxu1 %v5042_v16  ;;  %v5026_v24 = vcombine.low %v638_v12, %v646_v13  ;;  %v271_v9 = vld [vmem:[#allocation2 + $0x288] sm:$0xff] }
  0x4f   :  { %v374_v20 = vld [vmem:[#allocation2 + $0x5c0] sm:$0xff]  ;;  %3382 = vmatprep.subr.bf16.mxu0 %v4771_v17  ;;  %v5277_v4 = vcombine.low %v5263_v11, %v5263_v11  ;;  %v4933_v8 = vcombine.high %v543_v0, %v551_v1  ;;  %v279_v12 = vld [vmem:[#allocation2 + $0x2c8] sm:$0xff]  ;;  %v4932_v11 = vcombine.low %v543_v0, %v551_v1 }
  0x50   :  { %3433 = vmatprep.mubr.bf16.mxu1 %v5268_v15  ;;  %v622_v21 = vld [vmem:[#allocation2 + $0xd80] sm:$0xff]  ;;  %v4755_v25 = vcombine.high %v366_v19, %v374_v20  ;;  %3423 = vmatprep.subr.bf16.mxu1 %v5027_v18  ;;  %v4754_v31 = vcombine.low %v366_v19, %v374_v20  ;;  %v527_v3 = vld [vmem:[#allocation2 + $0xa88] sm:$0xff]  ;;  %v4661_v16 = vcombine.high %v271_v9, %v279_v12 }
  0x51   :  { %v630_v22 = vld [vmem:[#allocation2 + $0xdc0] sm:$0xff]  ;;  %3383 = vmatpush2.bf16.msra.mxu0 %v4770_v23  ;;  %v535_v13 = vld [vmem:[#allocation2 + $0xac8] sm:$0xff] }
  0x52   :  { %v5011_v26 = vcombine.high %v622_v21, %v630_v22  ;;  %v350_v27 = vld [vmem:[#allocation2 + $0x500] sm:$0xff]  ;;  %3424 = vmatpush2.bf16.msra.mxu1 %v5026_v24  ;;  %3384 = vmatprep.subr.bf16.mxu0 %v4755_v25  ;;  %v5010_v32 = vcombine.low %v622_v21, %v630_v22  ;;  %v4917_v17 = vcombine.high %v527_v3, %v535_v13  ;;  %v255_v18 = vld [vmem:[#allocation2 + $0x208] sm:$0xff] }
  0x53   :  { %v358_v28 = vld [vmem:[#allocation2 + $0x540] sm:$0xff]  ;;  %v263_v19 = vld [vmem:[#allocation2 + $0x248] sm:$0xff]  ;;  %v4660_v22 = vcombine.low %v271_v9, %v279_v12  ;;  %v4916_v23 = vcombine.low %v527_v3, %v535_v13 }
  0x54   :  { %v606_v29 = vld [vmem:[#allocation2 + $0xd00] sm:$0xff]  ;;  %v4739_v33 = vcombine.high %v350_v27, %v358_v28  ;;  %3425 = vmatprep.subr.bf16.mxu1 %v5011_v26  ;;  %v4738_v39 = vcombine.low %v350_v27, %v358_v28  ;;  %v511_v20 = vld [vmem:[#allocation2 + $0xa08] sm:$0xff]  ;;  %v4645_v24 = vcombine.high %v255_v18, %v263_v19 }
  0x55   :  { %v614_v30 = vld [vmem:[#allocation2 + $0xd40] sm:$0xff]  ;;  %3385 = vmatpush2.bf16.msra.mxu0 %v4754_v31  ;;  %v519_v21 = vld [vmem:[#allocation2 + $0xa48] sm:$0xff] }
  0x56   :  { %v4995_v34 = vcombine.high %v606_v29, %v614_v30  ;;  %v334_v35 = vld [vmem:[#allocation2 + $0x480] sm:$0xff]  ;;  %3426 = vmatpush2.bf16.msra.mxu1 %v5010_v32  ;;  %3386 = vmatprep.subr.bf16.mxu0 %v4739_v33  ;;  %v4994_v40 = vcombine.low %v606_v29, %v614_v30  ;;  %v4901_v25 = vcombine.high %v511_v20, %v519_v21  ;;  %v239_v26 = vld [vmem:[#allocation2 + $0x188] sm:$0xff] }
  0x57   :  { %v342_v36 = vld [vmem:[#allocation2 + $0x4c0] sm:$0xff]  ;;  %v247_v27 = vld [vmem:[#allocation2 + $0x1c8] sm:$0xff]  ;;  %v4644_v30 = vcombine.low %v255_v18, %v263_v19  ;;  %v4900_v31 = vcombine.low %v511_v20, %v519_v21 }
  0x58   :  { %v590_v37 = vld [vmem:[#allocation2 + $0xc80] sm:$0xff]  ;;  %v4723_v41 = vcombine.high %v334_v35, %v342_v36  ;;  %3427 = vmatprep.subr.bf16.mxu1 %v4995_v34  ;;  %v4722_v48 = vcombine.low %v334_v35, %v342_v36  ;;  %v495_v28 = vld [vmem:[#allocation2 + $0x988] sm:$0xff]  ;;  %v4629_v32 = vcombine.high %v239_v26, %v247_v27 }
  0x59   :  { %v598_v38 = vld [vmem:[#allocation2 + $0xcc0] sm:$0xff]  ;;  %3387 = vmatpush2.bf16.msra.mxu0 %v4738_v39  ;;  %v503_v29 = vld [vmem:[#allocation2 + $0x9c8] sm:$0xff] }
  0x5a   :  { %v4979_v42 = vcombine.high %v590_v37, %v598_v38  ;;  %v318_v43 = vld [vmem:[#allocation2 + $0x400] sm:$0xff]  ;;  %3428 = vmatpush2.bf16.msra.mxu1 %v4994_v40  ;;  %3388 = vmatprep.subr.bf16.mxu0 %v4723_v41  ;;  %v4978_v49 = vcombine.low %v590_v37, %v598_v38  ;;  %v4885_v33 = vcombine.high %v495_v28, %v503_v29  ;;  %v223_v34 = vld [vmem:[#allocation2 + $0x108] sm:$0xff] }
  0x5b   :  { %v326_v45 = vld [vmem:[#allocation2 + $0x440] sm:$0xff]  ;;  %v231_v35 = vld [vmem:[#allocation2 + $0x148] sm:$0xff]  ;;  %v4628_v38 = vcombine.low %v239_v26, %v247_v27  ;;  %v4884_v39 = vcombine.low %v495_v28, %v503_v29 }
  0x5c   :  { %v574_v46 = vld [vmem:[#allocation2 + $0xc00] sm:$0xff]  ;;  %v4707_v50 = vcombine.high %v318_v43, %v326_v45  ;;  %3429 = vmatprep.subr.bf16.mxu1 %v4979_v42  ;;  %v4706_v57 = vcombine.low %v318_v43, %v326_v45  ;;  %v479_v36 = vld [vmem:[#allocation2 + $0x908] sm:$0xff]  ;;  %v4613_v40 = vcombine.high %v223_v34, %v231_v35 }
  0x5d   :  { %v582_v47 = vld [vmem:[#allocation2 + $0xc40] sm:$0xff]  ;;  %3389 = vmatpush2.bf16.msra.mxu0 %v4722_v48  ;;  %v487_v37 = vld [vmem:[#allocation2 + $0x948] sm:$0xff] }
  0x5e   :  { %v4963_v51 = vcombine.high %v574_v46, %v582_v47  ;;  %3430 = vmatpush2.bf16.msra.mxu1 %v4978_v49  ;;  %3390 = vmatprep.subr.bf16.mxu0 %v4707_v50  ;;  %v4962_v58 = vcombine.low %v574_v46, %v582_v47  ;;  %v4869_v41 = vcombine.high %v479_v36, %v487_v37  ;;  %v207_v42 = vld [vmem:[#allocation2 + $0x88] sm:$0xff] }
  0x5f   :  { %v215_v43 = vld [vmem:[#allocation2 + $0xc8] sm:$0xff]  ;;  %v4612_v47 = vcombine.low %v223_v34, %v231_v35  ;;  %v4868_v48 = vcombine.low %v479_v36, %v487_v37 }
  0x60   :  { %3431 = vmatprep.subr.bf16.mxu1 %v4963_v51  ;;  %v463_v45 = vld [vmem:[#allocation2 + $0x888] sm:$0xff]  ;;  %v4597_v49 = vcombine.high %v207_v42, %v215_v43  ;;  %v4596_v56 = vcombine.low %v207_v42, %v215_v43 }
  0x61   :  { %3391 = vmatpush2.bf16.msra.mxu0 %v4706_v57  ;;  %v471_v46 = vld [vmem:[#allocation2 + $0x8c8] sm:$0xff] }
  0x62   :  { %3432 = vmatpush2.bf16.msra.mxu1 %v4962_v58  ;;  %3442 = vmatprep.subr.bf16.mxu0 %v4693_v59  ;;  %v4853_v50 = vcombine.high %v463_v45, %v471_v46  ;;  %v191_v51 = vld [vmem:[#allocation2 + $0x8] sm:$0xff]  ;;  %v4852_v57 = vcombine.low %v463_v45, %v471_v46 }
  0x63   :  { %3483 = vmatprep.subr.bf16.mxu1 %v4949_v60  ;;  %v199_v52 = vld [vmem:[#allocation2 + $0x48] sm:$0xff] }
  0x64   :  { %3393 = vmatmul.mubr.bf16.vlgmr.msra.gmra.mxu0 %v5273_v63  ;;  %v447_v53 = vld [vmem:[#allocation2 + $0x808] sm:$0xff]  ;;  %v4581_v58 = vcombine.high %v191_v51, %v199_v52  ;;  %v4580_v1 = vcombine.low %v191_v51, %v199_v52 }
  0x65   :  { %3434 = vmatmul.mubr.bf16.vlgmr.msra.gmra.mxu1 %v5277_v4  ;;  %3443 = vmatpush1.bf16.msra.mxu0 %v4692_v5  ;;  %v455_v54 = vld [vmem:[#allocation2 + $0x848] sm:$0xff] }
  0x66   :  { %3484 = vmatpush1.bf16.msra.mxu1 %v4948_v6  ;;  %3444 = vmatprep.subr.bf16.mxu0 %v4677_v7  ;;  %v4837_v59 = vcombine.high %v447_v53, %v455_v54  ;;  %v431_v60 = vld [vmem:[#allocation2 + $0x788] sm:$0xff]  ;;  %v4836_v5 = vcombine.low %v447_v53, %v455_v54 }
  0x67   :  { %3485 = vmatprep.subr.bf16.mxu1 %v4933_v8  ;;  %3474 = vmatprep.mubr.bf16.mxu0 %v5261_v10  ;;  %v439_v61 = vld [vmem:[#allocation2 + $0x7c8] sm:$0xff] }
  0x68   :  { %3515 = vmatprep.mubr.bf16.mxu1 %v5268_v15  ;;  %v687_v62 = vld [vmem:[#allocation2 + $0xf88] sm:$0xff]  ;;  %v4821_v6 = vcombine.high %v431_v60, %v439_v61  ;;  %v4820_v13 = vcombine.low %v431_v60, %v439_v61 }
  0x69   :  { %3445 = vmatpush1.bf16.msra.mxu0 %v4676_v14  ;;  %v695_v0 = vld [vmem:[#allocation2 + $0xfc8] sm:$0xff] }
  0x6a   :  { %3486 = vmatpush1.bf16.msra.mxu1 %v4932_v11  ;;  %3446 = vmatprep.subr.bf16.mxu0 %v4661_v16  ;;  %v5077_v7 = vcombine.high %v687_v62, %v695_v0  ;;  %v415_v8 = vld [vmem:[#allocation2 + $0x708] sm:$0xff]  ;;  %v5076_v14 = vcombine.low %v687_v62, %v695_v0 }
  0x6b   :  { %3487 = vmatprep.subr.bf16.mxu1 %v4917_v17  ;;  %v423_v9 = vld [vmem:[#allocation2 + $0x748] sm:$0xff] }
  0x6c   :  { %v671_v12 = vld [vmem:[#allocation2 + $0xf08] sm:$0xff]  ;;  %v4805_v11 = vcombine.high %v415_v8, %v423_v9  ;;  %v4804_v21 = vcombine.low %v415_v8, %v423_v9  ;;  %v312_v8 = vld [vmem:[#allocation2 + $0x3d0] sm:$0xff] }
  0x6d   :  { %3447 = vmatpush1.bf16.msra.mxu0 %v4660_v22  ;;  %v679_v3 = vld [vmem:[#allocation2 + $0xf48] sm:$0xff]  ;;  %v560_v9 = vld [vmem:[#allocation2 + $0xb90] sm:$0xff] }
  0x6e   :  { %3488 = vmatpush1.bf16.msra.mxu1 %v4916_v23  ;;  %3448 = vmatprep.subr.bf16.mxu0 %v4645_v24  ;;  %v5061_v16 = vcombine.high %v671_v12, %v679_v3  ;;  %v399_v17 = vld [vmem:[#allocation2 + $0x688] sm:$0xff]  ;;  %v5060_v22 = vcombine.low %v671_v12, %v679_v3  ;;  %v568_v12 = vld [vmem:[#allocation2 + $0xbd0] sm:$0xff] }
  0x6f   :  { %3489 = vmatprep.subr.bf16.mxu1 %v4901_v25  ;;  %v407_v18 = vld [vmem:[#allocation2 + $0x6c8] sm:$0xff] }
  0x70   :  { %v655_v19 = vld [vmem:[#allocation2 + $0xe88] sm:$0xff]  ;;  %v4789_v23 = vcombine.high %v399_v17, %v407_v18  ;;  %v4788_v29 = vcombine.low %v399_v17, %v407_v18  ;;  %v296_v17 = vld [vmem:[#allocation2 + $0x350] sm:$0xff] }
  0x71   :  { %3449 = vmatpush1.bf16.msra.mxu0 %v4644_v30  ;;  %v663_v20 = vld [vmem:[#allocation2 + $0xec8] sm:$0xff]  ;;  %v544_v18 = vld [vmem:[#allocation2 + $0xb10] sm:$0xff] }
  0x72   :  { %3490 = vmatpush1.bf16.msra.mxu1 %v4900_v31  ;;  %3450 = vmatprep.subr.bf16.mxu0 %v4629_v32  ;;  %v5045_v24 = vcombine.high %v655_v19, %v663_v20  ;;  %v383_v25 = vld [vmem:[#allocation2 + $0x608] sm:$0xff]  ;;  %v5044_v30 = vcombine.low %v655_v19, %v663_v20  ;;  %v552_v19 = vld [vmem:[#allocation2 + $0xb50] sm:$0xff] }
  0x73   :  { %3491 = vmatprep.subr.bf16.mxu1 %v4885_v33  ;;  %v391_v26 = vld [vmem:[#allocation2 + $0x648] sm:$0xff] }
  0x74   :  { %v639_v27 = vld [vmem:[#allocation2 + $0xe08] sm:$0xff]  ;;  %v4773_v31 = vcombine.high %v383_v25, %v391_v26  ;;  %v4772_v37 = vcombine.low %v383_v25, %v391_v26  ;;  %v280_v25 = vld [vmem:[#allocation2 + $0x2d0] sm:$0xff] }
  0x75   :  { %3451 = vmatpush1.bf16.msra.mxu0 %v4628_v38  ;;  %v647_v28 = vld [vmem:[#allocation2 + $0xe48] sm:$0xff]  ;;  %v528_v26 = vld [vmem:[#allocation2 + $0xa90] sm:$0xff] }
  0x76   :  { %3492 = vmatpush1.bf16.msra.mxu1 %v4884_v39  ;;  %3452 = vmatprep.subr.bf16.mxu0 %v4613_v40  ;;  %v5029_v32 = vcombine.high %v639_v27, %v647_v28  ;;  %v367_v33 = vld [vmem:[#allocation2 + $0x588] sm:$0xff]  ;;  %v5028_v38 = vcombine.low %v639_v27, %v647_v28  ;;  %v536_v27 = vld [vmem:[#allocation2 + $0xad0] sm:$0xff] }
  0x77   :  { %3493 = vmatprep.subr.bf16.mxu1 %v4869_v41  ;;  %v375_v34 = vld [vmem:[#allocation2 + $0x5c8] sm:$0xff] }
  0x78   :  { %v623_v35 = vld [vmem:[#allocation2 + $0xd88] sm:$0xff]  ;;  %v4757_v39 = vcombine.high %v367_v33, %v375_v34  ;;  %v4756_v46 = vcombine.low %v367_v33, %v375_v34  ;;  %v264_v33 = vld [vmem:[#allocation2 + $0x250] sm:$0xff] }
  0x79   :  { %3453 = vmatpush1.bf16.msra.mxu0 %v4612_v47  ;;  %v631_v36 = vld [vmem:[#allocation2 + $0xdc8] sm:$0xff]  ;;  %v512_v34 = vld [vmem:[#allocation2 + $0xa10] sm:$0xff] }
  0x7a   :  { %3494 = vmatpush1.bf16.msra.mxu1 %v4868_v48  ;;  %3454 = vmatprep.subr.bf16.mxu0 %v4597_v49  ;;  %v5013_v40 = vcombine.high %v623_v35, %v631_v36  ;;  %v351_v41 = vld [vmem:[#allocation2 + $0x508] sm:$0xff]  ;;  %v5012_v47 = vcombine.low %v623_v35, %v631_v36  ;;  %v520_v35 = vld [vmem:[#allocation2 + $0xa50] sm:$0xff] }
  0x7b   :  { %3495 = vmatprep.subr.bf16.mxu1 %v4853_v50  ;;  %v359_v42 = vld [vmem:[#allocation2 + $0x548] sm:$0xff] }
  0x7c   :  { %v607_v43 = vld [vmem:[#allocation2 + $0xd08] sm:$0xff]  ;;  %v4741_v48 = vcombine.high %v351_v41, %v359_v42  ;;  %v4740_v54 = vcombine.low %v351_v41, %v359_v42  ;;  %v248_v41 = vld [vmem:[#allocation2 + $0x1d0] sm:$0xff] }
  0x7d   :  { %3455 = vmatpush1.bf16.msra.mxu0 %v4596_v56  ;;  %v615_v45 = vld [vmem:[#allocation2 + $0xd48] sm:$0xff]  ;;  %v496_v42 = vld [vmem:[#allocation2 + $0x990] sm:$0xff] }
  0x7e   :  { %3496 = vmatpush1.bf16.msra.mxu1 %v4852_v57  ;;  %3456 = vmatprep.subr.bf16.mxu0 %v4581_v58  ;;  %v4997_v49 = vcombine.high %v607_v43, %v615_v45  ;;  %v335_v50 = vld [vmem:[#allocation2 + $0x488] sm:$0xff]  ;;  %v4996_v56 = vcombine.low %v607_v43, %v615_v45  ;;  %v504_v43 = vld [vmem:[#allocation2 + $0x9d0] sm:$0xff] }
  0x7f   :  { %3497 = vmatprep.subr.bf16.mxu1 %v4837_v59  ;;  %v343_v51 = vld [vmem:[#allocation2 + $0x4c8] sm:$0xff] }
  0x80   :  { %v591_v52 = vld [vmem:[#allocation2 + $0xc88] sm:$0xff]  ;;  %v4725_v57 = vcombine.high %v335_v50, %v343_v51  ;;  %v4724_v0 = vcombine.low %v335_v50, %v343_v51  ;;  %v232_v50 = vld [vmem:[#allocation2 + $0x150] sm:$0xff] }
  0x81   :  { %3457 = vmatpush1.bf16.msra.mxu0 %v4580_v1  ;;  %v599_v53 = vld [vmem:[#allocation2 + $0xcc8] sm:$0xff]  ;;  %v480_v51 = vld [vmem:[#allocation2 + $0x910] sm:$0xff] }
  0x82   :  { %3498 = vmatpush1.bf16.msra.mxu1 %v4836_v5  ;;  %3458 = vmatprep.subr.bf16.mxu0 %v4821_v6  ;;  %v4981_v58 = vcombine.high %v591_v52, %v599_v53  ;;  %v319_v59 = vld [vmem:[#allocation2 + $0x408] sm:$0xff]  ;;  %v4980_v1 = vcombine.low %v591_v52, %v599_v53  ;;  %v488_v52 = vld [vmem:[#allocation2 + $0x950] sm:$0xff] }
  0x83   :  { %3499 = vmatprep.subr.bf16.mxu1 %v5077_v7  ;;  %v327_v60 = vld [vmem:[#allocation2 + $0x448] sm:$0xff]  ;;  %v304_v7 = vld [vmem:[#allocation2 + $0x390] sm:$0xff] }
  0x84   :  { %v575_v61 = vld [vmem:[#allocation2 + $0xc08] sm:$0xff]  ;;  %v4709_v5 = vcombine.high %v319_v59, %v327_v60  ;;  %v4708_v3 = vcombine.low %v319_v59, %v327_v60  ;;  %v4694_v20 = vcombine.low %v304_v7, %v312_v8  ;;  %v216_v59 = vld [vmem:[#allocation2 + $0xd0] sm:$0xff] }
  0x85   :  { %3459 = vmatpush2.bf16.msra.mxu0 %v4820_v13  ;;  %v583_v62 = vld [vmem:[#allocation2 + $0xc48] sm:$0xff]  ;;  %v464_v60 = vld [vmem:[#allocation2 + $0x890] sm:$0xff] }
  0x86   :  { %3500 = vmatpush2.bf16.msra.mxu1 %v5076_v14  ;;  %3460 = vmatprep.subr.bf16.mxu0 %v4805_v11  ;;  %v4965_v6 = vcombine.high %v575_v61, %v583_v62  ;;  %v4964_v13 = vcombine.low %v575_v61, %v583_v62  ;;  %v4695_v14 = vcombine.high %v304_v7, %v312_v8  ;;  %v472_v61 = vld [vmem:[#allocation2 + $0x8d0] sm:$0xff] }
  0x87   :  { %3501 = vmatprep.subr.bf16.mxu1 %v5061_v16  ;;  %v4951_v11 = vcombine.high %v560_v9, %v568_v12  ;;  %v288_v16 = vld [vmem:[#allocation2 + $0x310] sm:$0xff] }
  0x88   :  { %v4678_v28 = vcombine.low %v288_v16, %v296_v17  ;;  %v200_v7 = vld [vmem:[#allocation2 + $0x50] sm:$0xff] }
  0x89   :  { %3461 = vmatpush2.bf16.msra.mxu0 %v4804_v21  ;;  %v4950_v21 = vcombine.low %v560_v9, %v568_v12  ;;  %v448_v8 = vld [vmem:[#allocation2 + $0x810] sm:$0xff] }
  0x8a   :  { %3502 = vmatpush2.bf16.msra.mxu1 %v5060_v22  ;;  %3462 = vmatprep.subr.bf16.mxu0 %v4789_v23  ;;  %v4679_v22 = vcombine.high %v288_v16, %v296_v17  ;;  %v4935_v23 = vcombine.high %v544_v18, %v552_v19  ;;  %v456_v9 = vld [vmem:[#allocation2 + $0x850] sm:$0xff] }
  0x8b   :  { %3503 = vmatprep.subr.bf16.mxu1 %v5045_v24  ;;  %v272_v24 = vld [vmem:[#allocation2 + $0x290] sm:$0xff] }
  0x8c   :  { %v4662_v36 = vcombine.low %v272_v24, %v280_v25  ;;  %v440_v16 = vld [vmem:[#allocation2 + $0x7d0] sm:$0xff] }
  0x8d   :  { %3463 = vmatpush2.bf16.msra.mxu0 %v4788_v29  ;;  %v4934_v29 = vcombine.low %v544_v18, %v552_v19  ;;  %v688_v17 = vld [vmem:[#allocation2 + $0xf90] sm:$0xff] }
  0x8e   :  { %3504 = vmatpush2.bf16.msra.mxu1 %v5044_v30  ;;  %3464 = vmatprep.subr.bf16.mxu0 %v4773_v31  ;;  %v4663_v30 = vcombine.high %v272_v24, %v280_v25  ;;  %v4919_v31 = vcombine.high %v528_v26, %v536_v27  ;;  %v696_v18 = vld [vmem:[#allocation2 + $0xfd0] sm:$0xff] }
  0x8f   :  { %3505 = vmatprep.subr.bf16.mxu1 %v5029_v32  ;;  %v256_v32 = vld [vmem:[#allocation2 + $0x210] sm:$0xff] }
  0x90   :  { %v4646_v45 = vcombine.low %v256_v32, %v264_v33  ;;  %v424_v24 = vld [vmem:[#allocation2 + $0x750] sm:$0xff] }
  0x91   :  { %3465 = vmatpush2.bf16.msra.mxu0 %v4772_v37  ;;  %v4918_v37 = vcombine.low %v528_v26, %v536_v27  ;;  %v672_v25 = vld [vmem:[#allocation2 + $0xf10] sm:$0xff] }
  0x92   :  { %3506 = vmatpush2.bf16.msra.mxu1 %v5028_v38  ;;  %3466 = vmatprep.subr.bf16.mxu0 %v4757_v39  ;;  %v4647_v38 = vcombine.high %v256_v32, %v264_v33  ;;  %v4903_v39 = vcombine.high %v512_v34, %v520_v35  ;;  %v680_v26 = vld [vmem:[#allocation2 + $0xf50] sm:$0xff] }
  0x93   :  { %3507 = vmatprep.subr.bf16.mxu1 %v5013_v40  ;;  %v240_v40 = vld [vmem:[#allocation2 + $0x190] sm:$0xff] }
  0x94   :  { %v4630_v53 = vcombine.low %v240_v40, %v248_v41  ;;  %v408_v32 = vld [vmem:[#allocation2 + $0x6d0] sm:$0xff] }
  0x95   :  { %3467 = vmatpush2.bf16.msra.mxu0 %v4756_v46  ;;  %v4902_v46 = vcombine.low %v512_v34, %v520_v35  ;;  %v656_v33 = vld [vmem:[#allocation2 + $0xe90] sm:$0xff] }
  0x96   :  { %3508 = vmatpush2.bf16.msra.mxu1 %v5012_v47  ;;  %3468 = vmatprep.subr.bf16.mxu0 %v4741_v48  ;;  %v4631_v47 = vcombine.high %v240_v40, %v248_v41  ;;  %v4887_v48 = vcombine.high %v496_v42, %v504_v43  ;;  %v664_v34 = vld [vmem:[#allocation2 + $0xed0] sm:$0xff] }
  0x97   :  { %3509 = vmatprep.subr.bf16.mxu1 %v4997_v49  ;;  %v224_v49 = vld [vmem:[#allocation2 + $0x110] sm:$0xff] }
  0x98   :  { %v4614_v62 = vcombine.low %v224_v49, %v232_v50  ;;  %v392_v40 = vld [vmem:[#allocation2 + $0x650] sm:$0xff] }
  0x99   :  { %3469 = vmatpush2.bf16.msra.mxu0 %v4740_v54  ;;  %v4886_v54 = vcombine.low %v496_v42, %v504_v43  ;;  %v640_v41 = vld [vmem:[#allocation2 + $0xe10] sm:$0xff] }
  0x9a   :  { %3510 = vmatpush2.bf16.msra.mxu1 %v4996_v56  ;;  %3470 = vmatprep.subr.bf16.mxu0 %v4725_v57  ;;  %v4615_v56 = vcombine.high %v224_v49, %v232_v50  ;;  %v4871_v57 = vcombine.high %v480_v51, %v488_v52  ;;  %v648_v42 = vld [vmem:[#allocation2 + $0xe50] sm:$0xff] }
  0x9b   :  { %3511 = vmatprep.subr.bf16.mxu1 %v4981_v58  ;;  %v208_v58 = vld [vmem:[#allocation2 + $0x90] sm:$0xff] }
  0x9c   :  { %v4598_v12 = vcombine.low %v208_v58, %v216_v59  ;;  %v376_v49 = vld [vmem:[#allocation2 + $0x5d0] sm:$0xff] }
  0x9d   :  { %3471 = vmatpush2.bf16.msra.mxu0 %v4724_v0  ;;  %v4870_v0 = vcombine.low %v480_v51, %v488_v52  ;;  %v624_v50 = vld [vmem:[#allocation2 + $0xd90] sm:$0xff] }
  0x9e   :  { %3512 = vmatpush2.bf16.msra.mxu1 %v4980_v1  ;;  %3472 = vmatprep.subr.bf16.mxu0 %v4709_v5  ;;  %v4599_v1 = vcombine.high %v208_v58, %v216_v59  ;;  %v4855_v5 = vcombine.high %v464_v60, %v472_v61  ;;  %v632_v51 = vld [vmem:[#allocation2 + $0xdd0] sm:$0xff] }
  0x9f   :  { %3513 = vmatprep.subr.bf16.mxu1 %v4965_v6  ;;  %v192_v6 = vld [vmem:[#allocation2 + $0x10] sm:$0xff] }
  0xa0   :  { %v4582_v19 = vcombine.low %v192_v6, %v200_v7  ;;  %v360_v58 = vld [vmem:[#allocation2 + $0x550] sm:$0xff] }
  0xa1   :  { %3473 = vmatpush2.bf16.msra.mxu0 %v4708_v3  ;;  %v4854_v3 = vcombine.low %v464_v60, %v472_v61  ;;  %v608_v59 = vld [vmem:[#allocation2 + $0xd10] sm:$0xff] }
  0xa2   :  { %3514 = vmatpush2.bf16.msra.mxu1 %v4964_v13  ;;  %3524 = vmatprep.subr.bf16.mxu0 %v4695_v14  ;;  %v4583_v13 = vcombine.high %v192_v6, %v200_v7  ;;  %v4839_v14 = vcombine.high %v448_v8, %v456_v9  ;;  %v616_v60 = vld [vmem:[#allocation2 + $0xd50] sm:$0xff] }
  0xa3   :  { %3565 = vmatprep.subr.bf16.mxu1 %v4951_v11  ;;  %v432_v11 = vld [vmem:[#allocation2 + $0x790] sm:$0xff] }
  0xa4   :  { %3475 = vmatmul.mubr.bf16.vlgmr.msra.gmra.mxu0 %v5273_v63  ;;  %v4822_v27 = vcombine.low %v432_v11, %v440_v16  ;;  %v344_v6 = vld [vmem:[#allocation2 + $0x4d0] sm:$0xff] }
  0xa5   :  { %3516 = vmatmul.mubr.bf16.vlgmr.msra.gmra.mxu1 %v5277_v4  ;;  %3525 = vmatpush1.bf16.msra.mxu0 %v4694_v20  ;;  %v4838_v20 = vcombine.low %v448_v8, %v456_v9  ;;  %v592_v7 = vld [vmem:[#allocation2 + $0xc90] sm:$0xff] }
  0xa6   :  { %3566 = vmatpush1.bf16.msra.mxu1 %v4950_v21  ;;  %3526 = vmatprep.subr.bf16.mxu0 %v4679_v22  ;;  %v4823_v21 = vcombine.high %v432_v11, %v440_v16  ;;  %v5079_v22 = vcombine.high %v688_v17, %v696_v18  ;;  %v600_v8 = vld [vmem:[#allocation2 + $0xcd0] sm:$0xff] }
  0xa7   :  { %3567 = vmatprep.subr.bf16.mxu1 %v4935_v23  ;;  %3556 = vmatprep.mubr.bf16.mxu0 %v5261_v10  ;;  %v416_v23 = vld [vmem:[#allocation2 + $0x710] sm:$0xff] }
  0xa8   :  { %3597 = vmatprep.mubr.bf16.mxu1 %v5268_v15  ;;  %v4806_v35 = vcombine.low %v416_v23, %v424_v24  ;;  %v328_v11 = vld [vmem:[#allocation2 + $0x450] sm:$0xff] }
  0xa9   :  { %3527 = vmatpush1.bf16.msra.mxu0 %v4678_v28  ;;  %v5078_v28 = vcombine.low %v688_v17, %v696_v18  ;;  %v576_v16 = vld [vmem:[#allocation2 + $0xc10] sm:$0xff] }
  0xaa   :  { %3568 = vmatpush1.bf16.msra.mxu1 %v4934_v29  ;;  %3528 = vmatprep.subr.bf16.mxu0 %v4663_v30  ;;  %v4807_v29 = vcombine.high %v416_v23, %v424_v24  ;;  %v5063_v30 = vcombine.high %v672_v25, %v680_v26  ;;  %v584_v17 = vld [vmem:[#allocation2 + $0xc50] sm:$0xff]  ;;  %v313_v23 = vld [vmem:[#allocation2 + $0x3d8] sm:$0xff] }
  0xab   :  { %3569 = vmatprep.subr.bf16.mxu1 %v4919_v31  ;;  %v400_v31 = vld [vmem:[#allocation2 + $0x690] sm:$0xff]  ;;  %v561_v24 = vld [vmem:[#allocation2 + $0xb98] sm:$0xff] }
  0xac   :  { %v4790_v43 = vcombine.low %v400_v31, %v408_v32 }
  0xad   :  { %3529 = vmatpush1.bf16.msra.mxu0 %v4662_v36  ;;  %v5062_v36 = vcombine.low %v672_v25, %v680_v26  ;;  %v569_v25 = vld [vmem:[#allocation2 + $0xbd8] sm:$0xff] }
  0xae   :  { %3570 = vmatpush1.bf16.msra.mxu1 %v4918_v37  ;;  %3530 = vmatprep.subr.bf16.mxu0 %v4647_v38  ;;  %v4791_v37 = vcombine.high %v400_v31, %v408_v32  ;;  %v5047_v38 = vcombine.high %v656_v33, %v664_v34  ;;  %v297_v31 = vld [vmem:[#allocation2 + $0x358] sm:$0xff] }
  0xaf   :  { %3571 = vmatprep.subr.bf16.mxu1 %v4903_v39  ;;  %v384_v39 = vld [vmem:[#allocation2 + $0x610] sm:$0xff]  ;;  %v545_v32 = vld [vmem:[#allocation2 + $0xb18] sm:$0xff] }
  0xb0   :  { %v4774_v52 = vcombine.low %v384_v39, %v392_v40 }
  0xb1   :  { %3531 = vmatpush1.bf16.msra.mxu0 %v4646_v45  ;;  %v5046_v45 = vcombine.low %v656_v33, %v664_v34  ;;  %v553_v33 = vld [vmem:[#allocation2 + $0xb58] sm:$0xff] }
  0xb2   :  { %3572 = vmatpush1.bf16.msra.mxu1 %v4902_v46  ;;  %3532 = vmatprep.subr.bf16.mxu0 %v4631_v47  ;;  %v4775_v46 = vcombine.high %v384_v39, %v392_v40  ;;  %v5031_v47 = vcombine.high %v640_v41, %v648_v42  ;;  %v281_v39 = vld [vmem:[#allocation2 + $0x2d8] sm:$0xff] }
  0xb3   :  { %3573 = vmatprep.subr.bf16.mxu1 %v4887_v48  ;;  %v368_v48 = vld [vmem:[#allocation2 + $0x590] sm:$0xff]  ;;  %v529_v40 = vld [vmem:[#allocation2 + $0xa98] sm:$0xff] }
  0xb4   :  { %v4758_v61 = vcombine.low %v368_v48, %v376_v49 }
  0xb5   :  { %3533 = vmatpush1.bf16.msra.mxu0 %v4630_v53  ;;  %v5030_v53 = vcombine.low %v640_v41, %v648_v42  ;;  %v537_v41 = vld [vmem:[#allocation2 + $0xad8] sm:$0xff] }
  0xb6   :  { %3574 = vmatpush1.bf16.msra.mxu1 %v4886_v54  ;;  %3534 = vmatprep.subr.bf16.mxu0 %v4615_v56  ;;  %v4759_v54 = vcombine.high %v368_v48, %v376_v49  ;;  %v5015_v56 = vcombine.high %v624_v50, %v632_v51  ;;  %v265_v48 = vld [vmem:[#allocation2 + $0x258] sm:$0xff] }
  0xb7   :  { %3575 = vmatprep.subr.bf16.mxu1 %v4871_v57  ;;  %v352_v57 = vld [vmem:[#allocation2 + $0x510] sm:$0xff]  ;;  %v513_v49 = vld [vmem:[#allocation2 + $0xa18] sm:$0xff] }
  0xb8   :  { %v4742_v9 = vcombine.low %v352_v57, %v360_v58 }
  0xb9   :  { %3535 = vmatpush1.bf16.msra.mxu0 %v4614_v62  ;;  %v5014_v62 = vcombine.low %v624_v50, %v632_v51  ;;  %v521_v50 = vld [vmem:[#allocation2 + $0xa58] sm:$0xff] }
  0xba   :  { %3576 = vmatpush1.bf16.msra.mxu1 %v4870_v0  ;;  %3536 = vmatprep.subr.bf16.mxu0 %v4599_v1  ;;  %v4743_v0 = vcombine.high %v352_v57, %v360_v58  ;;  %v4999_v1 = vcombine.high %v608_v59, %v616_v60  ;;  %v249_v57 = vld [vmem:[#allocation2 + $0x1d8] sm:$0xff] }
  0xbb   :  { %3577 = vmatprep.subr.bf16.mxu1 %v4855_v5  ;;  %v336_v5 = vld [vmem:[#allocation2 + $0x490] sm:$0xff]  ;;  %v497_v58 = vld [vmem:[#allocation2 + $0x998] sm:$0xff] }
  0xbc   :  { %v4726_v18 = vcombine.low %v336_v5, %v344_v6 }
  0xbd   :  { %3537 = vmatpush1.bf16.msra.mxu0 %v4598_v12  ;;  %v4998_v12 = vcombine.low %v608_v59, %v616_v60  ;;  %v505_v59 = vld [vmem:[#allocation2 + $0x9d8] sm:$0xff] }
  0xbe   :  { %3578 = vmatpush1.bf16.msra.mxu1 %v4854_v3  ;;  %3538 = vmatprep.subr.bf16.mxu0 %v4583_v13  ;;  %v4727_v3 = vcombine.high %v336_v5, %v344_v6  ;;  %v4983_v13 = vcombine.high %v592_v7, %v600_v8  ;;  %v233_v5 = vld [vmem:[#allocation2 + $0x158] sm:$0xff] }
  0xbf   :  { %3579 = vmatprep.subr.bf16.mxu1 %v4839_v14  ;;  %v320_v14 = vld [vmem:[#allocation2 + $0x410] sm:$0xff]  ;;  %v481_v6 = vld [vmem:[#allocation2 + $0x918] sm:$0xff] }
  0xc0   :  { %v4710_v26 = vcombine.low %v320_v14, %v328_v11 }
  0xc1   :  { %3539 = vmatpush1.bf16.msra.mxu0 %v4582_v19  ;;  %v4982_v19 = vcombine.low %v592_v7, %v600_v8  ;;  %v489_v7 = vld [vmem:[#allocation2 + $0x958] sm:$0xff] }
  0xc2   :  { %3580 = vmatpush1.bf16.msra.mxu1 %v4838_v20  ;;  %3540 = vmatprep.subr.bf16.mxu0 %v4823_v21  ;;  %v4711_v20 = vcombine.high %v320_v14, %v328_v11  ;;  %v4967_v21 = vcombine.high %v576_v16, %v584_v17  ;;  %v217_v14 = vld [vmem:[#allocation2 + $0xd8] sm:$0xff] }
  0xc3   :  { %3581 = vmatprep.subr.bf16.mxu1 %v5079_v22  ;;  %v305_v22 = vld [vmem:[#allocation2 + $0x398] sm:$0xff] }
  0xc4   :  { %v4696_v34 = vcombine.low %v305_v22, %v313_v23  ;;  %v465_v11 = vld [vmem:[#allocation2 + $0x898] sm:$0xff] }
  0xc5   :  { %3541 = vmatpush2.bf16.msra.mxu0 %v4822_v27  ;;  %v4966_v27 = vcombine.low %v576_v16, %v584_v17  ;;  %v473_v16 = vld [vmem:[#allocation2 + $0x8d8] sm:$0xff] }
  0xc6   :  { %3582 = vmatpush2.bf16.msra.mxu1 %v5078_v28  ;;  %3542 = vmatprep.subr.bf16.mxu0 %v4807_v29  ;;  %v4697_v28 = vcombine.high %v305_v22, %v313_v23  ;;  %v4953_v29 = vcombine.high %v561_v24, %v569_v25  ;;  %v201_v22 = vld [vmem:[#allocation2 + $0x58] sm:$0xff] }
  0xc7   :  { %3583 = vmatprep.subr.bf16.mxu1 %v5063_v30  ;;  %v289_v30 = vld [vmem:[#allocation2 + $0x318] sm:$0xff] }
  0xc8   :  { %v4680_v42 = vcombine.low %v289_v30, %v297_v31  ;;  %v449_v23 = vld [vmem:[#allocation2 + $0x818] sm:$0xff] }
  0xc9   :  { %3543 = vmatpush2.bf16.msra.mxu0 %v4806_v35  ;;  %v4952_v35 = vcombine.low %v561_v24, %v569_v25  ;;  %v457_v24 = vld [vmem:[#allocation2 + $0x858] sm:$0xff] }
  0xca   :  { %3584 = vmatpush2.bf16.msra.mxu1 %v5062_v36  ;;  %3544 = vmatprep.subr.bf16.mxu0 %v4791_v37  ;;  %v4681_v36 = vcombine.high %v289_v30, %v297_v31  ;;  %v4937_v37 = vcombine.high %v545_v32, %v553_v33  ;;  %v441_v30 = vld [vmem:[#allocation2 + $0x7d8] sm:$0xff] }
  0xcb   :  { %3585 = vmatprep.subr.bf16.mxu1 %v5047_v38  ;;  %v273_v38 = vld [vmem:[#allocation2 + $0x298] sm:$0xff] }
  0xcc   :  { %v4664_v51 = vcombine.low %v273_v38, %v281_v39  ;;  %v689_v31 = vld [vmem:[#allocation2 + $0xf98] sm:$0xff] }
  0xcd   :  { %3545 = vmatpush2.bf16.msra.mxu0 %v4790_v43  ;;  %v4936_v43 = vcombine.low %v545_v32, %v553_v33  ;;  %v697_v32 = vld [vmem:[#allocation2 + $0xfd8] sm:$0xff] }
  0xce   :  { %3586 = vmatpush2.bf16.msra.mxu1 %v5046_v45  ;;  %3546 = vmatprep.subr.bf16.mxu0 %v4775_v46  ;;  %v4665_v45 = vcombine.high %v273_v38, %v281_v39  ;;  %v4921_v46 = vcombine.high %v529_v40, %v537_v41  ;;  %v425_v38 = vld [vmem:[#allocation2 + $0x758] sm:$0xff] }
  0xcf   :  { %3587 = vmatprep.subr.bf16.mxu1 %v5031_v47  ;;  %v257_v47 = vld [vmem:[#allocation2 + $0x218] sm:$0xff] }
  0xd0   :  { %v4648_v60 = vcombine.low %v257_v47, %v265_v48  ;;  %v673_v39 = vld [vmem:[#allocation2 + $0xf18] sm:$0xff] }
  0xd1   :  { %3547 = vmatpush2.bf16.msra.mxu0 %v4774_v52  ;;  %v4920_v52 = vcombine.low %v529_v40, %v537_v41  ;;  %v681_v40 = vld [vmem:[#allocation2 + $0xf58] sm:$0xff] }
  0xd2   :  { %3588 = vmatpush2.bf16.msra.mxu1 %v5030_v53  ;;  %3548 = vmatprep.subr.bf16.mxu0 %v4759_v54  ;;  %v4649_v53 = vcombine.high %v257_v47, %v265_v48  ;;  %v4905_v54 = vcombine.high %v513_v49, %v521_v50  ;;  %v409_v47 = vld [vmem:[#allocation2 + $0x6d8] sm:$0xff] }
  0xd3   :  { %3589 = vmatprep.subr.bf16.mxu1 %v5015_v56  ;;  %v241_v56 = vld [vmem:[#allocation2 + $0x198] sm:$0xff] }
  0xd4   :  { %v4632_v8 = vcombine.low %v241_v56, %v249_v57  ;;  %v657_v48 = vld [vmem:[#allocation2 + $0xe98] sm:$0xff] }
  0xd5   :  { %3549 = vmatpush2.bf16.msra.mxu0 %v4758_v61  ;;  %v4904_v61 = vcombine.low %v513_v49, %v521_v50  ;;  %v665_v49 = vld [vmem:[#allocation2 + $0xed8] sm:$0xff] }
  0xd6   :  { %3590 = vmatpush2.bf16.msra.mxu1 %v5014_v62  ;;  %3550 = vmatprep.subr.bf16.mxu0 %v4743_v0  ;;  %v4633_v62 = vcombine.high %v241_v56, %v249_v57  ;;  %v4889_v0 = vcombine.high %v497_v58, %v505_v59  ;;  %v393_v56 = vld [vmem:[#allocation2 + $0x658] sm:$0xff] }
  0xd7   :  { %3591 = vmatprep.subr.bf16.mxu1 %v4999_v1  ;;  %v225_v1 = vld [vmem:[#allocation2 + $0x118] sm:$0xff] }
  0xd8   :  { %v4616_v17 = vcombine.low %v225_v1, %v233_v5  ;;  %v641_v57 = vld [vmem:[#allocation2 + $0xe18] sm:$0xff] }
  0xd9   :  { %3551 = vmatpush2.bf16.msra.mxu0 %v4742_v9  ;;  %v4888_v9 = vcombine.low %v497_v58, %v505_v59  ;;  %v649_v58 = vld [vmem:[#allocation2 + $0xe58] sm:$0xff] }
  0xda   :  { %3592 = vmatpush2.bf16.msra.mxu1 %v4998_v12  ;;  %3552 = vmatprep.subr.bf16.mxu0 %v4727_v3  ;;  %v4617_v12 = vcombine.high %v225_v1, %v233_v5  ;;  %v4873_v3 = vcombine.high %v481_v6, %v489_v7  ;;  %v377_v1 = vld [vmem:[#allocation2 + $0x5d8] sm:$0xff] }
  0xdb   :  { %3593 = vmatprep.subr.bf16.mxu1 %v4983_v13  ;;  %v209_v13 = vld [vmem:[#allocation2 + $0x98] sm:$0xff] }
  0xdc   :  { %v4600_v25 = vcombine.low %v209_v13, %v217_v14  ;;  %v625_v5 = vld [vmem:[#allocation2 + $0xd98] sm:$0xff] }
  0xdd   :  { %3553 = vmatpush2.bf16.msra.mxu0 %v4726_v18  ;;  %v4872_v18 = vcombine.low %v481_v6, %v489_v7  ;;  %v633_v6 = vld [vmem:[#allocation2 + $0xdd8] sm:$0xff] }
  0xde   :  { %3594 = vmatpush2.bf16.msra.mxu1 %v4982_v19  ;;  %3554 = vmatprep.subr.bf16.mxu0 %v4711_v20  ;;  %v4601_v19 = vcombine.high %v209_v13, %v217_v14  ;;  %v4857_v20 = vcombine.high %v465_v11, %v473_v16  ;;  %v361_v13 = vld [vmem:[#allocation2 + $0x558] sm:$0xff] }
  0xdf   :  { %3595 = vmatprep.subr.bf16.mxu1 %v4967_v21  ;;  %v193_v21 = vld [vmem:[#allocation2 + $0x18] sm:$0xff] }
  0xe0   :  { %v4584_v33 = vcombine.low %v193_v21, %v201_v22  ;;  %v609_v14 = vld [vmem:[#allocation2 + $0xd18] sm:$0xff] }
  0xe1   :  { %3555 = vmatpush2.bf16.msra.mxu0 %v4710_v26  ;;  %v4856_v26 = vcombine.low %v465_v11, %v473_v16  ;;  %v617_v11 = vld [vmem:[#allocation2 + $0xd58] sm:$0xff] }
  0xe2   :  { %3596 = vmatpush2.bf16.msra.mxu1 %v4966_v27  ;;  %3606 = vmatprep.subr.bf16.mxu0 %v4697_v28  ;;  %v4585_v27 = vcombine.high %v193_v21, %v201_v22  ;;  %v4841_v28 = vcombine.high %v449_v23, %v457_v24  ;;  %v345_v21 = vld [vmem:[#allocation2 + $0x4d8] sm:$0xff] }
  0xe3   :  { %3647 = vmatprep.subr.bf16.mxu1 %v4953_v29  ;;  %v433_v29 = vld [vmem:[#allocation2 + $0x798] sm:$0xff] }
  0xe4   :  { %3557 = vmatmul.mubr.bf16.vlgmr.msra.gmra.mxu0 %v5273_v63  ;;  %v4824_v41 = vcombine.low %v433_v29, %v441_v30  ;;  %v593_v22 = vld [vmem:[#allocation2 + $0xc98] sm:$0xff] }
  0xe5   :  { %3598 = vmatmul.mubr.bf16.vlgmr.msra.gmra.mxu1 %v5277_v4  ;;  %3607 = vmatpush1.bf16.msra.mxu0 %v4696_v34  ;;  %v4840_v34 = vcombine.low %v449_v23, %v457_v24  ;;  %v601_v23 = vld [vmem:[#allocation2 + $0xcd8] sm:$0xff] }
  0xe6   :  { %3648 = vmatpush1.bf16.msra.mxu1 %v4952_v35  ;;  %3608 = vmatprep.subr.bf16.mxu0 %v4681_v36  ;;  %v4825_v35 = vcombine.high %v433_v29, %v441_v30  ;;  %v5081_v36 = vcombine.high %v689_v31, %v697_v32  ;;  %v329_v29 = vld [vmem:[#allocation2 + $0x458] sm:$0xff] }
  0xe7   :  { %3649 = vmatprep.subr.bf16.mxu1 %v4937_v37  ;;  %3638 = vmatprep.mubr.bf16.mxu0 %v5261_v10  ;;  %v417_v37 = vld [vmem:[#allocation2 + $0x718] sm:$0xff] }
  0xe8   :  { %3679 = vmatprep.mubr.bf16.mxu1 %v5268_v15  ;;  %v4808_v50 = vcombine.low %v417_v37, %v425_v38  ;;  %v577_v30 = vld [vmem:[#allocation2 + $0xc18] sm:$0xff] }
  0xe9   :  { %3609 = vmatpush1.bf16.msra.mxu0 %v4680_v42  ;;  %v5080_v42 = vcombine.low %v689_v31, %v697_v32  ;;  %v585_v31 = vld [vmem:[#allocation2 + $0xc58] sm:$0xff] }
  0xea   :  { %3650 = vmatpush1.bf16.msra.mxu1 %v4936_v43  ;;  %3610 = vmatprep.subr.bf16.mxu0 %v4665_v45  ;;  %v4809_v43 = vcombine.high %v417_v37, %v425_v38  ;;  %v5065_v45 = vcombine.high %v673_v39, %v681_v40  ;;  %v314_v37 = vld [vmem:[#allocation2 + $0x3e0] sm:$0xff] }
  0xeb   :  { %3651 = vmatprep.subr.bf16.mxu1 %v4921_v46  ;;  %v401_v46 = vld [vmem:[#allocation2 + $0x698] sm:$0xff]  ;;  %v562_v38 = vld [vmem:[#allocation2 + $0xba0] sm:$0xff] }
  0xec   :  { %v4792_v59 = vcombine.low %v401_v46, %v409_v47 }
  0xed   :  { %3611 = vmatpush1.bf16.msra.mxu0 %v4664_v51  ;;  %v5064_v51 = vcombine.low %v673_v39, %v681_v40  ;;  %v570_v39 = vld [vmem:[#allocation2 + $0xbe0] sm:$0xff] }
  0xee   :  { %3652 = vmatpush1.bf16.msra.mxu1 %v4920_v52  ;;  %3612 = vmatprep.subr.bf16.mxu0 %v4649_v53  ;;  %v4793_v52 = vcombine.high %v401_v46, %v409_v47  ;;  %v5049_v53 = vcombine.high %v657_v48, %v665_v49  ;;  %v712_v46 = vsub.s32 1, %v5209_v44  ;;  %v290_v47 = vld [vmem:[#allocation2 + $0x320] sm:$0xff] }
  0xef   :  { %3653 = vmatprep.subr.bf16.mxu1 %v4905_v54  ;;  %v385_v54 = vld [vmem:[#allocation2 + $0x618] sm:$0xff] }
  0xf0   :  { %v4776_v7 = vcombine.low %v385_v54, %v393_v56 }
  0xf1   :  { %3613 = vmatpush1.bf16.msra.mxu0 %v4648_v60  ;;  %v5048_v60 = vcombine.low %v657_v48, %v665_v49  ;;  %v298_v48 = vld [vmem:[#allocation2 + $0x360] sm:$0xff] }
  0xf2   :  { %3654 = vmatpush1.bf16.msra.mxu1 %v4904_v61  ;;  %3614 = vmatprep.subr.bf16.mxu0 %v4633_v62  ;;  %v4777_v61 = vcombine.high %v385_v54, %v393_v56  ;;  %v5033_v62 = vcombine.high %v641_v57, %v649_v58  ;;  %v546_v49 = vld [vmem:[#allocation2 + $0xb20] sm:$0xff]  ;;  %v4683_v54 = vcombine.high %v290_v47, %v298_v48 }
  0xf3   :  { %3655 = vmatprep.subr.bf16.mxu1 %v4889_v0  ;;  %v369_v0 = vld [vmem:[#allocation2 + $0x598] sm:$0xff] }
  0xf4   :  { %v4760_v16 = vcombine.low %v369_v0, %v377_v1 }
  0xf5   :  { %3615 = vmatpush1.bf16.msra.mxu0 %v4632_v8  ;;  %v5032_v8 = vcombine.low %v641_v57, %v649_v58  ;;  %v274_v58 = vld [vmem:[#allocation2 + $0x2a0] sm:$0xff] }
  0xf6   :  { %3656 = vmatpush1.bf16.msra.mxu1 %v4888_v9  ;;  %3616 = vmatprep.subr.bf16.mxu0 %v4617_v12  ;;  %v4761_v9 = vcombine.high %v369_v0, %v377_v1  ;;  %v5017_v12 = vcombine.high %v625_v5, %v633_v6 }
  0xf7   :  { %3657 = vmatprep.subr.bf16.mxu1 %v4873_v3  ;;  %v353_v3 = vld [vmem:[#allocation2 + $0x518] sm:$0xff] }
  0xf8   :  { %v4744_v24 = vcombine.low %v353_v3, %v361_v13 }
  0xf9   :  { %3617 = vmatpush1.bf16.msra.mxu0 %v4616_v17  ;;  %v5016_v17 = vcombine.low %v625_v5, %v633_v6  ;;  %v4682_v5 = vcombine.low %v290_v47, %v298_v48 }
  0xfa   :  { %3658 = vmatpush1.bf16.msra.mxu1 %v4872_v18  ;;  %3618 = vmatprep.subr.bf16.mxu0 %v4601_v19  ;;  %v4745_v18 = vcombine.high %v353_v3, %v361_v13  ;;  %v5001_v19 = vcombine.high %v609_v14, %v617_v11 }
  0xfb   :  { %3659 = vmatprep.subr.bf16.mxu1 %v4857_v20  ;;  %v337_v20 = vld [vmem:[#allocation2 + $0x498] sm:$0xff] }
  0xfc   :  { %v4728_v32 = vcombine.low %v337_v20, %v345_v21 }
  0xfd   :  { %3619 = vmatpush1.bf16.msra.mxu0 %v4600_v25  ;;  %v5000_v25 = vcombine.low %v609_v14, %v617_v11  ;;  %v258_v14 = vld [vmem:[#allocation2 + $0x220] sm:$0xff] }
  0xfe   :  { %3660 = vmatpush1.bf16.msra.mxu1 %v4856_v26  ;;  %3620 = vmatprep.subr.bf16.mxu0 %v4585_v27  ;;  %v4729_v26 = vcombine.high %v337_v20, %v345_v21  ;;  %v4985_v27 = vcombine.high %v593_v22, %v601_v23  ;;  %v266_v11 = vld [vmem:[#allocation2 + $0x260] sm:$0xff] }
  0xff   :  { %3661 = vmatprep.subr.bf16.mxu1 %v4841_v28  ;;  %v321_v28 = vld [vmem:[#allocation2 + $0x418] sm:$0xff] }
 0x100   :  { %v4712_v40 = vcombine.low %v321_v28, %v329_v29 }
 0x101   :  { %3621 = vmatpush1.bf16.msra.mxu0 %v4584_v33  ;;  %v4984_v33 = vcombine.low %v593_v22, %v601_v23 }
 0x102   :  { %3662 = vmatpush1.bf16.msra.mxu1 %v4840_v34  ;;  %3622 = vmatprep.subr.bf16.mxu0 %v4825_v35  ;;  %v4713_v34 = vcombine.high %v321_v28, %v329_v29  ;;  %v4969_v35 = vcombine.high %v577_v30, %v585_v31  ;;  %v242_v28 = vld [vmem:[#allocation2 + $0x1a0] sm:$0xff] }
 0x103   :  { %3663 = vmatprep.subr.bf16.mxu1 %v5081_v36  ;;  %v306_v36 = vld [vmem:[#allocation2 + $0x3a0] sm:$0xff] }
 0x104   :  { %v250_v29 = vld [vmem:[#allocation2 + $0x1e0] sm:$0xff] }
 0x105   :  { %3623 = vmatpush2.bf16.msra.mxu0 %v4824_v41  ;;  %v4968_v41 = vcombine.low %v577_v30, %v585_v31 }
 0x106   :  { %3664 = vmatpush2.bf16.msra.mxu1 %v5080_v42  ;;  %3624 = vmatprep.subr.bf16.mxu0 %v4809_v43  ;;  %v5291_v42 = vld [vmem:[#allocation4] sm:$0xff]  ;;  %v4699_v43 = vcombine.high %v306_v36, %v314_v37 }
 0x107   :  { %3665 = vmatprep.subr.bf16.mxu1 %v5065_v45  ;;  %v4955_v45 = vcombine.high %v562_v38, %v570_v39  ;;  %v713_v56 = vrot.slane %v5291_v42, %v712_v46 }
 0x109   :  { %3625 = vmatpush2.bf16.msra.mxu0 %v4808_v50  ;;  %v554_v50 = vld [vmem:[#allocation2 + $0xb60] sm:$0xff] }
 0x10a   :  { %3666 = vmatpush2.bf16.msra.mxu1 %v5064_v51  ;;  %3626 = vmatprep.subr.bf16.mxu0 %v4793_v52  ;;  %v709_v51 = vrot.slane %v5291_v42, %v5226_v2  ;;  %v4698_v52 = vcombine.low %v306_v36, %v314_v37  ;;  %v4939_v57 = vcombine.high %v546_v49, %v554_v50 }
 0x10b   :  { %3667 = vmatprep.subr.bf16.mxu1 %v5049_v53  ;;  %v4954_v53 = vcombine.low %v562_v38, %v570_v39  ;;  %v498_v38 = vld [vmem:[#allocation2 + $0x9a0] sm:$0xff] }
 0x10c   :  { %v506_v39 = vld [vmem:[#allocation2 + $0x9e0] sm:$0xff] }
 0x10d   :  { %3627 = vmatpush2.bf16.msra.mxu0 %v4792_v59  ;;  %v282_v59 = vld [vmem:[#allocation2 + $0x2e0] sm:$0xff] }
 0x10e   :  { %3668 = vmatpush2.bf16.msra.mxu1 %v5048_v60  ;;  %3628 = vmatprep.subr.bf16.mxu0 %v4777_v61  ;;  %v530_v61 = vld [vmem:[#allocation2 + $0xaa0] sm:$0xff]  ;;  %v4666_v22 = vcombine.low %v274_v58, %v282_v59 }
 0x10f   :  { %3669 = vmatprep.subr.bf16.mxu1 %v5033_v62  ;;  %v538_v62 = vld [vmem:[#allocation2 + $0xae0] sm:$0xff] }
 0x110   :  { %v4923_v13 = vcombine.high %v530_v61, %v538_v62 }
 0x111   :  { %3629 = vmatpush2.bf16.msra.mxu0 %v4776_v7  ;;  %v4938_v7 = vcombine.low %v546_v49, %v554_v50  ;;  %v226_v50 = vld [vmem:[#allocation2 + $0x120] sm:$0xff] }
 0x112   :  { %3670 = vmatpush2.bf16.msra.mxu1 %v5032_v8  ;;  %3630 = vmatprep.subr.bf16.mxu0 %v4761_v9  ;;  %v4667_v8 = vcombine.high %v274_v58, %v282_v59  ;;  %v482_v58 = vld [vmem:[#allocation2 + $0x920] sm:$0xff] }
 0x113   :  { %3671 = vmatprep.subr.bf16.mxu1 %v5017_v12  ;;  %v490_v59 = vld [vmem:[#allocation2 + $0x960] sm:$0xff] }
 0x115   :  { %3631 = vmatpush2.bf16.msra.mxu0 %v4760_v16 }
 0x116   :  { %3672 = vmatpush2.bf16.msra.mxu1 %v5016_v17  ;;  %3632 = vmatprep.subr.bf16.mxu0 %v4745_v18  ;;  %v514_v17 = vld [vmem:[#allocation2 + $0xa20] sm:$0xff] }
 0x117   :  { %3673 = vmatprep.subr.bf16.mxu1 %v5001_v19  ;;  %v522_v18 = vld [vmem:[#allocation2 + $0xa60] sm:$0xff] }
 0x119   :  { %3633 = vmatpush2.bf16.msra.mxu0 %v4744_v24 }
 0x11a   :  { %3674 = vmatpush2.bf16.msra.mxu1 %v5000_v25  ;;  %3634 = vmatprep.subr.bf16.mxu0 %v4729_v26  ;;  %v4922_v26 = vcombine.low %v530_v61, %v538_v62  ;;  %v4890_v61 = vcombine.low %v498_v38, %v506_v39 }
 0x11b   :  { %3675 = vmatprep.subr.bf16.mxu1 %v4985_v27  ;;  %v4651_v27 = vcombine.high %v258_v14, %v266_v11 }
 0x11d   :  { %3635 = vmatpush2.bf16.msra.mxu0 %v4728_v32 }
 0x11e   :  { %3676 = vmatpush2.bf16.msra.mxu1 %v4984_v33  ;;  %3636 = vmatprep.subr.bf16.mxu0 %v4713_v34  ;;  %v4907_v33 = vcombine.high %v514_v17, %v522_v18 }
 0x11f   :  { %3677 = vmatprep.subr.bf16.mxu1 %v4969_v35 }
 0x121   :  { %3637 = vmatpush2.bf16.msra.mxu0 %v4712_v40  ;;  %v4650_v40 = vcombine.low %v258_v14, %v266_v11  ;;  %v466_v14 = vld [vmem:[#allocation2 + $0x8a0] sm:$0xff] }
 0x122   :  { %3678 = vmatpush2.bf16.msra.mxu1 %v4968_v41  ;;  %3688 = vmatprep.subr.bf16.mxu0 %v4699_v43  ;;  %v4906_v41 = vcombine.low %v514_v17, %v522_v18  ;;  %v4635_v43 = vcombine.high %v242_v28, %v250_v29  ;;  %v474_v11 = vld [vmem:[#allocation2 + $0x8e0] sm:$0xff]  ;;  %v4874_v17 = vcombine.low %v482_v58, %v490_v59 }
 0x123   :  { %3729 = vmatprep.subr.bf16.mxu1 %v4955_v45 }
 0x124   :  { %v3394_v60 = vpop.f32.mrf.mxu0  ;;  %3639 = vmatmul.mubr.bf16.vlgmr.msra.gmra.mxu0 %v5273_v63 }
 0x125   :  { %v3395_v0 = vadd.f32 %v3394_v60, %v709_v51  ;;  %v3435_v1 = vpop.f32.mrf.mxu1  ;;  %3680 = vmatmul.mubr.bf16.vlgmr.msra.gmra.mxu1 %v5277_v4  ;;  %3689 = vmatpush1.bf16.msra.mxu0 %v4698_v52  ;;  %v234_v51 = vld [vmem:[#allocation2 + $0x160] sm:$0xff]  ;;  %v4891_v52 = vcombine.high %v498_v38, %v506_v39  ;;  %v4634_v60 = vcombine.low %v242_v28, %v250_v29 }
 0x126   :  { %3730 = vmatpush1.bf16.msra.mxu1 %v4954_v53  ;;  %v3396_v6 = vpop.f32.mrf.mxu0  ;;  %3690 = vmatprep.subr.bf16.mxu0 %v4683_v54  ;;  %v4619_v62 = vcombine.high %v226_v50, %v234_v51  ;;  %v450_v28 = vld [vmem:[#allocation2 + $0x820] sm:$0xff] }
 0x127   :  { %v3436_v9 = vadd.f32 %v3435_v1, %v3395_v0  ;;  %v3397_v12 = vadd.f32 %v3396_v6, %v713_v56  ;;  %v3437_v3 = vpop.f32.mrf.mxu1  ;;  %3731 = vmatprep.subr.bf16.mxu1 %v4939_v57  ;;  %3720 = vmatprep.mubr.bf16.mxu0 %v5261_v10  ;;  %v458_v29 = vld [vmem:[#allocation2 + $0x860] sm:$0xff] }
 0x128   :  { %v3398_v16 = vpop.f32.mrf.mxu0  ;;  %3761 = vmatprep.mubr.bf16.mxu1 %v5268_v15  ;;  %v698_v38 = vld [vmem:[#allocation2 + $0xfe0] sm:$0xff] }
 0x129   :  { %v4094_v19 = vsel %vm4093_vm0, %v3436_v9, 0.0  ;;  %v3438_v20 = vadd.f32 %v3437_v3, %v3397_v12  ;;  %v3439_v21 = vpop.f32.mrf.mxu1  ;;  %3691 = vmatpush1.bf16.msra.mxu0 %v4682_v5  ;;  %v4618_v16 = vcombine.low %v226_v50, %v234_v51 }
 0x12a   :  { %v4110_v23 = vrot.slane %v4094_v19, 4  ;;  %v4324_v24 = vmul.f32 %v4094_v19, %v4094_v19  ;;  %3732 = vmatpush1.bf16.msra.mxu1 %v4938_v7  ;;  %v3399_v25 = vpop.f32.mrf.mxu0  ;;  %3692 = vmatprep.subr.bf16.mxu0 %v4667_v8  ;;  %v4875_v7 = vcombine.high %v482_v58, %v490_v59  ;;  %v210_v8 = vld [vmem:[#allocation2 + $0xa0] sm:$0xff] }
 0x12b   :  { %v5098_v30 = vpack.c.bf16 %v3438_v20, %v3436_v9  ;;  %v4095_v31 = vsel %vm4093_vm0, %v3438_v20, 0.0  ;;  %v3440_v32 = vpop.f32.mrf.mxu1  ;;  %3733 = vmatprep.subr.bf16.mxu1 %v4923_v13  ;;  %v218_v9 = vld [vmem:[#allocation2 + $0xe0] sm:$0xff] }
 0x12c   :  { %v4111_v34 = vadd.f32 %v4110_v23, %v4094_v19  ;;  %v4340_v35 = vrot.slane %v4324_v24, 4  ;;  %v4116_v36 = vrot.slane %v4095_v31, 4  ;;  %v4325_v37 = vmul.f32 %v4095_v31, %v4095_v31  ;;  %v194_v23 = vld [vmem:[#allocation2 + $0x20] sm:$0xff] }
 0x12d   :  { %4080 = vst [vmem:[%s5538_s5] sm:$0xff] %v5098_v30  ;;  %3693 = vmatpush1.bf16.msra.mxu0 %v4666_v22  ;;  %v4603_v21 = vcombine.high %v210_v8, %v218_v9  ;;  %v4859_v22 = vcombine.high %v466_v14, %v474_v11  ;;  %v4602_v30 = vcombine.low %v210_v8, %v218_v9  ;;  %v666_v58 = vld [vmem:[#allocation2 + $0xee0] sm:$0xff] }
 0x12e   :  { %v4112_v45 = vrot.slane %v4111_v34, 2  ;;  %v4341_v47 = vadd.f32 %v4340_v35, %v4324_v24  ;;  %v4117_v48 = vadd.f32 %v4116_v36, %v4095_v31  ;;  %v4346_v49 = vrot.slane %v4325_v37, 4  ;;  %3734 = vmatpush1.bf16.msra.mxu1 %v4922_v26  ;;  %3694 = vmatprep.subr.bf16.mxu0 %v4651_v27  ;;  %v202_v24 = vld [vmem:[#allocation2 + $0x60] sm:$0xff] }
 0x12f   :  { %3735 = vmatprep.subr.bf16.mxu1 %v4907_v33  ;;  %v4858_v32 = vcombine.low %v466_v14, %v474_v11  ;;  %v4587_v33 = vcombine.high %v194_v23, %v202_v24  ;;  %v434_v35 = vld [vmem:[#allocation2 + $0x7a0] sm:$0xff]  ;;  %v4586_v39 = vcombine.low %v194_v23, %v202_v24 }
 0x130   :  { %v4113_v53 = vadd.f32 %v4112_v45, %v4111_v34  ;;  %v4342_v54 = vrot.slane %v4341_v47, 2  ;;  %v4118_v56 = vrot.slane %v4117_v48, 2  ;;  %v4347_v57 = vadd.f32 %v4346_v49, %v4325_v37  ;;  %v442_v36 = vld [vmem:[#allocation2 + $0x7e0] sm:$0xff] }
 0x131   :  { %3695 = vmatpush1.bf16.msra.mxu0 %v4650_v40  ;;  %v4843_v34 = vcombine.high %v450_v28, %v458_v29  ;;  %v690_v37 = vld [vmem:[#allocation2 + $0xfa0] sm:$0xff]  ;;  %v4842_v40 = vcombine.low %v450_v28, %v458_v29  ;;  %v4826_v50 = vcombine.low %v434_v35, %v442_v36 }
 0x132   :  { %v4114_v0 = vrot.slane %v4113_v53, 1  ;;  %v4343_v1 = vadd.f32 %v4342_v54, %v4341_v47  ;;  %v4119_v5 = vadd.f32 %v4118_v56, %v4117_v48  ;;  %v4348_v6 = vrot.slane %v4347_v57, 2  ;;  %3736 = vmatpush1.bf16.msra.mxu1 %v4906_v41  ;;  %3696 = vmatprep.subr.bf16.mxu0 %v4635_v43  ;;  %v418_v45 = vld [vmem:[#allocation2 + $0x720] sm:$0xff] }
 0x133   :  { %3737 = vmatprep.subr.bf16.mxu1 %v4891_v52  ;;  %v4827_v41 = vcombine.high %v434_v35, %v442_v36  ;;  %v5083_v43 = vcombine.high %v690_v37, %v698_v38  ;;  %v426_v47 = vld [vmem:[#allocation2 + $0x760] sm:$0xff]  ;;  %v5082_v51 = vcombine.low %v690_v37, %v698_v38 }
 0x134   :  { %v4344_v12 = vrot.slane %v4343_v1, 1  ;;  %v4120_v3 = vrot.slane %v4119_v5, 1  ;;  %v4349_v13 = vadd.f32 %v4348_v6, %v4347_v57  ;;  %v5311_v18 = vadd.f32 %v4114_v0, %v4113_v53  ;;  %v674_v48 = vld [vmem:[#allocation2 + $0xf20] sm:$0xff] }
 0x135   :  { %3697 = vmatpush1.bf16.msra.mxu0 %v4634_v60  ;;  %v682_v49 = vld [vmem:[#allocation2 + $0xf60] sm:$0xff]  ;;  %v4811_v52 = vcombine.high %v418_v45, %v426_v47  ;;  %v4810_v59 = vcombine.low %v418_v45, %v426_v47 }
 0x136   :  { %v5313_v19 = vadd.f32 %v4120_v3, %v4119_v5  ;;  %v4350_v20 = vrot.slane %v4349_v13, 1  ;;  %3738 = vmatpush1.bf16.msra.mxu1 %v4890_v61  ;;  %3698 = vmatprep.subr.bf16.mxu0 %v4619_v62  ;;  %v5315_v25 = vadd.f32 %v4344_v12, %v4343_v1  ;;  %v5067_v53 = vcombine.high %v674_v48, %v682_v49  ;;  %v402_v54 = vld [vmem:[#allocation2 + $0x6a0] sm:$0xff] }
 0x137   :  { %3739 = vmatprep.subr.bf16.mxu1 %v4875_v7  ;;  %v410_v56 = vld [vmem:[#allocation2 + $0x6e0] sm:$0xff]  ;;  %v5066_v60 = vcombine.low %v674_v48, %v682_v49 }
 0x138   :  { %v4222_v26 = vcombine.low %v5311_v18, %v5313_v19  ;;  %v5319_v27 = vadd.f32 %v4350_v20, %v4349_v13  ;;  %v658_v57 = vld [vmem:[#allocation2 + $0xea0] sm:$0xff]  ;;  %v4795_v61 = vcombine.high %v402_v54, %v410_v56  ;;  %v4794_v7 = vcombine.low %v402_v54, %v410_v56  ;;  %v315_v54 = vld [vmem:[#allocation2 + $0x3e8] sm:$0xff] }
 0x139   :  { %3699 = vmatpush1.bf16.msra.mxu0 %v4618_v16  ;;  %v5051_v62 = vcombine.high %v658_v57, %v666_v58  ;;  %v386_v0 = vld [vmem:[#allocation2 + $0x620] sm:$0xff]  ;;  %v5050_v8 = vcombine.low %v658_v57, %v666_v58  ;;  %v563_v56 = vld [vmem:[#allocation2 + $0xba8] sm:$0xff] }
 0x13a   :  { %v4452_v31 = vcombine.low %v5315_v25, %v5319_v27  ;;  %3740 = vmatpush1.bf16.msra.mxu1 %v4874_v17  ;;  %3700 = vmatprep.subr.bf16.mxu0 %v4603_v21  ;;  %v394_v1 = vld [vmem:[#allocation2 + $0x660] sm:$0xff]  ;;  %v571_v57 = vld [vmem:[#allocation2 + $0xbe8] sm:$0xff] }
 0x13b   :  { %3741 = vmatprep.subr.bf16.mxu1 %v4859_v22  ;;  %v642_v5 = vld [vmem:[#allocation2 + $0xe20] sm:$0xff]  ;;  %v4779_v9 = vcombine.high %v386_v0, %v394_v1  ;;  %v4778_v16 = vcombine.low %v386_v0, %v394_v1  ;;  %v720_v0 = vsub.s32 3, %v5209_v44  ;;  %v291_v1 = vld [vmem:[#allocation2 + $0x328] sm:$0xff] }
 0x13c   :  { %v650_v6 = vld [vmem:[#allocation2 + $0xe60] sm:$0xff]  ;;  %v419_v27 = vld [vmem:[#allocation2 + $0x728] sm:$0xff] }
 0x13d   :  { %3701 = vmatpush1.bf16.msra.mxu0 %v4602_v30  ;;  %v5035_v12 = vcombine.high %v642_v5, %v650_v6  ;;  %v370_v3 = vld [vmem:[#allocation2 + $0x5a0] sm:$0xff]  ;;  %v5034_v17 = vcombine.low %v642_v5, %v650_v6  ;;  %v299_v5 = vld [vmem:[#allocation2 + $0x368] sm:$0xff] }
 0x13e   :  { %3742 = vmatpush1.bf16.msra.mxu1 %v4858_v32  ;;  %3702 = vmatprep.subr.bf16.mxu0 %v4587_v33  ;;  %v378_v13 = vld [vmem:[#allocation2 + $0x5e0] sm:$0xff]  ;;  %v547_v6 = vld [vmem:[#allocation2 + $0xb28] sm:$0xff] }
 0x13f   :  { %3743 = vmatprep.subr.bf16.mxu1 %v4843_v34  ;;  %v626_v14 = vld [vmem:[#allocation2 + $0xda0] sm:$0xff]  ;;  %v4763_v20 = vcombine.high %v370_v3, %v378_v13  ;;  %v4762_v29 = vcombine.low %v370_v3, %v378_v13  ;;  %v4685_v3 = vcombine.high %v291_v1, %v299_v5  ;;  %v721_v13 = vrot.slane %v5291_v42, %v720_v0 }
 0x140   :  { %v634_v11 = vld [vmem:[#allocation2 + $0xde0] sm:$0xff] }
 0x141   :  { %3703 = vmatpush1.bf16.msra.mxu0 %v4586_v39  ;;  %v5019_v21 = vcombine.high %v626_v14, %v634_v11  ;;  %v354_v22 = vld [vmem:[#allocation2 + $0x520] sm:$0xff]  ;;  %v5018_v30 = vcombine.low %v626_v14, %v634_v11  ;;  %v275_v11 = vld [vmem:[#allocation2 + $0x2a8] sm:$0xff] }
 0x142   :  { %3744 = vmatpush1.bf16.msra.mxu1 %v4842_v40  ;;  %3704 = vmatprep.subr.bf16.mxu0 %v4827_v41  ;;  %v362_v23 = vld [vmem:[#allocation2 + $0x560] sm:$0xff] }
 0x143   :  { %3745 = vmatprep.subr.bf16.mxu1 %v5083_v43  ;;  %v610_v24 = vld [vmem:[#allocation2 + $0xd20] sm:$0xff]  ;;  %v4747_v32 = vcombine.high %v354_v22, %v362_v23  ;;  %v4746_v38 = vcombine.low %v354_v22, %v362_v23 }
 0x144   :  { %v618_v28 = vld [vmem:[#allocation2 + $0xd60] sm:$0xff] }
 0x145   :  { %3705 = vmatpush2.bf16.msra.mxu0 %v4826_v50  ;;  %v5003_v33 = vcombine.high %v610_v24, %v618_v28  ;;  %v338_v34 = vld [vmem:[#allocation2 + $0x4a0] sm:$0xff]  ;;  %v5002_v39 = vcombine.low %v610_v24, %v618_v28  ;;  %v4684_v24 = vcombine.low %v291_v1, %v299_v5 }
 0x146   :  { %3746 = vmatpush2.bf16.msra.mxu1 %v5082_v51  ;;  %3706 = vmatprep.subr.bf16.mxu0 %v4811_v52  ;;  %v346_v35 = vld [vmem:[#allocation2 + $0x4e0] sm:$0xff] }
 0x147   :  { %3747 = vmatprep.subr.bf16.mxu1 %v5067_v53  ;;  %v594_v36 = vld [vmem:[#allocation2 + $0xca0] sm:$0xff]  ;;  %v4731_v40 = vcombine.high %v338_v34, %v346_v35  ;;  %v4730_v49 = vcombine.low %v338_v34, %v346_v35  ;;  %v307_v53 = vld [vmem:[#allocation2 + $0x3a8] sm:$0xff] }
 0x148   :  { %v602_v37 = vld [vmem:[#allocation2 + $0xce0] sm:$0xff] }
 0x149   :  { %3707 = vmatpush2.bf16.msra.mxu0 %v4810_v59  ;;  %v4987_v41 = vcombine.high %v594_v36, %v602_v37  ;;  %v322_v43 = vld [vmem:[#allocation2 + $0x420] sm:$0xff]  ;;  %v4986_v50 = vcombine.low %v594_v36, %v602_v37  ;;  %v716_v59 = vsub.s32 2, %v5209_v44  ;;  %v259_v36 = vld [vmem:[#allocation2 + $0x228] sm:$0xff] }
 0x14a   :  { %3748 = vmatpush2.bf16.msra.mxu1 %v5066_v60  ;;  %3708 = vmatprep.subr.bf16.mxu0 %v4795_v61  ;;  %v330_v45 = vld [vmem:[#allocation2 + $0x460] sm:$0xff]  ;;  %v4701_v61 = vcombine.high %v307_v53, %v315_v54  ;;  %v267_v37 = vld [vmem:[#allocation2 + $0x268] sm:$0xff] }
 0x14b   :  { %3749 = vmatprep.subr.bf16.mxu1 %v5051_v62  ;;  %v578_v47 = vld [vmem:[#allocation2 + $0xc20] sm:$0xff]  ;;  %v4715_v51 = vcombine.high %v322_v43, %v330_v45  ;;  %v4714_v58 = vcombine.low %v322_v43, %v330_v45  ;;  %v4957_v62 = vcombine.high %v563_v56, %v571_v57 }
 0x14c   :  { %v586_v48 = vld [vmem:[#allocation2 + $0xc60] sm:$0xff] }
 0x14d   :  { %3709 = vmatpush2.bf16.msra.mxu0 %v4794_v7  ;;  %v4971_v52 = vcombine.high %v578_v47, %v586_v48  ;;  %v4970_v60 = vcombine.low %v578_v47, %v586_v48  ;;  %v555_v7 = vld [vmem:[#allocation2 + $0xb68] sm:$0xff] }
 0x14e   :  { %3750 = vmatpush2.bf16.msra.mxu1 %v5050_v8  ;;  %3710 = vmatprep.subr.bf16.mxu0 %v4779_v9  ;;  %v717_v8 = vrot.slane %v5291_v42, %v716_v59  ;;  %v4700_v9 = vcombine.low %v307_v53, %v315_v54  ;;  %v4941_v14 = vcombine.high %v547_v6, %v555_v7  ;;  %v243_v53 = vld [vmem:[#allocation2 + $0x1a8] sm:$0xff] }
 0x14f   :  { %3751 = vmatprep.subr.bf16.mxu1 %v5035_v12  ;;  %v4956_v12 = vcombine.low %v563_v56, %v571_v57  ;;  %v251_v54 = vld [vmem:[#allocation2 + $0x1e8] sm:$0xff] }
 0x151   :  { %3711 = vmatpush2.bf16.msra.mxu0 %v4778_v16  ;;  %v283_v16 = vld [vmem:[#allocation2 + $0x2e8] sm:$0xff] }
 0x152   :  { %3752 = vmatpush2.bf16.msra.mxu1 %v5034_v17  ;;  %3712 = vmatprep.subr.bf16.mxu0 %v4763_v20  ;;  %v531_v20 = vld [vmem:[#allocation2 + $0xaa8] sm:$0xff]  ;;  %v4668_v47 = vcombine.low %v275_v11, %v283_v16 }
 0x153   :  { %3753 = vmatprep.subr.bf16.mxu1 %v5019_v21  ;;  %v539_v21 = vld [vmem:[#allocation2 + $0xae8] sm:$0xff] }
 0x154   :  { %v4925_v35 = vcombine.high %v531_v20, %v539_v21 }
 0x155   :  { %3713 = vmatpush2.bf16.msra.mxu0 %v4762_v29  ;;  %v4940_v29 = vcombine.low %v547_v6, %v555_v7  ;;  %v499_v6 = vld [vmem:[#allocation2 + $0x9a8] sm:$0xff] }
 0x156   :  { %3754 = vmatpush2.bf16.msra.mxu1 %v5018_v30  ;;  %3714 = vmatprep.subr.bf16.mxu0 %v4747_v32  ;;  %v4669_v30 = vcombine.high %v275_v11, %v283_v16  ;;  %v507_v7 = vld [vmem:[#allocation2 + $0x9e8] sm:$0xff] }
 0x157   :  { %3755 = vmatprep.subr.bf16.mxu1 %v5003_v33  ;;  %v227_v16 = vld [vmem:[#allocation2 + $0x128] sm:$0xff] }
 0x159   :  { %3715 = vmatpush2.bf16.msra.mxu0 %v4746_v38 }
 0x15a   :  { %3756 = vmatpush2.bf16.msra.mxu1 %v5002_v39  ;;  %3716 = vmatprep.subr.bf16.mxu0 %v4731_v40  ;;  %v515_v39 = vld [vmem:[#allocation2 + $0xa28] sm:$0xff] }
 0x15b   :  { %3757 = vmatprep.subr.bf16.mxu1 %v4987_v41  ;;  %v523_v40 = vld [vmem:[#allocation2 + $0xa68] sm:$0xff] }
 0x15d   :  { %3717 = vmatpush2.bf16.msra.mxu0 %v4730_v49 }
 0x15e   :  { %3758 = vmatpush2.bf16.msra.mxu1 %v4986_v50  ;;  %3718 = vmatprep.subr.bf16.mxu0 %v4715_v51  ;;  %v4924_v51 = vcombine.low %v531_v20, %v539_v21  ;;  %v4893_v20 = vcombine.high %v499_v6, %v507_v7 }
 0x15f   :  { %3759 = vmatprep.subr.bf16.mxu1 %v4971_v52  ;;  %v4653_v52 = vcombine.high %v259_v36, %v267_v37 }
 0x161   :  { %3719 = vmatpush2.bf16.msra.mxu0 %v4714_v58 }
 0x162   :  { %3760 = vmatpush2.bf16.msra.mxu1 %v4970_v60  ;;  %3770 = vmatprep.subr.bf16.mxu0 %v4701_v61  ;;  %v4909_v60 = vcombine.high %v515_v39, %v523_v40 }
 0x163   :  { %3811 = vmatprep.subr.bf16.mxu1 %v4957_v62 }
 0x164   :  { %v3476_v17 = vpop.f32.mrf.mxu0  ;;  %3721 = vmatmul.mubr.bf16.vlgmr.msra.gmra.mxu0 %v5273_v63 }
 0x165   :  { %v3477_v22 = vadd.f32 %v3476_v17, %v717_v8  ;;  %v3517_v23 = vpop.f32.mrf.mxu1  ;;  %3762 = vmatmul.mubr.bf16.vlgmr.msra.gmra.mxu1 %v5277_v4  ;;  %3771 = vmatpush1.bf16.msra.mxu0 %v4700_v9  ;;  %v4652_v8 = vcombine.low %v259_v36, %v267_v37  ;;  %v4908_v9 = vcombine.low %v515_v39, %v523_v40  ;;  %v235_v17 = vld [vmem:[#allocation2 + $0x168] sm:$0xff] }
 0x166   :  { %3812 = vmatpush1.bf16.msra.mxu1 %v4956_v12  ;;  %v3478_v28 = vpop.f32.mrf.mxu0  ;;  %3772 = vmatprep.subr.bf16.mxu0 %v4685_v3  ;;  %v4637_v12 = vcombine.high %v243_v53, %v251_v54  ;;  %v211_v39 = vld [vmem:[#allocation2 + $0xa8] sm:$0xff] }
 0x167   :  { %v3518_v32 = vadd.f32 %v3517_v23, %v3477_v22  ;;  %v3479_v33 = vadd.f32 %v3478_v28, %v721_v13  ;;  %v3519_v34 = vpop.f32.mrf.mxu1  ;;  %3813 = vmatprep.subr.bf16.mxu1 %v4941_v14  ;;  %3802 = vmatprep.mubr.bf16.mxu0 %v5261_v10  ;;  %v483_v28 = vld [vmem:[#allocation2 + $0x928] sm:$0xff] }
 0x168   :  { %v3480_v38 = vpop.f32.mrf.mxu0  ;;  %3843 = vmatprep.mubr.bf16.mxu1 %v5268_v15  ;;  %v219_v40 = vld [vmem:[#allocation2 + $0xe8] sm:$0xff] }
 0x169   :  { %v4096_v41 = vsel %vm4093_vm0, %v3518_v32, 0.0  ;;  %v3520_v43 = vadd.f32 %v3519_v34, %v3479_v33  ;;  %v3521_v45 = vpop.f32.mrf.mxu1  ;;  %3773 = vmatpush1.bf16.msra.mxu0 %v4684_v24  ;;  %v4621_v33 = vcombine.high %v227_v16, %v235_v17 }
 0x16a   :  { %v4122_v48 = vrot.slane %v4096_v41, 4  ;;  %v4326_v49 = vmul.f32 %v4096_v41, %v4096_v41  ;;  %3814 = vmatpush1.bf16.msra.mxu1 %v4940_v29  ;;  %v3481_v50 = vpop.f32.mrf.mxu0  ;;  %3774 = vmatprep.subr.bf16.mxu0 %v4669_v30  ;;  %v491_v29 = vld [vmem:[#allocation2 + $0x968] sm:$0xff]  ;;  %v4636_v30 = vcombine.low %v243_v53, %v251_v54  ;;  %v4605_v54 = vcombine.high %v211_v39, %v219_v40 }
 0x16b   :  { %v5099_v56 = vpack.c.bf16 %v3520_v43, %v3518_v32  ;;  %v4097_v57 = vsel %vm4093_vm0, %v3520_v43, 0.0  ;;  %v3522_v58 = vpop.f32.mrf.mxu1  ;;  %3815 = vmatprep.subr.bf16.mxu1 %v4925_v35  ;;  %v4892_v32 = vcombine.low %v499_v6, %v507_v7  ;;  %v4877_v38 = vcombine.high %v483_v28, %v491_v29 }
 0x16c   :  { %v4123_v61 = vadd.f32 %v4122_v48, %v4096_v41  ;;  %v4352_v62 = vrot.slane %v4326_v49, 4  ;;  %v4128_v1 = vrot.slane %v4097_v57, 4  ;;  %v4327_v5 = vmul.f32 %v4097_v57, %v4097_v57  ;;  %v475_v48 = vld [vmem:[#allocation2 + $0x8e8] sm:$0xff] }
 0x16d   :  { %4081 = vst [vmem:[%s5538_s5 + $0x8] sm:$0xff] %v5099_v56  ;;  %3775 = vmatpush1.bf16.msra.mxu0 %v4668_v47  ;;  %v467_v47 = vld [vmem:[#allocation2 + $0x8a8] sm:$0xff]  ;;  %v4876_v50 = vcombine.low %v483_v28, %v491_v29  ;;  %v4604_v6 = vcombine.low %v211_v39, %v219_v40 }
 0x16e   :  { %v4124_v3 = vrot.slane %v4123_v61, 2  ;;  %v4353_v13 = vadd.f32 %v4352_v62, %v4326_v49  ;;  %v4129_v14 = vadd.f32 %v4128_v1, %v4097_v57  ;;  %v4358_v11 = vrot.slane %v4327_v5, 4  ;;  %3816 = vmatpush1.bf16.msra.mxu1 %v4924_v51  ;;  %3776 = vmatprep.subr.bf16.mxu0 %v4653_v52  ;;  %v195_v56 = vld [vmem:[#allocation2 + $0x28] sm:$0xff] }
 0x16f   :  { %3817 = vmatprep.subr.bf16.mxu1 %v4909_v60  ;;  %v4620_v49 = vcombine.low %v227_v16, %v235_v17  ;;  %v203_v57 = vld [vmem:[#allocation2 + $0x68] sm:$0xff]  ;;  %v4861_v58 = vcombine.high %v467_v47, %v475_v48  ;;  %v4860_v7 = vcombine.low %v467_v47, %v475_v48  ;;  %v5355_v16 = vrot.slane %v4452_v31, %v5212_v55 }
 0x170   :  { %v4125_v21 = vadd.f32 %v4124_v3, %v4123_v61  ;;  %v4354_v22 = vrot.slane %v4353_v13, 2  ;;  %v4130_v23 = vrot.slane %v4129_v14, 2  ;;  %v4359_v24 = vadd.f32 %v4358_v11, %v4327_v5  ;;  %v451_v1 = vld [vmem:[#allocation2 + $0x828] sm:$0xff] }
 0x171   :  { %3777 = vmatpush1.bf16.msra.mxu0 %v4652_v8  ;;  %v459_v5 = vld [vmem:[#allocation2 + $0x868] sm:$0xff]  ;;  %v4589_v8 = vcombine.high %v195_v56, %v203_v57 }
 0x172   :  { %v4126_v34 = vrot.slane %v4125_v21, 1  ;;  %v4355_v35 = vadd.f32 %v4354_v22, %v4353_v13  ;;  %v4131_v36 = vadd.f32 %v4130_v23, %v4129_v14  ;;  %v4360_v37 = vrot.slane %v4359_v24, 2  ;;  %3818 = vmatpush1.bf16.msra.mxu1 %v4908_v9  ;;  %3778 = vmatprep.subr.bf16.mxu0 %v4637_v12  ;;  %v435_v14 = vld [vmem:[#allocation2 + $0x7a8] sm:$0xff] }
 0x173   :  { %3819 = vmatprep.subr.bf16.mxu1 %v4893_v20  ;;  %v5346_v9 = vrot.slane %v4222_v26, %v5212_v55  ;;  %v4845_v13 = vcombine.high %v451_v1, %v459_v5  ;;  %v443_v11 = vld [vmem:[#allocation2 + $0x7e8] sm:$0xff]  ;;  %v4588_v20 = vcombine.low %v195_v56, %v203_v57  ;;  %v4844_v22 = vcombine.low %v451_v1, %v459_v5 }
 0x174   :  { %v4356_v41 = vrot.slane %v4355_v35, 1  ;;  %v4132_v43 = vrot.slane %v4131_v36, 1  ;;  %v4361_v45 = vadd.f32 %v4360_v37, %v4359_v24  ;;  %v4127_v51 = vadd.f32 %v4126_v34, %v4125_v21  ;;  %v691_v26 = vld [vmem:[#allocation2 + $0xfa8] sm:$0xff] }
 0x175   :  { %3779 = vmatpush1.bf16.msra.mxu0 %v4636_v30  ;;  %v699_v17 = vld [vmem:[#allocation2 + $0xfe8] sm:$0xff]  ;;  %v4829_v23 = vcombine.high %v435_v14, %v443_v11  ;;  %v4828_v29 = vcombine.low %v435_v14, %v443_v11 }
 0x176   :  { %v4133_v52 = vadd.f32 %v4132_v43, %v4131_v36  ;;  %v4362_v53 = vrot.slane %v4361_v45, 1  ;;  %3820 = vmatpush1.bf16.msra.mxu1 %v4892_v32  ;;  %3780 = vmatprep.subr.bf16.mxu0 %v4621_v33  ;;  %v4357_v60 = vadd.f32 %v4356_v41, %v4355_v35  ;;  %v5085_v25 = vcombine.high %v691_v26, %v699_v17  ;;  %v427_v31 = vld [vmem:[#allocation2 + $0x768] sm:$0xff] }
 0x177   :  { %3821 = vmatprep.subr.bf16.mxu1 %v4877_v38  ;;  %v675_v24 = vld [vmem:[#allocation2 + $0xf28] sm:$0xff]  ;;  %v5084_v30 = vcombine.low %v691_v26, %v699_v17  ;;  %v4813_v32 = vcombine.high %v419_v27, %v427_v31  ;;  %v4812_v38 = vcombine.low %v419_v27, %v427_v31 }
 0x178   :  { %v4223_v61 = vcombine.low %v4127_v51, %v4133_v52  ;;  %v4363_v62 = vadd.f32 %v4362_v53, %v4361_v45  ;;  %v683_v28 = vld [vmem:[#allocation2 + $0xf68] sm:$0xff] }
 0x179   :  { %3781 = vmatpush1.bf16.msra.mxu0 %v4620_v49  ;;  %v5069_v33 = vcombine.high %v675_v24, %v683_v28  ;;  %v403_v34 = vld [vmem:[#allocation2 + $0x6a8] sm:$0xff]  ;;  %v5068_v39 = vcombine.low %v675_v24, %v683_v28 }
 0x17a   :  { %v5349_v12 = vrot.slane %v4223_v61, %v5212_v55  ;;  %v4453_v3 = vcombine.low %v4357_v60, %v4363_v62  ;;  %3822 = vmatpush1.bf16.msra.mxu1 %v4876_v50  ;;  %3782 = vmatprep.subr.bf16.mxu0 %v4605_v54  ;;  %v411_v35 = vld [vmem:[#allocation2 + $0x6e8] sm:$0xff] }
 0x17b   :  { %3823 = vmatprep.subr.bf16.mxu1 %v4861_v58  ;;  %v659_v36 = vld [vmem:[#allocation2 + $0xea8] sm:$0xff]  ;;  %v4797_v40 = vcombine.high %v403_v34, %v411_v35  ;;  %v4796_v49 = vcombine.low %v403_v34, %v411_v35  ;;  %v308_v35 = vld [vmem:[#allocation2 + $0x3b0] sm:$0xff] }
 0x17c   :  { %v4254_v18 = vcombine.low %v5346_v9, %v5349_v12  ;;  %v5360_v19 = vrot.slane %v4453_v3, %v5212_v55  ;;  %v667_v37 = vld [vmem:[#allocation2 + $0xee8] sm:$0xff] }
 0x17d   :  { %3783 = vmatpush1.bf16.msra.mxu0 %v4604_v6  ;;  %v5053_v41 = vcombine.high %v659_v36, %v667_v37  ;;  %v387_v43 = vld [vmem:[#allocation2 + $0x628] sm:$0xff]  ;;  %v5052_v50 = vcombine.low %v659_v36, %v667_v37  ;;  %v316_v36 = vld [vmem:[#allocation2 + $0x3f0] sm:$0xff] }
 0x17e   :  { %v4484_v21 = vcombine.low %v5355_v16, %v5360_v19  ;;  %3824 = vmatpush1.bf16.msra.mxu1 %v4860_v7  ;;  %3784 = vmatprep.subr.bf16.mxu0 %v4589_v8  ;;  %v395_v45 = vld [vmem:[#allocation2 + $0x668] sm:$0xff]  ;;  %v564_v37 = vld [vmem:[#allocation2 + $0xbb0] sm:$0xff]  ;;  %v405_v16 = vld [vmem:[#allocation2 + $0x6b8] sm:$0xff] }
 0x17f   :  { %3825 = vmatprep.subr.bf16.mxu1 %v4845_v13  ;;  %v643_v47 = vld [vmem:[#allocation2 + $0xe28] sm:$0xff]  ;;  %v4781_v51 = vcombine.high %v387_v43, %v395_v45  ;;  %v4780_v58 = vcombine.low %v387_v43, %v395_v45  ;;  %v4703_v43 = vcombine.high %v308_v35, %v316_v36  ;;  %v413_v19 = vld [vmem:[#allocation2 + $0x6f8] sm:$0xff] }
 0x180   :  { %v651_v48 = vld [vmem:[#allocation2 + $0xe68] sm:$0xff] }
 0x181   :  { %3785 = vmatpush1.bf16.msra.mxu0 %v4588_v20  ;;  %v5037_v52 = vcombine.high %v643_v47, %v651_v48  ;;  %v371_v53 = vld [vmem:[#allocation2 + $0x5a8] sm:$0xff]  ;;  %v5036_v60 = vcombine.low %v643_v47, %v651_v48  ;;  %v728_v47 = vsub.s32 5, %v5209_v44  ;;  %v292_v48 = vld [vmem:[#allocation2 + $0x330] sm:$0xff] }
 0x182   :  { %3826 = vmatpush1.bf16.msra.mxu1 %v4844_v22  ;;  %3786 = vmatprep.subr.bf16.mxu0 %v4829_v23  ;;  %v379_v54 = vld [vmem:[#allocation2 + $0x5e8] sm:$0xff] }
 0x183   :  { %3827 = vmatprep.subr.bf16.mxu1 %v5085_v25  ;;  %v627_v56 = vld [vmem:[#allocation2 + $0xda8] sm:$0xff]  ;;  %v4765_v61 = vcombine.high %v371_v53, %v379_v54  ;;  %v4764_v8 = vcombine.low %v371_v53, %v379_v54  ;;  %v4702_v53 = vcombine.low %v308_v35, %v316_v36 }
 0x184   :  { %v635_v57 = vld [vmem:[#allocation2 + $0xde8] sm:$0xff] }
 0x185   :  { %3787 = vmatpush2.bf16.msra.mxu0 %v4828_v29  ;;  %v5021_v62 = vcombine.high %v627_v56, %v635_v57  ;;  %v355_v1 = vld [vmem:[#allocation2 + $0x528] sm:$0xff]  ;;  %v5020_v3 = vcombine.low %v627_v56, %v635_v57  ;;  %v5369_v57 = vld [vmem:[#allocation4] sm:$0xff] }
 0x186   :  { %3828 = vmatpush2.bf16.msra.mxu1 %v5084_v30  ;;  %3788 = vmatprep.subr.bf16.mxu0 %v4813_v32  ;;  %v363_v5 = vld [vmem:[#allocation2 + $0x568] sm:$0xff] }
 0x187   :  { %3829 = vmatprep.subr.bf16.mxu1 %v5069_v33  ;;  %v611_v6 = vld [vmem:[#allocation2 + $0xd28] sm:$0xff]  ;;  %v4749_v13 = vcombine.high %v355_v1, %v363_v5  ;;  %v4748_v22 = vcombine.low %v355_v1, %v363_v5  ;;  %v532_v5 = vld [vmem:[#allocation2 + $0xab0] sm:$0xff] }
 0x188   :  { %v619_v7 = vld [vmem:[#allocation2 + $0xd68] sm:$0xff] }
 0x189   :  { %3789 = vmatpush2.bf16.msra.mxu0 %v4812_v38  ;;  %v5005_v14 = vcombine.high %v611_v6, %v619_v7  ;;  %v339_v11 = vld [vmem:[#allocation2 + $0x4a8] sm:$0xff]  ;;  %v5004_v23 = vcombine.low %v611_v6, %v619_v7  ;;  %v572_v38 = vld [vmem:[#allocation2 + $0xbf0] sm:$0xff] }
 0x18a   :  { %3830 = vmatpush2.bf16.msra.mxu1 %v5068_v39  ;;  %3790 = vmatprep.subr.bf16.mxu0 %v4797_v40  ;;  %v347_v26 = vld [vmem:[#allocation2 + $0x4e8] sm:$0xff]  ;;  %v724_v40 = vsub.s32 4, %v5209_v44  ;;  %v4959_v45 = vcombine.high %v564_v37, %v572_v38  ;;  %v4958_v54 = vcombine.low %v564_v37, %v572_v38  ;;  %v244_v37 = vld [vmem:[#allocation2 + $0x1b0] sm:$0xff] }
 0x18b   :  { %3831 = vmatprep.subr.bf16.mxu1 %v5053_v41  ;;  %v595_v17 = vld [vmem:[#allocation2 + $0xca8] sm:$0xff]  ;;  %v4733_v25 = vcombine.high %v339_v11, %v347_v26  ;;  %v4732_v30 = vcombine.low %v339_v11, %v347_v26  ;;  %v252_v38 = vld [vmem:[#allocation2 + $0x1f0] sm:$0xff] }
 0x18c   :  { %v603_v20 = vld [vmem:[#allocation2 + $0xce8] sm:$0xff] }
 0x18d   :  { %3791 = vmatpush2.bf16.msra.mxu0 %v4796_v49  ;;  %v4989_v27 = vcombine.high %v595_v17, %v603_v20  ;;  %v323_v31 = vld [vmem:[#allocation2 + $0x428] sm:$0xff]  ;;  %v4988_v32 = vcombine.low %v595_v17, %v603_v20  ;;  %v300_v49 = vld [vmem:[#allocation2 + $0x370] sm:$0xff] }
 0x18e   :  { %3832 = vmatpush2.bf16.msra.mxu1 %v5052_v50  ;;  %3792 = vmatprep.subr.bf16.mxu0 %v4781_v51  ;;  %v331_v24 = vld [vmem:[#allocation2 + $0x468] sm:$0xff]  ;;  %v548_v50 = vld [vmem:[#allocation2 + $0xb30] sm:$0xff]  ;;  %v4687_v56 = vcombine.high %v292_v48, %v300_v49 }
 0x18f   :  { %3833 = vmatprep.subr.bf16.mxu1 %v5037_v52  ;;  %v579_v28 = vld [vmem:[#allocation2 + $0xc28] sm:$0xff]  ;;  %v4717_v33 = vcombine.high %v323_v31, %v331_v24  ;;  %v4716_v39 = vcombine.low %v323_v31, %v331_v24  ;;  %v556_v51 = vld [vmem:[#allocation2 + $0xb70] sm:$0xff]  ;;  %v725_v52 = vrot.slane %v5291_v42, %v724_v40 }
 0x190   :  { %v587_v29 = vld [vmem:[#allocation2 + $0xc68] sm:$0xff]  ;;  %v540_v42 = vld [vmem:[#allocation2 + $0xaf0] sm:$0xff] }
 0x191   :  { %3793 = vmatpush2.bf16.msra.mxu0 %v4780_v58  ;;  %v4973_v34 = vcombine.high %v579_v28, %v587_v29  ;;  %v4972_v41 = vcombine.low %v579_v28, %v587_v29  ;;  %v729_v58 = vrot.slane %v5369_v57, %v728_v47  ;;  %v4927_v20 = vcombine.high %v532_v5, %v540_v42  ;;  %v524_v31 = vld [vmem:[#allocation2 + $0xa70] sm:$0xff] }
 0x192   :  { %3834 = vmatpush2.bf16.msra.mxu1 %v5036_v60  ;;  %3794 = vmatprep.subr.bf16.mxu0 %v4765_v61  ;;  %v4943_v60 = vcombine.high %v548_v50, %v556_v51  ;;  %v276_v61 = vld [vmem:[#allocation2 + $0x2b0] sm:$0xff]  ;;  %v4926_v35 = vcombine.low %v532_v5, %v540_v42 }
 0x193   :  { %3835 = vmatprep.subr.bf16.mxu1 %v5021_v62  ;;  %v284_v62 = vld [vmem:[#allocation2 + $0x2f0] sm:$0xff] }
 0x194   :  { %v228_v5 = vld [vmem:[#allocation2 + $0x130] sm:$0xff] }
 0x195   :  { %3795 = vmatpush2.bf16.msra.mxu0 %v4764_v8  ;;  %v4686_v8 = vcombine.low %v292_v48, %v300_v49  ;;  %v236_v42 = vld [vmem:[#allocation2 + $0x170] sm:$0xff] }
 0x196   :  { %3836 = vmatpush2.bf16.msra.mxu1 %v5020_v3  ;;  %3796 = vmatprep.subr.bf16.mxu0 %v4749_v13  ;;  %v4942_v13 = vcombine.low %v548_v50, %v556_v51 }
 0x197   :  { %3837 = vmatprep.subr.bf16.mxu1 %v5005_v14  ;;  %v4671_v14 = vcombine.high %v276_v61, %v284_v62 }
 0x199   :  { %3797 = vmatpush2.bf16.msra.mxu0 %v4748_v22  ;;  %v260_v22 = vld [vmem:[#allocation2 + $0x230] sm:$0xff] }
 0x19a   :  { %3838 = vmatpush2.bf16.msra.mxu1 %v5004_v23  ;;  %3798 = vmatprep.subr.bf16.mxu0 %v4733_v25  ;;  %v268_v23 = vld [vmem:[#allocation2 + $0x270] sm:$0xff] }
 0x19b   :  { %3839 = vmatprep.subr.bf16.mxu1 %v4989_v27  ;;  %v516_v27 = vld [vmem:[#allocation2 + $0xa30] sm:$0xff]  ;;  %v4655_v36 = vcombine.high %v260_v22, %v268_v23 }
 0x19d   :  { %3799 = vmatpush2.bf16.msra.mxu0 %v4732_v30  ;;  %v4670_v30 = vcombine.low %v276_v61, %v284_v62 }
 0x19e   :  { %3840 = vmatpush2.bf16.msra.mxu1 %v4988_v32  ;;  %3800 = vmatprep.subr.bf16.mxu0 %v4717_v33 }
 0x19f   :  { %3841 = vmatprep.subr.bf16.mxu1 %v4973_v34 }
 0x1a1   :  { %3801 = vmatpush2.bf16.msra.mxu0 %v4716_v39 }
 0x1a2   :  { %3842 = vmatpush2.bf16.msra.mxu1 %v4972_v41  ;;  %3852 = vmatprep.subr.bf16.mxu0 %v4703_v43 }
 0x1a3   :  { %3893 = vmatprep.subr.bf16.mxu1 %v4959_v45  ;;  %v4911_v45 = vcombine.high %v516_v27, %v524_v31 }
 0x1a4   :  { %v3558_v1 = vpop.f32.mrf.mxu0  ;;  %3803 = vmatmul.mubr.bf16.vlgmr.msra.gmra.mxu0 %v5273_v63 }
 0x1a5   :  { %v3559_v6 = vadd.f32 %v3558_v1, %v725_v52  ;;  %v3599_v7 = vpop.f32.mrf.mxu1  ;;  %3844 = vmatmul.mubr.bf16.vlgmr.msra.gmra.mxu1 %v5277_v4  ;;  %3853 = vmatpush1.bf16.msra.mxu0 %v4702_v53  ;;  %v500_v52 = vld [vmem:[#allocation2 + $0x9b0] sm:$0xff] }
 0x1a6   :  { %3894 = vmatpush1.bf16.msra.mxu1 %v4958_v54  ;;  %v3560_v3 = vpop.f32.mrf.mxu0  ;;  %3854 = vmatprep.subr.bf16.mxu0 %v4687_v56  ;;  %v508_v53 = vld [vmem:[#allocation2 + $0x9f0] sm:$0xff]  ;;  %v4654_v54 = vcombine.low %v260_v22, %v268_v23  ;;  %v4910_v56 = vcombine.low %v516_v27, %v524_v31 }
 0x1a7   :  { %v3600_v11 = vadd.f32 %v3599_v7, %v3559_v6  ;;  %v3561_v26 = vadd.f32 %v3560_v3, %v729_v58  ;;  %v3601_v17 = vpop.f32.mrf.mxu1  ;;  %3895 = vmatprep.subr.bf16.mxu1 %v4943_v60  ;;  %3884 = vmatprep.mubr.bf16.mxu0 %v5261_v10  ;;  %v4639_v58 = vcombine.high %v244_v37, %v252_v38 }
 0x1a8   :  { %v3562_v25 = vpop.f32.mrf.mxu0  ;;  %3925 = vmatprep.mubr.bf16.mxu1 %v5268_v15  ;;  %v4895_v6 = vcombine.high %v500_v52, %v508_v53 }
 0x1a9   :  { %v4098_v24 = vsel %vm4093_vm0, %v3600_v11, 0.0  ;;  %v3602_v28 = vadd.f32 %v3601_v17, %v3561_v26  ;;  %v3603_v29 = vpop.f32.mrf.mxu1  ;;  %3855 = vmatpush1.bf16.msra.mxu0 %v4686_v8  ;;  %v4638_v26 = vcombine.low %v244_v37, %v252_v38  ;;  %v4894_v17 = vcombine.low %v500_v52, %v508_v53  ;;  %v452_v52 = vld [vmem:[#allocation2 + $0x830] sm:$0xff] }
 0x1aa   :  { %v4134_v32 = vrot.slane %v4098_v24, 4  ;;  %v4328_v33 = vmul.f32 %v4098_v24, %v4098_v24  ;;  %3896 = vmatpush1.bf16.msra.mxu1 %v4942_v13  ;;  %v3563_v34 = vpop.f32.mrf.mxu0  ;;  %3856 = vmatprep.subr.bf16.mxu0 %v4671_v14  ;;  %v484_v14 = vld [vmem:[#allocation2 + $0x930] sm:$0xff] }
 0x1ab   :  { %v5100_v39 = vpack.c.bf16 %v3602_v28, %v3600_v11  ;;  %v4099_v41 = vsel %vm4093_vm0, %v3602_v28, 0.0  ;;  %v3604_v43 = vpop.f32.mrf.mxu1  ;;  %3897 = vmatprep.subr.bf16.mxu1 %v4927_v20  ;;  %v492_v11 = vld [vmem:[#allocation2 + $0x970] sm:$0xff]  ;;  %v4623_v20 = vcombine.high %v228_v5, %v236_v42 }
 0x1ac   :  { %v4135_v48 = vadd.f32 %v4134_v32, %v4098_v24  ;;  %v4364_v49 = vrot.slane %v4328_v33, 4  ;;  %v4140_v50 = vrot.slane %v4099_v41, 4  ;;  %v4329_v51 = vmul.f32 %v4099_v41, %v4099_v41  ;;  %v212_v24 = vld [vmem:[#allocation2 + $0xb0] sm:$0xff] }
 0x1ad   :  { %4082 = vst [vmem:[%s5538_s5 + $0x10] sm:$0xff] %v5100_v39  ;;  %3857 = vmatpush1.bf16.msra.mxu0 %v4670_v30  ;;  %v4879_v31 = vcombine.high %v484_v14, %v492_v11  ;;  %v220_v28 = vld [vmem:[#allocation2 + $0xf0] sm:$0xff] }
 0x1ae   :  { %v4136_v60 = vrot.slane %v4135_v48, 2  ;;  %v4365_v61 = vadd.f32 %v4364_v49, %v4328_v33  ;;  %v4141_v62 = vadd.f32 %v4140_v50, %v4099_v41  ;;  %v4370_v1 = vrot.slane %v4329_v51, 4  ;;  %3898 = vmatpush1.bf16.msra.mxu1 %v4926_v35  ;;  %3858 = vmatprep.subr.bf16.mxu0 %v4655_v36  ;;  %v468_v33 = vld [vmem:[#allocation2 + $0x8b0] sm:$0xff] }
 0x1af   :  { %3899 = vmatprep.subr.bf16.mxu1 %v4911_v45  ;;  %v476_v34 = vld [vmem:[#allocation2 + $0x8f0] sm:$0xff]  ;;  %v4622_v35 = vcombine.low %v228_v5, %v236_v42  ;;  %v4878_v36 = vcombine.low %v484_v14, %v492_v11  ;;  %v4607_v41 = vcombine.high %v212_v24, %v220_v28 }
 0x1b0   :  { %v4137_v7 = vadd.f32 %v4136_v60, %v4135_v48  ;;  %v4366_v8 = vrot.slane %v4365_v61, 2  ;;  %v4142_v3 = vrot.slane %v4141_v62, 2  ;;  %v4371_v13 = vadd.f32 %v4370_v1, %v4329_v51  ;;  %v196_v45 = vld [vmem:[#allocation2 + $0x30] sm:$0xff] }
 0x1b1   :  { %3859 = vmatpush1.bf16.msra.mxu0 %v4654_v54  ;;  %v4863_v43 = vcombine.high %v468_v33, %v476_v34  ;;  %v204_v48 = vld [vmem:[#allocation2 + $0x70] sm:$0xff]  ;;  %v4606_v54 = vcombine.low %v212_v24, %v220_v28 }
 0x1b2   :  { %v4138_v22 = vrot.slane %v4137_v7, 1  ;;  %v4367_v23 = vadd.f32 %v4366_v8, %v4365_v61  ;;  %v4143_v25 = vadd.f32 %v4142_v3, %v4141_v62  ;;  %v4372_v27 = vrot.slane %v4371_v13, 2  ;;  %3900 = vmatpush1.bf16.msra.mxu1 %v4910_v56  ;;  %3860 = vmatprep.subr.bf16.mxu0 %v4639_v58  ;;  %v460_v53 = vld [vmem:[#allocation2 + $0x870] sm:$0xff] }
 0x1b3   :  { %3901 = vmatprep.subr.bf16.mxu1 %v4895_v6  ;;  %v4862_v58 = vcombine.low %v468_v33, %v476_v34  ;;  %v4591_v60 = vcombine.high %v196_v45, %v204_v48  ;;  %v4847_v61 = vcombine.high %v452_v52, %v460_v53  ;;  %v436_v62 = vld [vmem:[#allocation2 + $0x7b0] sm:$0xff]  ;;  %v4590_v6 = vcombine.low %v196_v45, %v204_v48 }
 0x1b4   :  { %v4368_v29 = vrot.slane %v4367_v23, 1  ;;  %v4144_v30 = vrot.slane %v4143_v25, 1  ;;  %v4373_v32 = vadd.f32 %v4372_v27, %v4371_v13  ;;  %v5385_v37 = vadd.f32 %v4138_v22, %v4137_v7  ;;  %v444_v1 = vld [vmem:[#allocation2 + $0x7f0] sm:$0xff] }
 0x1b5   :  { %3861 = vmatpush1.bf16.msra.mxu0 %v4638_v26  ;;  %v692_v5 = vld [vmem:[#allocation2 + $0xfb0] sm:$0xff]  ;;  %v4846_v7 = vcombine.low %v452_v52, %v460_v53  ;;  %v4831_v8 = vcombine.high %v436_v62, %v444_v1 }
 0x1b6   :  { %v5387_v38 = vadd.f32 %v4144_v30, %v4143_v25  ;;  %v4374_v39 = vrot.slane %v4373_v32, 1  ;;  %3902 = vmatpush1.bf16.msra.mxu1 %v4894_v17  ;;  %3862 = vmatprep.subr.bf16.mxu0 %v4623_v20  ;;  %v5389_v49 = vadd.f32 %v4368_v29, %v4367_v23  ;;  %v700_v42 = vld [vmem:[#allocation2 + $0xff0] sm:$0xff]  ;;  %v4830_v17 = vcombine.low %v436_v62, %v444_v1 }
 0x1b7   :  { %3903 = vmatprep.subr.bf16.mxu1 %v4879_v31  ;;  %v5087_v3 = vcombine.high %v692_v5, %v700_v42  ;;  %v420_v13 = vld [vmem:[#allocation2 + $0x730] sm:$0xff]  ;;  %v5086_v20 = vcombine.low %v692_v5, %v700_v42 }
 0x1b8   :  { %v4224_v50 = vcombine.low %v5385_v37, %v5387_v38  ;;  %v5393_v51 = vadd.f32 %v4374_v39, %v4373_v32  ;;  %v428_v14 = vld [vmem:[#allocation2 + $0x770] sm:$0xff]  ;;  %v701_v37 = vld [vmem:[#allocation2 + $0xff8] sm:$0xff]  ;;  %v4262_v38 = vrot.slane %v4254_v18, %v5212_v55 }
 0x1b9   :  { %3863 = vmatpush1.bf16.msra.mxu0 %v4622_v35  ;;  %v676_v11 = vld [vmem:[#allocation2 + $0xf30] sm:$0xff]  ;;  %v4815_v22 = vcombine.high %v420_v13, %v428_v14  ;;  %v4814_v28 = vcombine.low %v420_v13, %v428_v14  ;;  %v677_v18 = vld [vmem:[#allocation2 + $0xf38] sm:$0xff] }
 0x1ba   :  { %v4454_v56 = vcombine.low %v5389_v49, %v5393_v51  ;;  %3904 = vmatpush1.bf16.msra.mxu1 %v4878_v36  ;;  %3864 = vmatprep.subr.bf16.mxu0 %v4607_v41  ;;  %v684_v26 = vld [vmem:[#allocation2 + $0xf70] sm:$0xff] }
 0x1bb   :  { %3905 = vmatprep.subr.bf16.mxu1 %v4863_v43  ;;  %v5071_v23 = vcombine.high %v676_v11, %v684_v26  ;;  %v404_v25 = vld [vmem:[#allocation2 + $0x6b0] sm:$0xff]  ;;  %v5070_v29 = vcombine.low %v676_v11, %v684_v26 }
 0x1bc   :  { %v412_v27 = vld [vmem:[#allocation2 + $0x6f0] sm:$0xff] }
 0x1bd   :  { %3865 = vmatpush1.bf16.msra.mxu0 %v4606_v54  ;;  %v660_v31 = vld [vmem:[#allocation2 + $0xeb0] sm:$0xff]  ;;  %v4799_v30 = vcombine.high %v404_v25, %v412_v27  ;;  %v4798_v39 = vcombine.low %v404_v25, %v412_v27 }
 0x1be   :  { %3906 = vmatpush1.bf16.msra.mxu1 %v4862_v58  ;;  %3866 = vmatprep.subr.bf16.mxu0 %v4591_v60  ;;  %v668_v24 = vld [vmem:[#allocation2 + $0xef0] sm:$0xff] }
 0x1bf   :  { %3907 = vmatprep.subr.bf16.mxu1 %v4847_v61  ;;  %v5055_v32 = vcombine.high %v660_v31, %v668_v24  ;;  %v388_v33 = vld [vmem:[#allocation2 + $0x630] sm:$0xff]  ;;  %v5054_v41 = vcombine.low %v660_v31, %v668_v24 }
 0x1c0   :  { %v396_v34 = vld [vmem:[#allocation2 + $0x670] sm:$0xff] }
 0x1c1   :  { %3867 = vmatpush1.bf16.msra.mxu0 %v4590_v6  ;;  %v644_v35 = vld [vmem:[#allocation2 + $0xe30] sm:$0xff]  ;;  %v4783_v43 = vcombine.high %v388_v33, %v396_v34  ;;  %v4782_v58 = vcombine.low %v388_v33, %v396_v34  ;;  %v309_v34 = vld [vmem:[#allocation2 + $0x3b8] sm:$0xff] }
 0x1c2   :  { %3908 = vmatpush1.bf16.msra.mxu1 %v4846_v7  ;;  %3868 = vmatprep.subr.bf16.mxu0 %v4831_v8  ;;  %v652_v36 = vld [vmem:[#allocation2 + $0xe70] sm:$0xff] }
 0x1c3   :  { %3909 = vmatprep.subr.bf16.mxu1 %v5087_v3  ;;  %v5039_v45 = vcombine.high %v644_v35, %v652_v36  ;;  %v372_v48 = vld [vmem:[#allocation2 + $0x5b0] sm:$0xff]  ;;  %v5038_v60 = vcombine.low %v644_v35, %v652_v36  ;;  %v317_v35 = vld [vmem:[#allocation2 + $0x3f8] sm:$0xff] }
 0x1c4   :  { %v380_v52 = vld [vmem:[#allocation2 + $0x5f0] sm:$0xff]  ;;  %v565_v36 = vld [vmem:[#allocation2 + $0xbb8] sm:$0xff] }
 0x1c5   :  { %3869 = vmatpush2.bf16.msra.mxu0 %v4830_v17  ;;  %v628_v53 = vld [vmem:[#allocation2 + $0xdb0] sm:$0xff]  ;;  %v4767_v61 = vcombine.high %v372_v48, %v380_v52  ;;  %v4766_v7 = vcombine.low %v372_v48, %v380_v52  ;;  %v4705_v48 = vcombine.high %v309_v34, %v317_v35 }
 0x1c6   :  { %3910 = vmatpush2.bf16.msra.mxu1 %v5086_v20  ;;  %3870 = vmatprep.subr.bf16.mxu0 %v4815_v22  ;;  %v636_v54 = vld [vmem:[#allocation2 + $0xdf0] sm:$0xff] }
 0x1c7   :  { %3911 = vmatprep.subr.bf16.mxu1 %v5071_v23  ;;  %v5023_v62 = vcombine.high %v628_v53, %v636_v54  ;;  %v356_v1 = vld [vmem:[#allocation2 + $0x530] sm:$0xff]  ;;  %v5022_v8 = vcombine.low %v628_v53, %v636_v54  ;;  %v736_v53 = vsub.s32 7, %v5209_v44  ;;  %v293_v54 = vld [vmem:[#allocation2 + $0x338] sm:$0xff] }
 0x1c8   :  { %v364_v5 = vld [vmem:[#allocation2 + $0x570] sm:$0xff] }
 0x1c9   :  { %3871 = vmatpush2.bf16.msra.mxu0 %v4814_v28  ;;  %v612_v42 = vld [vmem:[#allocation2 + $0xd30] sm:$0xff]  ;;  %v4751_v3 = vcombine.high %v356_v1, %v364_v5  ;;  %v4750_v20 = vcombine.low %v356_v1, %v364_v5  ;;  %v4704_v1 = vcombine.low %v309_v34, %v317_v35 }
 0x1ca   :  { %3912 = vmatpush2.bf16.msra.mxu1 %v5070_v29  ;;  %3872 = vmatprep.subr.bf16.mxu0 %v4799_v30  ;;  %v620_v6 = vld [vmem:[#allocation2 + $0xd70] sm:$0xff] }
 0x1cb   :  { %3913 = vmatprep.subr.bf16.mxu1 %v5055_v32  ;;  %v5007_v13 = vcombine.high %v612_v42, %v620_v6  ;;  %v340_v14 = vld [vmem:[#allocation2 + $0x4b0] sm:$0xff]  ;;  %v5006_v22 = vcombine.low %v612_v42, %v620_v6  ;;  %v737_v6 = vrot.slane %v5369_v57, %v736_v53 }
 0x1cc   :  { %v348_v11 = vld [vmem:[#allocation2 + $0x4f0] sm:$0xff] }
 0x1cd   :  { %3873 = vmatpush2.bf16.msra.mxu0 %v4798_v39  ;;  %v596_v26 = vld [vmem:[#allocation2 + $0xcb0] sm:$0xff]  ;;  %v4735_v23 = vcombine.high %v340_v14, %v348_v11  ;;  %v4734_v29 = vcombine.low %v340_v14, %v348_v11  ;;  %v573_v39 = vld [vmem:[#allocation2 + $0xbf8] sm:$0xff] }
 0x1ce   :  { %3914 = vmatpush2.bf16.msra.mxu1 %v5054_v41  ;;  %3874 = vmatprep.subr.bf16.mxu0 %v4783_v43  ;;  %v604_v17 = vld [vmem:[#allocation2 + $0xcf0] sm:$0xff]  ;;  %v732_v43 = vsub.s32 6, %v5209_v44  ;;  %v4961_v52 = vcombine.high %v565_v36, %v573_v39  ;;  %v4960_v5 = vcombine.low %v565_v36, %v573_v39  ;;  %v533_v14 = vld [vmem:[#allocation2 + $0xab8] sm:$0xff] }
 0x1cf   :  { %3915 = vmatprep.subr.bf16.mxu1 %v5039_v45  ;;  %v4991_v25 = vcombine.high %v596_v26, %v604_v17  ;;  %v324_v27 = vld [vmem:[#allocation2 + $0x430] sm:$0xff]  ;;  %v4990_v30 = vcombine.low %v596_v26, %v604_v17  ;;  %v541_v11 = vld [vmem:[#allocation2 + $0xaf8] sm:$0xff] }
 0x1d0   :  { %v332_v31 = vld [vmem:[#allocation2 + $0x470] sm:$0xff] }
 0x1d1   :  { %3875 = vmatpush2.bf16.msra.mxu0 %v4782_v58  ;;  %v580_v24 = vld [vmem:[#allocation2 + $0xc30] sm:$0xff]  ;;  %v4719_v32 = vcombine.high %v324_v27, %v332_v31  ;;  %v4718_v41 = vcombine.low %v324_v27, %v332_v31  ;;  %v301_v58 = vld [vmem:[#allocation2 + $0x378] sm:$0xff] }
 0x1d2   :  { %3916 = vmatpush2.bf16.msra.mxu1 %v5038_v60  ;;  %3876 = vmatprep.subr.bf16.mxu0 %v4767_v61  ;;  %v588_v28 = vld [vmem:[#allocation2 + $0xc70] sm:$0xff]  ;;  %v549_v60 = vld [vmem:[#allocation2 + $0xb38] sm:$0xff]  ;;  %v4689_v42 = vcombine.high %v293_v54, %v301_v58 }
 0x1d3   :  { %3917 = vmatprep.subr.bf16.mxu1 %v5023_v62  ;;  %v4975_v33 = vcombine.high %v580_v24, %v588_v28  ;;  %v4974_v45 = vcombine.low %v580_v24, %v588_v28  ;;  %v557_v61 = vld [vmem:[#allocation2 + $0xb78] sm:$0xff]  ;;  %v733_v62 = vrot.slane %v5369_v57, %v732_v43  ;;  %v4929_v24 = vcombine.high %v533_v14, %v541_v11 }
 0x1d4   :  { %v261_v28 = vld [vmem:[#allocation2 + $0x238] sm:$0xff] }
 0x1d5   :  { %3877 = vmatpush2.bf16.msra.mxu0 %v4766_v7  ;;  %v4945_v7 = vcombine.high %v549_v60, %v557_v61 }
 0x1d6   :  { %3918 = vmatpush2.bf16.msra.mxu1 %v5022_v8  ;;  %3878 = vmatprep.subr.bf16.mxu0 %v4751_v3  ;;  %v277_v8 = vld [vmem:[#allocation2 + $0x2b8] sm:$0xff] }
 0x1d7   :  { %3919 = vmatprep.subr.bf16.mxu1 %v5007_v13  ;;  %v285_v3 = vld [vmem:[#allocation2 + $0x2f8] sm:$0xff] }
 0x1d8   :  { %v4672_v39 = vcombine.low %v277_v8, %v285_v3 }
 0x1d9   :  { %3879 = vmatpush2.bf16.msra.mxu0 %v4750_v20  ;;  %v4688_v20 = vcombine.low %v293_v54, %v301_v58  ;;  %v253_v58 = vld [vmem:[#allocation2 + $0x1f8] sm:$0xff] }
 0x1da   :  { %3920 = vmatpush2.bf16.msra.mxu1 %v5006_v22  ;;  %3880 = vmatprep.subr.bf16.mxu0 %v4735_v23  ;;  %v4944_v23 = vcombine.low %v549_v60, %v557_v61 }
 0x1db   :  { %3921 = vmatprep.subr.bf16.mxu1 %v4991_v25  ;;  %v4673_v25 = vcombine.high %v277_v8, %v285_v3  ;;  %v509_v8 = vld [vmem:[#allocation2 + $0x9f8] sm:$0xff] }
 0x1dd   :  { %3881 = vmatpush2.bf16.msra.mxu0 %v4734_v29  ;;  %v269_v29 = vld [vmem:[#allocation2 + $0x278] sm:$0xff] }
 0x1de   :  { %3922 = vmatpush2.bf16.msra.mxu1 %v4990_v30  ;;  %3882 = vmatprep.subr.bf16.mxu0 %v4719_v32  ;;  %v517_v32 = vld [vmem:[#allocation2 + $0xa38] sm:$0xff]  ;;  %v4657_v54 = vcombine.high %v261_v28, %v269_v29  ;;  %v4656_v3 = vcombine.low %v261_v28, %v269_v29 }
 0x1df   :  { %3923 = vmatprep.subr.bf16.mxu1 %v4975_v33  ;;  %v525_v33 = vld [vmem:[#allocation2 + $0xa78] sm:$0xff] }
 0x1e1   :  { %3883 = vmatpush2.bf16.msra.mxu0 %v4718_v41 }
 0x1e2   :  { %3924 = vmatpush2.bf16.msra.mxu1 %v4974_v45  ;;  %3934 = vmatprep.subr.bf16.mxu0 %v4705_v48 }
 0x1e3   :  { %3975 = vmatprep.subr.bf16.mxu1 %v4961_v52  ;;  %v4928_v52 = vcombine.low %v533_v14, %v541_v11 }
 0x1e4   :  { %v3640_v13 = vpop.f32.mrf.mxu0  ;;  %3885 = vmatmul.mubr.bf16.vlgmr.msra.gmra.mxu0 %v5273_v63 }
 0x1e5   :  { %v3641_v26 = vadd.f32 %v3640_v13, %v733_v62  ;;  %v3681_v17 = vpop.f32.mrf.mxu1  ;;  %3926 = vmatmul.mubr.bf16.vlgmr.msra.gmra.mxu1 %v5277_v4  ;;  %3935 = vmatpush1.bf16.msra.mxu0 %v4704_v1  ;;  %v4913_v62 = vcombine.high %v517_v32, %v525_v33  ;;  %v4912_v13 = vcombine.low %v517_v32, %v525_v33 }
 0x1e6   :  { %3976 = vmatpush1.bf16.msra.mxu1 %v4960_v5  ;;  %v3642_v22 = vpop.f32.mrf.mxu0  ;;  %3936 = vmatprep.subr.bf16.mxu0 %v4689_v42 }
 0x1e7   :  { %v3682_v57 = vadd.f32 %v3681_v17, %v3641_v26  ;;  %v3643_v27 = vadd.f32 %v3642_v22, %v737_v6  ;;  %v3683_v31 = vpop.f32.mrf.mxu1  ;;  %3977 = vmatprep.subr.bf16.mxu1 %v4945_v7  ;;  %3966 = vmatprep.mubr.bf16.mxu0 %v5261_v10  ;;  %v245_v10 = vld [vmem:[#allocation2 + $0x1b8] sm:$0xff] }
 0x1e8   :  { %v3644_v30 = vpop.f32.mrf.mxu0  ;;  %4007 = vmatprep.mubr.bf16.mxu1 %v5268_v15  ;;  %v501_v7 = vld [vmem:[#allocation2 + $0x9b8] sm:$0xff]  ;;  %v4641_v14 = vcombine.high %v245_v10, %v253_v58  ;;  %v4640_v28 = vcombine.low %v245_v10, %v253_v58 }
 0x1e9   :  { %v4100_v34 = vsel %vm4093_vm0, %v3682_v57, 0.0  ;;  %v3684_v35 = vadd.f32 %v3683_v31, %v3643_v27  ;;  %v3685_v36 = vpop.f32.mrf.mxu1  ;;  %3937 = vmatpush1.bf16.msra.mxu0 %v4688_v20  ;;  %v229_v22 = vld [vmem:[#allocation2 + $0x138] sm:$0xff]  ;;  %v4896_v29 = vcombine.low %v501_v7, %v509_v8 }
 0x1ea   :  { %v4146_v41 = vrot.slane %v4100_v34, 4  ;;  %v4330_v45 = vmul.f32 %v4100_v34, %v4100_v34  ;;  %3978 = vmatpush1.bf16.msra.mxu1 %v4944_v23  ;;  %v3645_v48 = vpop.f32.mrf.mxu0  ;;  %3938 = vmatprep.subr.bf16.mxu0 %v4673_v25  ;;  %v237_v23 = vld [vmem:[#allocation2 + $0x178] sm:$0xff]  ;;  %v4897_v25 = vcombine.high %v501_v7, %v509_v8 }
 0x1eb   :  { %v5101_v60 = vpack.c.bf16 %v3684_v35, %v3682_v57  ;;  %v4101_v15 = vsel %vm4093_vm0, %v3684_v35, 0.0  ;;  %v3686_v61 = vpop.f32.mrf.mxu1  ;;  %3979 = vmatprep.subr.bf16.mxu1 %v4929_v24  ;;  %v485_v30 = vld [vmem:[#allocation2 + $0x938] sm:$0xff]  ;;  %v4625_v32 = vcombine.high %v229_v22, %v237_v23 }
 0x1ec   :  { %v4147_v1 = vadd.f32 %v4146_v41, %v4100_v34  ;;  %v4376_v5 = vrot.slane %v4330_v45, 4  ;;  %v4152_v42 = vrot.slane %v4101_v15, 4  ;;  %v4331_v6 = vmul.f32 %v4101_v15, %v4101_v15  ;;  %v493_v34 = vld [vmem:[#allocation2 + $0x978] sm:$0xff] }
 0x1ed   :  { %4083 = vst [vmem:[%s5538_s5 + $0x18] sm:$0xff] %v5101_v60  ;;  %3939 = vmatpush1.bf16.msra.mxu0 %v4672_v39  ;;  %v4881_v41 = vcombine.high %v485_v30, %v493_v34  ;;  %v221_v48 = vld [vmem:[#allocation2 + $0xf8] sm:$0xff]  ;;  %v4880_v10 = vcombine.low %v485_v30, %v493_v34  ;;  %v4476_v30 = vrot.slane %v4454_v56, %v5212_v55 }
 0x1ee   :  { %v4148_v11 = vrot.slane %v4147_v1, 2  ;;  %v4377_v26 = vadd.f32 %v4376_v5, %v4330_v45  ;;  %v4153_v17 = vadd.f32 %v4152_v42, %v4101_v15  ;;  %v4382_v20 = vrot.slane %v4331_v6, 4  ;;  %3980 = vmatpush1.bf16.msra.mxu1 %v4928_v52  ;;  %3940 = vmatprep.subr.bf16.mxu0 %v4657_v54  ;;  %v213_v45 = vld [vmem:[#allocation2 + $0xb8] sm:$0xff] }
 0x1ef   :  { %3981 = vmatprep.subr.bf16.mxu1 %v4913_v62  ;;  %v469_v15 = vld [vmem:[#allocation2 + $0x8b8] sm:$0xff]  ;;  %v4624_v62 = vcombine.low %v229_v22, %v237_v23  ;;  %v4609_v42 = vcombine.high %v213_v45, %v221_v48  ;;  %v4246_v23 = vrot.slane %v4224_v50, %v5212_v55 }
 0x1f0   :  { %v4149_v57 = vadd.f32 %v4148_v11, %v4147_v1  ;;  %v4378_v27 = vrot.slane %v4377_v26, 2  ;;  %v4154_v31 = vrot.slane %v4153_v17, 2  ;;  %v4383_v24 = vadd.f32 %v4382_v20, %v4331_v6  ;;  %v477_v61 = vld [vmem:[#allocation2 + $0x8f8] sm:$0xff] }
 0x1f1   :  { %3941 = vmatpush1.bf16.msra.mxu0 %v4656_v3  ;;  %v197_v6 = vld [vmem:[#allocation2 + $0x38] sm:$0xff]  ;;  %v4865_v8 = vcombine.high %v469_v15, %v477_v61  ;;  %v4864_v20 = vcombine.low %v469_v15, %v477_v61 }
 0x1f2   :  { %v4150_v33 = vrot.slane %v4149_v57, 1  ;;  %v4379_v35 = vadd.f32 %v4378_v27, %v4377_v26  ;;  %v4155_v36 = vadd.f32 %v4154_v31, %v4153_v17  ;;  %v4384_v39 = vrot.slane %v4383_v24, 2  ;;  %3982 = vmatpush1.bf16.msra.mxu1 %v4912_v13  ;;  %3942 = vmatprep.subr.bf16.mxu0 %v4641_v14  ;;  %v205_v7 = vld [vmem:[#allocation2 + $0x78] sm:$0xff] }
 0x1f3   :  { %3983 = vmatprep.subr.bf16.mxu1 %v4897_v25  ;;  %v453_v11 = vld [vmem:[#allocation2 + $0x838] sm:$0xff]  ;;  %v4608_v17 = vcombine.low %v213_v45, %v221_v48  ;;  %v4593_v22 = vcombine.high %v197_v6, %v205_v7  ;;  %v4592_v50 = vcombine.low %v197_v6, %v205_v7  ;;  %v4800_v7 = vcombine.low %v405_v16, %v413_v19 }
 0x1f4   :  { %v4380_v52 = vrot.slane %v4379_v35, 1  ;;  %v4156_v54 = vrot.slane %v4155_v36, 1  ;;  %v4385_v60 = vadd.f32 %v4384_v39, %v4383_v24  ;;  %v4151_v58 = vadd.f32 %v4150_v33, %v4149_v57  ;;  %v461_v26 = vld [vmem:[#allocation2 + $0x878] sm:$0xff] }
 0x1f5   :  { %3943 = vmatpush1.bf16.msra.mxu0 %v4640_v28  ;;  %v4849_v27 = vcombine.high %v453_v11, %v461_v26  ;;  %v437_v31 = vld [vmem:[#allocation2 + $0x7b8] sm:$0xff]  ;;  %v4492_v39 = vrot.slane %v4484_v21, %v5212_v55 }
 0x1f6   :  { %v4157_v1 = vadd.f32 %v4156_v54, %v4155_v36  ;;  %v4386_v5 = vrot.slane %v4385_v60, 1  ;;  %3984 = vmatpush1.bf16.msra.mxu1 %v4896_v29  ;;  %3944 = vmatprep.subr.bf16.mxu0 %v4625_v32  ;;  %v4381_v3 = vadd.f32 %v4380_v52, %v4379_v35  ;;  %v445_v24 = vld [vmem:[#allocation2 + $0x7f8] sm:$0xff]  ;;  %v4848_v32 = vcombine.low %v453_v11, %v461_v26 }
 0x1f7   :  { %3985 = vmatprep.subr.bf16.mxu1 %v4881_v41  ;;  %v693_v29 = vld [vmem:[#allocation2 + $0xfb8] sm:$0xff]  ;;  %v4833_v49 = vcombine.high %v437_v31, %v445_v24  ;;  %v4832_v45 = vcombine.low %v437_v31, %v445_v24 }
 0x1f8   :  { %v4225_v13 = vcombine.low %v4151_v58, %v4157_v1  ;;  %v4387_v14 = vadd.f32 %v4386_v5, %v4385_v60  ;;  %v5089_v51 = vcombine.high %v693_v29, %v701_v37  ;;  %v421_v56 = vld [vmem:[#allocation2 + $0x738] sm:$0xff]  ;;  %v5088_v52 = vcombine.low %v693_v29, %v701_v37 }
 0x1f9   :  { %3945 = vmatpush1.bf16.msra.mxu0 %v4624_v62  ;;  %v429_v36 = vld [vmem:[#allocation2 + $0x778] sm:$0xff] }
 0x1fa   :  { %v4253_v25 = vrot.slane %v4225_v13, %v5212_v55  ;;  %v4455_v57 = vcombine.low %v4381_v3, %v4387_v14  ;;  %3986 = vmatpush1.bf16.msra.mxu1 %v4880_v10  ;;  %3946 = vmatprep.subr.bf16.mxu0 %v4609_v42  ;;  %v685_v41 = vld [vmem:[#allocation2 + $0xf78] sm:$0xff]  ;;  %v4817_v54 = vcombine.high %v421_v56, %v429_v36 }
 0x1fb   :  { %3987 = vmatprep.subr.bf16.mxu1 %v4865_v8  ;;  %v5073_v60 = vcombine.high %v677_v18, %v685_v41  ;;  %v661_v21 = vld [vmem:[#allocation2 + $0xeb8] sm:$0xff]  ;;  %v4816_v61 = vcombine.low %v421_v56, %v429_v36  ;;  %v5072_v62 = vcombine.low %v677_v18, %v685_v41  ;;  %v4801_v10 = vcombine.high %v405_v16, %v413_v19 }
 0x1fc   :  { %v4255_v34 = vcombine.low %v4246_v23, %v4253_v25  ;;  %v4483_v28 = vrot.slane %v4455_v57, %v5212_v55  ;;  %v669_v15 = vld [vmem:[#allocation2 + $0xef8] sm:$0xff] }
 0x1fd   :  { %3947 = vmatpush1.bf16.msra.mxu0 %v4608_v17  ;;  %v5057_v58 = vcombine.high %v661_v21, %v669_v15  ;;  %v389_v1 = vld [vmem:[#allocation2 + $0x638] sm:$0xff]  ;;  %v5056_v8 = vcombine.low %v661_v21, %v669_v15 }
 0x1fe   :  { %v4269_v33 = vrot.slane %v4255_v34, %v5212_v55  ;;  %v4485_v35 = vcombine.low %v4476_v30, %v4483_v28  ;;  %3988 = vmatpush1.bf16.msra.mxu1 %v4864_v20  ;;  %3948 = vmatprep.subr.bf16.mxu0 %v4593_v22  ;;  %v397_v5 = vld [vmem:[#allocation2 + $0x678] sm:$0xff] }
 0x1ff   :  { %3989 = vmatprep.subr.bf16.mxu1 %v4849_v27  ;;  %v645_v42 = vld [vmem:[#allocation2 + $0xe38] sm:$0xff]  ;;  %v4785_v3 = vcombine.high %v389_v1, %v397_v5  ;;  %v4784_v20 = vcombine.low %v389_v1, %v397_v5 }
 0x200   :  { %v4270_v9 = vcombine.low %v4262_v38, %v4269_v33  ;;  %v4499_v12 = vrot.slane %v4485_v35, %v5212_v55  ;;  %v653_v6 = vld [vmem:[#allocation2 + $0xe78] sm:$0xff] }
 0x201   :  { %3949 = vmatpush1.bf16.msra.mxu0 %v4592_v50  ;;  %v5041_v13 = vcombine.high %v645_v42, %v653_v6  ;;  %v373_v14 = vld [vmem:[#allocation2 + $0x5b8] sm:$0xff]  ;;  %v5040_v22 = vcombine.low %v645_v42, %v653_v6 }
 0x202   :  { %4322 = vst [vmem:[%s5539_s6] sm:$0xff] %v4270_v9  ;;  %v4500_v48 = vcombine.low %v4492_v39, %v4499_v12  ;;  %3990 = vmatpush1.bf16.msra.mxu1 %v4848_v32  ;;  %3950 = vmatprep.subr.bf16.mxu0 %v4833_v49  ;;  %v381_v11 = vld [vmem:[#allocation2 + $0x5f8] sm:$0xff] }
 0x203   :  { %3991 = vmatprep.subr.bf16.mxu1 %v5089_v51  ;;  %v629_v26 = vld [vmem:[#allocation2 + $0xdb8] sm:$0xff]  ;;  %v4769_v23 = vcombine.high %v373_v14, %v381_v11  ;;  %v4768_v30 = vcombine.low %v373_v14, %v381_v11 }
 0x204   :  { %4552 = vst [vmem:[%s5540_s7] sm:$0xff] %v4500_v48  ;;  %v637_v17 = vld [vmem:[#allocation2 + $0xdf8] sm:$0xff] }
 0x205   :  { %3951 = vmatpush2.bf16.msra.mxu0 %v4832_v45  ;;  %v5025_v25 = vcombine.high %v629_v26, %v637_v17  ;;  %v357_v57 = vld [vmem:[#allocation2 + $0x538] sm:$0xff]  ;;  %v5024_v34 = vcombine.low %v629_v26, %v637_v17 }
 0x206   :  { %3992 = vmatpush2.bf16.msra.mxu1 %v5088_v52  ;;  %3952 = vmatprep.subr.bf16.mxu0 %v4817_v54  ;;  %v365_v27 = vld [vmem:[#allocation2 + $0x578] sm:$0xff]  ;;  %v5442_v54 = vld [vmem:[#allocation4 + $0x8] sm:$0xff] }
 0x207   :  { %3993 = vmatprep.subr.bf16.mxu1 %v5073_v60  ;;  %v613_v31 = vld [vmem:[#allocation2 + $0xd38] sm:$0xff]  ;;  %v4753_v28 = vcombine.high %v357_v57, %v365_v27  ;;  %v4752_v33 = vcombine.low %v357_v57, %v365_v27  ;;  %v741_v60 = vrot.slane %v5442_v54, %v5226_v2  ;;  %v745_v16 = vrot.slane %v5442_v54, %v712_v46 }
 0x208   :  { %v621_v24 = vld [vmem:[#allocation2 + $0xd78] sm:$0xff] }
 0x209   :  { %3953 = vmatpush2.bf16.msra.mxu0 %v4816_v61  ;;  %v5009_v29 = vcombine.high %v613_v31, %v621_v24  ;;  %v341_v37 = vld [vmem:[#allocation2 + $0x4b8] sm:$0xff]  ;;  %v5008_v35 = vcombine.low %v613_v31, %v621_v24 }
 0x20a   :  { %3994 = vmatpush2.bf16.msra.mxu1 %v5072_v62  ;;  %3954 = vmatprep.subr.bf16.mxu0 %v4801_v10  ;;  %v349_v38 = vld [vmem:[#allocation2 + $0x4f8] sm:$0xff] }
 0x20b   :  { %3995 = vmatprep.subr.bf16.mxu1 %v5057_v58  ;;  %v597_v50 = vld [vmem:[#allocation2 + $0xcb8] sm:$0xff]  ;;  %v4737_v49 = vcombine.high %v341_v37, %v349_v38  ;;  %v4736_v12 = vcombine.low %v341_v37, %v349_v38 }
 0x20c   :  { %v605_v32 = vld [vmem:[#allocation2 + $0xcf8] sm:$0xff] }
 0x20d   :  { %3955 = vmatpush2.bf16.msra.mxu0 %v4800_v7  ;;  %v4993_v51 = vcombine.high %v597_v50, %v605_v32  ;;  %v325_v56 = vld [vmem:[#allocation2 + $0x438] sm:$0xff]  ;;  %v4992_v18 = vcombine.low %v597_v50, %v605_v32 }
 0x20e   :  { %3996 = vmatpush2.bf16.msra.mxu1 %v5056_v8  ;;  %3956 = vmatprep.subr.bf16.mxu0 %v4785_v3  ;;  %v333_v36 = vld [vmem:[#allocation2 + $0x478] sm:$0xff] }
 0x20f   :  { %3997 = vmatprep.subr.bf16.mxu1 %v5041_v13  ;;  %v581_v39 = vld [vmem:[#allocation2 + $0xc38] sm:$0xff]  ;;  %v4721_v41 = vcombine.high %v325_v56, %v333_v36  ;;  %v4720_v48 = vcombine.low %v325_v56, %v333_v36  ;;  %v749_v56 = vrot.slane %v5442_v54, %v716_v59  ;;  %v753_v36 = vrot.slane %v5442_v54, %v720_v0 }
 0x210   :  { %v589_v9 = vld [vmem:[#allocation2 + $0xc78] sm:$0xff] }
 0x211   :  { %3957 = vmatpush2.bf16.msra.mxu0 %v4784_v20  ;;  %v4977_v45 = vcombine.high %v581_v39, %v589_v9  ;;  %v4976_v52 = vcombine.low %v581_v39, %v589_v9 }
 0x212   :  { %3998 = vmatpush2.bf16.msra.mxu1 %v5040_v22  ;;  %3958 = vmatprep.subr.bf16.mxu0 %v4769_v23 }
 0x213   :  { %3999 = vmatprep.subr.bf16.mxu1 %v5025_v25 }
 0x215   :  { %3959 = vmatpush2.bf16.msra.mxu0 %v4768_v30 }
 0x216   :  { %4000 = vmatpush2.bf16.msra.mxu1 %v5024_v34  ;;  %3960 = vmatprep.subr.bf16.mxu0 %v4753_v28 }
 0x217   :  { %4001 = vmatprep.subr.bf16.mxu1 %v5009_v29 }
 0x219   :  { %3961 = vmatpush2.bf16.msra.mxu0 %v4752_v33 }
 0x21a   :  { %4002 = vmatpush2.bf16.msra.mxu1 %v5008_v35  ;;  %3962 = vmatprep.subr.bf16.mxu0 %v4737_v49 }
 0x21b   :  { %4003 = vmatprep.subr.bf16.mxu1 %v4993_v51 }
 0x21d   :  { %3963 = vmatpush2.bf16.msra.mxu0 %v4736_v12 }
 0x21e   :  { %4004 = vmatpush2.bf16.msra.mxu1 %v4992_v18  ;;  %3964 = vmatprep.subr.bf16.mxu0 %v4721_v41 }
 0x21f   :  { %4005 = vmatprep.subr.bf16.mxu1 %v4977_v45 }
 0x221   :  { %3965 = vmatpush2.bf16.msra.mxu0 %v4720_v48 }
 0x222   :  { %4006 = vmatpush2.bf16.msra.mxu1 %v4976_v52 }
 0x224   :  { %v3722_v19 = vpop.f32.mrf.mxu0  ;;  %3967 = vmatmul.mubr.bf16.vlgmr.msra.gmra.mxu0 %v5273_v63 }
 0x225   :  { %v3723_v21 = vadd.f32 %v3722_v19, %v741_v60  ;;  %v3763_v15 = vpop.f32.mrf.mxu1  ;;  %4008 = vmatmul.mubr.bf16.vlgmr.msra.gmra.mxu1 %v5277_v4 }
 0x226   :  { %v3724_v61 = vpop.f32.mrf.mxu0 }
 0x227   :  { %v3764_v62 = vadd.f32 %v3763_v15, %v3723_v21  ;;  %v3725_v10 = vadd.f32 %v3724_v61, %v745_v16  ;;  %v3765_v58 = vpop.f32.mrf.mxu1 }
 0x228   :  { %v3726_v1 = vpop.f32.mrf.mxu0 }
 0x229   :  { %v4102_v2 = vsel %vm4093_vm0, %v3764_v62, 0.0  ;;  %v3766_v5 = vadd.f32 %v3765_v58, %v3725_v10  ;;  %v3767_v42 = vpop.f32.mrf.mxu1 }
 0x22a   :  { %v4158_v6 = vrot.slane %v4102_v2, 4  ;;  %v4332_v7 = vmul.f32 %v4102_v2, %v4102_v2  ;;  %v3727_v46 = vpop.f32.mrf.mxu0 }
 0x22b   :  { %v5102_v8 = vpack.c.bf16 %v3766_v5, %v3764_v62  ;;  %v4103_v63 = vsel %vm4093_vm0, %v3766_v5, 0.0  ;;  %v3768_v3 = vpop.f32.mrf.mxu1 }
 0x22c   :  { %v4159_v13 = vadd.f32 %v4158_v6, %v4102_v2  ;;  %v4388_v4 = vrot.slane %v4332_v7, 4  ;;  %v4164_v14 = vrot.slane %v4103_v63, 4  ;;  %v4333_v11 = vmul.f32 %v4103_v63, %v4103_v63 }
 0x22d   :  { %4084 = vst [vmem:[%s5538_s5 + $0x20] sm:$0xff] %v5102_v8 }
 0x22e   :  { %v4160_v26 = vrot.slane %v4159_v13, 2  ;;  %v4389_v17 = vadd.f32 %v4388_v4, %v4332_v7  ;;  %v4165_v20 = vadd.f32 %v4164_v14, %v4103_v63  ;;  %v4394_v22 = vrot.slane %v4333_v11, 4 }
 0x230   :  { %v4161_v23 = vadd.f32 %v4160_v26, %v4159_v13  ;;  %v4390_v25 = vrot.slane %v4389_v17, 2  ;;  %v4166_v57 = vrot.slane %v4165_v20, 2  ;;  %v4395_v27 = vadd.f32 %v4394_v22, %v4333_v11 }
 0x232   :  { %v4162_v31 = vrot.slane %v4161_v23, 1  ;;  %v4391_v24 = vadd.f32 %v4390_v25, %v4389_v17  ;;  %v4167_v30 = vadd.f32 %v4166_v57, %v4165_v20  ;;  %v4396_v34 = vrot.slane %v4395_v27, 2 }
 0x234   :  { %v4392_v28 = vrot.slane %v4391_v24, 1  ;;  %v4168_v29 = vrot.slane %v4167_v30, 1  ;;  %v4397_v37 = vadd.f32 %v4396_v34, %v4395_v27  ;;  %v4163_v38 = vadd.f32 %v4162_v31, %v4161_v23 }
 0x236   :  { %v4169_v50 = vadd.f32 %v4168_v29, %v4167_v30  ;;  %v4398_v32 = vrot.slane %v4397_v37, 1  ;;  %v4393_v33 = vadd.f32 %v4392_v28, %v4391_v24 }
 0x238   :  { %v4271_v35 = vcombine.low %v4163_v38, %v4169_v50  ;;  %v4399_v49 = vadd.f32 %v4398_v32, %v4397_v37  ;;  %v757_v50 = vrot.slane %v5442_v54, %v724_v40  ;;  %v761_v32 = vrot.slane %v5442_v54, %v728_v47 }
 0x23a   :  { %v4501_v51 = vcombine.low %v4393_v33, %v4399_v49  ;;  %v5472_v24 = vrot.slane %v4271_v35, %v5212_v55 }
 0x23c   :  { %v5478_v28 = vrot.slane %v4501_v51, %v5212_v55 }
 0x264   :  { %v3804_v39 = vpop.f32.mrf.mxu0 }
 0x265   :  { %v3805_v9 = vadd.f32 %v3804_v39, %v749_v56  ;;  %v3845_v12 = vpop.f32.mrf.mxu1 }
 0x266   :  { %v3806_v18 = vpop.f32.mrf.mxu0 }
 0x267   :  { %v3846_v41 = vadd.f32 %v3845_v12, %v3805_v9  ;;  %v3807_v45 = vadd.f32 %v3806_v18, %v753_v36  ;;  %v3847_v48 = vpop.f32.mrf.mxu1 }
 0x268   :  { %v3808_v52 = vpop.f32.mrf.mxu0 }
 0x269   :  { %v4104_v60 = vsel %vm4093_vm0, %v3846_v41, 0.0  ;;  %v3848_v16 = vadd.f32 %v3847_v48, %v3807_v45  ;;  %v3849_v19 = vpop.f32.mrf.mxu1 }
 0x26a   :  { %v4170_v21 = vrot.slane %v4104_v60, 4  ;;  %v4334_v15 = vmul.f32 %v4104_v60, %v4104_v60  ;;  %v3809_v59 = vpop.f32.mrf.mxu0 }
 0x26b   :  { %v5103_v61 = vpack.c.bf16 %v3848_v16, %v3846_v41  ;;  %v4105_v0 = vsel %vm4093_vm0, %v3848_v16, 0.0  ;;  %v3850_v62 = vpop.f32.mrf.mxu1 }
 0x26c   :  { %v4171_v10 = vadd.f32 %v4170_v21, %v4104_v60  ;;  %v4400_v58 = vrot.slane %v4334_v15, 4  ;;  %v4176_v1 = vrot.slane %v4105_v0, 4  ;;  %v4335_v2 = vmul.f32 %v4105_v0, %v4105_v0 }
 0x26d   :  { %4085 = vst [vmem:[%s5538_s5 + $0x28] sm:$0xff] %v5103_v61 }
 0x26e   :  { %v4172_v5 = vrot.slane %v4171_v10, 2  ;;  %v4401_v42 = vadd.f32 %v4400_v58, %v4334_v15  ;;  %v4177_v6 = vadd.f32 %v4176_v1, %v4105_v0  ;;  %v4406_v7 = vrot.slane %v4335_v2, 4 }
 0x270   :  { %v4173_v46 = vadd.f32 %v4172_v5, %v4171_v10  ;;  %v4402_v8 = vrot.slane %v4401_v42, 2  ;;  %v4178_v63 = vrot.slane %v4177_v6, 2  ;;  %v4407_v3 = vadd.f32 %v4406_v7, %v4335_v2 }
 0x272   :  { %v4174_v13 = vrot.slane %v4173_v46, 1  ;;  %v4403_v4 = vadd.f32 %v4402_v8, %v4401_v42  ;;  %v4179_v14 = vadd.f32 %v4178_v63, %v4177_v6  ;;  %v4408_v11 = vrot.slane %v4407_v3, 2 }
 0x274   :  { %v4404_v26 = vrot.slane %v4403_v4, 1  ;;  %v4180_v17 = vrot.slane %v4179_v14, 1  ;;  %v4409_v20 = vadd.f32 %v4408_v11, %v4407_v3  ;;  %v4175_v22 = vadd.f32 %v4174_v13, %v4173_v46 }
 0x276   :  { %v4181_v23 = vadd.f32 %v4180_v17, %v4179_v14  ;;  %v4410_v25 = vrot.slane %v4409_v20, 1  ;;  %v4405_v57 = vadd.f32 %v4404_v26, %v4403_v4 }
 0x278   :  { %v4272_v27 = vcombine.low %v4175_v22, %v4181_v23  ;;  %v4411_v31 = vadd.f32 %v4410_v25, %v4409_v20  ;;  %v765_v20 = vrot.slane %v5442_v54, %v732_v43  ;;  %v769_v22 = vrot.slane %v5442_v54, %v736_v53 }
 0x27a   :  { %v5475_v30 = vrot.slane %v4272_v27, %v5212_v55  ;;  %v4502_v34 = vcombine.low %v4405_v57, %v4411_v31 }
 0x27c   :  { %v4303_v29 = vcombine.low %v5472_v24, %v5475_v30  ;;  %v5483_v37 = vrot.slane %v4502_v34, %v5212_v55 }
 0x27e   :  { %v4533_v38 = vcombine.low %v5478_v28, %v5483_v37 }
 0x2a4   :  { %v3886_v33 = vpop.f32.mrf.mxu0 }
 0x2a5   :  { %v3887_v35 = vadd.f32 %v3886_v33, %v757_v50  ;;  %v3927_v49 = vpop.f32.mrf.mxu1 }
 0x2a6   :  { %v3888_v51 = vpop.f32.mrf.mxu0 }
 0x2a7   :  { %v3928_v56 = vadd.f32 %v3927_v49, %v3887_v35  ;;  %v3889_v36 = vadd.f32 %v3888_v51, %v761_v32  ;;  %v3929_v39 = vpop.f32.mrf.mxu1 }
 0x2a8   :  { %v3890_v9 = vpop.f32.mrf.mxu0 }
 0x2a9   :  { %v4106_v12 = vsel %vm4093_vm0, %v3928_v56, 0.0  ;;  %v3930_v18 = vadd.f32 %v3929_v39, %v3889_v36  ;;  %v3931_v41 = vpop.f32.mrf.mxu1 }
 0x2aa   :  { %v4182_v45 = vrot.slane %v4106_v12, 4  ;;  %v4336_v48 = vmul.f32 %v4106_v12, %v4106_v12  ;;  %v3891_v40 = vpop.f32.mrf.mxu0 }
 0x2ab   :  { %v5104_v52 = vpack.c.bf16 %v3930_v18, %v3928_v56  ;;  %v4107_v47 = vsel %vm4093_vm0, %v3930_v18, 0.0  ;;  %v3932_v60 = vpop.f32.mrf.mxu1 }
 0x2ac   :  { %v4183_v16 = vadd.f32 %v4182_v45, %v4106_v12  ;;  %v4412_v19 = vrot.slane %v4336_v48, 4  ;;  %v4188_v21 = vrot.slane %v4107_v47, 4  ;;  %v4337_v15 = vmul.f32 %v4107_v47, %v4107_v47 }
 0x2ad   :  { %4086 = vst [vmem:[%s5538_s5 + $0x30] sm:$0xff] %v5104_v52 }
 0x2ae   :  { %v4184_v59 = vrot.slane %v4183_v16, 2  ;;  %v4413_v61 = vadd.f32 %v4412_v19, %v4336_v48  ;;  %v4189_v0 = vadd.f32 %v4188_v21, %v4107_v47  ;;  %v4418_v62 = vrot.slane %v4337_v15, 4 }
 0x2b0   :  { %v4185_v10 = vadd.f32 %v4184_v59, %v4183_v16  ;;  %v4414_v58 = vrot.slane %v4413_v61, 2  ;;  %v4190_v1 = vrot.slane %v4189_v0, 2  ;;  %v4419_v2 = vadd.f32 %v4418_v62, %v4337_v15 }
 0x2b2   :  { %v4186_v5 = vrot.slane %v4185_v10, 1  ;;  %v4415_v42 = vadd.f32 %v4414_v58, %v4413_v61  ;;  %v4191_v6 = vadd.f32 %v4190_v1, %v4189_v0  ;;  %v4420_v7 = vrot.slane %v4419_v2, 2 }
 0x2b4   :  { %v4416_v46 = vrot.slane %v4415_v42, 1  ;;  %v4192_v8 = vrot.slane %v4191_v6, 1  ;;  %v4421_v63 = vadd.f32 %v4420_v7, %v4419_v2  ;;  %v4187_v3 = vadd.f32 %v4186_v5, %v4185_v10 }
 0x2b6   :  { %v4193_v13 = vadd.f32 %v4192_v8, %v4191_v6  ;;  %v4422_v4 = vrot.slane %v4421_v63, 1  ;;  %v4417_v14 = vadd.f32 %v4416_v46, %v4415_v42 }
 0x2b8   :  { %v4273_v11 = vcombine.low %v4187_v3, %v4193_v13  ;;  %v4423_v26 = vadd.f32 %v4422_v4, %v4421_v63  ;;  %v4311_v3 = vrot.slane %v4303_v29, %v5212_v55 }
 0x2ba   :  { %v4503_v17 = vcombine.low %v4417_v14, %v4423_v26  ;;  %v4295_v42 = vrot.slane %v4273_v11, %v5212_v55  ;;  %v4541_v14 = vrot.slane %v4533_v38, %v5212_v55 }
 0x2bc   :  { %v4525_v46 = vrot.slane %v4503_v17, %v5212_v55 }
 0x2e4   :  { %v3968_v23 = vpop.f32.mrf.mxu0 }
 0x2e5   :  { %v3969_v25 = vadd.f32 %v3968_v23, %v765_v20  ;;  %v4009_v57 = vpop.f32.mrf.mxu1 }
 0x2e6   :  { %v3970_v27 = vpop.f32.mrf.mxu0 }
 0x2e7   :  { %v4010_v31 = vadd.f32 %v4009_v57, %v3969_v25  ;;  %v3971_v34 = vadd.f32 %v3970_v27, %v769_v22  ;;  %v4011_v50 = vpop.f32.mrf.mxu1 }
 0x2e8   :  { %v3972_v32 = vpop.f32.mrf.mxu0 }
 0x2e9   :  { %v4108_v33 = vsel %vm4093_vm0, %v4010_v31, 0.0  ;;  %v4012_v35 = vadd.f32 %v4011_v50, %v3971_v34  ;;  %v4013_v49 = vpop.f32.mrf.mxu1 }
 0x2ea   :  { %v4194_v51 = vrot.slane %v4108_v33, 4  ;;  %v4338_v56 = vmul.f32 %v4108_v33, %v4108_v33  ;;  %v3973_v43 = vpop.f32.mrf.mxu0 }
 0x2eb   :  { %v5105_v36 = vpack.c.bf16 %v4012_v35, %v4010_v31  ;;  %v4109_v53 = vsel %vm4093_vm0, %v4012_v35, 0.0  ;;  %v4014_v54 = vpop.f32.mrf.mxu1 }
 0x2ec   :  { %v4195_v39 = vadd.f32 %v4194_v51, %v4108_v33  ;;  %v4424_v9 = vrot.slane %v4338_v56, 4  ;;  %v4200_v12 = vrot.slane %v4109_v53, 4  ;;  %v4339_v18 = vmul.f32 %v4109_v53, %v4109_v53 }
 0x2ed   :  { %4087 = vst [vmem:[%s5538_s5 + $0x38] sm:$0xff] %v5105_v36 }
 0x2ee   :  { %v4196_v41 = vrot.slane %v4195_v39, 2  ;;  %v4425_v45 = vadd.f32 %v4424_v9, %v4338_v56  ;;  %v4201_v48 = vadd.f32 %v4200_v12, %v4109_v53  ;;  %v4430_v40 = vrot.slane %v4339_v18, 4 }
 0x2f0   :  { %v4197_v52 = vadd.f32 %v4196_v41, %v4195_v39  ;;  %v4426_v47 = vrot.slane %v4425_v45, 2  ;;  %v4202_v60 = vrot.slane %v4201_v48, 2  ;;  %v4431_v16 = vadd.f32 %v4430_v40, %v4339_v18 }
 0x2f2   :  { %v4198_v19 = vrot.slane %v4197_v52, 1  ;;  %v4427_v44 = vadd.f32 %v4426_v47, %v4425_v45  ;;  %v4203_v21 = vadd.f32 %v4202_v60, %v4201_v48  ;;  %v4432_v15 = vrot.slane %v4431_v16, 2 }
 0x2f4   :  { %v4428_v59 = vrot.slane %v4427_v44, 1  ;;  %v4204_v61 = vrot.slane %v4203_v21, 1  ;;  %v4433_v0 = vadd.f32 %v4432_v15, %v4431_v16  ;;  %v4199_v62 = vadd.f32 %v4198_v19, %v4197_v52 }
 0x2f6   :  { %v4205_v10 = vadd.f32 %v4204_v61, %v4203_v21  ;;  %v4434_v58 = vrot.slane %v4433_v0, 1  ;;  %v4429_v1 = vadd.f32 %v4428_v59, %v4427_v44 }
 0x2f8   :  { %v4274_v2 = vcombine.low %v4199_v62, %v4205_v10  ;;  %v4435_v5 = vadd.f32 %v4434_v58, %v4433_v0 }
 0x2fa   :  { %v4302_v6 = vrot.slane %v4274_v2, %v5212_v55  ;;  %v4504_v7 = vcombine.low %v4429_v1, %v4435_v5 }
 0x2fc   :  { %v4304_v8 = vcombine.low %v4295_v42, %v4302_v6  ;;  %v4532_v63 = vrot.slane %v4504_v7, %v5212_v55 }
 0x2fe   :  { %v4318_v13 = vrot.slane %v4304_v8, %v5212_v55  ;;  %v4534_v4 = vcombine.low %v4525_v46, %v4532_v63 }
 0x300   :  { %v4319_v11 = vcombine.low %v4311_v3, %v4318_v13  ;;  %v4548_v26 = vrot.slane %v4534_v4, %v5212_v55 }
 0x302   :  { %4323 = vst [vmem:[%s5539_s6 + $0x8] sm:$0xff] %v4319_v11  ;;  %v4549_v17 = vcombine.low %v4541_v14, %v4548_v26 }
 0x304   :  { %4553 = vst [vmem:[%s5540_s7 + $0x8] sm:$0xff] %v4549_v17 }
 0x305   :  { %4566 = vsyncpa [#allocation3], 1 }
 0x306   :  { %4567 = vsyncpa [#allocation5], 1 }

// kernel: generator_forward.9
= control target key start
LH: loop header
LB: loop body
LE: loop exit
PB: predicated region body
PF: predicated region fallthrough
CT: control target
= control target key end

     0   :  { %10 = vsyncpa [#allocation3], 0  ;;  %s3008_s18 = smov [#allocation2]   ;;  %s4541_s0 = inlined_call_operand.vmem [shape: bf16[1024,64], index: 0, kind: input, shape index: {}]   ;;  %s4542_s1 = inlined_call_operand.vmem [shape: bf16[1,64], index: 1, kind: input, shape index: {}]   ;;  %s4543_s2 = inlined_call_operand.vmem [shape: bf16[1,64], index: 2, kind: input, shape index: {}]   ;;  %s4544_s3 = inlined_call_operand.vmem [shape: bf16[64,32], index: 3, kind: input, shape index: {}]   ;;  %s4545_s4 = inlined_call_operand.hbm [shape: f32[1,32], index: 4, kind: input, shape index: {}]   ;;  %s4546_s5 = inlined_call_operand.vmem [shape: bf16[1024,32], index: 5, kind: output, shape index: {}]  }
   0x1   :  { %s25_s19 = sshll.u32 %s3008_s18, 4  ;;  %s26_s19 = int_to_ptr.vmem [resolvable:$true] %s25_s19 }
   0x2   :  { %s2994_s20 = scalar_lea.vmem %s26_s19, 16  ;;  %s2998_s21 = scalar_lea.vmem %s26_s19, 32 }
   0x3   :  { %p2995_p0 = scmp.ne.s32.totalorder %s26_s19, %s2994_s20  ;;  %p2999_p1 = scmp.lt.s32.totalorder %s26_s19, %s26_s19 }
   0x4   :  { %p3000_p2 = scmp.lt.s32.totalorder %s2998_s21, %s2994_s20 }
   0x6   :  { %p3001_p3 = por %p3000_p2, %p2999_p1 }
   0x8   :  { %p3002_p4 = pnand %p3001_p3, %p2995_p0 }
   0xa   :  { %3005 = shalt.err (!%p3002_p4)
}
   0xb   :  { %28 = dma.hbm_to_vmem [thread:$0]  %s4545_s4, 16, %s26_s19, [#allocation3]  }
   0xc   :  { %3006 = dma.done.wait [#allocation3], 16  }
   0xd   :  { %3007 = vsyncadd [#allocation3], 4294967280  ;;  %v165_v0 = vlaneseq  ;;  %v2853_v2 = vld [vmem:[%s4544_s3 + $0x18] sm:$0xff]   ;;  %v2854_v3 = vld [vmem:[%s4544_s3 + $0x10] sm:$0xff]   ;;  %v3009_v39 = vmov 0   ;;  %vm928_vm0 = vcmask 523264  }
   0xe   :  { %2707 = vmatprep.subr.bf16.mxu0 %v2853_v2  ;;  %2843 = vmatprep.subr.bf16.mxu1 %v2853_v2  ;;  %v2855_v5 = vld [vmem:[%s4544_s3 + $0x8] sm:$0xff]   ;;  %v161_v6 = vld [vmem:[%s4542_s1] sm:$0x1]  ;;  %v34_v13 = vld [vmem:[%s4541_s0 + $0x4] sm:$0xf]  ;;  %vm2242_vm1 = vcmask 257024  }
   0xf   :  { %v166_v1 = vshrl.u32 %v165_v0, 7  ;;  %2708 = vmatpush3.bf16.msra.mxu0 %v2853_v2  ;;  %2847 = vmatpush3.bf16.msra.mxu1 %v2853_v2  ;;  %v163_v7 = vpack.i.b16 %v161_v6, %v161_v6  ;;  %v301_v8 = vld [vmem:[%s4543_s2] sm:$0x1]  ;;  %v98_v17 = vld [vmem:[%s4541_s0 + $0x104] sm:$0xf] }
  0x10   :  { %2709 = vmatprep.subr.bf16.mxu0 %v2854_v3  ;;  %2844 = vmatprep.subr.bf16.mxu1 %v2854_v3  ;;  %v303_v9 = vpack.i.b16 %v301_v8, %v301_v8  ;;  %v2856_v10 = vld [vmem:[%s4544_s3] sm:$0xff]   ;;  %v35_v18 = vld [vmem:[%s4541_s0 + $0x8] sm:$0xf]  ;;  %v36_v19 = vld [vmem:[%s4541_s0 + $0xc] sm:$0xf] }
  0x11   :  { %v167_v4 = vsub.s32 0, %v166_v1  ;;  %v33_v12 = vld [vmem:[%s4541_s0] sm:$0xf]  ;;  %v99_v21 = vld [vmem:[%s4541_s0 + $0x108] sm:$0xf] }
  0x12   :  { %v97_v15 = vld [vmem:[%s4541_s0 + $0x100] sm:$0xf]  ;;  %v100_v25 = vld [vmem:[%s4541_s0 + $0x10c] sm:$0xf]  ;;  %v37_v37 = vld [vmem:[%s4541_s0 + $0x10] sm:$0xf] }
  0x13   :  { %2710 = vmatpush3.bf16.msra.mxu0 %v2854_v3  ;;  %2848 = vmatpush3.bf16.msra.mxu1 %v2854_v3  ;;  %v168_v11 = vrot.slane %v163_v7, %v167_v4  ;;  %v308_v14 = vrot.slane %v303_v9, %v167_v4  ;;  %v38_v38 = vld [vmem:[%s4541_s0 + $0x14] sm:$0xf]  ;;  %v101_v43 = vld [vmem:[%s4541_s0 + $0x110] sm:$0xf]  ;;  %v39_v53 = vld [vmem:[%s4541_s0 + $0x18] sm:$0xf] }
  0x14   :  { %2711 = vmatprep.subr.bf16.mxu0 %v2855_v5  ;;  %2845 = vmatprep.subr.bf16.mxu1 %v2855_v5  ;;  %v102_v48 = vld [vmem:[%s4541_s0 + $0x114] sm:$0xf]  ;;  %v40_v54 = vld [vmem:[%s4541_s0 + $0x1c] sm:$0xf]  ;;  %v103_v63 = vld [vmem:[%s4541_s0 + $0x118] sm:$0xf] }
  0x15   :  { %v3070_v16 = vcombine.low %v168_v11, %v168_v11  ;;  %v3081_v20 = vcombine.low %v308_v14, %v308_v14  ;;  %v104_v3 = vld [vmem:[%s4541_s0 + $0x11c] sm:$0xf]  ;;  %v41_v4 = vld [vmem:[%s4541_s0 + $0x20] sm:$0xf]  ;;  %v42_v9 = vld [vmem:[%s4541_s0 + $0x24] sm:$0xf] }
  0x16   :  { %v105_v14 = vld [vmem:[%s4541_s0 + $0x120] sm:$0xf] }
  0x17   :  { %2712 = vmatpush3.bf16.msra.mxu0 %v2855_v5  ;;  %2849 = vmatpush3.bf16.msra.mxu1 %v2855_v5  ;;  %v173_v22 = vmul.bf16 %v3070_v16, %v33_v12  ;;  %v174_v23 = vmul.bf16 %v3070_v16, %v34_v13  ;;  %v237_v24 = vmul.bf16 %v3070_v16, %v97_v15 }
  0x18   :  { %2713 = vmatprep.subr.bf16.mxu0 %v2856_v10  ;;  %2846 = vmatprep.subr.bf16.mxu1 %v2856_v10  ;;  %v238_v26 = vmul.bf16 %v3070_v16, %v98_v17  ;;  %v175_v27 = vmul.bf16 %v3070_v16, %v35_v18  ;;  %v176_v28 = vmul.bf16 %v3070_v16, %v36_v19 }
  0x19   :  { %v313_v29 = vadd.bf16 %v3081_v20, %v173_v22  ;;  %v314_v30 = vadd.bf16 %v3081_v20, %v174_v23  ;;  %v377_v31 = vadd.bf16 %v3081_v20, %v237_v24  ;;  %v239_v32 = vmul.bf16 %v3070_v16, %v99_v21  ;;  %v106_v21 = vld [vmem:[%s4541_s0 + $0x124] sm:$0xf] }
  0x1a   :  { %v378_v33 = vadd.bf16 %v3081_v20, %v238_v26  ;;  %v315_v34 = vadd.bf16 %v3081_v20, %v175_v27  ;;  %v316_v35 = vadd.bf16 %v3081_v20, %v176_v28  ;;  %v240_v36 = vmul.bf16 %v3070_v16, %v100_v25  ;;  %v43_v26 = vld [vmem:[%s4541_s0 + $0x28] sm:$0xf] }
  0x1b   :  { %2714 = vmatpush3.bf16.msra.mxu0 %v2856_v10  ;;  %2850 = vmatpush3.bf16.msra.mxu1 %v2856_v10  ;;  %v441_v40 = vmax.bf16 %v3009_v39, %v313_v29  ;;  %v442_v41 = vmax.bf16 %v3009_v39, %v314_v30  ;;  %v505_v42 = vmax.bf16 %v3009_v39, %v377_v31  ;;  %v44_v31 = vld [vmem:[%s4541_s0 + $0x2c] sm:$0xf] }
  0x1c   :  { %v506_v44 = vmax.bf16 %v3009_v39, %v378_v33  ;;  %v443_v45 = vmax.bf16 %v3009_v39, %v315_v34  ;;  %v444_v46 = vmax.bf16 %v3009_v39, %v316_v35  ;;  %v379_v47 = vadd.bf16 %v3081_v20, %v239_v32  ;;  %v107_v32 = vld [vmem:[%s4541_s0 + $0x128] sm:$0xf] }
  0x1d   :  { %v2379_v49 = vcombine.low %v441_v40, %v442_v41  ;;  %v380_v50 = vadd.bf16 %v3081_v20, %v240_v36  ;;  %v177_v51 = vmul.bf16 %v3070_v16, %v37_v37  ;;  %v178_v52 = vmul.bf16 %v3070_v16, %v38_v38  ;;  %v108_v37 = vld [vmem:[%s4541_s0 + $0x12c] sm:$0xf] }
  0x1e   :  { %v2411_v55 = vcombine.low %v505_v42, %v506_v44  ;;  %v2380_v56 = vcombine.low %v443_v45, %v444_v46  ;;  %v507_v57 = vmax.bf16 %v3009_v39, %v379_v47  ;;  %v241_v58 = vmul.bf16 %v3070_v16, %v101_v43  ;;  %v45_v47 = vld [vmem:[%s4541_s0 + $0x30] sm:$0xf] }
  0x1f   :  { %2715 = vmatprep.mubr.msk.bf16.mxu0 %vm928_vm0, %v2379_v49  ;;  %v508_v59 = vmax.bf16 %v3009_v39, %v380_v50  ;;  %v317_v60 = vadd.bf16 %v3081_v20, %v177_v51  ;;  %v318_v61 = vadd.bf16 %v3081_v20, %v178_v52  ;;  %v242_v62 = vmul.bf16 %v3070_v16, %v102_v48  ;;  %v46_v48 = vld [vmem:[%s4541_s0 + $0x34] sm:$0xf] }
  0x20   :  { %2779 = vmatprep.mubr.msk.bf16.mxu1 %vm928_vm0, %v2411_v55  ;;  %2716 = vmatmul.mubr.msk.bf16.vlgmr.msra.gmra.mxu0 %vm928_vm0, %v2380_v56  ;;  %v381_v0 = vadd.bf16 %v3081_v20, %v241_v58  ;;  %v179_v1 = vmul.bf16 %v3070_v16, %v39_v53  ;;  %v180_v2 = vmul.bf16 %v3070_v16, %v40_v54  ;;  %v109_v53 = vld [vmem:[%s4541_s0 + $0x130] sm:$0xf]  ;;  %v110_v58 = vld [vmem:[%s4541_s0 + $0x134] sm:$0xf] }
  0x21   :  { %v2412_v5 = vcombine.low %v507_v57, %v508_v59  ;;  %v445_v6 = vmax.bf16 %v3009_v39, %v317_v60  ;;  %v446_v7 = vmax.bf16 %v3009_v39, %v318_v61  ;;  %v382_v8 = vadd.bf16 %v3081_v20, %v242_v62 }
  0x22   :  { %v509_v10 = vmax.bf16 %v3009_v39, %v381_v0  ;;  %v319_v11 = vadd.bf16 %v3081_v20, %v179_v1  ;;  %v320_v12 = vadd.bf16 %v3081_v20, %v180_v2  ;;  %v243_v13 = vmul.bf16 %v3070_v16, %v103_v63  ;;  %v47_v63 = vld [vmem:[%s4541_s0 + $0x38] sm:$0xf]  ;;  %v48_v0 = vld [vmem:[%s4541_s0 + $0x3c] sm:$0xf] }
  0x23   :  { %2780 = vmatmul.mubr.msk.bf16.vlgmr.msra.gmra.mxu1 %vm928_vm0, %v2412_v5  ;;  %v2381_v15 = vcombine.low %v445_v6, %v446_v7  ;;  %v510_v17 = vmax.bf16 %v3009_v39, %v382_v8  ;;  %v244_v18 = vmul.bf16 %v3070_v16, %v104_v3  ;;  %v181_v19 = vmul.bf16 %v3070_v16, %v41_v4 }
  0x24   :  { %v447_v22 = vmax.bf16 %v3009_v39, %v319_v11  ;;  %v448_v23 = vmax.bf16 %v3009_v39, %v320_v12  ;;  %v383_v24 = vadd.bf16 %v3081_v20, %v243_v13  ;;  %v182_v25 = vmul.bf16 %v3070_v16, %v42_v9  ;;  %v111_v9 = vld [vmem:[%s4541_s0 + $0x138] sm:$0xf] }
  0x25   :  { %2719 = vmatprep.mubr.msk.bf16.mxu0 %vm928_vm0, %v2381_v15  ;;  %v2413_v27 = vcombine.low %v509_v10, %v510_v17  ;;  %v384_v28 = vadd.bf16 %v3081_v20, %v244_v18  ;;  %v321_v29 = vadd.bf16 %v3081_v20, %v181_v19  ;;  %v245_v30 = vmul.bf16 %v3070_v16, %v105_v14  ;;  %v112_v14 = vld [vmem:[%s4541_s0 + $0x13c] sm:$0xf]  ;;  %v49_v15 = vld [vmem:[%s4541_s0 + $0x40] sm:$0xf] }
  0x26   :  { %v2382_v33 = vcombine.low %v447_v22, %v448_v23  ;;  %v511_v34 = vmax.bf16 %v3009_v39, %v383_v24  ;;  %v322_v35 = vadd.bf16 %v3081_v20, %v182_v25  ;;  %v246_v36 = vmul.bf16 %v3070_v16, %v106_v21  ;;  %v50_v22 = vld [vmem:[%s4541_s0 + $0x44] sm:$0xf] }
  0x27   :  { %2783 = vmatprep.mubr.msk.bf16.mxu1 %vm928_vm0, %v2413_v27  ;;  %v512_v38 = vmax.bf16 %v3009_v39, %v384_v28  ;;  %v449_v40 = vmax.bf16 %v3009_v39, %v321_v29  ;;  %v385_v41 = vadd.bf16 %v3081_v20, %v245_v30  ;;  %v183_v42 = vmul.bf16 %v3070_v16, %v43_v26 }
  0x28   :  { %2720 = vmatmul.mubr.msk.bf16.gmra.mxu0 %vm928_vm0, %v2382_v33  ;;  %v450_v43 = vmax.bf16 %v3009_v39, %v322_v35  ;;  %v386_v44 = vadd.bf16 %v3081_v20, %v246_v36  ;;  %v184_v45 = vmul.bf16 %v3070_v16, %v44_v31  ;;  %v247_v46 = vmul.bf16 %v3070_v16, %v107_v32  ;;  %v113_v31 = vld [vmem:[%s4541_s0 + $0x140] sm:$0xf]  ;;  %v114_v36 = vld [vmem:[%s4541_s0 + $0x144] sm:$0xf] }
  0x29   :  { %v2414_v49 = vcombine.low %v511_v34, %v512_v38  ;;  %v513_v50 = vmax.bf16 %v3009_v39, %v385_v41  ;;  %v323_v51 = vadd.bf16 %v3081_v20, %v183_v42  ;;  %v248_v52 = vmul.bf16 %v3070_v16, %v108_v37  ;;  %v51_v37 = vld [vmem:[%s4541_s0 + $0x48] sm:$0xf]  ;;  %v52_v42 = vld [vmem:[%s4541_s0 + $0x4c] sm:$0xf] }
  0x2a   :  { %v2383_v54 = vcombine.low %v449_v40, %v450_v43  ;;  %v514_v55 = vmax.bf16 %v3009_v39, %v386_v44  ;;  %v324_v56 = vadd.bf16 %v3081_v20, %v184_v45  ;;  %v387_v57 = vadd.bf16 %v3081_v20, %v247_v46  ;;  %v115_v43 = vld [vmem:[%s4541_s0 + $0x148] sm:$0xf] }
  0x2b   :  { %2784 = vmatmul.mubr.msk.bf16.gmra.mxu1 %vm928_vm0, %v2414_v49  ;;  %v451_v59 = vmax.bf16 %v3009_v39, %v323_v51  ;;  %v388_v60 = vadd.bf16 %v3081_v20, %v248_v52  ;;  %v185_v61 = vmul.bf16 %v3070_v16, %v45_v47  ;;  %v186_v62 = vmul.bf16 %v3070_v16, %v46_v48  ;;  %v116_v48 = vld [vmem:[%s4541_s0 + $0x14c] sm:$0xf] }
  0x2c   :  { %2723 = vmatprep.mubr.msk.bf16.mxu0 %vm928_vm0, %v2383_v54  ;;  %v2415_v1 = vcombine.low %v513_v50, %v514_v55  ;;  %v452_v2 = vmax.bf16 %v3009_v39, %v324_v56  ;;  %v515_v3 = vmax.bf16 %v3009_v39, %v387_v57  ;;  %v249_v4 = vmul.bf16 %v3070_v16, %v109_v53  ;;  %v53_v57 = vld [vmem:[%s4541_s0 + $0x50] sm:$0xf] }
  0x2d   :  { %v516_v5 = vmax.bf16 %v3009_v39, %v388_v60  ;;  %v325_v6 = vadd.bf16 %v3081_v20, %v185_v61  ;;  %v326_v7 = vadd.bf16 %v3081_v20, %v186_v62  ;;  %v250_v8 = vmul.bf16 %v3070_v16, %v110_v58  ;;  %v54_v62 = vld [vmem:[%s4541_s0 + $0x54] sm:$0xf] }
  0x2e   :  { %2787 = vmatprep.mubr.msk.bf16.mxu1 %vm928_vm0, %v2415_v1  ;;  %v2384_v10 = vcombine.low %v451_v59, %v452_v2  ;;  %v389_v11 = vadd.bf16 %v3081_v20, %v249_v4  ;;  %v187_v12 = vmul.bf16 %v3070_v16, %v47_v63  ;;  %v188_v13 = vmul.bf16 %v3070_v16, %v48_v0  ;;  %v117_v63 = vld [vmem:[%s4541_s0 + $0x150] sm:$0xf]  ;;  %v118_v4 = vld [vmem:[%s4541_s0 + $0x154] sm:$0xf] }
  0x2f   :  { %v2416_v17 = vcombine.low %v515_v3, %v516_v5  ;;  %v453_v18 = vmax.bf16 %v3009_v39, %v325_v6  ;;  %v454_v19 = vmax.bf16 %v3009_v39, %v326_v7  ;;  %v390_v21 = vadd.bf16 %v3081_v20, %v250_v8 }
  0x30   :  { %2724 = vmatmul.mubr.msk.bf16.gmra.mxu0 %vm928_vm0, %v2384_v10  ;;  %v517_v23 = vmax.bf16 %v3009_v39, %v389_v11  ;;  %v327_v24 = vadd.bf16 %v3081_v20, %v187_v12  ;;  %v328_v25 = vadd.bf16 %v3081_v20, %v188_v13  ;;  %v251_v26 = vmul.bf16 %v3070_v16, %v111_v9  ;;  %v55_v9 = vld [vmem:[%s4541_s0 + $0x58] sm:$0xf] }
  0x31   :  { %v2385_v27 = vcombine.low %v453_v18, %v454_v19  ;;  %v518_v28 = vmax.bf16 %v3009_v39, %v390_v21  ;;  %v252_v29 = vmul.bf16 %v3070_v16, %v112_v14  ;;  %v189_v30 = vmul.bf16 %v3070_v16, %v49_v15  ;;  %v56_v14 = vld [vmem:[%s4541_s0 + $0x5c] sm:$0xf]  ;;  %v119_v21 = vld [vmem:[%s4541_s0 + $0x158] sm:$0xf] }
  0x32   :  { %v455_v32 = vmax.bf16 %v3009_v39, %v327_v24  ;;  %v456_v33 = vmax.bf16 %v3009_v39, %v328_v25  ;;  %v391_v34 = vadd.bf16 %v3081_v20, %v251_v26  ;;  %v190_v35 = vmul.bf16 %v3070_v16, %v50_v22  ;;  %v120_v26 = vld [vmem:[%s4541_s0 + $0x15c] sm:$0xf] }
  0x33   :  { %2788 = vmatmul.mubr.msk.bf16.gmra.mxu1 %vm928_vm0, %v2416_v17  ;;  %2727 = vmatprep.mubr.msk.bf16.mxu0 %vm928_vm0, %v2385_v27  ;;  %v2417_v38 = vcombine.low %v517_v23, %v518_v28  ;;  %v392_v40 = vadd.bf16 %v3081_v20, %v252_v29  ;;  %v329_v41 = vadd.bf16 %v3081_v20, %v189_v30  ;;  %v57_v27 = vld [vmem:[%s4541_s0 + $0x60] sm:$0xf] }
  0x34   :  { %v2386_v44 = vcombine.low %v455_v32, %v456_v33  ;;  %v519_v45 = vmax.bf16 %v3009_v39, %v391_v34  ;;  %v330_v46 = vadd.bf16 %v3081_v20, %v190_v35  ;;  %v253_v47 = vmul.bf16 %v3070_v16, %v113_v31  ;;  %v58_v32 = vld [vmem:[%s4541_s0 + $0x64] sm:$0xf] }
  0x35   :  { %2791 = vmatprep.mubr.msk.bf16.mxu1 %vm928_vm0, %v2417_v38  ;;  %v520_v49 = vmax.bf16 %v3009_v39, %v392_v40  ;;  %v457_v50 = vmax.bf16 %v3009_v39, %v329_v41  ;;  %v254_v51 = vmul.bf16 %v3070_v16, %v114_v36  ;;  %v191_v52 = vmul.bf16 %v3070_v16, %v51_v37 }
  0x36   :  { %v458_v53 = vmax.bf16 %v3009_v39, %v330_v46  ;;  %v393_v54 = vadd.bf16 %v3081_v20, %v253_v47  ;;  %v192_v55 = vmul.bf16 %v3070_v16, %v52_v42  ;;  %v255_v56 = vmul.bf16 %v3070_v16, %v115_v43  ;;  %v121_v42 = vld [vmem:[%s4541_s0 + $0x160] sm:$0xf]  ;;  %v122_v43 = vld [vmem:[%s4541_s0 + $0x164] sm:$0xf] }
  0x37   :  { %v2418_v58 = vcombine.low %v519_v45, %v520_v49  ;;  %v394_v59 = vadd.bf16 %v3081_v20, %v254_v51  ;;  %v331_v60 = vadd.bf16 %v3081_v20, %v191_v52  ;;  %v256_v61 = vmul.bf16 %v3070_v16, %v116_v48  ;;  %v59_v48 = vld [vmem:[%s4541_s0 + $0x68] sm:$0xf] }
  0x38   :  { %2728 = vmatmul.mubr.msk.bf16.gmra.mxu0 %vm928_vm0, %v2386_v44  ;;  %v2387_v0 = vcombine.low %v457_v50, %v458_v53  ;;  %v521_v1 = vmax.bf16 %v3009_v39, %v393_v54  ;;  %v332_v2 = vadd.bf16 %v3081_v20, %v192_v55  ;;  %v395_v3 = vadd.bf16 %v3081_v20, %v255_v56  ;;  %v60_v53 = vld [vmem:[%s4541_s0 + $0x6c] sm:$0xf] }
  0x39   :  { %v522_v5 = vmax.bf16 %v3009_v39, %v394_v59  ;;  %v459_v6 = vmax.bf16 %v3009_v39, %v331_v60  ;;  %v396_v7 = vadd.bf16 %v3081_v20, %v256_v61  ;;  %v193_v8 = vmul.bf16 %v3070_v16, %v53_v57  ;;  %v124_v59 = vld [vmem:[%s4541_s0 + $0x16c] sm:$0xf] }
  0x3a   :  { %2731 = vmatprep.mubr.msk.bf16.mxu0 %vm928_vm0, %v2387_v0  ;;  %v460_v10 = vmax.bf16 %v3009_v39, %v332_v2  ;;  %v523_v11 = vmax.bf16 %v3009_v39, %v395_v3  ;;  %v194_v12 = vmul.bf16 %v3070_v16, %v54_v62  ;;  %v257_v13 = vmul.bf16 %v3070_v16, %v117_v63 }
  0x3b   :  { %2792 = vmatmul.mubr.msk.bf16.gmra.mxu1 %vm928_vm0, %v2418_v58  ;;  %v2419_v15 = vcombine.low %v521_v1, %v522_v5  ;;  %v524_v17 = vmax.bf16 %v3009_v39, %v396_v7  ;;  %v333_v18 = vadd.bf16 %v3081_v20, %v193_v8  ;;  %v258_v19 = vmul.bf16 %v3070_v16, %v118_v4  ;;  %v123_v58 = vld [vmem:[%s4541_s0 + $0x168] sm:$0xf]  ;;  %v61_v4 = vld [vmem:[%s4541_s0 + $0x70] sm:$0xf] }
  0x3c   :  { %v2388_v22 = vcombine.low %v459_v6, %v460_v10  ;;  %v334_v23 = vadd.bf16 %v3081_v20, %v194_v12  ;;  %v397_v24 = vadd.bf16 %v3081_v20, %v257_v13  ;;  %v195_v25 = vmul.bf16 %v3070_v16, %v55_v9  ;;  %v62_v9 = vld [vmem:[%s4541_s0 + $0x74] sm:$0xf]  ;;  %v125_v10 = vld [vmem:[%s4541_s0 + $0x170] sm:$0xf] }
  0x3d   :  { %2795 = vmatprep.mubr.msk.bf16.mxu1 %vm928_vm0, %v2419_v15  ;;  %v2420_v28 = vcombine.low %v523_v11, %v524_v17  ;;  %v461_v29 = vmax.bf16 %v3009_v39, %v333_v18  ;;  %v398_v30 = vadd.bf16 %v3081_v20, %v258_v19  ;;  %v196_v31 = vmul.bf16 %v3070_v16, %v56_v14  ;;  %v126_v15 = vld [vmem:[%s4541_s0 + $0x174] sm:$0xf] }
  0x3e   :  { %v462_v33 = vmax.bf16 %v3009_v39, %v334_v23  ;;  %v525_v34 = vmax.bf16 %v3009_v39, %v397_v24  ;;  %v335_v35 = vadd.bf16 %v3081_v20, %v195_v25  ;;  %v259_v36 = vmul.bf16 %v3070_v16, %v119_v21 }
  0x3f   :  { %v526_v37 = vmax.bf16 %v3009_v39, %v398_v30  ;;  %v336_v38 = vadd.bf16 %v3081_v20, %v196_v31  ;;  %v260_v40 = vmul.bf16 %v3070_v16, %v120_v26  ;;  %v197_v41 = vmul.bf16 %v3070_v16, %v57_v27  ;;  %v64_v27 = vld [vmem:[%s4541_s0 + $0x7c] sm:$0xf]  ;;  %v127_v31 = vld [vmem:[%s4541_s0 + $0x178] sm:$0xf] }
  0x40   :  { %2732 = vmatmul.mubr.msk.bf16.gmra.mxu0 %vm928_vm0, %v2388_v22  ;;  %v2389_v44 = vcombine.low %v461_v29, %v462_v33  ;;  %v463_v45 = vmax.bf16 %v3009_v39, %v335_v35  ;;  %v399_v46 = vadd.bf16 %v3081_v20, %v259_v36  ;;  %v198_v47 = vmul.bf16 %v3070_v16, %v58_v32  ;;  %v63_v22 = vld [vmem:[%s4541_s0 + $0x78] sm:$0xf]  ;;  %v128_v36 = vld [vmem:[%s4541_s0 + $0x17c] sm:$0xf] }
  0x41   :  { %v2421_v49 = vcombine.low %v525_v34, %v526_v37  ;;  %v464_v50 = vmax.bf16 %v3009_v39, %v336_v38  ;;  %v400_v51 = vadd.bf16 %v3081_v20, %v260_v40  ;;  %v337_v52 = vadd.bf16 %v3081_v20, %v197_v41  ;;  %v65_v37 = vld [vmem:[%s4541_s0 + $0x80] sm:$0xf] }
  0x42   :  { %2735 = vmatprep.mubr.msk.bf16.mxu0 %vm928_vm0, %v2389_v44  ;;  %v527_v54 = vmax.bf16 %v3009_v39, %v399_v46  ;;  %v338_v55 = vadd.bf16 %v3081_v20, %v198_v47  ;;  %v261_v56 = vmul.bf16 %v3070_v16, %v121_v42  ;;  %v262_v57 = vmul.bf16 %v3070_v16, %v122_v43  ;;  %v66_v43 = vld [vmem:[%s4541_s0 + $0x84] sm:$0xf] }
  0x43   :  { %2796 = vmatmul.mubr.msk.bf16.gmra.mxu1 %vm928_vm0, %v2420_v28  ;;  %v2390_v60 = vcombine.low %v463_v45, %v464_v50  ;;  %v528_v61 = vmax.bf16 %v3009_v39, %v400_v51  ;;  %v465_v62 = vmax.bf16 %v3009_v39, %v337_v52  ;;  %v199_v63 = vmul.bf16 %v3070_v16, %v59_v48  ;;  %v129_v52 = vld [vmem:[%s4541_s0 + $0x180] sm:$0xf] }
  0x44   :  { %2799 = vmatprep.mubr.msk.bf16.mxu1 %vm928_vm0, %v2421_v49  ;;  %v466_v0 = vmax.bf16 %v3009_v39, %v338_v55  ;;  %v401_v1 = vadd.bf16 %v3081_v20, %v261_v56  ;;  %v402_v2 = vadd.bf16 %v3081_v20, %v262_v57  ;;  %v200_v3 = vmul.bf16 %v3070_v16, %v60_v53  ;;  %v130_v53 = vld [vmem:[%s4541_s0 + $0x184] sm:$0xf] }
  0x45   :  { %v2422_v5 = vcombine.low %v527_v54, %v528_v61  ;;  %v339_v6 = vadd.bf16 %v3081_v20, %v199_v63  ;;  %v263_v7 = vmul.bf16 %v3070_v16, %v123_v58  ;;  %v264_v8 = vmul.bf16 %v3070_v16, %v124_v59  ;;  %v67_v58 = vld [vmem:[%s4541_s0 + $0x88] sm:$0xf]  ;;  %v68_v63 = vld [vmem:[%s4541_s0 + $0x8c] sm:$0xf] }
  0x46   :  { %v2391_v11 = vcombine.low %v465_v62, %v466_v0  ;;  %v529_v12 = vmax.bf16 %v3009_v39, %v401_v1  ;;  %v530_v13 = vmax.bf16 %v3009_v39, %v402_v2  ;;  %v340_v14 = vadd.bf16 %v3081_v20, %v200_v3 }
  0x47   :  { %v467_v17 = vmax.bf16 %v3009_v39, %v339_v6  ;;  %v403_v18 = vadd.bf16 %v3081_v20, %v263_v7  ;;  %v404_v19 = vadd.bf16 %v3081_v20, %v264_v8  ;;  %v201_v21 = vmul.bf16 %v3070_v16, %v61_v4  ;;  %v131_v4 = vld [vmem:[%s4541_s0 + $0x188] sm:$0xf] }
  0x48   :  { %2736 = vmatmul.mubr.msk.bf16.gmra.mxu0 %vm928_vm0, %v2390_v60  ;;  %v2423_v23 = vcombine.low %v529_v12, %v530_v13  ;;  %v468_v24 = vmax.bf16 %v3009_v39, %v340_v14  ;;  %v202_v25 = vmul.bf16 %v3070_v16, %v62_v9  ;;  %v265_v26 = vmul.bf16 %v3070_v16, %v125_v10  ;;  %v69_v14 = vld [vmem:[%s4541_s0 + $0x90] sm:$0xf] }
  0x49   :  { %2739 = vmatprep.mubr.msk.bf16.mxu0 %vm928_vm0, %v2391_v11  ;;  %v531_v28 = vmax.bf16 %v3009_v39, %v403_v18  ;;  %v341_v29 = vadd.bf16 %v3081_v20, %v201_v21  ;;  %v266_v30 = vmul.bf16 %v3070_v16, %v126_v15  ;;  %v532_v32 = vmax.bf16 %v3009_v39, %v404_v19  ;;  %v70_v19 = vld [vmem:[%s4541_s0 + $0x94] sm:$0xf]  ;;  %v133_v21 = vld [vmem:[%s4541_s0 + $0x190] sm:$0xf] }
  0x4a   :  { %v342_v33 = vadd.bf16 %v3081_v20, %v202_v25  ;;  %v405_v34 = vadd.bf16 %v3081_v20, %v265_v26  ;;  %v203_v35 = vmul.bf16 %v3070_v16, %v63_v22  ;;  %v2392_v38 = vcombine.low %v467_v17, %v468_v24  ;;  %v134_v26 = vld [vmem:[%s4541_s0 + $0x194] sm:$0xf] }
  0x4b   :  { %2800 = vmatmul.mubr.msk.bf16.gmra.mxu1 %vm928_vm0, %v2422_v5  ;;  %v469_v40 = vmax.bf16 %v3009_v39, %v341_v29  ;;  %v406_v41 = vadd.bf16 %v3081_v20, %v266_v30  ;;  %v204_v42 = vmul.bf16 %v3070_v16, %v64_v27  ;;  %v267_v47 = vmul.bf16 %v3070_v16, %v127_v31  ;;  %v132_v5 = vld [vmem:[%s4541_s0 + $0x18c] sm:$0xf]  ;;  %v71_v30 = vld [vmem:[%s4541_s0 + $0x98] sm:$0xf] }
  0x4c   :  { %2803 = vmatprep.mubr.msk.bf16.mxu1 %vm928_vm0, %v2423_v23  ;;  %v470_v44 = vmax.bf16 %v3009_v39, %v342_v33  ;;  %v533_v45 = vmax.bf16 %v3009_v39, %v405_v34  ;;  %v343_v46 = vadd.bf16 %v3081_v20, %v203_v35  ;;  %v268_v50 = vmul.bf16 %v3070_v16, %v128_v36  ;;  %v72_v35 = vld [vmem:[%s4541_s0 + $0x9c] sm:$0xf] }
  0x4d   :  { %v534_v48 = vmax.bf16 %v3009_v39, %v406_v41  ;;  %v344_v49 = vadd.bf16 %v3081_v20, %v204_v42  ;;  %v205_v51 = vmul.bf16 %v3070_v16, %v65_v37  ;;  %v2424_v54 = vcombine.low %v531_v28, %v532_v32  ;;  %v135_v41 = vld [vmem:[%s4541_s0 + $0x198] sm:$0xf] }
  0x4e   :  { %v2393_v55 = vcombine.low %v469_v40, %v470_v44  ;;  %v407_v56 = vadd.bf16 %v3081_v20, %v267_v47  ;;  %v206_v57 = vmul.bf16 %v3070_v16, %v66_v43  ;;  %v471_v60 = vmax.bf16 %v3009_v39, %v343_v46  ;;  %v136_v46 = vld [vmem:[%s4541_s0 + $0x19c] sm:$0xf]  ;;  %v73_v47 = vld [vmem:[%s4541_s0 + $0xa0] sm:$0xf] }
  0x4f   :  { %v2425_v59 = vcombine.low %v533_v45, %v534_v48  ;;  %v408_v61 = vadd.bf16 %v3081_v20, %v268_v50  ;;  %v345_v62 = vadd.bf16 %v3081_v20, %v205_v51  ;;  %v472_v0 = vmax.bf16 %v3009_v39, %v344_v49  ;;  %v74_v51 = vld [vmem:[%s4541_s0 + $0xa4] sm:$0xf] }
  0x50   :  { %2740 = vmatmul.mubr.msk.bf16.gmra.mxu0 %vm928_vm0, %v2392_v38  ;;  %v346_v1 = vadd.bf16 %v3081_v20, %v206_v57  ;;  %v269_v2 = vmul.bf16 %v3070_v16, %v129_v52  ;;  %v270_v3 = vmul.bf16 %v3070_v16, %v130_v53  ;;  %v535_v6 = vmax.bf16 %v3009_v39, %v407_v56 }
  0x51   :  { %2743 = vmatprep.mubr.msk.bf16.mxu0 %vm928_vm0, %v2393_v55  ;;  %v536_v7 = vmax.bf16 %v3009_v39, %v408_v61  ;;  %v473_v8 = vmax.bf16 %v3009_v39, %v345_v62  ;;  %v207_v9 = vmul.bf16 %v3070_v16, %v67_v58  ;;  %v208_v13 = vmul.bf16 %v3070_v16, %v68_v63  ;;  %v138_v61 = vld [vmem:[%s4541_s0 + $0x1a4] sm:$0xf] }
  0x52   :  { %v474_v10 = vmax.bf16 %v3009_v39, %v346_v1  ;;  %v409_v11 = vadd.bf16 %v3081_v20, %v269_v2  ;;  %v410_v12 = vadd.bf16 %v3081_v20, %v270_v3  ;;  %v271_v17 = vmul.bf16 %v3070_v16, %v131_v4  ;;  %v75_v2 = vld [vmem:[%s4541_s0 + $0xa8] sm:$0xf] }
  0x53   :  { %2804 = vmatmul.mubr.msk.bf16.gmra.mxu1 %vm928_vm0, %v2424_v54  ;;  %v347_v15 = vadd.bf16 %v3081_v20, %v207_v9  ;;  %v272_v18 = vmul.bf16 %v3070_v16, %v132_v5  ;;  %v2394_v22 = vcombine.low %v471_v60, %v472_v0  ;;  %v348_v25 = vadd.bf16 %v3081_v20, %v208_v13  ;;  %v137_v60 = vld [vmem:[%s4541_s0 + $0x1a0] sm:$0xf] }
  0x54   :  { %2807 = vmatprep.mubr.msk.bf16.mxu1 %vm928_vm0, %v2425_v59  ;;  %v537_v23 = vmax.bf16 %v3009_v39, %v409_v11  ;;  %v538_v24 = vmax.bf16 %v3009_v39, %v410_v12  ;;  %v2426_v27 = vcombine.low %v535_v6, %v536_v7  ;;  %v2395_v28 = vcombine.low %v473_v8, %v474_v10  ;;  %v76_v6 = vld [vmem:[%s4541_s0 + $0xac] sm:$0xf] }
  0x55   :  { %v209_v29 = vmul.bf16 %v3070_v16, %v69_v14  ;;  %v411_v31 = vadd.bf16 %v3081_v20, %v271_v17  ;;  %v412_v32 = vadd.bf16 %v3081_v20, %v272_v18  ;;  %v210_v33 = vmul.bf16 %v3070_v16, %v70_v19 }
  0x56   :  { %v273_v34 = vmul.bf16 %v3070_v16, %v133_v21  ;;  %v2427_v36 = vcombine.low %v537_v23, %v538_v24  ;;  %v475_v37 = vmax.bf16 %v3009_v39, %v347_v15  ;;  %v274_v40 = vmul.bf16 %v3070_v16, %v134_v26  ;;  %v139_v15 = vld [vmem:[%s4541_s0 + $0x1a8] sm:$0xf]  ;;  %v77_v23 = vld [vmem:[%s4541_s0 + $0xb0] sm:$0xf]  ;;  %v78_v26 = vld [vmem:[%s4541_s0 + $0xb4] sm:$0xf] }
  0x57   :  { %v349_v38 = vadd.bf16 %v3081_v20, %v209_v29  ;;  %v476_v42 = vmax.bf16 %v3009_v39, %v348_v25  ;;  %v350_v43 = vadd.bf16 %v3081_v20, %v210_v33  ;;  %v211_v45 = vmul.bf16 %v3070_v16, %v71_v30 }
  0x58   :  { %2744 = vmatmul.mubr.msk.bf16.gmra.mxu0 %vm928_vm0, %v2394_v22  ;;  %v413_v44 = vadd.bf16 %v3081_v20, %v273_v34  ;;  %v414_v49 = vadd.bf16 %v3081_v20, %v274_v40  ;;  %v212_v50 = vmul.bf16 %v3070_v16, %v72_v35  ;;  %v539_v52 = vmax.bf16 %v3009_v39, %v411_v31  ;;  %v140_v22 = vld [vmem:[%s4541_s0 + $0x1ac] sm:$0xf] }
  0x59   :  { %2747 = vmatprep.mubr.msk.bf16.mxu0 %vm928_vm0, %v2395_v28  ;;  %v477_v48 = vmax.bf16 %v3009_v39, %v349_v38  ;;  %v540_v53 = vmax.bf16 %v3009_v39, %v412_v32  ;;  %v478_v54 = vmax.bf16 %v3009_v39, %v350_v43  ;;  %v275_v55 = vmul.bf16 %v3070_v16, %v135_v41  ;;  %v142_v32 = vld [vmem:[%s4541_s0 + $0x1b4] sm:$0xf] }
  0x5a   :  { %v351_v56 = vadd.bf16 %v3081_v20, %v211_v45  ;;  %v352_v57 = vadd.bf16 %v3081_v20, %v212_v50  ;;  %v276_v58 = vmul.bf16 %v3070_v16, %v136_v46  ;;  %v213_v59 = vmul.bf16 %v3070_v16, %v73_v47  ;;  %v80_v46 = vld [vmem:[%s4541_s0 + $0xbc] sm:$0xf] }
  0x5b   :  { %2808 = vmatmul.mubr.msk.bf16.gmra.mxu1 %vm928_vm0, %v2426_v27  ;;  %v2396_v62 = vcombine.low %v475_v37, %v476_v42  ;;  %v541_v63 = vmax.bf16 %v3009_v39, %v413_v44  ;;  %v542_v0 = vmax.bf16 %v3009_v39, %v414_v49  ;;  %v214_v1 = vmul.bf16 %v3070_v16, %v74_v51  ;;  %v141_v27 = vld [vmem:[%s4541_s0 + $0x1b0] sm:$0xf]  ;;  %v79_v42 = vld [vmem:[%s4541_s0 + $0xb8] sm:$0xf] }
  0x5c   :  { %2811 = vmatprep.mubr.msk.bf16.mxu1 %vm928_vm0, %v2427_v36  ;;  %v2397_v3 = vcombine.low %v477_v48, %v478_v54  ;;  %v415_v4 = vadd.bf16 %v3081_v20, %v275_v55  ;;  %v353_v5 = vadd.bf16 %v3081_v20, %v213_v59  ;;  %v416_v7 = vadd.bf16 %v3081_v20, %v276_v58  ;;  %v143_v51 = vld [vmem:[%s4541_s0 + $0x1b8] sm:$0xf]  ;;  %v82_v58 = vld [vmem:[%s4541_s0 + $0xc4] sm:$0xf] }
  0x5d   :  { %v354_v8 = vadd.bf16 %v3081_v20, %v214_v1  ;;  %v277_v9 = vmul.bf16 %v3070_v16, %v137_v60  ;;  %v278_v10 = vmul.bf16 %v3070_v16, %v138_v61  ;;  %v2428_v11 = vcombine.low %v539_v52, %v540_v53  ;;  %v81_v52 = vld [vmem:[%s4541_s0 + $0xc0] sm:$0xf] }
  0x5e   :  { %v479_v12 = vmax.bf16 %v3009_v39, %v351_v56  ;;  %v480_v13 = vmax.bf16 %v3009_v39, %v352_v57  ;;  %v215_v14 = vmul.bf16 %v3070_v16, %v75_v2  ;;  %v2429_v17 = vcombine.low %v541_v63, %v542_v0  ;;  %v144_v57 = vld [vmem:[%s4541_s0 + $0x1bc] sm:$0xf]  ;;  %v145_v2 = vld [vmem:[%s4541_s0 + $0x1c0] sm:$0xf] }
  0x5f   :  { %v417_v18 = vadd.bf16 %v3081_v20, %v277_v9  ;;  %v418_v19 = vadd.bf16 %v3081_v20, %v278_v10  ;;  %v216_v21 = vmul.bf16 %v3070_v16, %v76_v6  ;;  %v481_v24 = vmax.bf16 %v3009_v39, %v353_v5 }
  0x60   :  { %2748 = vmatmul.mubr.msk.bf16.gmra.mxu0 %vm928_vm0, %v2396_v62  ;;  %v482_v25 = vmax.bf16 %v3009_v39, %v354_v8  ;;  %v543_v28 = vmax.bf16 %v3009_v39, %v415_v4  ;;  %v544_v29 = vmax.bf16 %v3009_v39, %v416_v7  ;;  %v355_v30 = vadd.bf16 %v3081_v20, %v215_v14 }
  0x61   :  { %2751 = vmatprep.mubr.msk.bf16.mxu0 %vm928_vm0, %v2397_v3  ;;  %v279_v31 = vmul.bf16 %v3070_v16, %v139_v15  ;;  %v2398_v33 = vcombine.low %v479_v12, %v480_v13  ;;  %v356_v34 = vadd.bf16 %v3081_v20, %v216_v21  ;;  %v280_v35 = vmul.bf16 %v3070_v16, %v140_v22  ;;  %v146_v3 = vld [vmem:[%s4541_s0 + $0x1c4] sm:$0xf] }
  0x62   :  { %v217_v36 = vmul.bf16 %v3070_v16, %v77_v23  ;;  %v545_v37 = vmax.bf16 %v3009_v39, %v417_v18  ;;  %v546_v38 = vmax.bf16 %v3009_v39, %v418_v19  ;;  %v218_v40 = vmul.bf16 %v3070_v16, %v78_v26 }
  0x63   :  { %2812 = vmatmul.mubr.msk.bf16.gmra.mxu1 %vm928_vm0, %v2428_v11  ;;  %v281_v41 = vmul.bf16 %v3070_v16, %v141_v27  ;;  %v2399_v43 = vcombine.low %v481_v24, %v482_v25  ;;  %v282_v45 = vmul.bf16 %v3070_v16, %v142_v32  ;;  %v2430_v47 = vcombine.low %v543_v28, %v544_v29  ;;  %v83_v11 = vld [vmem:[%s4541_s0 + $0xc8] sm:$0xf]  ;;  %v85_v25 = vld [vmem:[%s4541_s0 + $0xd0] sm:$0xf] }
  0x64   :  { %2815 = vmatprep.mubr.msk.bf16.mxu1 %vm928_vm0, %v2429_v17  ;;  %v357_v44 = vadd.bf16 %v3081_v20, %v217_v36  ;;  %v483_v48 = vmax.bf16 %v3009_v39, %v355_v30  ;;  %v419_v49 = vadd.bf16 %v3081_v20, %v279_v31  ;;  %v358_v50 = vadd.bf16 %v3081_v20, %v218_v40  ;;  %v84_v17 = vld [vmem:[%s4541_s0 + $0xcc] sm:$0xf]  ;;  %v147_v30 = vld [vmem:[%s4541_s0 + $0x1c8] sm:$0xf]  ;;  %v86_v31 = vld [vmem:[%s4541_s0 + $0xd4] sm:$0xf] }
  0x65   :  { %v484_v53 = vmax.bf16 %v3009_v39, %v356_v34  ;;  %v420_v54 = vadd.bf16 %v3081_v20, %v280_v35  ;;  %v421_v55 = vadd.bf16 %v3081_v20, %v281_v41  ;;  %v219_v56 = vmul.bf16 %v3070_v16, %v79_v42  ;;  %v148_v35 = vld [vmem:[%s4541_s0 + $0x1cc] sm:$0xf]  ;;  %v149_v41 = vld [vmem:[%s4541_s0 + $0x1d0] sm:$0xf]  ;;  %v150_v42 = vld [vmem:[%s4541_s0 + $0x1d4] sm:$0xf] }
  0x66   :  { %v2431_v59 = vcombine.low %v545_v37, %v546_v38  ;;  %v422_v60 = vadd.bf16 %v3081_v20, %v282_v45  ;;  %v220_v61 = vmul.bf16 %v3070_v16, %v80_v46  ;;  %v485_v62 = vmax.bf16 %v3009_v39, %v357_v44 }
  0x67   :  { %v486_v63 = vmax.bf16 %v3009_v39, %v358_v50  ;;  %v283_v0 = vmul.bf16 %v3070_v16, %v143_v51  ;;  %v221_v1 = vmul.bf16 %v3070_v16, %v81_v52  ;;  %v547_v4 = vmax.bf16 %v3009_v39, %v419_v49 }
  0x68   :  { %2752 = vmatmul.mubr.msk.bf16.gmra.mxu0 %vm928_vm0, %v2398_v33  ;;  %v284_v5 = vmul.bf16 %v3070_v16, %v144_v57  ;;  %v222_v6 = vmul.bf16 %v3070_v16, %v82_v58  ;;  %v2400_v7 = vcombine.low %v483_v48, %v484_v53  ;;  %v548_v8 = vmax.bf16 %v3009_v39, %v420_v54  ;;  %v87_v57 = vld [vmem:[%s4541_s0 + $0xd8] sm:$0xf]  ;;  %v88_v58 = vld [vmem:[%s4541_s0 + $0xdc] sm:$0xf] }
  0x69   :  { %2755 = vmatprep.mubr.msk.bf16.mxu0 %vm928_vm0, %v2399_v43  ;;  %v549_v9 = vmax.bf16 %v3009_v39, %v421_v55  ;;  %v359_v10 = vadd.bf16 %v3081_v20, %v219_v56  ;;  %v550_v12 = vmax.bf16 %v3009_v39, %v422_v60  ;;  %v360_v13 = vadd.bf16 %v3081_v20, %v220_v61  ;;  %v89_v61 = vld [vmem:[%s4541_s0 + $0xe0] sm:$0xf] }
  0x6a   :  { %v285_v14 = vmul.bf16 %v3070_v16, %v145_v2  ;;  %v286_v15 = vmul.bf16 %v3070_v16, %v146_v3  ;;  %v2401_v18 = vcombine.low %v485_v62, %v486_v63  ;;  %v423_v19 = vadd.bf16 %v3081_v20, %v283_v0  ;;  %v90_v62 = vld [vmem:[%s4541_s0 + $0xe4] sm:$0xf]  ;;  %v151_v3 = vld [vmem:[%s4541_s0 + $0x1d8] sm:$0xf] }
  0x6b   :  { %2816 = vmatmul.mubr.msk.bf16.gmra.mxu1 %vm928_vm0, %v2430_v47  ;;  %v361_v21 = vadd.bf16 %v3081_v20, %v221_v1  ;;  %v362_v22 = vadd.bf16 %v3081_v20, %v222_v6  ;;  %v424_v23 = vadd.bf16 %v3081_v20, %v284_v5  ;;  %v223_v24 = vmul.bf16 %v3070_v16, %v83_v11 }
  0x6c   :  { %2819 = vmatprep.mubr.msk.bf16.mxu1 %vm928_vm0, %v2431_v59  ;;  %v2432_v26 = vcombine.low %v547_v4, %v548_v8  ;;  %v425_v27 = vadd.bf16 %v3081_v20, %v285_v14  ;;  %v426_v28 = vadd.bf16 %v3081_v20, %v286_v15  ;;  %v224_v29 = vmul.bf16 %v3070_v16, %v84_v17  ;;  %v152_v4 = vld [vmem:[%s4541_s0 + $0x1dc] sm:$0xf] }
  0x6d   :  { %v2433_v32 = vcombine.low %v549_v9, %v550_v12  ;;  %v487_v33 = vmax.bf16 %v3009_v39, %v359_v10  ;;  %v488_v34 = vmax.bf16 %v3009_v39, %v360_v13  ;;  %v551_v36 = vmax.bf16 %v3009_v39, %v423_v19  ;;  %v153_v9 = vld [vmem:[%s4541_s0 + $0x1e0] sm:$0xf]  ;;  %v154_v10 = vld [vmem:[%s4541_s0 + $0x1e4] sm:$0xf] }
  0x6e   :  { %v489_v37 = vmax.bf16 %v3009_v39, %v361_v21  ;;  %v490_v38 = vmax.bf16 %v3009_v39, %v362_v22  ;;  %v225_v40 = vmul.bf16 %v3070_v16, %v85_v25  ;;  %v552_v43 = vmax.bf16 %v3009_v39, %v424_v23 }
  0x6f   :  { %v363_v44 = vadd.bf16 %v3081_v20, %v223_v24  ;;  %v287_v45 = vmul.bf16 %v3070_v16, %v147_v30  ;;  %v226_v46 = vmul.bf16 %v3070_v16, %v86_v31  ;;  %v553_v47 = vmax.bf16 %v3009_v39, %v425_v27  ;;  %v91_v24 = vld [vmem:[%s4541_s0 + $0xe8] sm:$0xf] }
  0x70   :  { %2756 = vmatmul.mubr.msk.bf16.gmra.mxu0 %vm928_vm0, %v2400_v7  ;;  %v554_v48 = vmax.bf16 %v3009_v39, %v426_v28  ;;  %v364_v49 = vadd.bf16 %v3081_v20, %v224_v29  ;;  %v288_v50 = vmul.bf16 %v3070_v16, %v148_v35  ;;  %v2402_v51 = vcombine.low %v487_v33, %v488_v34  ;;  %v92_v29 = vld [vmem:[%s4541_s0 + $0xec] sm:$0xf] }
  0x71   :  { %2759 = vmatprep.mubr.msk.bf16.mxu0 %vm928_vm0, %v2401_v18  ;;  %v289_v52 = vmul.bf16 %v3070_v16, %v149_v41  ;;  %v290_v53 = vmul.bf16 %v3070_v16, %v150_v42  ;;  %v2403_v54 = vcombine.low %v489_v37, %v490_v38  ;;  %v365_v55 = vadd.bf16 %v3081_v20, %v225_v40  ;;  %v94_v37 = vld [vmem:[%s4541_s0 + $0xf4] sm:$0xf] }
  0x72   :  { %v366_v56 = vadd.bf16 %v3081_v20, %v226_v46  ;;  %v2434_v59 = vcombine.low %v551_v36, %v552_v43  ;;  %v427_v60 = vadd.bf16 %v3081_v20, %v287_v45  ;;  %v2435_v63 = vcombine.low %v553_v47, %v554_v48  ;;  %v93_v36 = vld [vmem:[%s4541_s0 + $0xf0] sm:$0xf]  ;;  %v155_v43 = vld [vmem:[%s4541_s0 + $0x1e8] sm:$0xf]  ;;  %v156_v47 = vld [vmem:[%s4541_s0 + $0x1ec] sm:$0xf] }
  0x73   :  { %2820 = vmatmul.mubr.msk.bf16.gmra.mxu1 %vm928_vm0, %v2432_v26  ;;  %v491_v0 = vmax.bf16 %v3009_v39, %v363_v44  ;;  %v492_v1 = vmax.bf16 %v3009_v39, %v364_v49  ;;  %v428_v2 = vadd.bf16 %v3081_v20, %v288_v50  ;;  %v429_v5 = vadd.bf16 %v3081_v20, %v289_v52  ;;  %v157_v52 = vld [vmem:[%s4541_s0 + $0x1f0] sm:$0xf] }
  0x74   :  { %2823 = vmatprep.mubr.msk.bf16.mxu1 %vm928_vm0, %v2433_v32  ;;  %v430_v6 = vadd.bf16 %v3081_v20, %v290_v53  ;;  %v227_v7 = vmul.bf16 %v3070_v16, %v87_v57  ;;  %v228_v8 = vmul.bf16 %v3070_v16, %v88_v58  ;;  %v493_v11 = vmax.bf16 %v3009_v39, %v365_v55  ;;  %v158_v53 = vld [vmem:[%s4541_s0 + $0x1f4] sm:$0xf] }
  0x75   :  { %v494_v12 = vmax.bf16 %v3009_v39, %v366_v56  ;;  %v229_v13 = vmul.bf16 %v3070_v16, %v89_v61  ;;  %v230_v14 = vmul.bf16 %v3070_v16, %v90_v62  ;;  %v555_v15 = vmax.bf16 %v3009_v39, %v427_v60 }
  0x76   :  { %v291_v17 = vmul.bf16 %v3070_v16, %v151_v3  ;;  %v292_v18 = vmul.bf16 %v3070_v16, %v152_v4  ;;  %v2404_v19 = vcombine.low %v491_v0, %v492_v1  ;;  %v556_v21 = vmax.bf16 %v3009_v39, %v428_v2  ;;  %v95_v4 = vld [vmem:[%s4541_s0 + $0xf8] sm:$0xf] }
  0x77   :  { %v293_v22 = vmul.bf16 %v3070_v16, %v153_v9  ;;  %v294_v23 = vmul.bf16 %v3070_v16, %v154_v10  ;;  %v557_v25 = vmax.bf16 %v3009_v39, %v429_v5  ;;  %v558_v26 = vmax.bf16 %v3009_v39, %v430_v6  ;;  %v96_v5 = vld [vmem:[%s4541_s0 + $0xfc] sm:$0xf] }
  0x78   :  { %2760 = vmatmul.mubr.msk.bf16.gmra.mxu0 %vm928_vm0, %v2402_v51  ;;  %v367_v27 = vadd.bf16 %v3081_v20, %v227_v7  ;;  %v368_v28 = vadd.bf16 %v3081_v20, %v228_v8  ;;  %v2405_v30 = vcombine.low %v493_v11, %v494_v12  ;;  %v369_v31 = vadd.bf16 %v3081_v20, %v229_v13 }
  0x79   :  { %2763 = vmatprep.mubr.msk.bf16.mxu0 %vm928_vm0, %v2403_v54  ;;  %v370_v32 = vadd.bf16 %v3081_v20, %v230_v14  ;;  %v431_v33 = vadd.bf16 %v3081_v20, %v291_v17  ;;  %v432_v34 = vadd.bf16 %v3081_v20, %v292_v18  ;;  %v231_v35 = vmul.bf16 %v3070_v16, %v91_v24  ;;  %v159_v17 = vld [vmem:[%s4541_s0 + $0x1f8] sm:$0xf]  ;;  %v160_v18 = vld [vmem:[%s4541_s0 + $0x1fc] sm:$0xf] }
  0x7a   :  { %v2436_v38 = vcombine.low %v555_v15, %v556_v21  ;;  %v433_v40 = vadd.bf16 %v3081_v20, %v293_v22  ;;  %v434_v41 = vadd.bf16 %v3081_v20, %v294_v23  ;;  %v232_v42 = vmul.bf16 %v3070_v16, %v92_v29 }
  0x7b   :  { %2824 = vmatmul.mubr.msk.bf16.gmra.mxu1 %vm928_vm0, %v2434_v59  ;;  %v2437_v44 = vcombine.low %v557_v25, %v558_v26  ;;  %v495_v45 = vmax.bf16 %v3009_v39, %v367_v27  ;;  %v496_v46 = vmax.bf16 %v3009_v39, %v368_v28  ;;  %v497_v48 = vmax.bf16 %v3009_v39, %v369_v31 }
  0x7c   :  { %2827 = vmatprep.mubr.msk.bf16.mxu1 %vm928_vm0, %v2435_v63  ;;  %v498_v49 = vmax.bf16 %v3009_v39, %v370_v32  ;;  %v233_v50 = vmul.bf16 %v3070_v16, %v93_v36  ;;  %v234_v51 = vmul.bf16 %v3070_v16, %v94_v37  ;;  %v559_v54 = vmax.bf16 %v3009_v39, %v431_v33 }
  0x7d   :  { %v560_v55 = vmax.bf16 %v3009_v39, %v432_v34  ;;  %v371_v56 = vadd.bf16 %v3081_v20, %v231_v35  ;;  %v295_v57 = vmul.bf16 %v3070_v16, %v155_v43  ;;  %v561_v58 = vmax.bf16 %v3009_v39, %v433_v40 }
  0x7e   :  { %v562_v59 = vmax.bf16 %v3009_v39, %v434_v41  ;;  %v372_v60 = vadd.bf16 %v3081_v20, %v232_v42  ;;  %v296_v61 = vmul.bf16 %v3070_v16, %v156_v47  ;;  %v2406_v62 = vcombine.low %v495_v45, %v496_v46  ;;  %v3897_v42 = vld [vmem:[#allocation2] ss:$0 sm:$0xff] }
  0x7f   :  { %v297_v63 = vmul.bf16 %v3070_v16, %v157_v52  ;;  %v298_v0 = vmul.bf16 %v3070_v16, %v158_v53  ;;  %v2407_v1 = vcombine.low %v497_v48, %v498_v49  ;;  %v373_v2 = vadd.bf16 %v3081_v20, %v233_v50 }
  0x80   :  { %2764 = vmatmul.mubr.msk.bf16.gmra.mxu0 %vm928_vm0, %v2404_v19  ;;  %v374_v3 = vadd.bf16 %v3081_v20, %v234_v51  ;;  %v2438_v6 = vcombine.low %v559_v54, %v560_v55  ;;  %v435_v7 = vadd.bf16 %v3081_v20, %v295_v57  ;;  %v2439_v8 = vcombine.low %v561_v58, %v562_v59 }
  0x81   :  { %2767 = vmatprep.mubr.msk.bf16.mxu0 %vm928_vm0, %v2405_v30  ;;  %v499_v9 = vmax.bf16 %v3009_v39, %v371_v56  ;;  %v500_v10 = vmax.bf16 %v3009_v39, %v372_v60  ;;  %v436_v11 = vadd.bf16 %v3081_v20, %v296_v61  ;;  %v437_v12 = vadd.bf16 %v3081_v20, %v297_v63 }
  0x82   :  { %v438_v13 = vadd.bf16 %v3081_v20, %v298_v0  ;;  %v235_v14 = vmul.bf16 %v3070_v16, %v95_v4  ;;  %v236_v15 = vmul.bf16 %v3070_v16, %v96_v5  ;;  %v501_v19 = vmax.bf16 %v3009_v39, %v373_v2 }
  0x83   :  { %2828 = vmatmul.mubr.msk.bf16.gmra.mxu1 %vm928_vm0, %v2436_v38  ;;  %v502_v21 = vmax.bf16 %v3009_v39, %v374_v3  ;;  %v563_v22 = vmax.bf16 %v3009_v39, %v435_v7  ;;  %v2408_v23 = vcombine.low %v499_v9, %v500_v10  ;;  %v564_v24 = vmax.bf16 %v3009_v39, %v436_v11 }
  0x84   :  { %2831 = vmatprep.mubr.msk.bf16.mxu1 %vm928_vm0, %v2437_v44  ;;  %v299_v25 = vmul.bf16 %v3070_v16, %v159_v17  ;;  %v300_v26 = vmul.bf16 %v3070_v16, %v160_v18  ;;  %v565_v27 = vmax.bf16 %v3009_v39, %v437_v12  ;;  %v566_v28 = vmax.bf16 %v3009_v39, %v438_v13 }
  0x85   :  { %v375_v29 = vadd.bf16 %v3081_v20, %v235_v14  ;;  %v376_v30 = vadd.bf16 %v3081_v20, %v236_v15  ;;  %v2409_v31 = vcombine.low %v501_v19, %v502_v21  ;;  %v2440_v32 = vcombine.low %v563_v22, %v564_v24 }
  0x86   :  { %v439_v33 = vadd.bf16 %v3081_v20, %v299_v25  ;;  %v440_v34 = vadd.bf16 %v3081_v20, %v300_v26  ;;  %v2441_v35 = vcombine.low %v565_v27, %v566_v28 }
  0x87   :  { %v503_v16 = vmax.bf16 %v3009_v39, %v375_v29  ;;  %v504_v36 = vmax.bf16 %v3009_v39, %v376_v30 }
  0x88   :  { %2768 = vmatmul.mubr.msk.bf16.gmra.mxu0 %vm928_vm0, %v2406_v62  ;;  %v567_v37 = vmax.bf16 %v3009_v39, %v439_v33  ;;  %v568_v38 = vmax.bf16 %v3009_v39, %v440_v34 }
  0x89   :  { %2771 = vmatprep.mubr.msk.bf16.mxu0 %vm928_vm0, %v2407_v1  ;;  %v2410_v40 = vcombine.low %v503_v16, %v504_v36 }
  0x8a   :  { %v2442_v41 = vcombine.low %v567_v37, %v568_v38 }
  0x8b   :  { %2832 = vmatmul.mubr.msk.bf16.gmra.mxu1 %vm928_vm0, %v2438_v6 }
  0x8c   :  { %2835 = vmatprep.mubr.msk.bf16.mxu1 %vm928_vm0, %v2439_v8 }
  0x90   :  { %2772 = vmatmul.mubr.msk.bf16.gmra.mxu0 %vm928_vm0, %v2408_v23 }
  0x91   :  { %2775 = vmatprep.mubr.msk.bf16.mxu0 %vm928_vm0, %v2409_v31 }
  0x93   :  { %2836 = vmatmul.mubr.msk.bf16.gmra.mxu1 %vm928_vm0, %v2440_v32 }
  0x94   :  { %2839 = vmatprep.mubr.msk.bf16.mxu1 %vm928_vm0, %v2441_v35 }
  0x98   :  { %2776 = vmatmul.mubr.msk.bf16.gmra.mxu0 %vm928_vm0, %v2410_v40 }
  0x9b   :  { %2840 = vmatmul.mubr.msk.bf16.gmra.mxu1 %vm928_vm0, %v2442_v41 }
  0xe0   :  { %v2717_v20 = vpop.f32.mrf.mxu0 }
  0xe1   :  { %v1164_v46 = vadd.f32 %v2717_v20, %v3897_v42 }
  0xe2   :  { %v1155_v43 = vpop.f32.mrf.mxu0 }
  0xe3   :  { %v2781_v44 = vpop.f32.mrf.mxu1  ;;  %v1156_v49 = vadd.f32 %v3897_v42, %v1155_v43 }
  0xe4   :  { %v2718_v45 = vpop.f32.mrf.mxu0  ;;  %v1420_v53 = vadd.f32 %v2781_v44, %v3897_v42 }
  0xe5   :  { %v1411_v47 = vpop.f32.mrf.mxu1  ;;  %v1167_v48 = vadd.f32 %v2718_v45, %v3897_v42 }
  0xe6   :  { %v1158_v39 = vpop.f32.mrf.mxu0  ;;  %v1412_v58 = vadd.f32 %v3897_v42, %v1411_v47 }
  0xe7   :  { %v1667_v50 = vpack.c.bf16 %v1167_v48, %v1164_v46  ;;  %v2782_v51 = vpop.f32.mrf.mxu1  ;;  %v1159_v52 = vadd.f32 %v3897_v42, %v1158_v39 }
  0xe8   :  { %v1423_v54 = vadd.f32 %v2782_v51, %v3897_v42  ;;  %v2721_v55 = vpop.f32.mrf.mxu0 }
  0xe9   :  { %2857 = vtanh.bf16 %v1667_v50  ;;  %v1666_v56 = vpack.c.bf16 %v1159_v52, %v1156_v49  ;;  %v1414_v57 = vpop.f32.mrf.mxu1  ;;  %v1180_v1 = vadd.f32 %v2721_v55, %v3897_v42 }
  0xea   :  { %v1699_v59 = vpack.c.bf16 %v1423_v54, %v1420_v53  ;;  %v1415_v60 = vadd.f32 %v3897_v42, %v1414_v57  ;;  %v1171_v61 = vpop.f32.mrf.mxu0 }
  0xeb   :  { %2859 = vtanh.bf16 %v1666_v56  ;;  %v2785_v62 = vpop.f32.mrf.mxu1  ;;  %v1172_v5 = vadd.f32 %v3897_v42, %v1171_v61 }
  0xec   :  { %2861 = vtanh.bf16 %v1699_v59  ;;  %v1698_v63 = vpack.c.bf16 %v1415_v60, %v1412_v58  ;;  %v2722_v0 = vpop.f32.mrf.mxu0  ;;  %v1436_v9 = vadd.f32 %v2785_v62, %v3897_v42 }
  0xed   :  { %v1427_v2 = vpop.f32.mrf.mxu1  ;;  %v1183_v3 = vadd.f32 %v2722_v0, %v3897_v42 }
  0xee   :  { %2863 = vtanh.bf16 %v1698_v63  ;;  %v1174_v4 = vpop.f32.mrf.mxu0  ;;  %v1428_v14 = vadd.f32 %v3897_v42, %v1427_v2 }
  0xef   :  { %v1669_v6 = vpack.c.bf16 %v1183_v3, %v1180_v1  ;;  %v2786_v7 = vpop.f32.mrf.mxu1  ;;  %v1175_v8 = vadd.f32 %v3897_v42, %v1174_v4 }
  0xf0   :  { %v1439_v10 = vadd.f32 %v2786_v7, %v3897_v42  ;;  %v2725_v11 = vpop.f32.mrf.mxu0 }
  0xf1   :  { %2865 = vtanh.bf16 %v1669_v6  ;;  %v1668_v12 = vpack.c.bf16 %v1175_v8, %v1172_v5  ;;  %v1430_v13 = vpop.f32.mrf.mxu1  ;;  %v1196_v23 = vadd.f32 %v2725_v11, %v3897_v42 }
  0xf2   :  { %v1701_v15 = vpack.c.bf16 %v1439_v10, %v1436_v9  ;;  %v1431_v17 = vadd.f32 %v3897_v42, %v1430_v13  ;;  %v1187_v18 = vpop.f32.mrf.mxu0 }
  0xf3   :  { %2867 = vtanh.bf16 %v1668_v12  ;;  %v2789_v19 = vpop.f32.mrf.mxu1  ;;  %v1188_v28 = vadd.f32 %v3897_v42, %v1187_v18 }
  0xf4   :  { %2869 = vtanh.bf16 %v1701_v15  ;;  %v1700_v21 = vpack.c.bf16 %v1431_v17, %v1428_v14  ;;  %v2726_v22 = vpop.f32.mrf.mxu0  ;;  %v1452_v34 = vadd.f32 %v2789_v19, %v3897_v42 }
  0xf5   :  { %v1443_v24 = vpop.f32.mrf.mxu1  ;;  %v1199_v25 = vadd.f32 %v2726_v22, %v3897_v42 }
  0xf6   :  { %2871 = vtanh.bf16 %v1700_v21  ;;  %v1190_v26 = vpop.f32.mrf.mxu0  ;;  %v1444_v37 = vadd.f32 %v3897_v42, %v1443_v24 }
  0xf7   :  { %v2858_v27 = vpop.eup %2857  ;;  %v1671_v29 = vpack.c.bf16 %v1199_v25, %v1196_v23  ;;  %v2790_v30 = vpop.f32.mrf.mxu1  ;;  %v1191_v31 = vadd.f32 %v3897_v42, %v1190_v26 }
  0xf8   :  { %v2513_v32 = vcombine.low %v2858_v27, %v2858_v27  ;;  %v2514_v33 = vcombine.high %v2858_v27, %v2858_v27  ;;  %v1455_v35 = vadd.f32 %v2790_v30, %v3897_v42  ;;  %v2729_v16 = vpop.f32.mrf.mxu0 }
  0xf9   :  { %v2860_v36 = vpop.eup %2859  ;;  %2873 = vtanh.bf16 %v1671_v29  ;;  %v1670_v38 = vpack.c.bf16 %v1191_v31, %v1188_v28  ;;  %v1446_v40 = vpop.f32.mrf.mxu1  ;;  %v1212_v54 = vadd.f32 %v2729_v16, %v3897_v42 }
  0xfa   :  { %v2862_v41 = vpop.eup %2861  ;;  %2245 = vst.msk [vmem:[%s4546_s5 + $0x8] sm:$0xf] %vm2242_vm1, %v2513_v32  ;;  %2246 = vst.msk [vmem:[%s4546_s5 + $0xc] sm:$0xf] %vm2242_vm1, %v2514_v33  ;;  %v2511_v20 = vcombine.low %v2860_v36, %v2860_v36  ;;  %v2512_v43 = vcombine.high %v2860_v36, %v2860_v36  ;;  %v1703_v44 = vpack.c.bf16 %v1455_v35, %v1452_v34  ;;  %v1203_v46 = vpop.f32.mrf.mxu0 }
  0xfb   :  { %v1447_v45 = vadd.f32 %v3897_v42, %v1446_v40  ;;  %v2577_v47 = vcombine.low %v2862_v41, %v2862_v41  ;;  %v2578_v48 = vcombine.high %v2862_v41, %v2862_v41  ;;  %2875 = vtanh.bf16 %v1670_v38  ;;  %v2793_v39 = vpop.f32.mrf.mxu1 }
  0xfc   :  { %v2864_v49 = vpop.eup %2863  ;;  %2243 = vst.msk [vmem:[%s4546_s5] sm:$0xf] %vm2242_vm1, %v2511_v20  ;;  %2244 = vst.msk [vmem:[%s4546_s5 + $0x4] sm:$0xf] %vm2242_vm1, %v2512_v43  ;;  %2877 = vtanh.bf16 %v1703_v44  ;;  %v2730_v51 = vpop.f32.mrf.mxu0  ;;  %v1204_v59 = vadd.f32 %v3897_v42, %v1203_v46  ;;  %v1468_v1 = vadd.f32 %v2793_v39, %v3897_v42 }
  0xfd   :  { %v1702_v50 = vpack.c.bf16 %v1447_v45, %v1444_v37  ;;  %2309 = vst.msk [vmem:[%s4546_s5 + $0x108] sm:$0xf] %vm2242_vm1, %v2577_v47  ;;  %2310 = vst.msk [vmem:[%s4546_s5 + $0x10c] sm:$0xf] %vm2242_vm1, %v2578_v48  ;;  %v2575_v52 = vcombine.low %v2864_v49, %v2864_v49  ;;  %v2576_v53 = vcombine.high %v2864_v49, %v2864_v49  ;;  %v1459_v55 = vpop.f32.mrf.mxu1 }
  0xfe   :  { %v1215_v56 = vadd.f32 %v2730_v51, %v3897_v42  ;;  %v1206_v57 = vpop.f32.mrf.mxu0  ;;  %v1460_v5 = vadd.f32 %v3897_v42, %v1459_v55 }
  0xff   :  { %2879 = vtanh.bf16 %v1702_v50  ;;  %v2866_v58 = vpop.eup %2865  ;;  %2307 = vst.msk [vmem:[%s4546_s5 + $0x100] sm:$0xf] %vm2242_vm1, %v2575_v52  ;;  %2308 = vst.msk [vmem:[%s4546_s5 + $0x104] sm:$0xf] %vm2242_vm1, %v2576_v53  ;;  %v2794_v61 = vpop.f32.mrf.mxu1  ;;  %v1207_v62 = vadd.f32 %v3897_v42, %v1206_v57 }
 0x100   :  { %v1673_v60 = vpack.c.bf16 %v1215_v56, %v1212_v54  ;;  %v2517_v63 = vcombine.low %v2866_v58, %v2866_v58  ;;  %v2518_v0 = vcombine.high %v2866_v58, %v2866_v58  ;;  %v1471_v2 = vadd.f32 %v2794_v61, %v3897_v42  ;;  %v2733_v3 = vpop.f32.mrf.mxu0 }
 0x101   :  { %v2868_v4 = vpop.eup %2867  ;;  %v1672_v6 = vpack.c.bf16 %v1207_v62, %v1204_v59  ;;  %v1462_v7 = vpop.f32.mrf.mxu1  ;;  %v1228_v24 = vadd.f32 %v2733_v3, %v3897_v42 }
 0x102   :  { %2881 = vtanh.bf16 %v1673_v60  ;;  %v2870_v8 = vpop.eup %2869  ;;  %2249 = vst.msk [vmem:[%s4546_s5 + $0x18] sm:$0xf] %vm2242_vm1, %v2517_v63  ;;  %2250 = vst.msk [vmem:[%s4546_s5 + $0x1c] sm:$0xf] %vm2242_vm1, %v2518_v0  ;;  %v2515_v9 = vcombine.low %v2868_v4, %v2868_v4  ;;  %v2516_v10 = vcombine.high %v2868_v4, %v2868_v4  ;;  %v1705_v11 = vpack.c.bf16 %v1471_v2, %v1468_v1  ;;  %v1219_v13 = vpop.f32.mrf.mxu0 }
 0x103   :  { %v1463_v12 = vadd.f32 %v3897_v42, %v1462_v7  ;;  %v2581_v14 = vcombine.low %v2870_v8, %v2870_v8  ;;  %v2582_v15 = vcombine.high %v2870_v8, %v2870_v8  ;;  %2883 = vtanh.bf16 %v1672_v6  ;;  %v2797_v17 = vpop.f32.mrf.mxu1 }
 0x104   :  { %v2872_v18 = vpop.eup %2871  ;;  %2247 = vst.msk [vmem:[%s4546_s5 + $0x10] sm:$0xf] %vm2242_vm1, %v2515_v9  ;;  %2248 = vst.msk [vmem:[%s4546_s5 + $0x14] sm:$0xf] %vm2242_vm1, %v2516_v10  ;;  %2885 = vtanh.bf16 %v1705_v11  ;;  %v2734_v21 = vpop.f32.mrf.mxu0  ;;  %v1220_v29 = vadd.f32 %v3897_v42, %v1219_v13  ;;  %v1484_v35 = vadd.f32 %v2797_v17, %v3897_v42 }
 0x105   :  { %v1704_v19 = vpack.c.bf16 %v1463_v12, %v1460_v5  ;;  %2313 = vst.msk [vmem:[%s4546_s5 + $0x118] sm:$0xf] %vm2242_vm1, %v2581_v14  ;;  %2314 = vst.msk [vmem:[%s4546_s5 + $0x11c] sm:$0xf] %vm2242_vm1, %v2582_v15  ;;  %v2579_v22 = vcombine.low %v2872_v18, %v2872_v18  ;;  %v2580_v23 = vcombine.high %v2872_v18, %v2872_v18  ;;  %v1475_v25 = vpop.f32.mrf.mxu1 }
 0x106   :  { %v1231_v26 = vadd.f32 %v2734_v21, %v3897_v42  ;;  %v1222_v27 = vpop.f32.mrf.mxu0  ;;  %v1476_v38 = vadd.f32 %v3897_v42, %v1475_v25 }
 0x107   :  { %2887 = vtanh.bf16 %v1704_v19  ;;  %v2874_v28 = vpop.eup %2873  ;;  %2311 = vst.msk [vmem:[%s4546_s5 + $0x110] sm:$0xf] %vm2242_vm1, %v2579_v22  ;;  %2312 = vst.msk [vmem:[%s4546_s5 + $0x114] sm:$0xf] %vm2242_vm1, %v2580_v23  ;;  %v2798_v31 = vpop.f32.mrf.mxu1  ;;  %v1223_v32 = vadd.f32 %v3897_v42, %v1222_v27 }
 0x108   :  { %v1675_v30 = vpack.c.bf16 %v1231_v26, %v1228_v24  ;;  %v2521_v33 = vcombine.low %v2874_v28, %v2874_v28  ;;  %v2522_v34 = vcombine.high %v2874_v28, %v2874_v28  ;;  %v1487_v16 = vadd.f32 %v2798_v31, %v3897_v42  ;;  %v2737_v36 = vpop.f32.mrf.mxu0 }
 0x109   :  { %v2876_v37 = vpop.eup %2875  ;;  %v1674_v40 = vpack.c.bf16 %v1223_v32, %v1220_v29  ;;  %v1478_v41 = vpop.f32.mrf.mxu1  ;;  %v1244_v55 = vadd.f32 %v2737_v36, %v3897_v42 }
 0x10a   :  { %2889 = vtanh.bf16 %v1675_v30  ;;  %v2878_v20 = vpop.eup %2877  ;;  %2253 = vst.msk [vmem:[%s4546_s5 + $0x28] sm:$0xf] %vm2242_vm1, %v2521_v33  ;;  %2254 = vst.msk [vmem:[%s4546_s5 + $0x2c] sm:$0xf] %vm2242_vm1, %v2522_v34  ;;  %v2519_v43 = vcombine.low %v2876_v37, %v2876_v37  ;;  %v2520_v44 = vcombine.high %v2876_v37, %v2876_v37  ;;  %v1707_v45 = vpack.c.bf16 %v1487_v16, %v1484_v35  ;;  %v1235_v47 = vpop.f32.mrf.mxu0 }
 0x10b   :  { %v1479_v46 = vadd.f32 %v3897_v42, %v1478_v41  ;;  %v2585_v48 = vcombine.low %v2878_v20, %v2878_v20  ;;  %v2586_v39 = vcombine.high %v2878_v20, %v2878_v20  ;;  %2891 = vtanh.bf16 %v1674_v40  ;;  %v2801_v49 = vpop.f32.mrf.mxu1 }
 0x10c   :  { %2251 = vst.msk [vmem:[%s4546_s5 + $0x20] sm:$0xf] %vm2242_vm1, %v2519_v43  ;;  %2252 = vst.msk [vmem:[%s4546_s5 + $0x24] sm:$0xf] %vm2242_vm1, %v2520_v44  ;;  %2893 = vtanh.bf16 %v1707_v45  ;;  %v2738_v52 = vpop.f32.mrf.mxu0  ;;  %v1236_v60 = vadd.f32 %v3897_v42, %v1235_v47  ;;  %v1500_v2 = vadd.f32 %v2801_v49, %v3897_v42 }
 0x10d   :  { %v2880_v50 = vpop.eup %2879  ;;  %v1706_v51 = vpack.c.bf16 %v1479_v46, %v1476_v38  ;;  %2317 = vst.msk [vmem:[%s4546_s5 + $0x128] sm:$0xf] %vm2242_vm1, %v2585_v48  ;;  %2318 = vst.msk [vmem:[%s4546_s5 + $0x12c] sm:$0xf] %vm2242_vm1, %v2586_v39  ;;  %v1491_v56 = vpop.f32.mrf.mxu1  ;;  %v1247_v57 = vadd.f32 %v2738_v52, %v3897_v42 }
 0x10e   :  { %v2583_v53 = vcombine.low %v2880_v50, %v2880_v50  ;;  %v2584_v54 = vcombine.high %v2880_v50, %v2880_v50  ;;  %v1238_v58 = vpop.f32.mrf.mxu0  ;;  %v1492_v6 = vadd.f32 %v3897_v42, %v1491_v56 }
 0x10f   :  { %2895 = vtanh.bf16 %v1706_v51  ;;  %v1677_v61 = vpack.c.bf16 %v1247_v57, %v1244_v55  ;;  %v2802_v62 = vpop.f32.mrf.mxu1  ;;  %v1239_v63 = vadd.f32 %v3897_v42, %v1238_v58 }
 0x110   :  { %v2882_v59 = vpop.eup %2881  ;;  %2315 = vst.msk [vmem:[%s4546_s5 + $0x120] sm:$0xf] %vm2242_vm1, %v2583_v53  ;;  %2316 = vst.msk [vmem:[%s4546_s5 + $0x124] sm:$0xf] %vm2242_vm1, %v2584_v54  ;;  %v1503_v3 = vadd.f32 %v2802_v62, %v3897_v42  ;;  %v2741_v4 = vpop.f32.mrf.mxu0 }
 0x111   :  { %v2525_v0 = vcombine.low %v2882_v59, %v2882_v59  ;;  %v2526_v1 = vcombine.high %v2882_v59, %v2882_v59  ;;  %v2884_v5 = vpop.eup %2883  ;;  %2897 = vtanh.bf16 %v1677_v61  ;;  %v1676_v7 = vpack.c.bf16 %v1239_v63, %v1236_v60  ;;  %v1494_v8 = vpop.f32.mrf.mxu1 }
 0x112   :  { %v2886_v9 = vpop.eup %2885  ;;  %v2523_v10 = vcombine.low %v2884_v5, %v2884_v5  ;;  %v2524_v11 = vcombine.high %v2884_v5, %v2884_v5  ;;  %v1709_v12 = vpack.c.bf16 %v1503_v3, %v1500_v2  ;;  %v1495_v13 = vadd.f32 %v3897_v42, %v1494_v8  ;;  %v1251_v14 = vpop.f32.mrf.mxu0 }
 0x113   :  { %2257 = vst.msk [vmem:[%s4546_s5 + $0x38] sm:$0xf] %vm2242_vm1, %v2525_v0  ;;  %2258 = vst.msk [vmem:[%s4546_s5 + $0x3c] sm:$0xf] %vm2242_vm1, %v2526_v1  ;;  %v2589_v15 = vcombine.low %v2886_v9, %v2886_v9  ;;  %v2590_v17 = vcombine.high %v2886_v9, %v2886_v9  ;;  %2899 = vtanh.bf16 %v1676_v7  ;;  %v2805_v18 = vpop.f32.mrf.mxu1  ;;  %v1260_v25 = vadd.f32 %v2741_v4, %v3897_v42 }
 0x114   :  { %2255 = vst.msk [vmem:[%s4546_s5 + $0x30] sm:$0xf] %vm2242_vm1, %v2523_v10  ;;  %2256 = vst.msk [vmem:[%s4546_s5 + $0x34] sm:$0xf] %vm2242_vm1, %v2524_v11  ;;  %2901 = vtanh.bf16 %v1709_v12  ;;  %v1708_v21 = vpack.c.bf16 %v1495_v13, %v1492_v6  ;;  %v2742_v22 = vpop.f32.mrf.mxu0  ;;  %v1252_v30 = vadd.f32 %v3897_v42, %v1251_v14  ;;  %v1516_v16 = vadd.f32 %v2805_v18, %v3897_v42 }
 0x115   :  { %v2888_v19 = vpop.eup %2887  ;;  %2321 = vst.msk [vmem:[%s4546_s5 + $0x138] sm:$0xf] %vm2242_vm1, %v2589_v15  ;;  %2322 = vst.msk [vmem:[%s4546_s5 + $0x13c] sm:$0xf] %vm2242_vm1, %v2590_v17  ;;  %v1507_v26 = vpop.f32.mrf.mxu1  ;;  %v1263_v27 = vadd.f32 %v2742_v22, %v3897_v42 }
 0x116   :  { %v2587_v23 = vcombine.low %v2888_v19, %v2888_v19  ;;  %v2588_v24 = vcombine.high %v2888_v19, %v2888_v19  ;;  %2903 = vtanh.bf16 %v1708_v21  ;;  %v1254_v28 = vpop.f32.mrf.mxu0  ;;  %v1508_v40 = vadd.f32 %v3897_v42, %v1507_v26 }
 0x117   :  { %v1679_v31 = vpack.c.bf16 %v1263_v27, %v1260_v25  ;;  %v2806_v32 = vpop.f32.mrf.mxu1  ;;  %v1255_v33 = vadd.f32 %v3897_v42, %v1254_v28 }
 0x118   :  { %v2890_v29 = vpop.eup %2889  ;;  %2319 = vst.msk [vmem:[%s4546_s5 + $0x130] sm:$0xf] %vm2242_vm1, %v2587_v23  ;;  %2320 = vst.msk [vmem:[%s4546_s5 + $0x134] sm:$0xf] %vm2242_vm1, %v2588_v24  ;;  %v1519_v36 = vadd.f32 %v2806_v32, %v3897_v42  ;;  %v2745_v37 = vpop.f32.mrf.mxu0 }
 0x119   :  { %v2529_v34 = vcombine.low %v2890_v29, %v2890_v29  ;;  %v2530_v35 = vcombine.high %v2890_v29, %v2890_v29  ;;  %v2892_v38 = vpop.eup %2891  ;;  %2905 = vtanh.bf16 %v1679_v31  ;;  %v1678_v41 = vpack.c.bf16 %v1255_v33, %v1252_v30  ;;  %v1510_v20 = vpop.f32.mrf.mxu1 }
 0x11a   :  { %v2894_v43 = vpop.eup %2893  ;;  %v2527_v44 = vcombine.low %v2892_v38, %v2892_v38  ;;  %v2528_v45 = vcombine.high %v2892_v38, %v2892_v38  ;;  %v1711_v46 = vpack.c.bf16 %v1519_v36, %v1516_v16  ;;  %v1511_v47 = vadd.f32 %v3897_v42, %v1510_v20  ;;  %v1267_v48 = vpop.f32.mrf.mxu0 }
 0x11b   :  { %2261 = vst.msk [vmem:[%s4546_s5 + $0x48] sm:$0xf] %vm2242_vm1, %v2529_v34  ;;  %2262 = vst.msk [vmem:[%s4546_s5 + $0x4c] sm:$0xf] %vm2242_vm1, %v2530_v35  ;;  %v2593_v39 = vcombine.low %v2894_v43, %v2894_v43  ;;  %v2594_v49 = vcombine.high %v2894_v43, %v2894_v43  ;;  %2907 = vtanh.bf16 %v1678_v41  ;;  %v2809_v50 = vpop.f32.mrf.mxu1  ;;  %v1276_v56 = vadd.f32 %v2745_v37, %v3897_v42 }
 0x11c   :  { %2259 = vst.msk [vmem:[%s4546_s5 + $0x40] sm:$0xf] %vm2242_vm1, %v2527_v44  ;;  %2260 = vst.msk [vmem:[%s4546_s5 + $0x44] sm:$0xf] %vm2242_vm1, %v2528_v45  ;;  %2909 = vtanh.bf16 %v1711_v46  ;;  %v1710_v52 = vpack.c.bf16 %v1511_v47, %v1508_v40  ;;  %v2746_v53 = vpop.f32.mrf.mxu0  ;;  %v1268_v61 = vadd.f32 %v3897_v42, %v1267_v48  ;;  %v1532_v3 = vadd.f32 %v2809_v50, %v3897_v42 }
 0x11d   :  { %v2896_v51 = vpop.eup %2895  ;;  %2325 = vst.msk [vmem:[%s4546_s5 + $0x148] sm:$0xf] %vm2242_vm1, %v2593_v39  ;;  %2326 = vst.msk [vmem:[%s4546_s5 + $0x14c] sm:$0xf] %vm2242_vm1, %v2594_v49  ;;  %v1523_v57 = vpop.f32.mrf.mxu1  ;;  %v1279_v58 = vadd.f32 %v2746_v53, %v3897_v42 }
 0x11e   :  { %v2591_v54 = vcombine.low %v2896_v51, %v2896_v51  ;;  %v2592_v55 = vcombine.high %v2896_v51, %v2896_v51  ;;  %2911 = vtanh.bf16 %v1710_v52  ;;  %v1270_v59 = vpop.f32.mrf.mxu0  ;;  %v1524_v7 = vadd.f32 %v3897_v42, %v1523_v57 }
 0x11f   :  { %v2898_v60 = vpop.eup %2897  ;;  %v1681_v62 = vpack.c.bf16 %v1279_v58, %v1276_v56  ;;  %v2810_v63 = vpop.f32.mrf.mxu1  ;;  %v1271_v0 = vadd.f32 %v3897_v42, %v1270_v59 }
 0x120   :  { %2323 = vst.msk [vmem:[%s4546_s5 + $0x140] sm:$0xf] %vm2242_vm1, %v2591_v54  ;;  %2324 = vst.msk [vmem:[%s4546_s5 + $0x144] sm:$0xf] %vm2242_vm1, %v2592_v55  ;;  %v2533_v1 = vcombine.low %v2898_v60, %v2898_v60  ;;  %v2534_v2 = vcombine.high %v2898_v60, %v2898_v60  ;;  %v1535_v4 = vadd.f32 %v2810_v63, %v3897_v42  ;;  %v2749_v5 = vpop.f32.mrf.mxu0 }
 0x121   :  { %v2900_v6 = vpop.eup %2899  ;;  %2913 = vtanh.bf16 %v1681_v62  ;;  %v1680_v8 = vpack.c.bf16 %v1271_v0, %v1268_v61  ;;  %v1526_v9 = vpop.f32.mrf.mxu1  ;;  %v1292_v26 = vadd.f32 %v2749_v5, %v3897_v42 }
 0x122   :  { %v2902_v10 = vpop.eup %2901  ;;  %2265 = vst.msk [vmem:[%s4546_s5 + $0x58] sm:$0xf] %vm2242_vm1, %v2533_v1  ;;  %2266 = vst.msk [vmem:[%s4546_s5 + $0x5c] sm:$0xf] %vm2242_vm1, %v2534_v2  ;;  %v2531_v11 = vcombine.low %v2900_v6, %v2900_v6  ;;  %v2532_v12 = vcombine.high %v2900_v6, %v2900_v6  ;;  %v1713_v13 = vpack.c.bf16 %v1535_v4, %v1532_v3  ;;  %v1283_v15 = vpop.f32.mrf.mxu0 }
 0x123   :  { %v1527_v14 = vadd.f32 %v3897_v42, %v1526_v9  ;;  %v2597_v17 = vcombine.low %v2902_v10, %v2902_v10  ;;  %v2598_v18 = vcombine.high %v2902_v10, %v2902_v10  ;;  %2915 = vtanh.bf16 %v1680_v8  ;;  %v2813_v19 = vpop.f32.mrf.mxu1 }
 0x124   :  { %v2904_v21 = vpop.eup %2903  ;;  %2263 = vst.msk [vmem:[%s4546_s5 + $0x50] sm:$0xf] %vm2242_vm1, %v2531_v11  ;;  %2264 = vst.msk [vmem:[%s4546_s5 + $0x54] sm:$0xf] %vm2242_vm1, %v2532_v12  ;;  %2917 = vtanh.bf16 %v1713_v13  ;;  %v2750_v23 = vpop.f32.mrf.mxu0  ;;  %v1284_v31 = vadd.f32 %v3897_v42, %v1283_v15  ;;  %v1548_v36 = vadd.f32 %v2813_v19, %v3897_v42 }
 0x125   :  { %v1712_v22 = vpack.c.bf16 %v1527_v14, %v1524_v7  ;;  %2329 = vst.msk [vmem:[%s4546_s5 + $0x158] sm:$0xf] %vm2242_vm1, %v2597_v17  ;;  %2330 = vst.msk [vmem:[%s4546_s5 + $0x15c] sm:$0xf] %vm2242_vm1, %v2598_v18  ;;  %v2595_v24 = vcombine.low %v2904_v21, %v2904_v21  ;;  %v2596_v25 = vcombine.high %v2904_v21, %v2904_v21  ;;  %v1539_v27 = vpop.f32.mrf.mxu1 }
 0x126   :  { %v1295_v28 = vadd.f32 %v2750_v23, %v3897_v42  ;;  %v1286_v29 = vpop.f32.mrf.mxu0  ;;  %v1540_v41 = vadd.f32 %v3897_v42, %v1539_v27 }
 0x127   :  { %2919 = vtanh.bf16 %v1712_v22  ;;  %v2906_v30 = vpop.eup %2905  ;;  %2327 = vst.msk [vmem:[%s4546_s5 + $0x150] sm:$0xf] %vm2242_vm1, %v2595_v24  ;;  %2328 = vst.msk [vmem:[%s4546_s5 + $0x154] sm:$0xf] %vm2242_vm1, %v2596_v25  ;;  %v2814_v33 = vpop.f32.mrf.mxu1  ;;  %v1287_v34 = vadd.f32 %v3897_v42, %v1286_v29 }
 0x128   :  { %v1683_v32 = vpack.c.bf16 %v1295_v28, %v1292_v26  ;;  %v2537_v35 = vcombine.low %v2906_v30, %v2906_v30  ;;  %v2538_v16 = vcombine.high %v2906_v30, %v2906_v30  ;;  %v1551_v37 = vadd.f32 %v2814_v33, %v3897_v42  ;;  %v2753_v38 = vpop.f32.mrf.mxu0 }
 0x129   :  { %v2908_v40 = vpop.eup %2907  ;;  %v1682_v20 = vpack.c.bf16 %v1287_v34, %v1284_v31  ;;  %v1542_v43 = vpop.f32.mrf.mxu1  ;;  %v1308_v57 = vadd.f32 %v2753_v38, %v3897_v42 }
 0x12a   :  { %2921 = vtanh.bf16 %v1683_v32  ;;  %v2910_v44 = vpop.eup %2909  ;;  %2269 = vst.msk [vmem:[%s4546_s5 + $0x68] sm:$0xf] %vm2242_vm1, %v2537_v35  ;;  %2270 = vst.msk [vmem:[%s4546_s5 + $0x6c] sm:$0xf] %vm2242_vm1, %v2538_v16  ;;  %v2535_v45 = vcombine.low %v2908_v40, %v2908_v40  ;;  %v2536_v46 = vcombine.high %v2908_v40, %v2908_v40  ;;  %v1715_v47 = vpack.c.bf16 %v1551_v37, %v1548_v36  ;;  %v1299_v39 = vpop.f32.mrf.mxu0 }
 0x12b   :  { %v1543_v48 = vadd.f32 %v3897_v42, %v1542_v43  ;;  %v2601_v49 = vcombine.low %v2910_v44, %v2910_v44  ;;  %v2602_v50 = vcombine.high %v2910_v44, %v2910_v44  ;;  %2923 = vtanh.bf16 %v1682_v20  ;;  %v2817_v51 = vpop.f32.mrf.mxu1 }
 0x12c   :  { %v2912_v52 = vpop.eup %2911  ;;  %2267 = vst.msk [vmem:[%s4546_s5 + $0x60] sm:$0xf] %vm2242_vm1, %v2535_v45  ;;  %2268 = vst.msk [vmem:[%s4546_s5 + $0x64] sm:$0xf] %vm2242_vm1, %v2536_v46  ;;  %2925 = vtanh.bf16 %v1715_v47  ;;  %v2754_v54 = vpop.f32.mrf.mxu0  ;;  %v1300_v62 = vadd.f32 %v3897_v42, %v1299_v39  ;;  %v1564_v4 = vadd.f32 %v2817_v51, %v3897_v42 }
 0x12d   :  { %v1714_v53 = vpack.c.bf16 %v1543_v48, %v1540_v41  ;;  %2333 = vst.msk [vmem:[%s4546_s5 + $0x168] sm:$0xf] %vm2242_vm1, %v2601_v49  ;;  %2334 = vst.msk [vmem:[%s4546_s5 + $0x16c] sm:$0xf] %vm2242_vm1, %v2602_v50  ;;  %v2599_v55 = vcombine.low %v2912_v52, %v2912_v52  ;;  %v2600_v56 = vcombine.high %v2912_v52, %v2912_v52  ;;  %v1555_v58 = vpop.f32.mrf.mxu1 }
 0x12e   :  { %v1311_v59 = vadd.f32 %v2754_v54, %v3897_v42  ;;  %v1302_v60 = vpop.f32.mrf.mxu0  ;;  %v1556_v8 = vadd.f32 %v3897_v42, %v1555_v58 }
 0x12f   :  { %2927 = vtanh.bf16 %v1714_v53  ;;  %v2914_v61 = vpop.eup %2913  ;;  %2331 = vst.msk [vmem:[%s4546_s5 + $0x160] sm:$0xf] %vm2242_vm1, %v2599_v55  ;;  %2332 = vst.msk [vmem:[%s4546_s5 + $0x164] sm:$0xf] %vm2242_vm1, %v2600_v56  ;;  %v2818_v0 = vpop.f32.mrf.mxu1  ;;  %v1303_v1 = vadd.f32 %v3897_v42, %v1302_v60 }
 0x130   :  { %v1685_v63 = vpack.c.bf16 %v1311_v59, %v1308_v57  ;;  %v2541_v2 = vcombine.low %v2914_v61, %v2914_v61  ;;  %v2542_v3 = vcombine.high %v2914_v61, %v2914_v61  ;;  %v1567_v5 = vadd.f32 %v2818_v0, %v3897_v42  ;;  %v2757_v6 = vpop.f32.mrf.mxu0 }
 0x131   :  { %v2916_v7 = vpop.eup %2915  ;;  %v1684_v9 = vpack.c.bf16 %v1303_v1, %v1300_v62  ;;  %v1558_v10 = vpop.f32.mrf.mxu1  ;;  %v1324_v27 = vadd.f32 %v2757_v6, %v3897_v42 }
 0x132   :  { %2929 = vtanh.bf16 %v1685_v63  ;;  %v2918_v11 = vpop.eup %2917  ;;  %2273 = vst.msk [vmem:[%s4546_s5 + $0x78] sm:$0xf] %vm2242_vm1, %v2541_v2  ;;  %2274 = vst.msk [vmem:[%s4546_s5 + $0x7c] sm:$0xf] %vm2242_vm1, %v2542_v3  ;;  %v2539_v12 = vcombine.low %v2916_v7, %v2916_v7  ;;  %v2540_v13 = vcombine.high %v2916_v7, %v2916_v7  ;;  %v1717_v14 = vpack.c.bf16 %v1567_v5, %v1564_v4  ;;  %v1315_v17 = vpop.f32.mrf.mxu0 }
 0x133   :  { %v1559_v15 = vadd.f32 %v3897_v42, %v1558_v10  ;;  %v2605_v18 = vcombine.low %v2918_v11, %v2918_v11  ;;  %v2606_v19 = vcombine.high %v2918_v11, %v2918_v11  ;;  %2931 = vtanh.bf16 %v1684_v9  ;;  %v2821_v21 = vpop.f32.mrf.mxu1 }
 0x134   :  { %2271 = vst.msk [vmem:[%s4546_s5 + $0x70] sm:$0xf] %vm2242_vm1, %v2539_v12  ;;  %2272 = vst.msk [vmem:[%s4546_s5 + $0x74] sm:$0xf] %vm2242_vm1, %v2540_v13  ;;  %2933 = vtanh.bf16 %v1717_v14  ;;  %v2758_v24 = vpop.f32.mrf.mxu0  ;;  %v1316_v32 = vadd.f32 %v3897_v42, %v1315_v17  ;;  %v1580_v37 = vadd.f32 %v2821_v21, %v3897_v42 }
 0x135   :  { %v2920_v22 = vpop.eup %2919  ;;  %v1716_v23 = vpack.c.bf16 %v1559_v15, %v1556_v8  ;;  %2337 = vst.msk [vmem:[%s4546_s5 + $0x178] sm:$0xf] %vm2242_vm1, %v2605_v18  ;;  %2338 = vst.msk [vmem:[%s4546_s5 + $0x17c] sm:$0xf] %vm2242_vm1, %v2606_v19  ;;  %v1571_v28 = vpop.f32.mrf.mxu1  ;;  %v1327_v29 = vadd.f32 %v2758_v24, %v3897_v42 }
 0x136   :  { %v2603_v25 = vcombine.low %v2920_v22, %v2920_v22  ;;  %v2604_v26 = vcombine.high %v2920_v22, %v2920_v22  ;;  %v1318_v30 = vpop.f32.mrf.mxu0  ;;  %v1572_v20 = vadd.f32 %v3897_v42, %v1571_v28 }
 0x137   :  { %2935 = vtanh.bf16 %v1716_v23  ;;  %v1687_v33 = vpack.c.bf16 %v1327_v29, %v1324_v27  ;;  %v2822_v34 = vpop.f32.mrf.mxu1  ;;  %v1319_v35 = vadd.f32 %v3897_v42, %v1318_v30 }
 0x138   :  { %v2922_v31 = vpop.eup %2921  ;;  %2335 = vst.msk [vmem:[%s4546_s5 + $0x170] sm:$0xf] %vm2242_vm1, %v2603_v25  ;;  %2336 = vst.msk [vmem:[%s4546_s5 + $0x174] sm:$0xf] %vm2242_vm1, %v2604_v26  ;;  %v1583_v38 = vadd.f32 %v2822_v34, %v3897_v42  ;;  %v2761_v40 = vpop.f32.mrf.mxu0 }
 0x139   :  { %v2545_v16 = vcombine.low %v2922_v31, %v2922_v31  ;;  %v2546_v36 = vcombine.high %v2922_v31, %v2922_v31  ;;  %v2924_v41 = vpop.eup %2923  ;;  %2937 = vtanh.bf16 %v1687_v33  ;;  %v1686_v43 = vpack.c.bf16 %v1319_v35, %v1316_v32  ;;  %v1574_v44 = vpop.f32.mrf.mxu1 }
 0x13a   :  { %v2926_v45 = vpop.eup %2925  ;;  %v2543_v46 = vcombine.low %v2924_v41, %v2924_v41  ;;  %v2544_v47 = vcombine.high %v2924_v41, %v2924_v41  ;;  %v1719_v48 = vpack.c.bf16 %v1583_v38, %v1580_v37  ;;  %v1575_v39 = vadd.f32 %v3897_v42, %v1574_v44  ;;  %v1331_v49 = vpop.f32.mrf.mxu0 }
 0x13b   :  { %2277 = vst.msk [vmem:[%s4546_s5 + $0x88] sm:$0xf] %vm2242_vm1, %v2545_v16  ;;  %2278 = vst.msk [vmem:[%s4546_s5 + $0x8c] sm:$0xf] %vm2242_vm1, %v2546_v36  ;;  %v2609_v50 = vcombine.low %v2926_v45, %v2926_v45  ;;  %v2610_v51 = vcombine.high %v2926_v45, %v2926_v45  ;;  %2939 = vtanh.bf16 %v1686_v43  ;;  %v2825_v52 = vpop.f32.mrf.mxu1  ;;  %v1340_v58 = vadd.f32 %v2761_v40, %v3897_v42 }
 0x13c   :  { %2275 = vst.msk [vmem:[%s4546_s5 + $0x80] sm:$0xf] %vm2242_vm1, %v2543_v46  ;;  %2276 = vst.msk [vmem:[%s4546_s5 + $0x84] sm:$0xf] %vm2242_vm1, %v2544_v47  ;;  %2941 = vtanh.bf16 %v1719_v48  ;;  %v1718_v54 = vpack.c.bf16 %v1575_v39, %v1572_v20  ;;  %v2762_v55 = vpop.f32.mrf.mxu0  ;;  %v1332_v63 = vadd.f32 %v3897_v42, %v1331_v49  ;;  %v1596_v5 = vadd.f32 %v2825_v52, %v3897_v42  ;;  %v4330_v49 = vld [vmem:[#allocation2] ss:$0 sm:$0xff] }
 0x13d   :  { %v2928_v53 = vpop.eup %2927  ;;  %2341 = vst.msk [vmem:[%s4546_s5 + $0x188] sm:$0xf] %vm2242_vm1, %v2609_v50  ;;  %2342 = vst.msk [vmem:[%s4546_s5 + $0x18c] sm:$0xf] %vm2242_vm1, %v2610_v51  ;;  %v1587_v59 = vpop.f32.mrf.mxu1  ;;  %v1343_v60 = vadd.f32 %v2762_v55, %v3897_v42 }
 0x13e   :  { %v2607_v56 = vcombine.low %v2928_v53, %v2928_v53  ;;  %v2608_v57 = vcombine.high %v2928_v53, %v2928_v53  ;;  %2943 = vtanh.bf16 %v1718_v54  ;;  %v1334_v61 = vpop.f32.mrf.mxu0  ;;  %v1588_v9 = vadd.f32 %v3897_v42, %v1587_v59 }
 0x13f   :  { %v1689_v0 = vpack.c.bf16 %v1343_v60, %v1340_v58  ;;  %v2826_v1 = vpop.f32.mrf.mxu1  ;;  %v1335_v2 = vadd.f32 %v3897_v42, %v1334_v61 }
 0x140   :  { %v2930_v62 = vpop.eup %2929  ;;  %2339 = vst.msk [vmem:[%s4546_s5 + $0x180] sm:$0xf] %vm2242_vm1, %v2607_v56  ;;  %2340 = vst.msk [vmem:[%s4546_s5 + $0x184] sm:$0xf] %vm2242_vm1, %v2608_v57  ;;  %v1599_v6 = vadd.f32 %v2826_v1, %v3897_v42  ;;  %v2765_v7 = vpop.f32.mrf.mxu0 }
 0x141   :  { %v2549_v3 = vcombine.low %v2930_v62, %v2930_v62  ;;  %v2550_v4 = vcombine.high %v2930_v62, %v2930_v62  ;;  %v2932_v8 = vpop.eup %2931  ;;  %2945 = vtanh.bf16 %v1689_v0  ;;  %v1688_v10 = vpack.c.bf16 %v1335_v2, %v1332_v63  ;;  %v1590_v11 = vpop.f32.mrf.mxu1 }
 0x142   :  { %v2934_v12 = vpop.eup %2933  ;;  %v2547_v13 = vcombine.low %v2932_v8, %v2932_v8  ;;  %v2548_v14 = vcombine.high %v2932_v8, %v2932_v8  ;;  %v1721_v15 = vpack.c.bf16 %v1599_v6, %v1596_v5  ;;  %v1591_v17 = vadd.f32 %v3897_v42, %v1590_v11  ;;  %v1347_v18 = vpop.f32.mrf.mxu0 }
 0x143   :  { %2281 = vst.msk [vmem:[%s4546_s5 + $0x98] sm:$0xf] %vm2242_vm1, %v2549_v3  ;;  %2282 = vst.msk [vmem:[%s4546_s5 + $0x9c] sm:$0xf] %vm2242_vm1, %v2550_v4  ;;  %v2613_v19 = vcombine.low %v2934_v12, %v2934_v12  ;;  %v2614_v21 = vcombine.high %v2934_v12, %v2934_v12  ;;  %2947 = vtanh.bf16 %v1688_v10  ;;  %v2829_v22 = vpop.f32.mrf.mxu1  ;;  %v1356_v28 = vadd.f32 %v2765_v7, %v3897_v42 }
 0x144   :  { %2279 = vst.msk [vmem:[%s4546_s5 + $0x90] sm:$0xf] %vm2242_vm1, %v2547_v13  ;;  %2280 = vst.msk [vmem:[%s4546_s5 + $0x94] sm:$0xf] %vm2242_vm1, %v2548_v14  ;;  %2949 = vtanh.bf16 %v1721_v15  ;;  %v1720_v24 = vpack.c.bf16 %v1591_v17, %v1588_v9  ;;  %v2766_v25 = vpop.f32.mrf.mxu0  ;;  %v1348_v33 = vadd.f32 %v3897_v42, %v1347_v18  ;;  %v1612_v38 = vadd.f32 %v2829_v22, %v3897_v42 }
 0x145   :  { %v2936_v23 = vpop.eup %2935  ;;  %2345 = vst.msk [vmem:[%s4546_s5 + $0x198] sm:$0xf] %vm2242_vm1, %v2613_v19  ;;  %2346 = vst.msk [vmem:[%s4546_s5 + $0x19c] sm:$0xf] %vm2242_vm1, %v2614_v21  ;;  %v1603_v29 = vpop.f32.mrf.mxu1  ;;  %v1359_v30 = vadd.f32 %v2766_v25, %v3897_v42 }
 0x146   :  { %v2611_v26 = vcombine.low %v2936_v23, %v2936_v23  ;;  %v2612_v27 = vcombine.high %v2936_v23, %v2936_v23  ;;  %2951 = vtanh.bf16 %v1720_v24  ;;  %v1350_v31 = vpop.f32.mrf.mxu0  ;;  %v1604_v43 = vadd.f32 %v3897_v42, %v1603_v29 }
 0x147   :  { %v2938_v32 = vpop.eup %2937  ;;  %v1691_v34 = vpack.c.bf16 %v1359_v30, %v1356_v28  ;;  %v2830_v35 = vpop.f32.mrf.mxu1  ;;  %v1351_v16 = vadd.f32 %v3897_v42, %v1350_v31 }
 0x148   :  { %2343 = vst.msk [vmem:[%s4546_s5 + $0x190] sm:$0xf] %vm2242_vm1, %v2611_v26  ;;  %2344 = vst.msk [vmem:[%s4546_s5 + $0x194] sm:$0xf] %vm2242_vm1, %v2612_v27  ;;  %v2553_v36 = vcombine.low %v2938_v32, %v2938_v32  ;;  %v2554_v37 = vcombine.high %v2938_v32, %v2938_v32  ;;  %v1615_v40 = vadd.f32 %v2830_v35, %v3897_v42  ;;  %v2769_v41 = vpop.f32.mrf.mxu0 }
 0x149   :  { %v2940_v20 = vpop.eup %2939  ;;  %2953 = vtanh.bf16 %v1691_v34  ;;  %v1690_v44 = vpack.c.bf16 %v1351_v16, %v1348_v33  ;;  %v1606_v45 = vpop.f32.mrf.mxu1  ;;  %v1372_v59 = vadd.f32 %v4330_v49, %v2769_v41 }
 0x14a   :  { %v2942_v46 = vpop.eup %2941  ;;  %2285 = vst.msk [vmem:[%s4546_s5 + $0xa8] sm:$0xf] %vm2242_vm1, %v2553_v36  ;;  %2286 = vst.msk [vmem:[%s4546_s5 + $0xac] sm:$0xf] %vm2242_vm1, %v2554_v37  ;;  %v2551_v47 = vcombine.low %v2940_v20, %v2940_v20  ;;  %v2552_v48 = vcombine.high %v2940_v20, %v2940_v20  ;;  %v1723_v39 = vpack.c.bf16 %v1615_v40, %v1612_v38  ;;  %v1363_v50 = vpop.f32.mrf.mxu0 }
 0x14b   :  { %v1607_v42 = vadd.f32 %v4330_v49, %v1606_v45  ;;  %v2617_v51 = vcombine.low %v2942_v46, %v2942_v46  ;;  %v2618_v52 = vcombine.high %v2942_v46, %v2942_v46  ;;  %2955 = vtanh.bf16 %v1690_v44  ;;  %v2833_v53 = vpop.f32.mrf.mxu1 }
 0x14c   :  { %v2944_v54 = vpop.eup %2943  ;;  %2283 = vst.msk [vmem:[%s4546_s5 + $0xa0] sm:$0xf] %vm2242_vm1, %v2551_v47  ;;  %2284 = vst.msk [vmem:[%s4546_s5 + $0xa4] sm:$0xf] %vm2242_vm1, %v2552_v48  ;;  %2957 = vtanh.bf16 %v1723_v39  ;;  %v2770_v56 = vpop.f32.mrf.mxu0  ;;  %v1364_v0 = vadd.f32 %v4330_v49, %v1363_v50  ;;  %v1628_v6 = vadd.f32 %v4330_v49, %v2833_v53 }
 0x14d   :  { %v1722_v55 = vpack.c.bf16 %v1607_v42, %v1604_v43  ;;  %2349 = vst.msk [vmem:[%s4546_s5 + $0x1a8] sm:$0xf] %vm2242_vm1, %v2617_v51  ;;  %2350 = vst.msk [vmem:[%s4546_s5 + $0x1ac] sm:$0xf] %vm2242_vm1, %v2618_v52  ;;  %v2615_v57 = vcombine.low %v2944_v54, %v2944_v54  ;;  %v2616_v58 = vcombine.high %v2944_v54, %v2944_v54  ;;  %v1619_v60 = vpop.f32.mrf.mxu1 }
 0x14e   :  { %v1375_v61 = vadd.f32 %v4330_v49, %v2770_v56  ;;  %v1366_v62 = vpop.f32.mrf.mxu0  ;;  %v1620_v10 = vadd.f32 %v4330_v49, %v1619_v60 }
 0x14f   :  { %2959 = vtanh.bf16 %v1722_v55  ;;  %v2946_v63 = vpop.eup %2945  ;;  %2347 = vst.msk [vmem:[%s4546_s5 + $0x1a0] sm:$0xf] %vm2242_vm1, %v2615_v57  ;;  %2348 = vst.msk [vmem:[%s4546_s5 + $0x1a4] sm:$0xf] %vm2242_vm1, %v2616_v58  ;;  %v2834_v2 = vpop.f32.mrf.mxu1  ;;  %v1367_v3 = vadd.f32 %v4330_v49, %v1366_v62 }
 0x150   :  { %v1693_v1 = vpack.c.bf16 %v1375_v61, %v1372_v59  ;;  %v2557_v4 = vcombine.low %v2946_v63, %v2946_v63  ;;  %v2558_v5 = vcombine.high %v2946_v63, %v2946_v63  ;;  %v1631_v7 = vadd.f32 %v4330_v49, %v2834_v2  ;;  %v2773_v8 = vpop.f32.mrf.mxu0 }
 0x151   :  { %v2948_v9 = vpop.eup %2947  ;;  %v1692_v11 = vpack.c.bf16 %v1367_v3, %v1364_v0  ;;  %v1622_v12 = vpop.f32.mrf.mxu1  ;;  %v1388_v29 = vadd.f32 %v4330_v49, %v2773_v8 }
 0x152   :  { %2961 = vtanh.bf16 %v1693_v1  ;;  %v2950_v13 = vpop.eup %2949  ;;  %2289 = vst.msk [vmem:[%s4546_s5 + $0xb8] sm:$0xf] %vm2242_vm1, %v2557_v4  ;;  %2290 = vst.msk [vmem:[%s4546_s5 + $0xbc] sm:$0xf] %vm2242_vm1, %v2558_v5  ;;  %v2555_v14 = vcombine.low %v2948_v9, %v2948_v9  ;;  %v2556_v15 = vcombine.high %v2948_v9, %v2948_v9  ;;  %v1725_v17 = vpack.c.bf16 %v1631_v7, %v1628_v6  ;;  %v1379_v19 = vpop.f32.mrf.mxu0 }
 0x153   :  { %v1623_v18 = vadd.f32 %v4330_v49, %v1622_v12  ;;  %v2621_v21 = vcombine.low %v2950_v13, %v2950_v13  ;;  %v2622_v22 = vcombine.high %v2950_v13, %v2950_v13  ;;  %2963 = vtanh.bf16 %v1692_v11  ;;  %v2837_v23 = vpop.f32.mrf.mxu1 }
 0x154   :  { %v2952_v24 = vpop.eup %2951  ;;  %2287 = vst.msk [vmem:[%s4546_s5 + $0xb0] sm:$0xf] %vm2242_vm1, %v2555_v14  ;;  %2288 = vst.msk [vmem:[%s4546_s5 + $0xb4] sm:$0xf] %vm2242_vm1, %v2556_v15  ;;  %2965 = vtanh.bf16 %v1725_v17  ;;  %v2774_v26 = vpop.f32.mrf.mxu0  ;;  %v1380_v34 = vadd.f32 %v4330_v49, %v1379_v19  ;;  %v1644_v40 = vadd.f32 %v4330_v49, %v2837_v23 }
 0x155   :  { %v1724_v25 = vpack.c.bf16 %v1623_v18, %v1620_v10  ;;  %2353 = vst.msk [vmem:[%s4546_s5 + $0x1b8] sm:$0xf] %vm2242_vm1, %v2621_v21  ;;  %2354 = vst.msk [vmem:[%s4546_s5 + $0x1bc] sm:$0xf] %vm2242_vm1, %v2622_v22  ;;  %v2619_v27 = vcombine.low %v2952_v24, %v2952_v24  ;;  %v2620_v28 = vcombine.high %v2952_v24, %v2952_v24  ;;  %v1635_v30 = vpop.f32.mrf.mxu1 }
 0x156   :  { %v1391_v31 = vadd.f32 %v4330_v49, %v2774_v26  ;;  %v1382_v32 = vpop.f32.mrf.mxu0  ;;  %v1636_v44 = vadd.f32 %v4330_v49, %v1635_v30 }
 0x157   :  { %2967 = vtanh.bf16 %v1724_v25  ;;  %v2954_v33 = vpop.eup %2953  ;;  %2351 = vst.msk [vmem:[%s4546_s5 + $0x1b0] sm:$0xf] %vm2242_vm1, %v2619_v27  ;;  %2352 = vst.msk [vmem:[%s4546_s5 + $0x1b4] sm:$0xf] %vm2242_vm1, %v2620_v28  ;;  %v2838_v16 = vpop.f32.mrf.mxu1  ;;  %v1383_v36 = vadd.f32 %v4330_v49, %v1382_v32 }
 0x158   :  { %v1695_v35 = vpack.c.bf16 %v1391_v31, %v1388_v29  ;;  %v2561_v37 = vcombine.low %v2954_v33, %v2954_v33  ;;  %v2562_v38 = vcombine.high %v2954_v33, %v2954_v33  ;;  %v1647_v41 = vadd.f32 %v4330_v49, %v2838_v16  ;;  %v2777_v20 = vpop.f32.mrf.mxu0 }
 0x159   :  { %v2956_v43 = vpop.eup %2955  ;;  %v1694_v45 = vpack.c.bf16 %v1383_v36, %v1380_v34  ;;  %v1638_v46 = vpop.f32.mrf.mxu1  ;;  %v1404_v60 = vadd.f32 %v4330_v49, %v2777_v20 }
 0x15a   :  { %2969 = vtanh.bf16 %v1695_v35  ;;  %v2958_v47 = vpop.eup %2957  ;;  %2293 = vst.msk [vmem:[%s4546_s5 + $0xc8] sm:$0xf] %vm2242_vm1, %v2561_v37  ;;  %2294 = vst.msk [vmem:[%s4546_s5 + $0xcc] sm:$0xf] %vm2242_vm1, %v2562_v38  ;;  %v2559_v48 = vcombine.low %v2956_v43, %v2956_v43  ;;  %v2560_v39 = vcombine.high %v2956_v43, %v2956_v43  ;;  %v1727_v42 = vpack.c.bf16 %v1647_v41, %v1644_v40  ;;  %v1395_v51 = vpop.f32.mrf.mxu0 }
 0x15b   :  { %v1639_v50 = vadd.f32 %v4330_v49, %v1638_v46  ;;  %v2625_v52 = vcombine.low %v2958_v47, %v2958_v47  ;;  %v2626_v53 = vcombine.high %v2958_v47, %v2958_v47  ;;  %2971 = vtanh.bf16 %v1694_v45  ;;  %v2841_v54 = vpop.f32.mrf.mxu1 }
 0x15c   :  { %2291 = vst.msk [vmem:[%s4546_s5 + $0xc0] sm:$0xf] %vm2242_vm1, %v2559_v48  ;;  %2292 = vst.msk [vmem:[%s4546_s5 + $0xc4] sm:$0xf] %vm2242_vm1, %v2560_v39  ;;  %2973 = vtanh.bf16 %v1727_v42  ;;  %v2778_v57 = vpop.f32.mrf.mxu0  ;;  %v1396_v1 = vadd.f32 %v4330_v49, %v1395_v51  ;;  %v1660_v7 = vadd.f32 %v4330_v49, %v2841_v54 }
 0x15d   :  { %v2960_v55 = vpop.eup %2959  ;;  %v1726_v56 = vpack.c.bf16 %v1639_v50, %v1636_v44  ;;  %2357 = vst.msk [vmem:[%s4546_s5 + $0x1c8] sm:$0xf] %vm2242_vm1, %v2625_v52  ;;  %2358 = vst.msk [vmem:[%s4546_s5 + $0x1cc] sm:$0xf] %vm2242_vm1, %v2626_v53  ;;  %v1651_v61 = vpop.f32.mrf.mxu1  ;;  %v1407_v62 = vadd.f32 %v4330_v49, %v2778_v57 }
 0x15e   :  { %v2623_v58 = vcombine.low %v2960_v55, %v2960_v55  ;;  %v2624_v59 = vcombine.high %v2960_v55, %v2960_v55  ;;  %v1398_v63 = vpop.f32.mrf.mxu0  ;;  %v1652_v10 = vadd.f32 %v4330_v49, %v1651_v61 }
 0x15f   :  { %2975 = vtanh.bf16 %v1726_v56  ;;  %v1697_v2 = vpack.c.bf16 %v1407_v62, %v1404_v60  ;;  %v2842_v3 = vpop.f32.mrf.mxu1  ;;  %v1399_v4 = vadd.f32 %v4330_v49, %v1398_v63 }
 0x160   :  { %v2962_v0 = vpop.eup %2961  ;;  %2355 = vst.msk [vmem:[%s4546_s5 + $0x1c0] sm:$0xf] %vm2242_vm1, %v2623_v58  ;;  %2356 = vst.msk [vmem:[%s4546_s5 + $0x1c4] sm:$0xf] %vm2242_vm1, %v2624_v59  ;;  %v1663_v8 = vadd.f32 %v4330_v49, %v2842_v3 }
 0x161   :  { %v2565_v5 = vcombine.low %v2962_v0, %v2962_v0  ;;  %v2566_v6 = vcombine.high %v2962_v0, %v2962_v0  ;;  %v2964_v9 = vpop.eup %2963  ;;  %2977 = vtanh.bf16 %v1697_v2  ;;  %v1696_v11 = vpack.c.bf16 %v1399_v4, %v1396_v1  ;;  %v1654_v12 = vpop.f32.mrf.mxu1 }
 0x162   :  { %v2966_v13 = vpop.eup %2965  ;;  %v2563_v14 = vcombine.low %v2964_v9, %v2964_v9  ;;  %v2564_v15 = vcombine.high %v2964_v9, %v2964_v9  ;;  %v1729_v17 = vpack.c.bf16 %v1663_v8, %v1660_v7  ;;  %v1655_v18 = vadd.f32 %v4330_v49, %v1654_v12 }
 0x163   :  { %2297 = vst.msk [vmem:[%s4546_s5 + $0xd8] sm:$0xf] %vm2242_vm1, %v2565_v5  ;;  %2298 = vst.msk [vmem:[%s4546_s5 + $0xdc] sm:$0xf] %vm2242_vm1, %v2566_v6  ;;  %v2629_v19 = vcombine.low %v2966_v13, %v2966_v13  ;;  %v2630_v21 = vcombine.high %v2966_v13, %v2966_v13  ;;  %2979 = vtanh.bf16 %v1696_v11 }
 0x164   :  { %2295 = vst.msk [vmem:[%s4546_s5 + $0xd0] sm:$0xf] %vm2242_vm1, %v2563_v14  ;;  %2296 = vst.msk [vmem:[%s4546_s5 + $0xd4] sm:$0xf] %vm2242_vm1, %v2564_v15  ;;  %2981 = vtanh.bf16 %v1729_v17  ;;  %v1728_v23 = vpack.c.bf16 %v1655_v18, %v1652_v10 }
 0x165   :  { %v2968_v22 = vpop.eup %2967  ;;  %2361 = vst.msk [vmem:[%s4546_s5 + $0x1d8] sm:$0xf] %vm2242_vm1, %v2629_v19  ;;  %2362 = vst.msk [vmem:[%s4546_s5 + $0x1dc] sm:$0xf] %vm2242_vm1, %v2630_v21 }
 0x166   :  { %v2627_v49 = vcombine.low %v2968_v22, %v2968_v22  ;;  %v2628_v24 = vcombine.high %v2968_v22, %v2968_v22  ;;  %2983 = vtanh.bf16 %v1728_v23 }
 0x168   :  { %v2970_v25 = vpop.eup %2969  ;;  %2359 = vst.msk [vmem:[%s4546_s5 + $0x1d0] sm:$0xf] %vm2242_vm1, %v2627_v49  ;;  %2360 = vst.msk [vmem:[%s4546_s5 + $0x1d4] sm:$0xf] %vm2242_vm1, %v2628_v24 }
 0x169   :  { %v2569_v26 = vcombine.low %v2970_v25, %v2970_v25  ;;  %v2570_v27 = vcombine.high %v2970_v25, %v2970_v25  ;;  %v2972_v28 = vpop.eup %2971 }
 0x16a   :  { %v2974_v29 = vpop.eup %2973  ;;  %v2567_v30 = vcombine.low %v2972_v28, %v2972_v28  ;;  %v2568_v31 = vcombine.high %v2972_v28, %v2972_v28 }
 0x16b   :  { %2301 = vst.msk [vmem:[%s4546_s5 + $0xe8] sm:$0xf] %vm2242_vm1, %v2569_v26  ;;  %2302 = vst.msk [vmem:[%s4546_s5 + $0xec] sm:$0xf] %vm2242_vm1, %v2570_v27  ;;  %v2633_v32 = vcombine.low %v2974_v29, %v2974_v29  ;;  %v2634_v33 = vcombine.high %v2974_v29, %v2974_v29 }
 0x16c   :  { %2299 = vst.msk [vmem:[%s4546_s5 + $0xe0] sm:$0xf] %vm2242_vm1, %v2567_v30  ;;  %2300 = vst.msk [vmem:[%s4546_s5 + $0xe4] sm:$0xf] %vm2242_vm1, %v2568_v31 }
 0x16d   :  { %v2976_v34 = vpop.eup %2975  ;;  %2365 = vst.msk [vmem:[%s4546_s5 + $0x1e8] sm:$0xf] %vm2242_vm1, %v2633_v32  ;;  %2366 = vst.msk [vmem:[%s4546_s5 + $0x1ec] sm:$0xf] %vm2242_vm1, %v2634_v33 }
 0x16e   :  { %v2631_v35 = vcombine.low %v2976_v34, %v2976_v34  ;;  %v2632_v16 = vcombine.high %v2976_v34, %v2976_v34 }
 0x16f   :  { %v2978_v36 = vpop.eup %2977 }
 0x170   :  { %2363 = vst.msk [vmem:[%s4546_s5 + $0x1e0] sm:$0xf] %vm2242_vm1, %v2631_v35  ;;  %2364 = vst.msk [vmem:[%s4546_s5 + $0x1e4] sm:$0xf] %vm2242_vm1, %v2632_v16  ;;  %v2573_v37 = vcombine.low %v2978_v36, %v2978_v36  ;;  %v2574_v38 = vcombine.high %v2978_v36, %v2978_v36 }
 0x171   :  { %v2980_v40 = vpop.eup %2979 }
 0x172   :  { %v2982_v41 = vpop.eup %2981  ;;  %2305 = vst.msk [vmem:[%s4546_s5 + $0xf8] sm:$0xf] %vm2242_vm1, %v2573_v37  ;;  %2306 = vst.msk [vmem:[%s4546_s5 + $0xfc] sm:$0xf] %vm2242_vm1, %v2574_v38  ;;  %v2571_v20 = vcombine.low %v2980_v40, %v2980_v40  ;;  %v2572_v43 = vcombine.high %v2980_v40, %v2980_v40 }
 0x173   :  { %v2637_v44 = vcombine.low %v2982_v41, %v2982_v41  ;;  %v2638_v45 = vcombine.high %v2982_v41, %v2982_v41 }
 0x174   :  { %v2984_v46 = vpop.eup %2983  ;;  %2303 = vst.msk [vmem:[%s4546_s5 + $0xf0] sm:$0xf] %vm2242_vm1, %v2571_v20  ;;  %2304 = vst.msk [vmem:[%s4546_s5 + $0xf4] sm:$0xf] %vm2242_vm1, %v2572_v43 }
 0x175   :  { %2369 = vst.msk [vmem:[%s4546_s5 + $0x1f8] sm:$0xf] %vm2242_vm1, %v2637_v44  ;;  %2370 = vst.msk [vmem:[%s4546_s5 + $0x1fc] sm:$0xf] %vm2242_vm1, %v2638_v45  ;;  %v2635_v47 = vcombine.low %v2984_v46, %v2984_v46  ;;  %v2636_v48 = vcombine.high %v2984_v46, %v2984_v46 }
 0x177   :  { %2367 = vst.msk [vmem:[%s4546_s5 + $0x1f0] sm:$0xf] %vm2242_vm1, %v2635_v47  ;;  %2368 = vst.msk [vmem:[%s4546_s5 + $0x1f4] sm:$0xf] %vm2242_vm1, %v2636_v48 }
 0x178   :  { %2375 = vsyncpa [#allocation3], 1 }

</bundles_post_ra>
